<compile_context>
chip_gen: v5e
topology: v5e:2x2
jax: 0.10.0
libtpu: 0.0.40
codegen_flags: <defaults>
</compile_context>

<pallas_src>
import functools

import numpy as np

import jax
import jax.numpy as jnp
from jax.experimental import pallas as pl
from jax.experimental.pallas import tpu as pltpu  # noqa: F401  (TPU backend)


# ------------------------------- fused kernel -------------------------------

def _fused_forward_kernel(x_ref, w1_ref, b1_ref, s1_ref, w2_ref, b2_ref,
                          s2_ref, sel_ref, wih0_ref, rb0_ref, wih1_ref,
                          rb1_ref, wfc_ref, bfc_ref, out_ref, *,
                          B, CIN, C1, C2, K, W, P1W, L1, L2, P1N, P2N):
    f32 = jnp.float32
    bcin, bc1, bc2 = B * CIN, B * C1, B * C2

    x = x_ref[...]                   # [B*CIN, H*W]      flat NCHW input rows
    w1 = w1_ref[...]                 # [B*C1, K*K*B*CIN] batch-block-diag taps
    w2 = w2_ref[...]                 # [B*C2, K*K*B*C1]

    # ---- conv1 + bias + ReLU: accumulate over the K*K taps.
    # Column p = ho*W + wo of acc1 holds conv1[b, co, ho, wo] (valid for
    # wo < W-K+1; out-of-window columns are garbage and get discarded by the
    # pooling selection below).
    acc1 = jnp.zeros((bc1, L1), f32)
    for kh in range(K):
        for kw in range(K):
            t = kh * K + kw
            s = kh * W + kw
            acc1 = acc1 + jnp.dot(w1[:, t * bcin:(t + 1) * bcin],
                                  x[:, s:s + L1],
                                  preferred_element_type=f32)
    y1 = jnp.maximum(acc1 + b1_ref[...], 0.0)                     # [B*C1, L1]

    # ---- maxpool1 (2x2, stride 2): exact 0/1 selection matmul, then max over
    # the four (dh, dw) window offsets.  Result columns are po*P1W + qo.
    g1 = jnp.dot(y1, s1_ref[...], preferred_element_type=f32)     # [B*C1, 4*P1N]
    p1 = jnp.maximum(jnp.maximum(g1[:, 0:P1N], g1[:, P1N:2 * P1N]),
                     jnp.maximum(g1[:, 2 * P1N:3 * P1N], g1[:, 3 * P1N:4 * P1N]))

    # ---- conv2 + bias + ReLU (same shifted-slice scheme on the P1W-wide map).
    acc2 = jnp.zeros((bc2, L2), f32)
    for kh in range(K):
        for kw in range(K):
            t = kh * K + kw
            s = kh * P1W + kw
            acc2 = acc2 + jnp.dot(w2[:, t * bc1:(t + 1) * bc1],
                                  p1[:, s:s + L2],
                                  preferred_element_type=f32)
    y2 = jnp.maximum(acc2 + b2_ref[...], 0.0)                     # [B*C2, L2]

    # ---- maxpool2 (2x2, stride 2).
    g2 = jnp.dot(y2, s2_ref[...], preferred_element_type=f32)     # [B*C2, 4*P2N]
    p2 = jnp.maximum(jnp.maximum(g2[:, 0:P2N], g2[:, P2N:2 * P2N]),
                     jnp.maximum(g2[:, 2 * P2N:3 * P2N], g2[:, 3 * P2N:4 * P2N]))

    # ---- RNN layer 0 with the NCHW flatten folded in:
    #   h0[b, j] = relu( sum_{c,q} p2[b*C2+c, q] * W_ih_l0[j, c*P2N+q]
    #                    + b_ih_l0 + b_hh_l0 )
    # The row gather p2[b*C2+c, :] is a 0/1 selection matmul (sel_ref), so no
    # reshape / transpose / concatenate is needed inside the kernel.
    wih0 = wih0_ref[...]             # [C2*P2N, HID]  (= W_ih_l0.T)
    sel = sel_ref[...]               # [C2*B, B*C2]
    hid = wih0.shape[1]
    h0pre = jnp.zeros((B, hid), f32)
    for c in range(C2):
        xc = jnp.dot(sel[c * B:(c + 1) * B, :], p2,
                     preferred_element_type=f32)                  # [B, P2N]
        h0pre = h0pre + jnp.dot(xc, wih0[c * P2N:(c + 1) * P2N, :],
                                preferred_element_type=f32)
    # seq_len == 1 and h0 == 0  =>  the recurrent h @ W_hh terms are zero.
    h0 = jnp.maximum(h0pre + rb0_ref[...], 0.0)                   # [B, HID]

    # ---- RNN layer 1 (same time step) and fc1.
    h1 = jnp.maximum(jnp.dot(h0, wih1_ref[...], preferred_element_type=f32)
                     + rb1_ref[...], 0.0)
    out_ref[...] = (jnp.dot(h1, wfc_ref[...], preferred_element_type=f32)
                    + bfc_ref[...]).astype(out_ref.dtype)


# --------------------------- host-side weight prep ---------------------------

def _pool_select_matrix(out_h, out_w, row_stride, in_len):
    """0/1 matrix S so that (y @ S)[:, d*out_h*out_w + po*out_w + qo]
    == y[:, (2*po+dh)*row_stride + (2*qo+dw)]  with d = dh*2 + dw."""
    n = out_h * out_w
    S = np.zeros((in_len, 4 * n), np.float32)
    for dh in range(2):
        for dw in range(2):
            d = dh * 2 + dw
            for po in range(out_h):
                for qo in range(out_w):
                    S[(2 * po + dh) * row_stride + (2 * qo + dw),
                      d * n + po * out_w + qo] = 1.0
    return S


def _row_select_matrix(B, C):
    """0/1 matrix E so that (E[c*B:(c+1)*B, :] @ p)[b, :] == p[b*C + c, :]."""
    E = np.zeros((C * B, B * C), np.float32)
    for c in range(C):
        for b in range(B):
            E[c * B + b, b * C + c] = 1.0
    return E


def make_forward(params, *, B, Cin, H, W):
    """Packs weights once (outside the hot path) and returns a jitted
    forward(x) that runs the whole RNN_Model forward as ONE Pallas kernel."""
    K = 5
    conv1_w = np.asarray(params['conv1_w'], np.float32)     # [C1, Cin, K, K]
    conv1_b = np.asarray(params['conv1_b'], np.float32)
    conv2_w = np.asarray(params['conv2_w'], np.float32)     # [C2, C1, K, K]
    conv2_b = np.asarray(params['conv2_b'], np.float32)
    C1, C2 = conv1_w.shape[0], conv2_w.shape[0]
    assert conv1_w.shape[1] == Cin and conv2_w.shape[1] == C1

    # Spatial bookkeeping (stride-1 valid convs, 2x2/2 pools).
    H1, W1 = H - K + 1, W - K + 1
    assert H1 % 2 == 0 and W1 % 2 == 0
    P1H, P1W = H1 // 2, W1 // 2
    H2, W2 = P1H - K + 1, P1W - K + 1
    assert H2 % 2 == 0 and W2 % 2 == 0
    P2H, P2W = H2 // 2, W2 // 2
    L1 = (H1 - 1) * W + W1           # flat conv1 output length (rows of width W)
    L2 = (H2 - 1) * P1W + W2         # flat conv2 output length (rows of width P1W)
    P1N, P2N = P1H * P1W, P2H * P2W
    F = C2 * P2N                     # RNN input features (NCHW flatten)
    assert params['rnn_w_ih_l0'].shape[1] == F

    # Per-tap conv weights, block-diagonal over the batch so one matmul handles
    # all batch rows at once:  rows = (b, co), cols = (b, ci).
    eye_b = np.eye(B, dtype=np.float32)
    w1bd = np.concatenate([np.kron(eye_b, conv1_w[:, :, kh, kw])
                           for kh in range(K) for kw in range(K)], axis=1)
    w2bd = np.concatenate([np.kron(eye_b, conv2_w[:, :, kh, kw])
                           for kh in range(K) for kw in range(K)], axis=1)
    b1bd = np.tile(conv1_b.reshape(C1, 1), (B, 1))
    b2bd = np.tile(conv2_b.reshape(C2, 1), (B, 1))

    s1 = _pool_select_matrix(P1H, P1W, W, L1)
    s2 = _pool_select_matrix(P2H, P2W, P1W, L2)
    sel = _row_select_matrix(B, C2)

    wih0T = np.asarray(params['rnn_w_ih_l0'], np.float32).T       # [F, HID]
    rb0 = (np.asarray(params['rnn_b_ih_l0'], np.float32)
           + np.asarray(params['rnn_b_hh_l0'], np.float32)).reshape(1, -1)
    wih1T = np.asarray(params['rnn_w_ih_l1'], np.float32).T       # [HID, HID]
    rb1 = (np.asarray(params['rnn_b_ih_l1'], np.float32)
           + np.asarray(params['rnn_b_hh_l1'], np.float32)).reshape(1, -1)
    # TODO(synk): rnn_w_hh_l{0,1} are intentionally unused -- seq_len == 1 and
    # h0 == 0 make both recurrent matmuls identically zero (b_hh is kept above).
    wfcT = np.asarray(params['fc1_w'], np.float32).T              # [HID, OUT]
    bfc = np.asarray(params['fc1_b'], np.float32).reshape(1, -1)
    OUT = wfcT.shape[1]

    consts = tuple(jnp.asarray(a) for a in
                   (w1bd, b1bd, s1, w2bd, b2bd, s2, sel,
                    wih0T, rb0, wih1T, rb1, wfcT, bfc))

    kern = functools.partial(
        _fused_forward_kernel,
        B=B, CIN=Cin, C1=C1, C2=C2, K=K, W=W, P1W=P1W,
        L1=L1, L2=L2, P1N=P1N, P2N=P2N)

    @jax.jit
    def forward(x):
        # NCHW input -> rows (b, ci), flat spatial columns (free reshape).
        x2d = x.astype(jnp.float32).reshape(B * Cin, H * W)
        args = (x2d,) + consts
        # Single-block call: everything (< 4 MiB) lives in VMEM on every TPU
        # generation.
        # TODO(synk): for large batch sizes, tile the batch/spatial dimension
        # with a real grid (parallel semantics) instead of one full block.
        return pl.pallas_call(
            kern,
            out_shape=jax.ShapeDtypeStruct((B, OUT), jnp.float32),
            grid=(1,),
            in_specs=[pl.BlockSpec(a.shape, lambda i: (0, 0)) for a in args],
            out_specs=pl.BlockSpec((B, OUT), lambda i: (0, 0)),
        )(*args)

    return forward


# --------------------------------- params ------------------------------------

def _init_params(key, rnn_input_dim, hidden_dim, output_dim):
    ks = jax.random.split(key, 16)
    def u(k, shape, fan_in):
        bound = 1.0 / jnp.sqrt(jnp.float32(fan_in))
        return jax.random.uniform(k, shape, jnp.float32, -bound, bound)
    return {
        'conv1_w': u(ks[0], (6, 3, 5, 5), 3 * 5 * 5),
        'conv1_b': u(ks[1], (6,), 3 * 5 * 5),
        'conv2_w': u(ks[2], (16, 6, 5, 5), 6 * 5 * 5),
        'conv2_b': u(ks[3], (16,), 6 * 5 * 5),
        'rnn_w_ih_l0': u(ks[4], (hidden_dim, rnn_input_dim), hidden_dim),
        'rnn_w_hh_l0': u(ks[5], (hidden_dim, hidden_dim), hidden_dim),
        'rnn_b_ih_l0': u(ks[6], (hidden_dim,), hidden_dim),
        'rnn_b_hh_l0': u(ks[7], (hidden_dim,), hidden_dim),
        'rnn_w_ih_l1': u(ks[8], (hidden_dim, hidden_dim), hidden_dim),
        'rnn_w_hh_l1': u(ks[9], (hidden_dim, hidden_dim), hidden_dim),
        'rnn_b_ih_l1': u(ks[10], (hidden_dim,), hidden_dim),
        'rnn_b_hh_l1': u(ks[11], (hidden_dim,), hidden_dim),
        'fc1_w': u(ks[12], (output_dim, hidden_dim), hidden_dim),
        'fc1_b': u(ks[13], (output_dim,), hidden_dim),
    }


# ---------------------------------- main --------------------------------------

if __name__ == "__main__":
    # Small shapes consistent with the forward: 32x32x3 -> conv5 -> 28 -> pool
    # -> 14 -> conv5 -> 10 -> pool -> 5  =>  RNN input_dim = 16*5*5 = 400.
    B, Cin, S = 2, 3, 32
    hidden_dim, layer_dim, output_dim = 32, 2, 2
    rnn_input_dim = 16 * 5 * 5

    key = jax.random.PRNGKey(0)
    kx, kp = jax.random.split(key)
    x = jax.random.normal(kx, (B, Cin, S, S), jnp.float32)
    params = _init_params(kp, rnn_input_dim, hidden_dim, output_dim)

    # TODO(synk): torchvision.utils.make_grid / rnn.flatten_parameters are
    # training/visualization glue with no kernel equivalent; intentionally omitted.
    forward = make_forward(params, B=B, Cin=Cin, H=S, W=S)
    out = forward(x)
    jax.block_until_ready(out)
    assert out.shape == (B, output_dim)
    print("KERNEL_OK")
</pallas_src>

<mosaic_0001>
module attributes {stable_mosaic.version = 11 : i64} {
  func.func @_fused_forward_kernel(%arg0: i32, %arg1: memref<6x1024xf32, #tpu.memory_space<vmem>>, %arg2: memref<12x150xf32, #tpu.memory_space<vmem>>, %arg3: memref<12x1xf32, #tpu.memory_space<vmem>>, %arg4: memref<892x784xf32, #tpu.memory_space<vmem>>, %arg5: memref<32x300xf32, #tpu.memory_space<vmem>>, %arg6: memref<32x1xf32, #tpu.memory_space<vmem>>, %arg7: memref<136x100xf32, #tpu.memory_space<vmem>>, %arg8: memref<32x32xf32, #tpu.memory_space<vmem>>, %arg9: memref<400x32xf32, #tpu.memory_space<vmem>>, %arg10: memref<1x32xf32, #tpu.memory_space<vmem>>, %arg11: memref<32x32xf32, #tpu.memory_space<vmem>>, %arg12: memref<1x32xf32, #tpu.memory_space<vmem>>, %arg13: memref<32x2xf32, #tpu.memory_space<vmem>>, %arg14: memref<1x2xf32, #tpu.memory_space<vmem>>, %arg15: memref<2x2xf32, #tpu.memory_space<vmem>>) attributes {dimension_semantics = [#tpu.dimension_semantics<arbitrary>], iteration_bounds = array<i64: 1>, scalar_prefetch = 0 : i64, scratch_operands = 0 : i64, tpu.core_type = #tpu.core_type<tc>, window_params = [{pipeline_mode = #tpu.pipeline_mode<synchronous>, transform_indices = @transform_0, window_bounds = array<i64: 6, 1024>}, {pipeline_mode = #tpu.pipeline_mode<synchronous>, transform_indices = @transform_1, window_bounds = array<i64: 12, 150>}, {pipeline_mode = #tpu.pipeline_mode<synchronous>, transform_indices = @transform_2, window_bounds = array<i64: 12, 1>}, {pipeline_mode = #tpu.pipeline_mode<synchronous>, transform_indices = @transform_3, window_bounds = array<i64: 892, 784>}, {pipeline_mode = #tpu.pipeline_mode<synchronous>, transform_indices = @transform_4, window_bounds = array<i64: 32, 300>}, {pipeline_mode = #tpu.pipeline_mode<synchronous>, transform_indices = @transform_5, window_bounds = array<i64: 32, 1>}, {pipeline_mode = #tpu.pipeline_mode<synchronous>, transform_indices = @transform_6, window_bounds = array<i64: 136, 100>}, {pipeline_mode = #tpu.pipeline_mode<synchronous>, transform_indices = @transform_7, window_bounds = array<i64: 32, 32>}, {pipeline_mode = #tpu.pipeline_mode<synchronous>, transform_indices = @transform_8, window_bounds = array<i64: 400, 32>}, {pipeline_mode = #tpu.pipeline_mode<synchronous>, transform_indices = @transform_9, window_bounds = array<i64: 1, 32>}, {pipeline_mode = #tpu.pipeline_mode<synchronous>, transform_indices = @transform_10, window_bounds = array<i64: 32, 32>}, {pipeline_mode = #tpu.pipeline_mode<synchronous>, transform_indices = @transform_11, window_bounds = array<i64: 1, 32>}, {pipeline_mode = #tpu.pipeline_mode<synchronous>, transform_indices = @transform_12, window_bounds = array<i64: 32, 2>}, {pipeline_mode = #tpu.pipeline_mode<synchronous>, transform_indices = @transform_13, window_bounds = array<i64: 1, 2>}, {pipeline_mode = #tpu.pipeline_mode<synchronous>, transform_indices = @transform_14, window_bounds = array<i64: 2, 2>}]} {
    %c0 = arith.constant 0 : index
    %c0_0 = arith.constant 0 : index
    %0 = vector.load %arg1[%c0, %c0_0] : memref<6x1024xf32, #tpu.memory_space<vmem>>, vector<6x1024xf32>
    %c0_1 = arith.constant 0 : index
    %c0_2 = arith.constant 0 : index
    %1 = vector.load %arg2[%c0_1, %c0_2] : memref<12x150xf32, #tpu.memory_space<vmem>>, vector<12x150xf32>
    %c0_3 = arith.constant 0 : index
    %c0_4 = arith.constant 0 : index
    %2 = vector.load %arg5[%c0_3, %c0_4] : memref<32x300xf32, #tpu.memory_space<vmem>>, vector<32x300xf32>
    %cst = arith.constant 0.000000e+00 : f32
    %3 = vector.broadcast %cst : f32 to vector<12x892xf32>
    %4 = vector.extract_strided_slice %1 {offsets = [0, 0], sizes = [12, 6], strides = [1, 1]} : vector<12x150xf32> to vector<12x6xf32>
    %5 = vector.extract_strided_slice %0 {offsets = [0, 0], sizes = [6, 892], strides = [1, 1]} : vector<6x1024xf32> to vector<6x892xf32>
    %cst_5 = arith.constant dense<0.000000e+00> : vector<12x892xf32>
    %6 = tpu.matmul %4, %5, %cst_5 {dimension_numbers = #tpu.dot_dimension_numbers<[1], [0], [0], [1], [0, 0, 1, 1], [], []>} : vector<12x6xf32>, vector<6x892xf32>, vector<12x892xf32> -> vector<12x892xf32>
    %7 = arith.addf %3, %6 : vector<12x892xf32>
    %8 = vector.extract_strided_slice %1 {offsets = [0, 6], sizes = [12, 6], strides = [1, 1]} : vector<12x150xf32> to vector<12x6xf32>
    %9 = vector.extract_strided_slice %0 {offsets = [0, 1], sizes = [6, 892], strides = [1, 1]} : vector<6x1024xf32> to vector<6x892xf32>
    %cst_6 = arith.constant dense<0.000000e+00> : vector<12x892xf32>
    %10 = tpu.matmul %8, %9, %cst_6 {dimension_numbers = #tpu.dot_dimension_numbers<[1], [0], [0], [1], [0, 0, 1, 1], [], []>} : vector<12x6xf32>, vector<6x892xf32>, vector<12x892xf32> -> vector<12x892xf32>
    %11 = arith.addf %7, %10 : vector<12x892xf32>
    %12 = vector.extract_strided_slice %1 {offsets = [0, 12], sizes = [12, 6], strides = [1, 1]} : vector<12x150xf32> to vector<12x6xf32>
    %13 = vector.extract_strided_slice %0 {offsets = [0, 2], sizes = [6, 892], strides = [1, 1]} : vector<6x1024xf32> to vector<6x892xf32>
    %cst_7 = arith.constant dense<0.000000e+00> : vector<12x892xf32>
    %14 = tpu.matmul %12, %13, %cst_7 {dimension_numbers = #tpu.dot_dimension_numbers<[1], [0], [0], [1], [0, 0, 1, 1], [], []>} : vector<12x6xf32>, vector<6x892xf32>, vector<12x892xf32> -> vector<12x892xf32>
    %15 = arith.addf %11, %14 : vector<12x892xf32>
    %16 = vector.extract_strided_slice %1 {offsets = [0, 18], sizes = [12, 6], strides = [1, 1]} : vector<12x150xf32> to vector<12x6xf32>
    %17 = vector.extract_strided_slice %0 {offsets = [0, 3], sizes = [6, 892], strides = [1, 1]} : vector<6x1024xf32> to vector<6x892xf32>
    %cst_8 = arith.constant dense<0.000000e+00> : vector<12x892xf32>
    %18 = tpu.matmul %16, %17, %cst_8 {dimension_numbers = #tpu.dot_dimension_numbers<[1], [0], [0], [1], [0, 0, 1, 1], [], []>} : vector<12x6xf32>, vector<6x892xf32>, vector<12x892xf32> -> vector<12x892xf32>
    %19 = arith.addf %15, %18 : vector<12x892xf32>
    %20 = vector.extract_strided_slice %1 {offsets = [0, 24], sizes = [12, 6], strides = [1, 1]} : vector<12x150xf32> to vector<12x6xf32>
    %21 = vector.extract_strided_slice %0 {offsets = [0, 4], sizes = [6, 892], strides = [1, 1]} : vector<6x1024xf32> to vector<6x892xf32>
    %cst_9 = arith.constant dense<0.000000e+00> : vector<12x892xf32>
    %22 = tpu.matmul %20, %21, %cst_9 {dimension_numbers = #tpu.dot_dimension_numbers<[1], [0], [0], [1], [0, 0, 1, 1], [], []>} : vector<12x6xf32>, vector<6x892xf32>, vector<12x892xf32> -> vector<12x892xf32>
    %23 = arith.addf %19, %22 : vector<12x892xf32>
    %24 = vector.extract_strided_slice %1 {offsets = [0, 30], sizes = [12, 6], strides = [1, 1]} : vector<12x150xf32> to vector<12x6xf32>
    %25 = vector.extract_strided_slice %0 {offsets = [0, 32], sizes = [6, 892], strides = [1, 1]} : vector<6x1024xf32> to vector<6x892xf32>
    %cst_10 = arith.constant dense<0.000000e+00> : vector<12x892xf32>
    %26 = tpu.matmul %24, %25, %cst_10 {dimension_numbers = #tpu.dot_dimension_numbers<[1], [0], [0], [1], [0, 0, 1, 1], [], []>} : vector<12x6xf32>, vector<6x892xf32>, vector<12x892xf32> -> vector<12x892xf32>
    %27 = arith.addf %23, %26 : vector<12x892xf32>
    %28 = vector.extract_strided_slice %1 {offsets = [0, 36], sizes = [12, 6], strides = [1, 1]} : vector<12x150xf32> to vector<12x6xf32>
    %29 = vector.extract_strided_slice %0 {offsets = [0, 33], sizes = [6, 892], strides = [1, 1]} : vector<6x1024xf32> to vector<6x892xf32>
    %cst_11 = arith.constant dense<0.000000e+00> : vector<12x892xf32>
    %30 = tpu.matmul %28, %29, %cst_11 {dimension_numbers = #tpu.dot_dimension_numbers<[1], [0], [0], [1], [0, 0, 1, 1], [], []>} : vector<12x6xf32>, vector<6x892xf32>, vector<12x892xf32> -> vector<12x892xf32>
    %31 = arith.addf %27, %30 : vector<12x892xf32>
    %32 = vector.extract_strided_slice %1 {offsets = [0, 42], sizes = [12, 6], strides = [1, 1]} : vector<12x150xf32> to vector<12x6xf32>
    %33 = vector.extract_strided_slice %0 {offsets = [0, 34], sizes = [6, 892], strides = [1, 1]} : vector<6x1024xf32> to vector<6x892xf32>
    %cst_12 = arith.constant dense<0.000000e+00> : vector<12x892xf32>
    %34 = tpu.matmul %32, %33, %cst_12 {dimension_numbers = #tpu.dot_dimension_numbers<[1], [0], [0], [1], [0, 0, 1, 1], [], []>} : vector<12x6xf32>, vector<6x892xf32>, vector<12x892xf32> -> vector<12x892xf32>
    %35 = arith.addf %31, %34 : vector<12x892xf32>
    %36 = vector.extract_strided_slice %1 {offsets = [0, 48], sizes = [12, 6], strides = [1, 1]} : vector<12x150xf32> to vector<12x6xf32>
    %37 = vector.extract_strided_slice %0 {offsets = [0, 35], sizes = [6, 892], strides = [1, 1]} : vector<6x1024xf32> to vector<6x892xf32>
    %cst_13 = arith.constant dense<0.000000e+00> : vector<12x892xf32>
    %38 = tpu.matmul %36, %37, %cst_13 {dimension_numbers = #tpu.dot_dimension_numbers<[1], [0], [0], [1], [0, 0, 1, 1], [], []>} : vector<12x6xf32>, vector<6x892xf32>, vector<12x892xf32> -> vector<12x892xf32>
    %39 = arith.addf %35, %38 : vector<12x892xf32>
    %40 = vector.extract_strided_slice %1 {offsets = [0, 54], sizes = [12, 6], strides = [1, 1]} : vector<12x150xf32> to vector<12x6xf32>
    %41 = vector.extract_strided_slice %0 {offsets = [0, 36], sizes = [6, 892], strides = [1, 1]} : vector<6x1024xf32> to vector<6x892xf32>
    %cst_14 = arith.constant dense<0.000000e+00> : vector<12x892xf32>
    %42 = tpu.matmul %40, %41, %cst_14 {dimension_numbers = #tpu.dot_dimension_numbers<[1], [0], [0], [1], [0, 0, 1, 1], [], []>} : vector<12x6xf32>, vector<6x892xf32>, vector<12x892xf32> -> vector<12x892xf32>
    %43 = arith.addf %39, %42 : vector<12x892xf32>
    %44 = vector.extract_strided_slice %1 {offsets = [0, 60], sizes = [12, 6], strides = [1, 1]} : vector<12x150xf32> to vector<12x6xf32>
    %45 = vector.extract_strided_slice %0 {offsets = [0, 64], sizes = [6, 892], strides = [1, 1]} : vector<6x1024xf32> to vector<6x892xf32>
    %cst_15 = arith.constant dense<0.000000e+00> : vector<12x892xf32>
    %46 = tpu.matmul %44, %45, %cst_15 {dimension_numbers = #tpu.dot_dimension_numbers<[1], [0], [0], [1], [0, 0, 1, 1], [], []>} : vector<12x6xf32>, vector<6x892xf32>, vector<12x892xf32> -> vector<12x892xf32>
    %47 = arith.addf %43, %46 : vector<12x892xf32>
    %48 = vector.extract_strided_slice %1 {offsets = [0, 66], sizes = [12, 6], strides = [1, 1]} : vector<12x150xf32> to vector<12x6xf32>
    %49 = vector.extract_strided_slice %0 {offsets = [0, 65], sizes = [6, 892], strides = [1, 1]} : vector<6x1024xf32> to vector<6x892xf32>
    %cst_16 = arith.constant dense<0.000000e+00> : vector<12x892xf32>
    %50 = tpu.matmul %48, %49, %cst_16 {dimension_numbers = #tpu.dot_dimension_numbers<[1], [0], [0], [1], [0, 0, 1, 1], [], []>} : vector<12x6xf32>, vector<6x892xf32>, vector<12x892xf32> -> vector<12x892xf32>
    %51 = arith.addf %47, %50 : vector<12x892xf32>
    %52 = vector.extract_strided_slice %1 {offsets = [0, 72], sizes = [12, 6], strides = [1, 1]} : vector<12x150xf32> to vector<12x6xf32>
    %53 = vector.extract_strided_slice %0 {offsets = [0, 66], sizes = [6, 892], strides = [1, 1]} : vector<6x1024xf32> to vector<6x892xf32>
    %cst_17 = arith.constant dense<0.000000e+00> : vector<12x892xf32>
    %54 = tpu.matmul %52, %53, %cst_17 {dimension_numbers = #tpu.dot_dimension_numbers<[1], [0], [0], [1], [0, 0, 1, 1], [], []>} : vector<12x6xf32>, vector<6x892xf32>, vector<12x892xf32> -> vector<12x892xf32>
    %55 = arith.addf %51, %54 : vector<12x892xf32>
    %56 = vector.extract_strided_slice %1 {offsets = [0, 78], sizes = [12, 6], strides = [1, 1]} : vector<12x150xf32> to vector<12x6xf32>
    %57 = vector.extract_strided_slice %0 {offsets = [0, 67], sizes = [6, 892], strides = [1, 1]} : vector<6x1024xf32> to vector<6x892xf32>
    %cst_18 = arith.constant dense<0.000000e+00> : vector<12x892xf32>
    %58 = tpu.matmul %56, %57, %cst_18 {dimension_numbers = #tpu.dot_dimension_numbers<[1], [0], [0], [1], [0, 0, 1, 1], [], []>} : vector<12x6xf32>, vector<6x892xf32>, vector<12x892xf32> -> vector<12x892xf32>
    %59 = arith.addf %55, %58 : vector<12x892xf32>
    %60 = vector.extract_strided_slice %1 {offsets = [0, 84], sizes = [12, 6], strides = [1, 1]} : vector<12x150xf32> to vector<12x6xf32>
    %61 = vector.extract_strided_slice %0 {offsets = [0, 68], sizes = [6, 892], strides = [1, 1]} : vector<6x1024xf32> to vector<6x892xf32>
    %cst_19 = arith.constant dense<0.000000e+00> : vector<12x892xf32>
    %62 = tpu.matmul %60, %61, %cst_19 {dimension_numbers = #tpu.dot_dimension_numbers<[1], [0], [0], [1], [0, 0, 1, 1], [], []>} : vector<12x6xf32>, vector<6x892xf32>, vector<12x892xf32> -> vector<12x892xf32>
    %63 = arith.addf %59, %62 : vector<12x892xf32>
    %64 = vector.extract_strided_slice %1 {offsets = [0, 90], sizes = [12, 6], strides = [1, 1]} : vector<12x150xf32> to vector<12x6xf32>
    %65 = vector.extract_strided_slice %0 {offsets = [0, 96], sizes = [6, 892], strides = [1, 1]} : vector<6x1024xf32> to vector<6x892xf32>
    %cst_20 = arith.constant dense<0.000000e+00> : vector<12x892xf32>
    %66 = tpu.matmul %64, %65, %cst_20 {dimension_numbers = #tpu.dot_dimension_numbers<[1], [0], [0], [1], [0, 0, 1, 1], [], []>} : vector<12x6xf32>, vector<6x892xf32>, vector<12x892xf32> -> vector<12x892xf32>
    %67 = arith.addf %63, %66 : vector<12x892xf32>
    %68 = vector.extract_strided_slice %1 {offsets = [0, 96], sizes = [12, 6], strides = [1, 1]} : vector<12x150xf32> to vector<12x6xf32>
    %69 = vector.extract_strided_slice %0 {offsets = [0, 97], sizes = [6, 892], strides = [1, 1]} : vector<6x1024xf32> to vector<6x892xf32>
    %cst_21 = arith.constant dense<0.000000e+00> : vector<12x892xf32>
    %70 = tpu.matmul %68, %69, %cst_21 {dimension_numbers = #tpu.dot_dimension_numbers<[1], [0], [0], [1], [0, 0, 1, 1], [], []>} : vector<12x6xf32>, vector<6x892xf32>, vector<12x892xf32> -> vector<12x892xf32>
    %71 = arith.addf %67, %70 : vector<12x892xf32>
    %72 = vector.extract_strided_slice %1 {offsets = [0, 102], sizes = [12, 6], strides = [1, 1]} : vector<12x150xf32> to vector<12x6xf32>
    %73 = vector.extract_strided_slice %0 {offsets = [0, 98], sizes = [6, 892], strides = [1, 1]} : vector<6x1024xf32> to vector<6x892xf32>
    %cst_22 = arith.constant dense<0.000000e+00> : vector<12x892xf32>
    %74 = tpu.matmul %72, %73, %cst_22 {dimension_numbers = #tpu.dot_dimension_numbers<[1], [0], [0], [1], [0, 0, 1, 1], [], []>} : vector<12x6xf32>, vector<6x892xf32>, vector<12x892xf32> -> vector<12x892xf32>
    %75 = arith.addf %71, %74 : vector<12x892xf32>
    %76 = vector.extract_strided_slice %1 {offsets = [0, 108], sizes = [12, 6], strides = [1, 1]} : vector<12x150xf32> to vector<12x6xf32>
    %77 = vector.extract_strided_slice %0 {offsets = [0, 99], sizes = [6, 892], strides = [1, 1]} : vector<6x1024xf32> to vector<6x892xf32>
    %cst_23 = arith.constant dense<0.000000e+00> : vector<12x892xf32>
    %78 = tpu.matmul %76, %77, %cst_23 {dimension_numbers = #tpu.dot_dimension_numbers<[1], [0], [0], [1], [0, 0, 1, 1], [], []>} : vector<12x6xf32>, vector<6x892xf32>, vector<12x892xf32> -> vector<12x892xf32>
    %79 = arith.addf %75, %78 : vector<12x892xf32>
    %80 = vector.extract_strided_slice %1 {offsets = [0, 114], sizes = [12, 6], strides = [1, 1]} : vector<12x150xf32> to vector<12x6xf32>
    %81 = vector.extract_strided_slice %0 {offsets = [0, 100], sizes = [6, 892], strides = [1, 1]} : vector<6x1024xf32> to vector<6x892xf32>
    %cst_24 = arith.constant dense<0.000000e+00> : vector<12x892xf32>
    %82 = tpu.matmul %80, %81, %cst_24 {dimension_numbers = #tpu.dot_dimension_numbers<[1], [0], [0], [1], [0, 0, 1, 1], [], []>} : vector<12x6xf32>, vector<6x892xf32>, vector<12x892xf32> -> vector<12x892xf32>
    %83 = arith.addf %79, %82 : vector<12x892xf32>
    %84 = vector.extract_strided_slice %1 {offsets = [0, 120], sizes = [12, 6], strides = [1, 1]} : vector<12x150xf32> to vector<12x6xf32>
    %85 = vector.extract_strided_slice %0 {offsets = [0, 128], sizes = [6, 892], strides = [1, 1]} : vector<6x1024xf32> to vector<6x892xf32>
    %cst_25 = arith.constant dense<0.000000e+00> : vector<12x892xf32>
    %86 = tpu.matmul %84, %85, %cst_25 {dimension_numbers = #tpu.dot_dimension_numbers<[1], [0], [0], [1], [0, 0, 1, 1], [], []>} : vector<12x6xf32>, vector<6x892xf32>, vector<12x892xf32> -> vector<12x892xf32>
    %87 = arith.addf %83, %86 : vector<12x892xf32>
    %88 = vector.extract_strided_slice %1 {offsets = [0, 126], sizes = [12, 6], strides = [1, 1]} : vector<12x150xf32> to vector<12x6xf32>
    %89 = vector.extract_strided_slice %0 {offsets = [0, 129], sizes = [6, 892], strides = [1, 1]} : vector<6x1024xf32> to vector<6x892xf32>
    %cst_26 = arith.constant dense<0.000000e+00> : vector<12x892xf32>
    %90 = tpu.matmul %88, %89, %cst_26 {dimension_numbers = #tpu.dot_dimension_numbers<[1], [0], [0], [1], [0, 0, 1, 1], [], []>} : vector<12x6xf32>, vector<6x892xf32>, vector<12x892xf32> -> vector<12x892xf32>
    %91 = arith.addf %87, %90 : vector<12x892xf32>
    %92 = vector.extract_strided_slice %1 {offsets = [0, 132], sizes = [12, 6], strides = [1, 1]} : vector<12x150xf32> to vector<12x6xf32>
    %93 = vector.extract_strided_slice %0 {offsets = [0, 130], sizes = [6, 892], strides = [1, 1]} : vector<6x1024xf32> to vector<6x892xf32>
    %cst_27 = arith.constant dense<0.000000e+00> : vector<12x892xf32>
    %94 = tpu.matmul %92, %93, %cst_27 {dimension_numbers = #tpu.dot_dimension_numbers<[1], [0], [0], [1], [0, 0, 1, 1], [], []>} : vector<12x6xf32>, vector<6x892xf32>, vector<12x892xf32> -> vector<12x892xf32>
    %95 = arith.addf %91, %94 : vector<12x892xf32>
    %96 = vector.extract_strided_slice %1 {offsets = [0, 138], sizes = [12, 6], strides = [1, 1]} : vector<12x150xf32> to vector<12x6xf32>
    %97 = vector.extract_strided_slice %0 {offsets = [0, 131], sizes = [6, 892], strides = [1, 1]} : vector<6x1024xf32> to vector<6x892xf32>
    %cst_28 = arith.constant dense<0.000000e+00> : vector<12x892xf32>
    %98 = tpu.matmul %96, %97, %cst_28 {dimension_numbers = #tpu.dot_dimension_numbers<[1], [0], [0], [1], [0, 0, 1, 1], [], []>} : vector<12x6xf32>, vector<6x892xf32>, vector<12x892xf32> -> vector<12x892xf32>
    %99 = arith.addf %95, %98 : vector<12x892xf32>
    %100 = vector.extract_strided_slice %1 {offsets = [0, 144], sizes = [12, 6], strides = [1, 1]} : vector<12x150xf32> to vector<12x6xf32>
    %101 = vector.extract_strided_slice %0 {offsets = [0, 132], sizes = [6, 892], strides = [1, 1]} : vector<6x1024xf32> to vector<6x892xf32>
    %cst_29 = arith.constant dense<0.000000e+00> : vector<12x892xf32>
    %102 = tpu.matmul %100, %101, %cst_29 {dimension_numbers = #tpu.dot_dimension_numbers<[1], [0], [0], [1], [0, 0, 1, 1], [], []>} : vector<12x6xf32>, vector<6x892xf32>, vector<12x892xf32> -> vector<12x892xf32>
    %103 = arith.addf %99, %102 : vector<12x892xf32>
    %c0_30 = arith.constant 0 : index
    %c0_31 = arith.constant 0 : index
    %104 = vector.load %arg3[%c0_30, %c0_31] : memref<12x1xf32, #tpu.memory_space<vmem>>, vector<12x1xf32>
    %105 = vector.broadcast %104 : vector<12x1xf32> to vector<12x892xf32>
    %106 = arith.addf %103, %105 : vector<12x892xf32>
    %cst_32 = arith.constant 0.000000e+00 : f32
    %107 = vector.broadcast %cst_32 : f32 to vector<12x892xf32>
    %108 = arith.maximumf %106, %107 : vector<12x892xf32>
    %c0_33 = arith.constant 0 : index
    %c0_34 = arith.constant 0 : index
    %109 = vector.load %arg4[%c0_33, %c0_34] : memref<892x784xf32, #tpu.memory_space<vmem>>, vector<892x784xf32>
    %cst_35 = arith.constant dense<0.000000e+00> : vector<12x784xf32>
    %110 = tpu.matmul %108, %109, %cst_35 {dimension_numbers = #tpu.dot_dimension_numbers<[1], [0], [0], [1], [0, 0, 1, 1], [], []>} : vector<12x892xf32>, vector<892x784xf32>, vector<12x784xf32> -> vector<12x784xf32>
    %111 = vector.extract_strided_slice %110 {offsets = [0, 0], sizes = [12, 196], strides = [1, 1]} : vector<12x784xf32> to vector<12x196xf32>
    %112 = vector.extract_strided_slice %110 {offsets = [0, 196], sizes = [12, 196], strides = [1, 1]} : vector<12x784xf32> to vector<12x196xf32>
    %113 = arith.maximumf %111, %112 : vector<12x196xf32>
    %114 = vector.extract_strided_slice %110 {offsets = [0, 392], sizes = [12, 196], strides = [1, 1]} : vector<12x784xf32> to vector<12x196xf32>
    %115 = vector.extract_strided_slice %110 {offsets = [0, 588], sizes = [12, 196], strides = [1, 1]} : vector<12x784xf32> to vector<12x196xf32>
    %116 = arith.maximumf %114, %115 : vector<12x196xf32>
    %117 = arith.maximumf %113, %116 : vector<12x196xf32>
    %cst_36 = arith.constant 0.000000e+00 : f32
    %118 = vector.broadcast %cst_36 : f32 to vector<32x136xf32>
    %119 = vector.extract_strided_slice %2 {offsets = [0, 0], sizes = [32, 12], strides = [1, 1]} : vector<32x300xf32> to vector<32x12xf32>
    %120 = vector.extract_strided_slice %117 {offsets = [0, 0], sizes = [12, 136], strides = [1, 1]} : vector<12x196xf32> to vector<12x136xf32>
    %cst_37 = arith.constant dense<0.000000e+00> : vector<32x136xf32>
    %121 = tpu.matmul %119, %120, %cst_37 {dimension_numbers = #tpu.dot_dimension_numbers<[1], [0], [0], [1], [0, 0, 1, 1], [], []>} : vector<32x12xf32>, vector<12x136xf32>, vector<32x136xf32> -> vector<32x136xf32>
    %122 = arith.addf %118, %121 : vector<32x136xf32>
    %123 = vector.extract_strided_slice %2 {offsets = [0, 12], sizes = [32, 12], strides = [1, 1]} : vector<32x300xf32> to vector<32x12xf32>
    %124 = vector.extract_strided_slice %117 {offsets = [0, 1], sizes = [12, 136], strides = [1, 1]} : vector<12x196xf32> to vector<12x136xf32>
    %cst_38 = arith.constant dense<0.000000e+00> : vector<32x136xf32>
    %125 = tpu.matmul %123, %124, %cst_38 {dimension_numbers = #tpu.dot_dimension_numbers<[1], [0], [0], [1], [0, 0, 1, 1], [], []>} : vector<32x12xf32>, vector<12x136xf32>, vector<32x136xf32> -> vector<32x136xf32>
    %126 = arith.addf %122, %125 : vector<32x136xf32>
    %127 = vector.extract_strided_slice %2 {offsets = [0, 24], sizes = [32, 12], strides = [1, 1]} : vector<32x300xf32> to vector<32x12xf32>
    %128 = vector.extract_strided_slice %117 {offsets = [0, 2], sizes = [12, 136], strides = [1, 1]} : vector<12x196xf32> to vector<12x136xf32>
    %cst_39 = arith.constant dense<0.000000e+00> : vector<32x136xf32>
    %129 = tpu.matmul %127, %128, %cst_39 {dimension_numbers = #tpu.dot_dimension_numbers<[1], [0], [0], [1], [0, 0, 1, 1], [], []>} : vector<32x12xf32>, vector<12x136xf32>, vector<32x136xf32> -> vector<32x136xf32>
    %130 = arith.addf %126, %129 : vector<32x136xf32>
    %131 = vector.extract_strided_slice %2 {offsets = [0, 36], sizes = [32, 12], strides = [1, 1]} : vector<32x300xf32> to vector<32x12xf32>
    %132 = vector.extract_strided_slice %117 {offsets = [0, 3], sizes = [12, 136], strides = [1, 1]} : vector<12x196xf32> to vector<12x136xf32>
    %cst_40 = arith.constant dense<0.000000e+00> : vector<32x136xf32>
    %133 = tpu.matmul %131, %132, %cst_40 {dimension_numbers = #tpu.dot_dimension_numbers<[1], [0], [0], [1], [0, 0, 1, 1], [], []>} : vector<32x12xf32>, vector<12x136xf32>, vector<32x136xf32> -> vector<32x136xf32>
    %134 = arith.addf %130, %133 : vector<32x136xf32>
    %135 = vector.extract_strided_slice %2 {offsets = [0, 48], sizes = [32, 12], strides = [1, 1]} : vector<32x300xf32> to vector<32x12xf32>
    %136 = vector.extract_strided_slice %117 {offsets = [0, 4], sizes = [12, 136], strides = [1, 1]} : vector<12x196xf32> to vector<12x136xf32>
    %cst_41 = arith.constant dense<0.000000e+00> : vector<32x136xf32>
    %137 = tpu.matmul %135, %136, %cst_41 {dimension_numbers = #tpu.dot_dimension_numbers<[1], [0], [0], [1], [0, 0, 1, 1], [], []>} : vector<32x12xf32>, vector<12x136xf32>, vector<32x136xf32> -> vector<32x136xf32>
    %138 = arith.addf %134, %137 : vector<32x136xf32>
    %139 = vector.extract_strided_slice %2 {offsets = [0, 60], sizes = [32, 12], strides = [1, 1]} : vector<32x300xf32> to vector<32x12xf32>
    %140 = vector.extract_strided_slice %117 {offsets = [0, 14], sizes = [12, 136], strides = [1, 1]} : vector<12x196xf32> to vector<12x136xf32>
    %cst_42 = arith.constant dense<0.000000e+00> : vector<32x136xf32>
    %141 = tpu.matmul %139, %140, %cst_42 {dimension_numbers = #tpu.dot_dimension_numbers<[1], [0], [0], [1], [0, 0, 1, 1], [], []>} : vector<32x12xf32>, vector<12x136xf32>, vector<32x136xf32> -> vector<32x136xf32>
    %142 = arith.addf %138, %141 : vector<32x136xf32>
    %143 = vector.extract_strided_slice %2 {offsets = [0, 72], sizes = [32, 12], strides = [1, 1]} : vector<32x300xf32> to vector<32x12xf32>
    %144 = vector.extract_strided_slice %117 {offsets = [0, 15], sizes = [12, 136], strides = [1, 1]} : vector<12x196xf32> to vector<12x136xf32>
    %cst_43 = arith.constant dense<0.000000e+00> : vector<32x136xf32>
    %145 = tpu.matmul %143, %144, %cst_43 {dimension_numbers = #tpu.dot_dimension_numbers<[1], [0], [0], [1], [0, 0, 1, 1], [], []>} : vector<32x12xf32>, vector<12x136xf32>, vector<32x136xf32> -> vector<32x136xf32>
    %146 = arith.addf %142, %145 : vector<32x136xf32>
    %147 = vector.extract_strided_slice %2 {offsets = [0, 84], sizes = [32, 12], strides = [1, 1]} : vector<32x300xf32> to vector<32x12xf32>
    %148 = vector.extract_strided_slice %117 {offsets = [0, 16], sizes = [12, 136], strides = [1, 1]} : vector<12x196xf32> to vector<12x136xf32>
    %cst_44 = arith.constant dense<0.000000e+00> : vector<32x136xf32>
    %149 = tpu.matmul %147, %148, %cst_44 {dimension_numbers = #tpu.dot_dimension_numbers<[1], [0], [0], [1], [0, 0, 1, 1], [], []>} : vector<32x12xf32>, vector<12x136xf32>, vector<32x136xf32> -> vector<32x136xf32>
    %150 = arith.addf %146, %149 : vector<32x136xf32>
    %151 = vector.extract_strided_slice %2 {offsets = [0, 96], sizes = [32, 12], strides = [1, 1]} : vector<32x300xf32> to vector<32x12xf32>
    %152 = vector.extract_strided_slice %117 {offsets = [0, 17], sizes = [12, 136], strides = [1, 1]} : vector<12x196xf32> to vector<12x136xf32>
    %cst_45 = arith.constant dense<0.000000e+00> : vector<32x136xf32>
    %153 = tpu.matmul %151, %152, %cst_45 {dimension_numbers = #tpu.dot_dimension_numbers<[1], [0], [0], [1], [0, 0, 1, 1], [], []>} : vector<32x12xf32>, vector<12x136xf32>, vector<32x136xf32> -> vector<32x136xf32>
    %154 = arith.addf %150, %153 : vector<32x136xf32>
    %155 = vector.extract_strided_slice %2 {offsets = [0, 108], sizes = [32, 12], strides = [1, 1]} : vector<32x300xf32> to vector<32x12xf32>
    %156 = vector.extract_strided_slice %117 {offsets = [0, 18], sizes = [12, 136], strides = [1, 1]} : vector<12x196xf32> to vector<12x136xf32>
    %cst_46 = arith.constant dense<0.000000e+00> : vector<32x136xf32>
    %157 = tpu.matmul %155, %156, %cst_46 {dimension_numbers = #tpu.dot_dimension_numbers<[1], [0], [0], [1], [0, 0, 1, 1], [], []>} : vector<32x12xf32>, vector<12x136xf32>, vector<32x136xf32> -> vector<32x136xf32>
    %158 = arith.addf %154, %157 : vector<32x136xf32>
    %159 = vector.extract_strided_slice %2 {offsets = [0, 120], sizes = [32, 12], strides = [1, 1]} : vector<32x300xf32> to vector<32x12xf32>
    %160 = vector.extract_strided_slice %117 {offsets = [0, 28], sizes = [12, 136], strides = [1, 1]} : vector<12x196xf32> to vector<12x136xf32>
    %cst_47 = arith.constant dense<0.000000e+00> : vector<32x136xf32>
    %161 = tpu.matmul %159, %160, %cst_47 {dimension_numbers = #tpu.dot_dimension_numbers<[1], [0], [0], [1], [0, 0, 1, 1], [], []>} : vector<32x12xf32>, vector<12x136xf32>, vector<32x136xf32> -> vector<32x136xf32>
    %162 = arith.addf %158, %161 : vector<32x136xf32>
    %163 = vector.extract_strided_slice %2 {offsets = [0, 132], sizes = [32, 12], strides = [1, 1]} : vector<32x300xf32> to vector<32x12xf32>
    %164 = vector.extract_strided_slice %117 {offsets = [0, 29], sizes = [12, 136], strides = [1, 1]} : vector<12x196xf32> to vector<12x136xf32>
    %cst_48 = arith.constant dense<0.000000e+00> : vector<32x136xf32>
    %165 = tpu.matmul %163, %164, %cst_48 {dimension_numbers = #tpu.dot_dimension_numbers<[1], [0], [0], [1], [0, 0, 1, 1], [], []>} : vector<32x12xf32>, vector<12x136xf32>, vector<32x136xf32> -> vector<32x136xf32>
    %166 = arith.addf %162, %165 : vector<32x136xf32>
    %167 = vector.extract_strided_slice %2 {offsets = [0, 144], sizes = [32, 12], strides = [1, 1]} : vector<32x300xf32> to vector<32x12xf32>
    %168 = vector.extract_strided_slice %117 {offsets = [0, 30], sizes = [12, 136], strides = [1, 1]} : vector<12x196xf32> to vector<12x136xf32>
    %cst_49 = arith.constant dense<0.000000e+00> : vector<32x136xf32>
    %169 = tpu.matmul %167, %168, %cst_49 {dimension_numbers = #tpu.dot_dimension_numbers<[1], [0], [0], [1], [0, 0, 1, 1], [], []>} : vector<32x12xf32>, vector<12x136xf32>, vector<32x136xf32> -> vector<32x136xf32>
    %170 = arith.addf %166, %169 : vector<32x136xf32>
    %171 = vector.extract_strided_slice %2 {offsets = [0, 156], sizes = [32, 12], strides = [1, 1]} : vector<32x300xf32> to vector<32x12xf32>
    %172 = vector.extract_strided_slice %117 {offsets = [0, 31], sizes = [12, 136], strides = [1, 1]} : vector<12x196xf32> to vector<12x136xf32>
    %cst_50 = arith.constant dense<0.000000e+00> : vector<32x136xf32>
    %173 = tpu.matmul %171, %172, %cst_50 {dimension_numbers = #tpu.dot_dimension_numbers<[1], [0], [0], [1], [0, 0, 1, 1], [], []>} : vector<32x12xf32>, vector<12x136xf32>, vector<32x136xf32> -> vector<32x136xf32>
    %174 = arith.addf %170, %173 : vector<32x136xf32>
    %175 = vector.extract_strided_slice %2 {offsets = [0, 168], sizes = [32, 12], strides = [1, 1]} : vector<32x300xf32> to vector<32x12xf32>
    %176 = vector.extract_strided_slice %117 {offsets = [0, 32], sizes = [12, 136], strides = [1, 1]} : vector<12x196xf32> to vector<12x136xf32>
    %cst_51 = arith.constant dense<0.000000e+00> : vector<32x136xf32>
    %177 = tpu.matmul %175, %176, %cst_51 {dimension_numbers = #tpu.dot_dimension_numbers<[1], [0], [0], [1], [0, 0, 1, 1], [], []>} : vector<32x12xf32>, vector<12x136xf32>, vector<32x136xf32> -> vector<32x136xf32>
    %178 = arith.addf %174, %177 : vector<32x136xf32>
    %179 = vector.extract_strided_slice %2 {offsets = [0, 180], sizes = [32, 12], strides = [1, 1]} : vector<32x300xf32> to vector<32x12xf32>
    %180 = vector.extract_strided_slice %117 {offsets = [0, 42], sizes = [12, 136], strides = [1, 1]} : vector<12x196xf32> to vector<12x136xf32>
    %cst_52 = arith.constant dense<0.000000e+00> : vector<32x136xf32>
    %181 = tpu.matmul %179, %180, %cst_52 {dimension_numbers = #tpu.dot_dimension_numbers<[1], [0], [0], [1], [0, 0, 1, 1], [], []>} : vector<32x12xf32>, vector<12x136xf32>, vector<32x136xf32> -> vector<32x136xf32>
    %182 = arith.addf %178, %181 : vector<32x136xf32>
    %183 = vector.extract_strided_slice %2 {offsets = [0, 192], sizes = [32, 12], strides = [1, 1]} : vector<32x300xf32> to vector<32x12xf32>
    %184 = vector.extract_strided_slice %117 {offsets = [0, 43], sizes = [12, 136], strides = [1, 1]} : vector<12x196xf32> to vector<12x136xf32>
    %cst_53 = arith.constant dense<0.000000e+00> : vector<32x136xf32>
    %185 = tpu.matmul %183, %184, %cst_53 {dimension_numbers = #tpu.dot_dimension_numbers<[1], [0], [0], [1], [0, 0, 1, 1], [], []>} : vector<32x12xf32>, vector<12x136xf32>, vector<32x136xf32> -> vector<32x136xf32>
    %186 = arith.addf %182, %185 : vector<32x136xf32>
    %187 = vector.extract_strided_slice %2 {offsets = [0, 204], sizes = [32, 12], strides = [1, 1]} : vector<32x300xf32> to vector<32x12xf32>
    %188 = vector.extract_strided_slice %117 {offsets = [0, 44], sizes = [12, 136], strides = [1, 1]} : vector<12x196xf32> to vector<12x136xf32>
    %cst_54 = arith.constant dense<0.000000e+00> : vector<32x136xf32>
    %189 = tpu.matmul %187, %188, %cst_54 {dimension_numbers = #tpu.dot_dimension_numbers<[1], [0], [0], [1], [0, 0, 1, 1], [], []>} : vector<32x12xf32>, vector<12x136xf32>, vector<32x136xf32> -> vector<32x136xf32>
    %190 = arith.addf %186, %189 : vector<32x136xf32>
    %191 = vector.extract_strided_slice %2 {offsets = [0, 216], sizes = [32, 12], strides = [1, 1]} : vector<32x300xf32> to vector<32x12xf32>
    %192 = vector.extract_strided_slice %117 {offsets = [0, 45], sizes = [12, 136], strides = [1, 1]} : vector<12x196xf32> to vector<12x136xf32>
    %cst_55 = arith.constant dense<0.000000e+00> : vector<32x136xf32>
    %193 = tpu.matmul %191, %192, %cst_55 {dimension_numbers = #tpu.dot_dimension_numbers<[1], [0], [0], [1], [0, 0, 1, 1], [], []>} : vector<32x12xf32>, vector<12x136xf32>, vector<32x136xf32> -> vector<32x136xf32>
    %194 = arith.addf %190, %193 : vector<32x136xf32>
    %195 = vector.extract_strided_slice %2 {offsets = [0, 228], sizes = [32, 12], strides = [1, 1]} : vector<32x300xf32> to vector<32x12xf32>
    %196 = vector.extract_strided_slice %117 {offsets = [0, 46], sizes = [12, 136], strides = [1, 1]} : vector<12x196xf32> to vector<12x136xf32>
    %cst_56 = arith.constant dense<0.000000e+00> : vector<32x136xf32>
    %197 = tpu.matmul %195, %196, %cst_56 {dimension_numbers = #tpu.dot_dimension_numbers<[1], [0], [0], [1], [0, 0, 1, 1], [], []>} : vector<32x12xf32>, vector<12x136xf32>, vector<32x136xf32> -> vector<32x136xf32>
    %198 = arith.addf %194, %197 : vector<32x136xf32>
    %199 = vector.extract_strided_slice %2 {offsets = [0, 240], sizes = [32, 12], strides = [1, 1]} : vector<32x300xf32> to vector<32x12xf32>
    %200 = vector.extract_strided_slice %117 {offsets = [0, 56], sizes = [12, 136], strides = [1, 1]} : vector<12x196xf32> to vector<12x136xf32>
    %cst_57 = arith.constant dense<0.000000e+00> : vector<32x136xf32>
    %201 = tpu.matmul %199, %200, %cst_57 {dimension_numbers = #tpu.dot_dimension_numbers<[1], [0], [0], [1], [0, 0, 1, 1], [], []>} : vector<32x12xf32>, vector<12x136xf32>, vector<32x136xf32> -> vector<32x136xf32>
    %202 = arith.addf %198, %201 : vector<32x136xf32>
    %203 = vector.extract_strided_slice %2 {offsets = [0, 252], sizes = [32, 12], strides = [1, 1]} : vector<32x300xf32> to vector<32x12xf32>
    %204 = vector.extract_strided_slice %117 {offsets = [0, 57], sizes = [12, 136], strides = [1, 1]} : vector<12x196xf32> to vector<12x136xf32>
    %cst_58 = arith.constant dense<0.000000e+00> : vector<32x136xf32>
    %205 = tpu.matmul %203, %204, %cst_58 {dimension_numbers = #tpu.dot_dimension_numbers<[1], [0], [0], [1], [0, 0, 1, 1], [], []>} : vector<32x12xf32>, vector<12x136xf32>, vector<32x136xf32> -> vector<32x136xf32>
    %206 = arith.addf %202, %205 : vector<32x136xf32>
    %207 = vector.extract_strided_slice %2 {offsets = [0, 264], sizes = [32, 12], strides = [1, 1]} : vector<32x300xf32> to vector<32x12xf32>
    %208 = vector.extract_strided_slice %117 {offsets = [0, 58], sizes = [12, 136], strides = [1, 1]} : vector<12x196xf32> to vector<12x136xf32>
    %cst_59 = arith.constant dense<0.000000e+00> : vector<32x136xf32>
    %209 = tpu.matmul %207, %208, %cst_59 {dimension_numbers = #tpu.dot_dimension_numbers<[1], [0], [0], [1], [0, 0, 1, 1], [], []>} : vector<32x12xf32>, vector<12x136xf32>, vector<32x136xf32> -> vector<32x136xf32>
    %210 = arith.addf %206, %209 : vector<32x136xf32>
    %211 = vector.extract_strided_slice %2 {offsets = [0, 276], sizes = [32, 12], strides = [1, 1]} : vector<32x300xf32> to vector<32x12xf32>
    %212 = vector.extract_strided_slice %117 {offsets = [0, 59], sizes = [12, 136], strides = [1, 1]} : vector<12x196xf32> to vector<12x136xf32>
    %cst_60 = arith.constant dense<0.000000e+00> : vector<32x136xf32>
    %213 = tpu.matmul %211, %212, %cst_60 {dimension_numbers = #tpu.dot_dimension_numbers<[1], [0], [0], [1], [0, 0, 1, 1], [], []>} : vector<32x12xf32>, vector<12x136xf32>, vector<32x136xf32> -> vector<32x136xf32>
    %214 = arith.addf %210, %213 : vector<32x136xf32>
    %215 = vector.extract_strided_slice %2 {offsets = [0, 288], sizes = [32, 12], strides = [1, 1]} : vector<32x300xf32> to vector<32x12xf32>
    %216 = vector.extract_strided_slice %117 {offsets = [0, 60], sizes = [12, 136], strides = [1, 1]} : vector<12x196xf32> to vector<12x136xf32>
    %cst_61 = arith.constant dense<0.000000e+00> : vector<32x136xf32>
    %217 = tpu.matmul %215, %216, %cst_61 {dimension_numbers = #tpu.dot_dimension_numbers<[1], [0], [0], [1], [0, 0, 1, 1], [], []>} : vector<32x12xf32>, vector<12x136xf32>, vector<32x136xf32> -> vector<32x136xf32>
    %218 = arith.addf %214, %217 : vector<32x136xf32>
    %c0_62 = arith.constant 0 : index
    %c0_63 = arith.constant 0 : index
    %219 = vector.load %arg6[%c0_62, %c0_63] : memref<32x1xf32, #tpu.memory_space<vmem>>, vector<32x1xf32>
    %220 = vector.broadcast %219 : vector<32x1xf32> to vector<32x136xf32>
    %221 = arith.addf %218, %220 : vector<32x136xf32>
    %cst_64 = arith.constant 0.000000e+00 : f32
    %222 = vector.broadcast %cst_64 : f32 to vector<32x136xf32>
    %223 = arith.maximumf %221, %222 : vector<32x136xf32>
    %c0_65 = arith.constant 0 : index
    %c0_66 = arith.constant 0 : index
    %224 = vector.load %arg7[%c0_65, %c0_66] : memref<136x100xf32, #tpu.memory_space<vmem>>, vector<136x100xf32>
    %cst_67 = arith.constant dense<0.000000e+00> : vector<32x100xf32>
    %225 = tpu.matmul %223, %224, %cst_67 {dimension_numbers = #tpu.dot_dimension_numbers<[1], [0], [0], [1], [0, 0, 1, 1], [], []>} : vector<32x136xf32>, vector<136x100xf32>, vector<32x100xf32> -> vector<32x100xf32>
    %226 = vector.extract_strided_slice %225 {offsets = [0, 0], sizes = [32, 25], strides = [1, 1]} : vector<32x100xf32> to vector<32x25xf32>
    %227 = vector.extract_strided_slice %225 {offsets = [0, 25], sizes = [32, 25], strides = [1, 1]} : vector<32x100xf32> to vector<32x25xf32>
    %228 = arith.maximumf %226, %227 : vector<32x25xf32>
    %229 = vector.extract_strided_slice %225 {offsets = [0, 50], sizes = [32, 25], strides = [1, 1]} : vector<32x100xf32> to vector<32x25xf32>
    %230 = vector.extract_strided_slice %225 {offsets = [0, 75], sizes = [32, 25], strides = [1, 1]} : vector<32x100xf32> to vector<32x25xf32>
    %231 = arith.maximumf %229, %230 : vector<32x25xf32>
    %232 = arith.maximumf %228, %231 : vector<32x25xf32>
    %c0_68 = arith.constant 0 : index
    %c0_69 = arith.constant 0 : index
    %233 = vector.load %arg9[%c0_68, %c0_69] : memref<400x32xf32, #tpu.memory_space<vmem>>, vector<400x32xf32>
    %c0_70 = arith.constant 0 : index
    %c0_71 = arith.constant 0 : index
    %234 = vector.load %arg8[%c0_70, %c0_71] : memref<32x32xf32, #tpu.memory_space<vmem>>, vector<32x32xf32>
    %cst_72 = arith.constant 0.000000e+00 : f32
    %235 = vector.broadcast %cst_72 : f32 to vector<2x32xf32>
    %236 = vector.extract_strided_slice %234 {offsets = [0, 0], sizes = [2, 32], strides = [1, 1]} : vector<32x32xf32> to vector<2x32xf32>
    %cst_73 = arith.constant dense<0.000000e+00> : vector<2x25xf32>
    %237 = tpu.matmul %236, %232, %cst_73 {dimension_numbers = #tpu.dot_dimension_numbers<[1], [0], [0], [1], [0, 0, 1, 1], [], []>} : vector<2x32xf32>, vector<32x25xf32>, vector<2x25xf32> -> vector<2x25xf32>
    %238 = vector.extract_strided_slice %233 {offsets = [0, 0], sizes = [25, 32], strides = [1, 1]} : vector<400x32xf32> to vector<25x32xf32>
    %cst_74 = arith.constant dense<0.000000e+00> : vector<2x32xf32>
    %239 = tpu.matmul %237, %238, %cst_74 {dimension_numbers = #tpu.dot_dimension_numbers<[1], [0], [0], [1], [0, 0, 1, 1], [], []>} : vector<2x25xf32>, vector<25x32xf32>, vector<2x32xf32> -> vector<2x32xf32>
    %240 = arith.addf %235, %239 : vector<2x32xf32>
    %241 = vector.extract_strided_slice %234 {offsets = [2, 0], sizes = [2, 32], strides = [1, 1]} : vector<32x32xf32> to vector<2x32xf32>
    %cst_75 = arith.constant dense<0.000000e+00> : vector<2x25xf32>
    %242 = tpu.matmul %241, %232, %cst_75 {dimension_numbers = #tpu.dot_dimension_numbers<[1], [0], [0], [1], [0, 0, 1, 1], [], []>} : vector<2x32xf32>, vector<32x25xf32>, vector<2x25xf32> -> vector<2x25xf32>
    %243 = vector.extract_strided_slice %233 {offsets = [25, 0], sizes = [25, 32], strides = [1, 1]} : vector<400x32xf32> to vector<25x32xf32>
    %cst_76 = arith.constant dense<0.000000e+00> : vector<2x32xf32>
    %244 = tpu.matmul %242, %243, %cst_76 {dimension_numbers = #tpu.dot_dimension_numbers<[1], [0], [0], [1], [0, 0, 1, 1], [], []>} : vector<2x25xf32>, vector<25x32xf32>, vector<2x32xf32> -> vector<2x32xf32>
    %245 = arith.addf %240, %244 : vector<2x32xf32>
    %246 = vector.extract_strided_slice %234 {offsets = [4, 0], sizes = [2, 32], strides = [1, 1]} : vector<32x32xf32> to vector<2x32xf32>
    %cst_77 = arith.constant dense<0.000000e+00> : vector<2x25xf32>
    %247 = tpu.matmul %246, %232, %cst_77 {dimension_numbers = #tpu.dot_dimension_numbers<[1], [0], [0], [1], [0, 0, 1, 1], [], []>} : vector<2x32xf32>, vector<32x25xf32>, vector<2x25xf32> -> vector<2x25xf32>
    %248 = vector.extract_strided_slice %233 {offsets = [50, 0], sizes = [25, 32], strides = [1, 1]} : vector<400x32xf32> to vector<25x32xf32>
    %cst_78 = arith.constant dense<0.000000e+00> : vector<2x32xf32>
    %249 = tpu.matmul %247, %248, %cst_78 {dimension_numbers = #tpu.dot_dimension_numbers<[1], [0], [0], [1], [0, 0, 1, 1], [], []>} : vector<2x25xf32>, vector<25x32xf32>, vector<2x32xf32> -> vector<2x32xf32>
    %250 = arith.addf %245, %249 : vector<2x32xf32>
    %251 = vector.extract_strided_slice %234 {offsets = [6, 0], sizes = [2, 32], strides = [1, 1]} : vector<32x32xf32> to vector<2x32xf32>
    %cst_79 = arith.constant dense<0.000000e+00> : vector<2x25xf32>
    %252 = tpu.matmul %251, %232, %cst_79 {dimension_numbers = #tpu.dot_dimension_numbers<[1], [0], [0], [1], [0, 0, 1, 1], [], []>} : vector<2x32xf32>, vector<32x25xf32>, vector<2x25xf32> -> vector<2x25xf32>
    %253 = vector.extract_strided_slice %233 {offsets = [75, 0], sizes = [25, 32], strides = [1, 1]} : vector<400x32xf32> to vector<25x32xf32>
    %cst_80 = arith.constant dense<0.000000e+00> : vector<2x32xf32>
    %254 = tpu.matmul %252, %253, %cst_80 {dimension_numbers = #tpu.dot_dimension_numbers<[1], [0], [0], [1], [0, 0, 1, 1], [], []>} : vector<2x25xf32>, vector<25x32xf32>, vector<2x32xf32> -> vector<2x32xf32>
    %255 = arith.addf %250, %254 : vector<2x32xf32>
    %256 = vector.extract_strided_slice %234 {offsets = [8, 0], sizes = [2, 32], strides = [1, 1]} : vector<32x32xf32> to vector<2x32xf32>
    %cst_81 = arith.constant dense<0.000000e+00> : vector<2x25xf32>
    %257 = tpu.matmul %256, %232, %cst_81 {dimension_numbers = #tpu.dot_dimension_numbers<[1], [0], [0], [1], [0, 0, 1, 1], [], []>} : vector<2x32xf32>, vector<32x25xf32>, vector<2x25xf32> -> vector<2x25xf32>
    %258 = vector.extract_strided_slice %233 {offsets = [100, 0], sizes = [25, 32], strides = [1, 1]} : vector<400x32xf32> to vector<25x32xf32>
    %cst_82 = arith.constant dense<0.000000e+00> : vector<2x32xf32>
    %259 = tpu.matmul %257, %258, %cst_82 {dimension_numbers = #tpu.dot_dimension_numbers<[1], [0], [0], [1], [0, 0, 1, 1], [], []>} : vector<2x25xf32>, vector<25x32xf32>, vector<2x32xf32> -> vector<2x32xf32>
    %260 = arith.addf %255, %259 : vector<2x32xf32>
    %261 = vector.extract_strided_slice %234 {offsets = [10, 0], sizes = [2, 32], strides = [1, 1]} : vector<32x32xf32> to vector<2x32xf32>
    %cst_83 = arith.constant dense<0.000000e+00> : vector<2x25xf32>
    %262 = tpu.matmul %261, %232, %cst_83 {dimension_numbers = #tpu.dot_dimension_numbers<[1], [0], [0], [1], [0, 0, 1, 1], [], []>} : vector<2x32xf32>, vector<32x25xf32>, vector<2x25xf32> -> vector<2x25xf32>
    %263 = vector.extract_strided_slice %233 {offsets = [125, 0], sizes = [25, 32], strides = [1, 1]} : vector<400x32xf32> to vector<25x32xf32>
    %cst_84 = arith.constant dense<0.000000e+00> : vector<2x32xf32>
    %264 = tpu.matmul %262, %263, %cst_84 {dimension_numbers = #tpu.dot_dimension_numbers<[1], [0], [0], [1], [0, 0, 1, 1], [], []>} : vector<2x25xf32>, vector<25x32xf32>, vector<2x32xf32> -> vector<2x32xf32>
    %265 = arith.addf %260, %264 : vector<2x32xf32>
    %266 = vector.extract_strided_slice %234 {offsets = [12, 0], sizes = [2, 32], strides = [1, 1]} : vector<32x32xf32> to vector<2x32xf32>
    %cst_85 = arith.constant dense<0.000000e+00> : vector<2x25xf32>
    %267 = tpu.matmul %266, %232, %cst_85 {dimension_numbers = #tpu.dot_dimension_numbers<[1], [0], [0], [1], [0, 0, 1, 1], [], []>} : vector<2x32xf32>, vector<32x25xf32>, vector<2x25xf32> -> vector<2x25xf32>
    %268 = vector.extract_strided_slice %233 {offsets = [150, 0], sizes = [25, 32], strides = [1, 1]} : vector<400x32xf32> to vector<25x32xf32>
    %cst_86 = arith.constant dense<0.000000e+00> : vector<2x32xf32>
    %269 = tpu.matmul %267, %268, %cst_86 {dimension_numbers = #tpu.dot_dimension_numbers<[1], [0], [0], [1], [0, 0, 1, 1], [], []>} : vector<2x25xf32>, vector<25x32xf32>, vector<2x32xf32> -> vector<2x32xf32>
    %270 = arith.addf %265, %269 : vector<2x32xf32>
    %271 = vector.extract_strided_slice %234 {offsets = [14, 0], sizes = [2, 32], strides = [1, 1]} : vector<32x32xf32> to vector<2x32xf32>
    %cst_87 = arith.constant dense<0.000000e+00> : vector<2x25xf32>
    %272 = tpu.matmul %271, %232, %cst_87 {dimension_numbers = #tpu.dot_dimension_numbers<[1], [0], [0], [1], [0, 0, 1, 1], [], []>} : vector<2x32xf32>, vector<32x25xf32>, vector<2x25xf32> -> vector<2x25xf32>
    %273 = vector.extract_strided_slice %233 {offsets = [175, 0], sizes = [25, 32], strides = [1, 1]} : vector<400x32xf32> to vector<25x32xf32>
    %cst_88 = arith.constant dense<0.000000e+00> : vector<2x32xf32>
    %274 = tpu.matmul %272, %273, %cst_88 {dimension_numbers = #tpu.dot_dimension_numbers<[1], [0], [0], [1], [0, 0, 1, 1], [], []>} : vector<2x25xf32>, vector<25x32xf32>, vector<2x32xf32> -> vector<2x32xf32>
    %275 = arith.addf %270, %274 : vector<2x32xf32>
    %276 = vector.extract_strided_slice %234 {offsets = [16, 0], sizes = [2, 32], strides = [1, 1]} : vector<32x32xf32> to vector<2x32xf32>
    %cst_89 = arith.constant dense<0.000000e+00> : vector<2x25xf32>
    %277 = tpu.matmul %276, %232, %cst_89 {dimension_numbers = #tpu.dot_dimension_numbers<[1], [0], [0], [1], [0, 0, 1, 1], [], []>} : vector<2x32xf32>, vector<32x25xf32>, vector<2x25xf32> -> vector<2x25xf32>
    %278 = vector.extract_strided_slice %233 {offsets = [200, 0], sizes = [25, 32], strides = [1, 1]} : vector<400x32xf32> to vector<25x32xf32>
    %cst_90 = arith.constant dense<0.000000e+00> : vector<2x32xf32>
    %279 = tpu.matmul %277, %278, %cst_90 {dimension_numbers = #tpu.dot_dimension_numbers<[1], [0], [0], [1], [0, 0, 1, 1], [], []>} : vector<2x25xf32>, vector<25x32xf32>, vector<2x32xf32> -> vector<2x32xf32>
    %280 = arith.addf %275, %279 : vector<2x32xf32>
    %281 = vector.extract_strided_slice %234 {offsets = [18, 0], sizes = [2, 32], strides = [1, 1]} : vector<32x32xf32> to vector<2x32xf32>
    %cst_91 = arith.constant dense<0.000000e+00> : vector<2x25xf32>
    %282 = tpu.matmul %281, %232, %cst_91 {dimension_numbers = #tpu.dot_dimension_numbers<[1], [0], [0], [1], [0, 0, 1, 1], [], []>} : vector<2x32xf32>, vector<32x25xf32>, vector<2x25xf32> -> vector<2x25xf32>
    %283 = vector.extract_strided_slice %233 {offsets = [225, 0], sizes = [25, 32], strides = [1, 1]} : vector<400x32xf32> to vector<25x32xf32>
    %cst_92 = arith.constant dense<0.000000e+00> : vector<2x32xf32>
    %284 = tpu.matmul %282, %283, %cst_92 {dimension_numbers = #tpu.dot_dimension_numbers<[1], [0], [0], [1], [0, 0, 1, 1], [], []>} : vector<2x25xf32>, vector<25x32xf32>, vector<2x32xf32> -> vector<2x32xf32>
    %285 = arith.addf %280, %284 : vector<2x32xf32>
    %286 = vector.extract_strided_slice %234 {offsets = [20, 0], sizes = [2, 32], strides = [1, 1]} : vector<32x32xf32> to vector<2x32xf32>
    %cst_93 = arith.constant dense<0.000000e+00> : vector<2x25xf32>
    %287 = tpu.matmul %286, %232, %cst_93 {dimension_numbers = #tpu.dot_dimension_numbers<[1], [0], [0], [1], [0, 0, 1, 1], [], []>} : vector<2x32xf32>, vector<32x25xf32>, vector<2x25xf32> -> vector<2x25xf32>
    %288 = vector.extract_strided_slice %233 {offsets = [250, 0], sizes = [25, 32], strides = [1, 1]} : vector<400x32xf32> to vector<25x32xf32>
    %cst_94 = arith.constant dense<0.000000e+00> : vector<2x32xf32>
    %289 = tpu.matmul %287, %288, %cst_94 {dimension_numbers = #tpu.dot_dimension_numbers<[1], [0], [0], [1], [0, 0, 1, 1], [], []>} : vector<2x25xf32>, vector<25x32xf32>, vector<2x32xf32> -> vector<2x32xf32>
    %290 = arith.addf %285, %289 : vector<2x32xf32>
    %291 = vector.extract_strided_slice %234 {offsets = [22, 0], sizes = [2, 32], strides = [1, 1]} : vector<32x32xf32> to vector<2x32xf32>
    %cst_95 = arith.constant dense<0.000000e+00> : vector<2x25xf32>
    %292 = tpu.matmul %291, %232, %cst_95 {dimension_numbers = #tpu.dot_dimension_numbers<[1], [0], [0], [1], [0, 0, 1, 1], [], []>} : vector<2x32xf32>, vector<32x25xf32>, vector<2x25xf32> -> vector<2x25xf32>
    %293 = vector.extract_strided_slice %233 {offsets = [275, 0], sizes = [25, 32], strides = [1, 1]} : vector<400x32xf32> to vector<25x32xf32>
    %cst_96 = arith.constant dense<0.000000e+00> : vector<2x32xf32>
    %294 = tpu.matmul %292, %293, %cst_96 {dimension_numbers = #tpu.dot_dimension_numbers<[1], [0], [0], [1], [0, 0, 1, 1], [], []>} : vector<2x25xf32>, vector<25x32xf32>, vector<2x32xf32> -> vector<2x32xf32>
    %295 = arith.addf %290, %294 : vector<2x32xf32>
    %296 = vector.extract_strided_slice %234 {offsets = [24, 0], sizes = [2, 32], strides = [1, 1]} : vector<32x32xf32> to vector<2x32xf32>
    %cst_97 = arith.constant dense<0.000000e+00> : vector<2x25xf32>
    %297 = tpu.matmul %296, %232, %cst_97 {dimension_numbers = #tpu.dot_dimension_numbers<[1], [0], [0], [1], [0, 0, 1, 1], [], []>} : vector<2x32xf32>, vector<32x25xf32>, vector<2x25xf32> -> vector<2x25xf32>
    %298 = vector.extract_strided_slice %233 {offsets = [300, 0], sizes = [25, 32], strides = [1, 1]} : vector<400x32xf32> to vector<25x32xf32>
    %cst_98 = arith.constant dense<0.000000e+00> : vector<2x32xf32>
    %299 = tpu.matmul %297, %298, %cst_98 {dimension_numbers = #tpu.dot_dimension_numbers<[1], [0], [0], [1], [0, 0, 1, 1], [], []>} : vector<2x25xf32>, vector<25x32xf32>, vector<2x32xf32> -> vector<2x32xf32>
    %300 = arith.addf %295, %299 : vector<2x32xf32>
    %301 = vector.extract_strided_slice %234 {offsets = [26, 0], sizes = [2, 32], strides = [1, 1]} : vector<32x32xf32> to vector<2x32xf32>
    %cst_99 = arith.constant dense<0.000000e+00> : vector<2x25xf32>
    %302 = tpu.matmul %301, %232, %cst_99 {dimension_numbers = #tpu.dot_dimension_numbers<[1], [0], [0], [1], [0, 0, 1, 1], [], []>} : vector<2x32xf32>, vector<32x25xf32>, vector<2x25xf32> -> vector<2x25xf32>
    %303 = vector.extract_strided_slice %233 {offsets = [325, 0], sizes = [25, 32], strides = [1, 1]} : vector<400x32xf32> to vector<25x32xf32>
    %cst_100 = arith.constant dense<0.000000e+00> : vector<2x32xf32>
    %304 = tpu.matmul %302, %303, %cst_100 {dimension_numbers = #tpu.dot_dimension_numbers<[1], [0], [0], [1], [0, 0, 1, 1], [], []>} : vector<2x25xf32>, vector<25x32xf32>, vector<2x32xf32> -> vector<2x32xf32>
    %305 = arith.addf %300, %304 : vector<2x32xf32>
    %306 = vector.extract_strided_slice %234 {offsets = [28, 0], sizes = [2, 32], strides = [1, 1]} : vector<32x32xf32> to vector<2x32xf32>
    %cst_101 = arith.constant dense<0.000000e+00> : vector<2x25xf32>
    %307 = tpu.matmul %306, %232, %cst_101 {dimension_numbers = #tpu.dot_dimension_numbers<[1], [0], [0], [1], [0, 0, 1, 1], [], []>} : vector<2x32xf32>, vector<32x25xf32>, vector<2x25xf32> -> vector<2x25xf32>
    %308 = vector.extract_strided_slice %233 {offsets = [350, 0], sizes = [25, 32], strides = [1, 1]} : vector<400x32xf32> to vector<25x32xf32>
    %cst_102 = arith.constant dense<0.000000e+00> : vector<2x32xf32>
    %309 = tpu.matmul %307, %308, %cst_102 {dimension_numbers = #tpu.dot_dimension_numbers<[1], [0], [0], [1], [0, 0, 1, 1], [], []>} : vector<2x25xf32>, vector<25x32xf32>, vector<2x32xf32> -> vector<2x32xf32>
    %310 = arith.addf %305, %309 : vector<2x32xf32>
    %311 = vector.extract_strided_slice %234 {offsets = [30, 0], sizes = [2, 32], strides = [1, 1]} : vector<32x32xf32> to vector<2x32xf32>
    %cst_103 = arith.constant dense<0.000000e+00> : vector<2x25xf32>
    %312 = tpu.matmul %311, %232, %cst_103 {dimension_numbers = #tpu.dot_dimension_numbers<[1], [0], [0], [1], [0, 0, 1, 1], [], []>} : vector<2x32xf32>, vector<32x25xf32>, vector<2x25xf32> -> vector<2x25xf32>
    %313 = vector.extract_strided_slice %233 {offsets = [375, 0], sizes = [25, 32], strides = [1, 1]} : vector<400x32xf32> to vector<25x32xf32>
    %cst_104 = arith.constant dense<0.000000e+00> : vector<2x32xf32>
    %314 = tpu.matmul %312, %313, %cst_104 {dimension_numbers = #tpu.dot_dimension_numbers<[1], [0], [0], [1], [0, 0, 1, 1], [], []>} : vector<2x25xf32>, vector<25x32xf32>, vector<2x32xf32> -> vector<2x32xf32>
    %315 = arith.addf %310, %314 : vector<2x32xf32>
    %c0_105 = arith.constant 0 : index
    %c0_106 = arith.constant 0 : index
    %316 = vector.load %arg10[%c0_105, %c0_106] : memref<1x32xf32, #tpu.memory_space<vmem>>, vector<1x32xf32>
    %317 = vector.broadcast %316 : vector<1x32xf32> to vector<2x32xf32>
    %318 = arith.addf %315, %317 : vector<2x32xf32>
    %cst_107 = arith.constant 0.000000e+00 : f32
    %319 = vector.broadcast %cst_107 : f32 to vector<2x32xf32>
    %320 = arith.maximumf %318, %319 : vector<2x32xf32>
    %c0_108 = arith.constant 0 : index
    %c0_109 = arith.constant 0 : index
    %321 = vector.load %arg11[%c0_108, %c0_109] : memref<32x32xf32, #tpu.memory_space<vmem>>, vector<32x32xf32>
    %cst_110 = arith.constant dense<0.000000e+00> : vector<2x32xf32>
    %322 = tpu.matmul %320, %321, %cst_110 {dimension_numbers = #tpu.dot_dimension_numbers<[1], [0], [0], [1], [0, 0, 1, 1], [], []>} : vector<2x32xf32>, vector<32x32xf32>, vector<2x32xf32> -> vector<2x32xf32>
    %c0_111 = arith.constant 0 : index
    %c0_112 = arith.constant 0 : index
    %323 = vector.load %arg12[%c0_111, %c0_112] : memref<1x32xf32, #tpu.memory_space<vmem>>, vector<1x32xf32>
    %324 = vector.broadcast %323 : vector<1x32xf32> to vector<2x32xf32>
    %325 = arith.addf %322, %324 : vector<2x32xf32>
    %cst_113 = arith.constant 0.000000e+00 : f32
    %326 = vector.broadcast %cst_113 : f32 to vector<2x32xf32>
    %327 = arith.maximumf %325, %326 : vector<2x32xf32>
    %c0_114 = arith.constant 0 : index
    %c0_115 = arith.constant 0 : index
    %328 = vector.load %arg13[%c0_114, %c0_115] : memref<32x2xf32, #tpu.memory_space<vmem>>, vector<32x2xf32>
    %cst_116 = arith.constant dense<0.000000e+00> : vector<2x2xf32>
    %329 = tpu.matmul %327, %328, %cst_116 {dimension_numbers = #tpu.dot_dimension_numbers<[1], [0], [0], [1], [0, 0, 1, 1], [], []>} : vector<2x32xf32>, vector<32x2xf32>, vector<2x2xf32> -> vector<2x2xf32>
    %c0_117 = arith.constant 0 : index
    %c0_118 = arith.constant 0 : index
    %330 = vector.load %arg14[%c0_117, %c0_118] : memref<1x2xf32, #tpu.memory_space<vmem>>, vector<1x2xf32>
    %331 = vector.broadcast %330 : vector<1x2xf32> to vector<2x2xf32>
    %332 = arith.addf %329, %331 : vector<2x2xf32>
    %c0_119 = arith.constant 0 : index
    %c0_120 = arith.constant 0 : index
    %333 = vector.load %arg15[%c0_119, %c0_120] : memref<2x2xf32, #tpu.memory_space<vmem>>, vector<2x2xf32>
    tpu.vector_store %arg15[%c0_119, %c0_120], %332 {strides = array<i32>} : memref<2x2xf32, #tpu.memory_space<vmem>>, vector<2x2xf32>,
    return
  }
  func.func @transform_0(%arg0: i32) -> (i32, i32) {
    %c0_i32 = arith.constant 0 : i32
    %c0_i32_0 = arith.constant 0 : i32
    %c0_i32_1 = arith.constant 0 : i32
    return %c0_i32, %c0_i32_0 : i32, i32
  }
  func.func @transform_1(%arg0: i32) -> (i32, i32) {
    %c0_i32 = arith.constant 0 : i32
    %c0_i32_0 = arith.constant 0 : i32
    %c0_i32_1 = arith.constant 0 : i32
    return %c0_i32, %c0_i32_0 : i32, i32
  }
  func.func @transform_2(%arg0: i32) -> (i32, i32) {
    %c0_i32 = arith.constant 0 : i32
    %c0_i32_0 = arith.constant 0 : i32
    %c0_i32_1 = arith.constant 0 : i32
    return %c0_i32, %c0_i32_0 : i32, i32
  }
  func.func @transform_3(%arg0: i32) -> (i32, i32) {
    %c0_i32 = arith.constant 0 : i32
    %c0_i32_0 = arith.constant 0 : i32
    %c0_i32_1 = arith.constant 0 : i32
    return %c0_i32, %c0_i32_0 : i32, i32
  }
  func.func @transform_4(%arg0: i32) -> (i32, i32) {
    %c0_i32 = arith.constant 0 : i32
    %c0_i32_0 = arith.constant 0 : i32
    %c0_i32_1 = arith.constant 0 : i32
    return %c0_i32, %c0_i32_0 : i32, i32
  }
  func.func @transform_5(%arg0: i32) -> (i32, i32) {
    %c0_i32 = arith.constant 0 : i32
    %c0_i32_0 = arith.constant 0 : i32
    %c0_i32_1 = arith.constant 0 : i32
    return %c0_i32, %c0_i32_0 : i32, i32
  }
  func.func @transform_6(%arg0: i32) -> (i32, i32) {
    %c0_i32 = arith.constant 0 : i32
    %c0_i32_0 = arith.constant 0 : i32
    %c0_i32_1 = arith.constant 0 : i32
    return %c0_i32, %c0_i32_0 : i32, i32
  }
  func.func @transform_7(%arg0: i32) -> (i32, i32) {
    %c0_i32 = arith.constant 0 : i32
    %c0_i32_0 = arith.constant 0 : i32
    %c0_i32_1 = arith.constant 0 : i32
    return %c0_i32, %c0_i32_0 : i32, i32
  }
  func.func @transform_8(%arg0: i32) -> (i32, i32) {
    %c0_i32 = arith.constant 0 : i32
    %c0_i32_0 = arith.constant 0 : i32
    %c0_i32_1 = arith.constant 0 : i32
    return %c0_i32, %c0_i32_0 : i32, i32
  }
  func.func @transform_9(%arg0: i32) -> (i32, i32) {
    %c0_i32 = arith.constant 0 : i32
    %c0_i32_0 = arith.constant 0 : i32
    %c0_i32_1 = arith.constant 0 : i32
    return %c0_i32, %c0_i32_0 : i32, i32
  }
  func.func @transform_10(%arg0: i32) -> (i32, i32) {
    %c0_i32 = arith.constant 0 : i32
    %c0_i32_0 = arith.constant 0 : i32
    %c0_i32_1 = arith.constant 0 : i32
    return %c0_i32, %c0_i32_0 : i32, i32
  }
  func.func @transform_11(%arg0: i32) -> (i32, i32) {
    %c0_i32 = arith.constant 0 : i32
    %c0_i32_0 = arith.constant 0 : i32
    %c0_i32_1 = arith.constant 0 : i32
    return %c0_i32, %c0_i32_0 : i32, i32
  }
  func.func @transform_12(%arg0: i32) -> (i32, i32) {
    %c0_i32 = arith.constant 0 : i32
    %c0_i32_0 = arith.constant 0 : i32
    %c0_i32_1 = arith.constant 0 : i32
    return %c0_i32, %c0_i32_0 : i32, i32
  }
  func.func @transform_13(%arg0: i32) -> (i32, i32) {
    %c0_i32 = arith.constant 0 : i32
    %c0_i32_0 = arith.constant 0 : i32
    %c0_i32_1 = arith.constant 0 : i32
    return %c0_i32, %c0_i32_0 : i32, i32
  }
  func.func @transform_14(%arg0: i32) -> (i32, i32) {
    %c0_i32 = arith.constant 0 : i32
    %c0_i32_0 = arith.constant 0 : i32
    %c0_i32_1 = arith.constant 0 : i32
    return %c0_i32, %c0_i32_0 : i32, i32
  }
}

</mosaic_0001>

<bundles_post_ra>
// kernel: forward.1
= control target key start
LH: loop header
LB: loop body
LE: loop exit
PB: predicated region body
PF: predicated region fallthrough
CT: control target
= control target key end

     0   :  { %19 = vsyncpa [#allocation3], 0  ;;  %s17909_s0 = inlined_call_operand.vmem [shape: f32[6,1024], index: 0, kind: input, shape index: {}]   ;;  %s17910_s1 = inlined_call_operand.hbm [shape: f32[12,150], index: 1, kind: input, shape index: {}]   ;;  %s17911_s2 = inlined_call_operand.hbm [shape: f32[12,1], index: 2, kind: input, shape index: {}]   ;;  %s17912_s3 = inlined_call_operand.hbm [shape: f32[892,784], index: 3, kind: input, shape index: {}]   ;;  %s17913_s4 = inlined_call_operand.hbm [shape: f32[32,300], index: 4, kind: input, shape index: {}]   ;;  %s17914_s5 = inlined_call_operand.hbm [shape: f32[32,1], index: 5, kind: input, shape index: {}]   ;;  %s17915_s6 = inlined_call_operand.hbm [shape: f32[136,100], index: 6, kind: input, shape index: {}]   ;;  %s17916_s7 = inlined_call_operand.hbm [shape: f32[32,32], index: 7, kind: input, shape index: {}]   ;;  %s17917_s8 = inlined_call_operand.hbm [shape: f32[400,32], index: 8, kind: input, shape index: {}]   ;;  %s17918_s9 = inlined_call_operand.hbm [shape: f32[1,32], index: 9, kind: input, shape index: {}]   ;;  %s17919_s10 = inlined_call_operand.hbm [shape: f32[32,32], index: 10, kind: input, shape index: {}]   ;;  %s17920_s11 = inlined_call_operand.hbm [shape: f32[1,32], index: 11, kind: input, shape index: {}]   ;;  %s17921_s12 = inlined_call_operand.hbm [shape: f32[32,2], index: 12, kind: input, shape index: {}]   ;;  %s17922_s13 = inlined_call_operand.hbm [shape: f32[1,2], index: 13, kind: input, shape index: {}]   ;;  %s17923_s14 = inlined_call_operand.hbm [shape: f32[2,2], index: 14, kind: output, shape index: {}]  }
   0x1   :  { %20 = vsyncpa [#allocation6], 0 }
   0x2   :  { %21 = vsyncpa [#allocation9], 0 }
   0x3   :  { %22 = vsyncpa [#allocation12], 0 }
   0x4   :  { %23 = vsyncpa [#allocation15], 0 }
   0x5   :  { %24 = vsyncpa [#allocation18], 0 }
   0x6   :  { %25 = vsyncpa [#allocation21], 0  ;;  %s46_s15 = sshll.u32 %s17911_s2, 4  ;;  %s47_s15 = int_to_ptr.hbm [resolvable:$true] %s46_s15 }
   0x7   :  { %26 = vsyncpa [#allocation4], 0  ;;  %s12879_s16 = smov [#allocation5]   ;;  %s72_s20 = sshll.u32 %s17913_s4, 4  ;;  %s73_s20 = int_to_ptr.hbm [resolvable:$true] %s72_s20 }
   0x8   :  { %s48_s17 = sshll.u32 %s12879_s16, 4  ;;  %s12880_s21 = smov 128   ;;  %s49_s17 = int_to_ptr.vmem [resolvable:$true] %s48_s17 }
   0x9   :  { %s12881_s22 = smov 8   ;;  %s12882_s23 = smov [#allocation8]  }
   0xa   :  { %54 = dma.hbm_to_vmem [thread:$0]  %s47_s15, 256, %s49_s17, [#allocation6], %s12880_s21, %s12880_s21, %s12881_s22  }
   0xb   :  { %s74_s24 = sshll.u32 %s12882_s23, 4  ;;  %s12883_s2 = smov 384   ;;  %s75_s24 = int_to_ptr.vmem [resolvable:$true] %s74_s24 }
   0xc   :  { %s12884_s25 = smov 24   ;;  %s98_s28 = sshll.u32 %s17915_s6, 4  ;;  %s99_s28 = int_to_ptr.hbm [resolvable:$true] %s98_s28 }
   0xd   :  { %80 = dma.hbm_to_vmem [thread:$0]  %s73_s20, 1536, %s75_s24, [#allocation9], %s12883_s2, %s12883_s2, %s12884_s25  }
   0xe   :  { %s12885_s29 = smov [#allocation11]   ;;  %s124_s18 = sshll.u32 %s17917_s8, 4  ;;  %s125_s18 = int_to_ptr.hbm [resolvable:$true] %s124_s18 }
   0xf   :  { %s100_s4 = sshll.u32 %s12885_s29, 4  ;;  %s12886_s15 = smov [#allocation14]   ;;  %s101_s4 = int_to_ptr.vmem [resolvable:$true] %s100_s4 }
  0x10   :  { %106 = dma.hbm_to_vmem [thread:$0]  %s99_s28, 2176, %s101_s4, [#allocation12], %s12880_s21, %s12880_s21, %s12881_s22  }
  0x11   :  { %s126_s17 = sshll.u32 %s12886_s15, 4  ;;  %s148_s23 = sshll.u32 %s17919_s10, 4  ;;  %s127_s17 = int_to_ptr.vmem [resolvable:$true] %s126_s17  ;;  %s149_s23 = int_to_ptr.hbm [resolvable:$true] %s148_s23 }
  0x12   :  { %132 = dma.hbm_to_vmem [thread:$0]  %s125_s18, 6400, %s127_s17, [#allocation15], %s12880_s21, %s12880_s21, %s12881_s22  }
  0x13   :  { %s172_s8 = sshll.u32 %s17921_s12, 4  ;;  %s12887_s2 = smov [#allocation17]   ;;  %s173_s8 = int_to_ptr.hbm [resolvable:$true] %s172_s8 }
  0x14   :  { %s150_s25 = sshll.u32 %s12887_s2, 4  ;;  %s12888_s26 = smov [#allocation20]   ;;  %s151_s25 = int_to_ptr.vmem [resolvable:$true] %s150_s25 }
  0x15   :  { %156 = dma.hbm_to_vmem [thread:$0]  %s149_s23, 512, %s151_s25, [#allocation18], %s12880_s21, %s12880_s21, %s12881_s22  }
  0x16   :  { %s174_s10 = sshll.u32 %s12888_s26, 4  ;;  %s33_s29 = sshll.u32 %s17910_s1, 4  ;;  %s175_s10 = int_to_ptr.vmem [resolvable:$true] %s174_s10  ;;  %s34_s29 = int_to_ptr.hbm [resolvable:$true] %s33_s29 }
  0x17   :  { %180 = dma.hbm_to_vmem [thread:$0]  %s173_s8, 512, %s175_s10, [#allocation21], %s12880_s21, %s12880_s21, %s12881_s22  }
  0x18   :  { %s12889_s12 = smov [#allocation2]   ;;  %s59_s18 = sshll.u32 %s17912_s3, 4  ;;  %s60_s18 = int_to_ptr.hbm [resolvable:$true] %s59_s18 }
  0x19   :  { %s35_s4 = sshll.u32 %s12889_s12, 4  ;;  %s12890_s15 = smov 256   ;;  %s36_s4 = int_to_ptr.vmem [resolvable:$true] %s35_s4 }
  0x1a   :  { %s12891_s17 = smov 16   ;;  %s12892_s19 = smov [#allocation7]  }
  0x1b   :  { %41 = dma.hbm_to_vmem [thread:$0]  %s34_s29, 512, %s36_s4, [#allocation3], %s12890_s15, %s12890_s15, %s12891_s17  }
  0x1c   :  { %s61_s1 = sshll.u32 %s12892_s19, 4  ;;  %s12893_s20 = smov 896   ;;  %s62_s1 = int_to_ptr.vmem [resolvable:$true] %s61_s1 }
  0x1d   :  { %s12894_s23 = smov 56   ;;  %s85_s8 = sshll.u32 %s17914_s5, 4  ;;  %s86_s8 = int_to_ptr.hbm [resolvable:$true] %s85_s8 }
  0x1e   :  { %67 = dma.hbm_to_vmem [thread:$0]  %s60_s18, 100352, %s62_s1, [#allocation6], %s12893_s20, %s12893_s20, %s12894_s23  }
  0x1f   :  { %s12895_s2 = smov [#allocation10]   ;;  %s111_s10 = sshll.u32 %s17916_s7, 4  ;;  %s112_s10 = int_to_ptr.hbm [resolvable:$true] %s111_s10 }
  0x20   :  { %s87_s25 = sshll.u32 %s12895_s2, 4  ;;  %s12896_s27 = smov [#allocation13]   ;;  %s88_s25 = int_to_ptr.vmem [resolvable:$true] %s87_s25 }
  0x21   :  { %93 = dma.hbm_to_vmem [thread:$0]  %s86_s8, 512, %s88_s25, [#allocation9], %s12880_s21, %s12880_s21, %s12881_s22  }
  0x22   :  { %s113_s28 = sshll.u32 %s12896_s27, 4  ;;  %s138_s4 = sshll.u32 %s17918_s9, 4  ;;  %s114_s28 = int_to_ptr.vmem [resolvable:$true] %s113_s28  ;;  %s139_s4 = int_to_ptr.hbm [resolvable:$true] %s138_s4 }
  0x23   :  { %119 = dma.hbm_to_vmem [thread:$0]  %s112_s10, 512, %s114_s28, [#allocation12], %s12880_s21, %s12880_s21, %s12881_s22  }
  0x24   :  { %s162_s7 = sshll.u32 %s17920_s11, 4  ;;  %s12897_s16 = smov [#allocation16]   ;;  %s163_s7 = int_to_ptr.hbm [resolvable:$true] %s162_s7 }
  0x25   :  { %s140_s18 = sshll.u32 %s12897_s16, 4  ;;  %s12898_s15 = smov [#allocation19]   ;;  %s141_s18 = int_to_ptr.vmem [resolvable:$true] %s140_s18 }
  0x26   :  { %143 = dma.hbm_to_vmem [thread:$0]  %s139_s4, 16, %s141_s18, [#allocation15]  }
  0x27   :  { %s164_s19 = sshll.u32 %s12898_s15, 4  ;;  %s186_s9 = sshll.u32 %s17922_s13, 4  ;;  %s165_s19 = int_to_ptr.vmem [resolvable:$true] %s164_s19  ;;  %s187_s9 = int_to_ptr.hbm [resolvable:$true] %s186_s9 }
  0x28   :  { %167 = dma.hbm_to_vmem [thread:$0]  %s163_s7, 16, %s165_s19, [#allocation18]  }
  0x29   :  { %s12899_s6 = smov [#allocation22]  }
  0x2a   :  { %s188_s21 = sshll.u32 %s12899_s6, 4  ;;  %s189_s21 = int_to_ptr.vmem [resolvable:$true] %s188_s21 }
  0x2b   :  { %191 = dma.hbm_to_vmem [thread:$0]  %s187_s9, 16, %s189_s21, [#allocation21]  }
  0x2c   :  { %12863 = dma.done.wait [#allocation3], 512  }
  0x2d   :  { %12864 = vsyncadd [#allocation3], 4294966784 }
  0x2e   :  { %12865 = dma.done.wait [#allocation6], 100608  }
  0x2f   :  { %12866 = vsyncadd [#allocation6], 4294866688 }
  0x30   :  { %12867 = dma.done.wait [#allocation9], 2048  }
  0x31   :  { %12868 = vsyncadd [#allocation9], 4294965248 }
  0x32   :  { %12869 = dma.done.wait [#allocation12], 2688  }
  0x33   :  { %12870 = vsyncadd [#allocation12], 4294964608 }
  0x34   :  { %12871 = dma.done.wait [#allocation15], 6416  }
  0x35   :  { %12872 = vsyncadd [#allocation15], 4294960880 }
  0x36   :  { %12873 = dma.done.wait [#allocation18], 528  }
  0x37   :  { %12874 = vsyncadd [#allocation18], 4294966768 }
  0x38   :  { %12875 = dma.done.wait [#allocation21], 528  }
  0x39   :  { %12876 = vsyncadd [#allocation21], 4294966768  ;;  %v13099_v0 = vld [vmem:[#allocation2] sm:$0xff]  ;;  %s12900_s24 = smov 122   ;;  %s12901_s8 = smov 127   ;;  %vm295_vm0 = vcmask 1039360  }
  0x3a   :  { %v13104_v1 = vld [vmem:[%s17909_s0] sm:$0x3f]  ;;  %270 = vrot.lane.b32.xlu1 %v13099_v0, %s12900_s24  ;;  %v13119_v3 = vld [vmem:[%s17909_s0 + $0x18] sm:$0x3f]  ;;  %v13124_v4 = vld [vmem:[%s17909_s0 + $0x8] sm:$0x3f] }
  0x3b   :  { %281 = vrot.lane.b32.xlu0 %v13104_v1, %s12901_s8  ;;  %v13112_v2 = vld [vmem:[%s17909_s0 + $0x20] sm:$0x3f]  ;;  %v13126_v5 = vld [vmem:[#allocation2 + $0x10] sm:$0xf]  ;;  %v13136_v6 = vld [vmem:[%s17909_s0 + $0x28] sm:$0x3f] }
  0x3c   :  { %289 = vrot.lane.b32.xlu2 %v13112_v2, %s12901_s8  ;;  %v13141_v7 = vld [vmem:[%s17909_s0 + $0x10] sm:$0x3f]  ;;  %s12902_s7 = smov 126   ;;  %s12903_s16 = smov 116   ;;  %vm307_vm1 = vcmask 1045504   ;;  %vm302_vm2 = vcmask 48128  }
  0x3d   :  { %v13146_v8 = vld [vmem:[%s17909_s0 + $0x30] sm:$0x3f]  ;;  %s12904_s18 = smov 125   ;;  %s12905_s15 = smov 110   ;;  %v13289_v24 = vld [vmem:[%s17909_s0 + $0x38] sm:$0x3f] }
  0x3e   :  { %s12906_s19 = smov 124   ;;  %s12907_s1 = smov 104   ;;  %vm680_vm3 = vcmask 1031168   ;;  %vm898_vm4 = vcmask 1022976   ;;  %vm1116_vm5 = vcmask 1014784   ;;  %vm1337_vm6 = vcmask 785408  }
  0x3f   :  { %s12908_s20 = smov 96   ;;  %s12909_s9 = smov 98   ;;  %vm1558_vm7 = vcmask 777216   ;;  %vm1779_vm8 = vcmask 769024   ;;  %vm2000_vm9 = vcmask 760832   ;;  %vm2221_vm10 = vcmask 752640  }
  0x40   :  { %s12910_s6 = smov 95   ;;  %s12911_s21 = smov 92   ;;  %vm2442_vm11 = vcmask 523264   ;;  %vm2663_vm12 = vcmask 515072   ;;  %vm2884_vm13 = vcmask 506880   ;;  %vm3105_vm14 = vcmask 498688  }
  0x41   :  { %s12913_s2 = smov 86   ;;  %s12914_s25 = smov 93   ;;  %vm3326_vm15 = vcmask 490496  }
  0x42   :  { %287 = vrot.lane.b32.xlu1 %v13119_v3, %s12901_s8  ;;  %s12915_s3 = smov 80   ;;  %s12916_s26 = smov 74  }
  0x43   :  { %283 = vrot.lane.b32.xlu0 %v13124_v4, %s12901_s8  ;;  %s12917_s10 = smov 64   ;;  %s12918_s27 = smov 68  }
  0x44   :  { %272 = vrot.lane.b32.xlu2 %v13126_v5, %s12900_s24  ;;  %s12912_s24 = smov 94   ;;  %s12919_s28 = smov 63  }
  0x45   :  { %s12920_s29 = smov 62   ;;  %s12921_s12 = smov 61  }
  0x46   :  { %s12922_s4 = smov 50   ;;  %s12923_s5 = smov 60  }
  0x47   :  { %s12925_s30 = smov 32   ;;  %s12930_s11 = smov 29  }
  0x48   :  { %s12931_s13 = smov 20  }
  0x4a   :  { %291 = vrot.lane.b32.xlu1 %v13136_v6, %s12901_s8 }
  0x4b   :  { %285 = vrot.lane.b32.xlu0 %v13141_v7, %s12901_s8 }
  0x4c   :  { %293 = vrot.lane.b32.xlu2 %v13146_v8, %s12901_s8 }
  0x52   :  { %670 = vrot.lane.b32.xlu1 %v13141_v7, %s12902_s7 }
  0x53   :  { %668 = vrot.lane.b32.xlu0 %v13124_v4, %s12902_s7 }
  0x54   :  { %662 = vrot.lane.b32.xlu2 %v13099_v0, %s12903_s16 }
  0x5a   :  { %672 = vrot.lane.b32.xlu1 %v13119_v3, %s12902_s7 }
  0x5b   :  { %666 = vrot.lane.b32.xlu0 %v13104_v1, %s12902_s7 }
  0x5c   :  { %664 = vrot.lane.b32.xlu2 %v13126_v5, %s12903_s16 }
  0x62   :  { %678 = vrot.lane.b32.xlu1 %v13146_v8, %s12902_s7 }
  0x63   :  { %676 = vrot.lane.b32.xlu0 %v13136_v6, %s12902_s7 }
  0x64   :  { %674 = vrot.lane.b32.xlu2 %v13112_v2, %s12902_s7 }
  0x6a   :  { %890 = vrot.lane.b32.xlu1 %v13119_v3, %s12904_s18 }
  0x6b   :  { %888 = vrot.lane.b32.xlu0 %v13141_v7, %s12904_s18 }
  0x6c   :  { %880 = vrot.lane.b32.xlu2 %v13099_v0, %s12905_s15 }
  0x72   :  { %884 = vrot.lane.b32.xlu1 %v13104_v1, %s12904_s18 }
  0x73   :  { %886 = vrot.lane.b32.xlu0 %v13124_v4, %s12904_s18 }
  0x74   :  { %892 = vrot.lane.b32.xlu2 %v13112_v2, %s12904_s18 }
  0x7a   :  { %896 = vrot.lane.b32.xlu1 %v13146_v8, %s12904_s18 }
  0x7b   :  { %882 = vrot.lane.b32.xlu0 %v13126_v5, %s12905_s15 }
  0x7c   :  { %894 = vrot.lane.b32.xlu2 %v13136_v6, %s12904_s18 }
  0x82   :  { %1104 = vrot.lane.b32.xlu1 %v13124_v4, %s12906_s19 }
  0x83   :  { %1102 = vrot.lane.b32.xlu0 %v13104_v1, %s12906_s19 }
  0x84   :  { %1098 = vrot.lane.b32.xlu2 %v13099_v0, %s12907_s1 }
  0x8a   :  { %1110 = vrot.lane.b32.xlu1 %v13112_v2, %s12906_s19 }
  0x8b   :  { %1108 = vrot.lane.b32.xlu0 %v13119_v3, %s12906_s19 }
  0x8c   :  { %1100 = vrot.lane.b32.xlu2 %v13126_v5, %s12907_s1 }
  0x92   :  { %1112 = vrot.lane.b32.xlu1 %v13136_v6, %s12906_s19 }
  0x93   :  { %1106 = vrot.lane.b32.xlu0 %v13141_v7, %s12906_s19 }
  0x94   :  { %1321 = vrot.lane.b32.xlu2 %v13104_v1, %s12908_s20 }
  0x96   :  { %v290_v9 = vpop.permute.xlu2 %289 }
  0x9a   :  { %1316 = vrot.lane.b32.xlu1 %v13099_v0, %s12909_s9 }
  0x9b   :  { %1323 = vrot.lane.b32.xlu0 %v13124_v4, %s12908_s20 }
  0x9c   :  { %1114 = vrot.lane.b32.xlu2 %v13146_v8, %s12906_s19 }
  0x9e   :  { %v13228_v12 = vpop.permute.xlu2 %272 }
  0xa2   :  { %1318 = vrot.lane.b32.xlu1 %v13126_v5, %s12909_s9 }
  0xa3   :  { %1325 = vrot.lane.b32.xlu0 %v13141_v7, %s12908_s20 }
  0xa4   :  { %1329 = vrot.lane.b32.xlu2 %v13112_v2, %s12908_s20 }
  0xa6   :  { %v13253_v17 = vpop.permute.xlu2 %293 }
  0xaa   :  { %1327 = vrot.lane.b32.xlu1 %v13119_v3, %s12908_s20 }
  0xab   :  { %1331 = vrot.lane.b32.xlu0 %v13136_v6, %s12908_s20 }
  0xac   :  { %v13224_v10 = vpop.permute.xlu1 %270  ;;  %1333 = vrot.lane.b32.xlu2 %v13146_v8, %s12908_s20 }
  0xad   :  { %v282_v11 = vpop.permute.xlu0 %281 }
  0xae   :  { %v13305_v27 = vpop.permute.xlu2 %662 }
  0xb2   :  { %1546 = vrot.lane.b32.xlu1 %v13141_v7, %s12910_s6 }
  0xb3   :  { %1544 = vrot.lane.b32.xlu0 %v13124_v4, %s12910_s6 }
  0xb4   :  { %v288_v13 = vpop.permute.xlu1 %287  ;;  %1538 = vrot.lane.b32.xlu2 %v13099_v0, %s12911_s21 }
  0xb5   :  { %v284_v14 = vpop.permute.xlu0 %283  ;;  %v13238_v16 = vsel %vm295_vm0, %v288_v13, %v290_v9 }
  0xb6   :  { %v296_v15 = vsel %vm295_vm0, %v282_v11, %v284_v14  ;;  %11420 = vmatpush.msk.msra.mxu3 %vm307_vm1, %v13238_v16  ;;  %v13335_v32 = vpop.permute.xlu2 %664 }
  0xb7   :  { %11411 = vmatpush.msk.msra.mxu0 %vm307_vm1, %v296_v15  ;;  %11421 = vmatmul.msk.f32.vlgmr.msra.gmra.mxu3 %vm302_vm2, %v13224_v10 }
  0xb8   :  { %11412 = vmatmul.msk.f32.vlgmr.msra.gmra.mxu0 %vm302_vm2, %v13224_v10  ;;  %11432 = vmatpush.msk.msrb.mxu3 %vm307_vm1, %v13104_v1 }
  0xba   :  { %11444 = vmatpush.msk.msra.mxu3 %vm307_vm1, %v13112_v2  ;;  %1335 = vrot.lane.b32.xlu1 %v13289_v24, %s12908_s20 }
  0xbb   :  { %1542 = vrot.lane.b32.xlu0 %v13104_v1, %s12910_s6 }
  0xbc   :  { %v292_v18 = vpop.permute.xlu1 %291  ;;  %1548 = vrot.lane.b32.xlu2 %v13119_v3, %s12910_s6 }
  0xbd   :  { %v286_v19 = vpop.permute.xlu0 %285  ;;  %v13264_v22 = vsel %vm295_vm0, %v290_v9, %v292_v18  ;;  %v13272_v23 = vsel %vm295_vm0, %v292_v18, %v13253_v17 }
  0xbe   :  { %v13258_v20 = vsel %vm295_vm0, %v284_v14, %v286_v19  ;;  %v13261_v21 = vsel %vm295_vm0, %v286_v19, %v288_v13  ;;  %11423 = vmatpush.msk.msrb.mxu0 %vm307_vm1, %v13264_v22  ;;  %v675_v37 = vpop.permute.xlu2 %674 }
  0xbf   :  { %11414 = vmatpush.msk.msra.mxu1 %vm307_vm1, %v13258_v20  ;;  %11417 = vmatpush.msk.msra.mxu2 %vm307_vm1, %v13261_v21 }
  0xc0   :  { %11415 = vmatmul.msk.f32.vlgmr.msra.gmra.mxu1 %vm302_vm2, %v13224_v10  ;;  %11413 = vmatmul.msk.f32.gmra.mxu0 %vm302_vm2, %v13228_v12 }
  0xc1   :  { %11418 = vmatmul.msk.f32.vlgmr.msra.gmra.mxu2 %vm302_vm2, %v13224_v10  ;;  %11422 = vmatmul.msk.f32.gmra.mxu3 %vm302_vm2, %v13228_v12 }
  0xc2   :  { %11426 = vmatpush.msk.msrb.mxu1 %vm307_vm1, %v13272_v23  ;;  %11429 = vmatpush.msk.msrb.mxu2 %vm307_vm1, %v13253_v17 }
  0xc3   :  { %1540 = vrot.lane.b32.xlu0 %v13126_v5, %s12911_s21  ;;  %11435 = vmatpush.msk.msra.mxu0 %vm307_vm1, %v13124_v4 }
  0xc4   :  { %11438 = vmatpush.msk.msra.mxu1 %vm307_vm1, %v13141_v7  ;;  %11441 = vmatpush.msk.msra.mxu2 %vm307_vm1, %v13119_v3  ;;  %v671_v26 = vpop.permute.xlu1 %670 }
  0xc5   :  { %v669_v25 = vpop.permute.xlu0 %668  ;;  %1554 = vrot.lane.b32.xlu2 %v13146_v8, %s12910_s6  ;;  %1552 = vrot.lane.b32.xlu1 %v13136_v6, %s12910_s6 }
  0xc6   :  { %v13310_v28 = vsel %vm680_vm3, %v669_v25, %v671_v26  ;;  %v13395_v41 = vpop.permute.xlu2 %880 }
  0xc8   :  { %11416 = vmatmul.msk.f32.gmra.mxu1 %vm302_vm2, %v13228_v12  ;;  %11424 = vmatmul.msk.f32.vlgmr.msrb.gmra.mxu0 %vm302_vm2, %v13224_v10 }
  0xc9   :  { %11419 = vmatmul.msk.f32.gmra.mxu2 %vm302_vm2, %v13228_v12  ;;  %11433 = vmatmul.msk.f32.vlgmr.msrb.gmra.mxu3 %vm302_vm2, %v13099_v0 }
  0xca   :  { %11447 = vmatpush.msk.msrb.mxu0 %vm307_vm1, %v13136_v6  ;;  %11456 = vmatpush.msk.msrb.mxu3 %vm307_vm1, %v13310_v28 }
  0xcb   :  { %1550 = vrot.lane.b32.xlu0 %v13112_v2, %s12910_s6 }
  0xcc   :  { %v673_v30 = vpop.permute.xlu1 %672 }
  0xcd   :  { %v667_v29 = vpop.permute.xlu0 %666  ;;  %1767 = vrot.lane.b32.xlu2 %v13141_v7, %s12912_s24  ;;  %1556 = vrot.lane.b32.xlu1 %v13289_v24, %s12910_s6  ;;  %v13351_v35 = vsel %vm680_vm3, %v671_v26, %v673_v30  ;;  %v13376_v39 = vsel %vm680_vm3, %v673_v30, %v675_v37  ;;  %s12926_s6 = smov 38  }
  0xce   :  { %v681_v31 = vsel %vm680_vm3, %v667_v29, %v669_v25  ;;  %v893_v45 = vpop.permute.xlu2 %892 }
  0xd0   :  { %11427 = vmatmul.msk.f32.vlgmr.msrb.gmra.mxu1 %vm302_vm2, %v13224_v10  ;;  %11425 = vmatmul.msk.f32.gmra.mxu0 %vm302_vm2, %v13228_v12 }
  0xd1   :  { %11430 = vmatmul.msk.f32.vlgmr.msrb.gmra.mxu2 %vm302_vm2, %v13224_v10  ;;  %11434 = vmatmul.msk.f32.gmra.mxu3 %vm302_vm2, %v13126_v5 }
  0xd2   :  { %11450 = vmatpush.msk.msrb.mxu1 %vm307_vm1, %v13146_v8  ;;  %11453 = vmatpush.msk.msrb.mxu2 %vm307_vm1, %v681_v31 }
  0xd3   :  { %1769 = vrot.lane.b32.xlu0 %v13119_v3, %s12912_s24 }
  0xd4   :  { %v13344_v34 = vpop.permute.xlu1 %678 }
  0xd5   :  { %v677_v33 = vpop.permute.xlu0 %676  ;;  %1765 = vrot.lane.b32.xlu2 %v13124_v4, %s12912_s24  ;;  %1759 = vrot.lane.b32.xlu1 %v13099_v0, %s12913_s2 }
  0xd6   :  { %v13357_v36 = vsel %vm680_vm3, %v677_v33, %v13344_v34  ;;  %v13381_v40 = vsel %vm680_vm3, %v675_v37, %v677_v33  ;;  %v895_v51 = vpop.permute.xlu2 %894 }
  0xd7   :  { %v13471_v57 = vsel %vm898_vm4, %v893_v45, %v895_v51 }
  0xd8   :  { %11428 = vmatmul.msk.f32.gmra.mxu1 %vm302_vm2, %v13228_v12  ;;  %11436 = vmatmul.msk.f32.vlgmr.msra.gmra.mxu0 %vm302_vm2, %v13099_v0  ;;  %17943 = vst [vmem:[#allocation36_spill] sm:$0xff] %v13471_v57 }
  0xd9   :  { %11431 = vmatmul.msk.f32.gmra.mxu2 %vm302_vm2, %v13228_v12  ;;  %11445 = vmatmul.msk.f32.vlgmr.msra.gmra.mxu3 %vm302_vm2, %v13099_v0 }
  0xda   :  { %11459 = vmatpush.msk.msra.mxu0 %vm307_vm1, %v13351_v35  ;;  %11468 = vmatpush.msk.msra.mxu3 %vm307_vm1, %v13357_v36 }
  0xdb   :  { %1763 = vrot.lane.b32.xlu0 %v13104_v1, %s12912_s24 }
  0xdc   :  { %v891_v42 = vpop.permute.xlu1 %890 }
  0xdd   :  { %v889_v38 = vpop.permute.xlu0 %888  ;;  %1761 = vrot.lane.b32.xlu2 %v13126_v5, %s12913_s2  ;;  %1771 = vrot.lane.b32.xlu1 %v13112_v2, %s12912_s24  ;;  %v13448_v53 = vsel %vm898_vm4, %v891_v42, %v893_v45 }
  0xde   :  { %v13404_v44 = vsel %vm898_vm4, %v889_v38, %v891_v42  ;;  %17942 = vst [vmem:[#allocation35_spill] sm:$0xff] %v13448_v53  ;;  %v13466_v56 = vpop.permute.xlu2 %1098 }
  0xdf   :  { %17939 = vst [vmem:[#allocation32_spill] sm:$0xff] %v13404_v44 }
  0xe0   :  { %11439 = vmatmul.msk.f32.vlgmr.msra.gmra.mxu1 %vm302_vm2, %v13099_v0  ;;  %11437 = vmatmul.msk.f32.gmra.mxu0 %vm302_vm2, %v13126_v5 }
  0xe1   :  { %11442 = vmatmul.msk.f32.vlgmr.msra.gmra.mxu2 %vm302_vm2, %v13099_v0  ;;  %11446 = vmatmul.msk.f32.gmra.mxu3 %vm302_vm2, %v13126_v5 }
  0xe2   :  { %11462 = vmatpush.msk.msra.mxu1 %vm307_vm1, %v13376_v39  ;;  %11465 = vmatpush.msk.msra.mxu2 %vm307_vm1, %v13381_v40 }
  0xe3   :  { %1775 = vrot.lane.b32.xlu0 %v13146_v8, %s12912_s24 }
  0xe4   :  { %v885_v46 = vpop.permute.xlu1 %884 }
  0xe5   :  { %v887_v43 = vpop.permute.xlu0 %886  ;;  %1773 = vrot.lane.b32.xlu2 %v13136_v6, %s12912_s24  ;;  %1777 = vrot.lane.b32.xlu1 %v13289_v24, %s12912_s24  ;;  %s12924_s24 = smov 44  }
  0xe6   :  { %v899_v48 = vsel %vm898_vm4, %v885_v46, %v887_v43  ;;  %v13426_v49 = vsel %vm898_vm4, %v887_v43, %v889_v38  ;;  %v13498_v62 = vpop.permute.xlu2 %1100 }
  0xe7   :  { %17940 = vst [vmem:[#allocation33_spill] sm:$0xff] %v13426_v49 }
  0xe8   :  { %11440 = vmatmul.msk.f32.gmra.mxu1 %vm302_vm2, %v13126_v5  ;;  %11448 = vmatmul.msk.f32.vlgmr.msrb.gmra.mxu0 %vm302_vm2, %v13099_v0 }
  0xe9   :  { %11443 = vmatmul.msk.f32.gmra.mxu2 %vm302_vm2, %v13126_v5  ;;  %11457 = vmatmul.msk.f32.vlgmr.msrb.gmra.mxu3 %vm302_vm2, %v13305_v27 }
  0xea   :  { %11471 = vmatpush.msk.msrb.mxu0 %vm307_vm1, %v13344_v34  ;;  %11480 = vmatpush.msk.msrb.mxu3 %vm307_vm1, %v13404_v44 }
  0xeb   :  { %1984 = vrot.lane.b32.xlu0 %v13104_v1, %s12914_s25 }
  0xec   :  { %v13441_v50 = vpop.permute.xlu1 %896 }
  0xed   :  { %v13418_v47 = vpop.permute.xlu0 %882  ;;  %1980 = vrot.lane.b32.xlu2 %v13099_v0, %s12915_s3  ;;  %17941 = vst [vmem:[#allocation34_spill] sm:$0xff] %v13441_v50  ;;  %1986 = vrot.lane.b32.xlu1 %v13124_v4, %s12914_s25  ;;  %v13477_v58 = vsel %vm898_vm4, %v895_v51, %v13441_v50 }
  0xee   :  { %17944 = vst [vmem:[#allocation37_spill] sm:$0xff] %v13477_v58  ;;  %v1322_v13 = vpop.permute.xlu2 %1321 }
  0xf0   :  { %11451 = vmatmul.msk.f32.vlgmr.msrb.gmra.mxu1 %vm302_vm2, %v13099_v0  ;;  %11449 = vmatmul.msk.f32.gmra.mxu0 %vm302_vm2, %v13126_v5 }
  0xf1   :  { %11454 = vmatmul.msk.f32.vlgmr.msrb.gmra.mxu2 %vm302_vm2, %v13305_v27  ;;  %11458 = vmatmul.msk.f32.gmra.mxu3 %vm302_vm2, %v13335_v32 }
  0xf2   :  { %11474 = vmatpush.msk.msrb.mxu1 %vm307_vm1, %v899_v48  ;;  %11477 = vmatpush.msk.msrb.mxu2 %vm307_vm1, %v13426_v49 }
  0xf3   :  { %1990 = vrot.lane.b32.xlu0 %v13119_v3, %s12914_s25 }
  0xf4   :  { %v1105_v54 = vpop.permute.xlu1 %1104 }
  0xf5   :  { %v1103_v52 = vpop.permute.xlu0 %1102  ;;  %1982 = vrot.lane.b32.xlu2 %v13126_v5, %s12915_s3  ;;  %1992 = vrot.lane.b32.xlu1 %v13112_v2, %s12914_s25 }
  0xf6   :  { %v1117_v61 = vsel %vm1116_vm5, %v1103_v52, %v1105_v54  ;;  %v13559_v25 = vpop.permute.xlu2 %1114 }
  0xf7   :  { %17949 = vst [vmem:[#allocation42_spill] sm:$0xff] %v13559_v25 }
  0xf8   :  { %11452 = vmatmul.msk.f32.gmra.mxu1 %vm302_vm2, %v13126_v5  ;;  %11460 = vmatmul.msk.f32.vlgmr.msra.gmra.mxu0 %vm302_vm2, %v13305_v27 }
  0xf9   :  { %11455 = vmatmul.msk.f32.gmra.mxu2 %vm302_vm2, %v13335_v32  ;;  %11469 = vmatmul.msk.f32.vlgmr.msra.gmra.mxu3 %vm302_vm2, %v13305_v27 }
  0xfa   :  { %11483 = vmatpush.msk.msra.mxu0 %vm307_vm1, %v13448_v53  ;;  %11492 = vmatpush.msk.msra.mxu3 %vm307_vm1, %v13441_v50 }
  0xfb   :  { %1988 = vrot.lane.b32.xlu0 %v13141_v7, %s12914_s25 }
  0xfc   :  { %v1111_v59 = vpop.permute.xlu1 %1110 }
  0xfd   :  { %v1109_v55 = vpop.permute.xlu0 %1108  ;;  %2205 = vrot.lane.b32.xlu2 %v13104_v1, %s12911_s21  ;;  %1994 = vrot.lane.b32.xlu1 %v13136_v6, %s12914_s25 }
  0xfe   :  { %v13501_v63 = vsel %vm1116_vm5, %v1109_v55, %v1111_v59  ;;  %v1330_v31 = vpop.permute.xlu2 %1329 }
  0xff   :  { %17945 = vst [vmem:[#allocation38_spill] sm:$0xff] %v13501_v63 }
 0x100   :  { %11463 = vmatmul.msk.f32.vlgmr.msra.gmra.mxu1 %vm302_vm2, %v13305_v27  ;;  %11461 = vmatmul.msk.f32.gmra.mxu0 %vm302_vm2, %v13335_v32 }
 0x101   :  { %11466 = vmatmul.msk.f32.vlgmr.msra.gmra.mxu2 %vm302_vm2, %v13305_v27  ;;  %11470 = vmatmul.msk.f32.gmra.mxu3 %vm302_vm2, %v13335_v32 }
 0x102   :  { %11486 = vmatpush.msk.msra.mxu1 %vm307_vm1, %v13471_v57  ;;  %11489 = vmatpush.msk.msra.mxu2 %vm307_vm1, %v13477_v58 }
 0x103   :  { %2207 = vrot.lane.b32.xlu0 %v13124_v4, %s12911_s21 }
 0x104   :  { %v1113_v9 = vpop.permute.xlu1 %1112 }
 0x105   :  { %v1107_v60 = vpop.permute.xlu0 %1106  ;;  %1996 = vrot.lane.b32.xlu2 %v13146_v8, %s12914_s25  ;;  %2201 = vrot.lane.b32.xlu1 %v13099_v0, %s12916_s26  ;;  %v13543_v18 = vsel %vm1116_vm5, %v1111_v59, %v1113_v9  ;;  %v13569_v29 = vsel %vm1116_vm5, %v1113_v9, %v13559_v25 }
 0x106   :  { %v13517_v11 = vsel %vm1116_vm5, %v1105_v54, %v1107_v60  ;;  %v13520_v12 = vsel %vm1116_vm5, %v1107_v60, %v1109_v55  ;;  %17948 = vst [vmem:[#allocation41_spill] sm:$0xff] %v13543_v18 }
 0x107   :  { %17946 = vst [vmem:[#allocation39_spill] sm:$0xff] %v13517_v11 }
 0x108   :  { %11464 = vmatmul.msk.f32.gmra.mxu1 %vm302_vm2, %v13335_v32  ;;  %11472 = vmatmul.msk.f32.vlgmr.msrb.gmra.mxu0 %vm302_vm2, %v13305_v27  ;;  %17947 = vst [vmem:[#allocation40_spill] sm:$0xff] %v13520_v12 }
 0x109   :  { %11467 = vmatmul.msk.f32.gmra.mxu2 %vm302_vm2, %v13335_v32  ;;  %11481 = vmatmul.msk.f32.vlgmr.msrb.gmra.mxu3 %vm302_vm2, %v13395_v41  ;;  %17950 = vst [vmem:[#allocation43_spill] sm:$0xff] %v13569_v29 }
 0x10a   :  { %11495 = vmatpush.msk.msrb.mxu0 %vm307_vm1, %v1117_v61  ;;  %11504 = vmatpush.msk.msrb.mxu3 %vm307_vm1, %v13501_v63 }
 0x10b   :  { %1998 = vrot.lane.b32.xlu0 %v13289_v24, %s12914_s25  ;;  %s12932_s25 = smov 28  }
 0x10c   :  { %v13536_v14 = vpop.permute.xlu1 %1316 }
 0x10d   :  { %v1324_v10 = vpop.permute.xlu0 %1323  ;;  %2203 = vrot.lane.b32.xlu2 %v13126_v5, %s12916_s26  ;;  %2209 = vrot.lane.b32.xlu1 %v13141_v7, %s12911_s21  ;;  %s12933_s26 = smov 14  }
 0x10e   :  { %v1338_v19 = vsel %vm1337_vm6, %v1322_v13, %v1324_v10 }
 0x110   :  { %11475 = vmatmul.msk.f32.vlgmr.msrb.gmra.mxu1 %vm302_vm2, %v13395_v41  ;;  %11473 = vmatmul.msk.f32.gmra.mxu0 %vm302_vm2, %v13335_v32 }
 0x111   :  { %11478 = vmatmul.msk.f32.vlgmr.msrb.gmra.mxu2 %vm302_vm2, %v13395_v41  ;;  %11482 = vmatmul.msk.f32.gmra.mxu3 %vm302_vm2, %v13418_v47 }
 0x112   :  { %11498 = vmatpush.msk.msrb.mxu1 %vm307_vm1, %v13517_v11  ;;  %11501 = vmatpush.msk.msrb.mxu2 %vm307_vm1, %v13520_v12 }
 0x113   :  { %2213 = vrot.lane.b32.xlu0 %v13112_v2, %s12911_s21 }
 0x114   :  { %v13563_v27 = vpop.permute.xlu1 %1318 }
 0x115   :  { %v1326_v15 = vpop.permute.xlu0 %1325  ;;  %2211 = vrot.lane.b32.xlu2 %v13119_v3, %s12911_s21  ;;  %2215 = vrot.lane.b32.xlu1 %v13136_v6, %s12911_s21 }
 0x116   :  { %v1339_v32 = vsel %vm1337_vm6, %v1324_v10, %v1326_v15 }
 0x118   :  { %11476 = vmatmul.msk.f32.gmra.mxu1 %vm302_vm2, %v13418_v47  ;;  %11484 = vmatmul.msk.f32.vlgmr.msra.gmra.mxu0 %vm302_vm2, %v13395_v41 }
 0x119   :  { %11479 = vmatmul.msk.f32.gmra.mxu2 %vm302_vm2, %v13418_v47  ;;  %11493 = vmatmul.msk.f32.vlgmr.msra.gmra.mxu3 %vm302_vm2, %v13395_v41 }
 0x11a   :  { %11507 = vmatpush.msk.msra.mxu0 %vm307_vm1, %v13543_v18  ;;  %11516 = vmatpush.msk.msra.mxu3 %vm307_vm1, %v1338_v19 }
 0x11b   :  { %2217 = vrot.lane.b32.xlu0 %v13146_v8, %s12911_s21 }
 0x11c   :  { %v1328_v37 = vpop.permute.xlu1 %1327 }
 0x11d   :  { %v1332_v26 = vpop.permute.xlu0 %1331  ;;  %2430 = vrot.lane.b32.xlu2 %v13141_v7, %s12917_s10  ;;  %2428 = vrot.lane.b32.xlu1 %v13124_v4, %s12917_s10  ;;  %v1340_v42 = vsel %vm1337_vm6, %v1326_v15, %v1328_v37  ;;  %v1341_v43 = vsel %vm1337_vm6, %v1328_v37, %v1330_v31 }
 0x11e   :  { %v1342_v33 = vsel %vm1337_vm6, %v1330_v31, %v1332_v26 }
 0x120   :  { %11487 = vmatmul.msk.f32.vlgmr.msra.gmra.mxu1 %vm302_vm2, %v13395_v41  ;;  %11485 = vmatmul.msk.f32.gmra.mxu0 %vm302_vm2, %v13418_v47 }
 0x121   :  { %11490 = vmatmul.msk.f32.vlgmr.msra.gmra.mxu2 %vm302_vm2, %v13395_v41  ;;  %11494 = vmatmul.msk.f32.gmra.mxu3 %vm302_vm2, %v13418_v47  ;;  %v1334_v41 = vpop.permute.xlu2 %1333 }
 0x122   :  { %11510 = vmatpush.msk.msra.mxu1 %vm307_vm1, %v13569_v29  ;;  %11513 = vmatpush.msk.msra.mxu2 %vm307_vm1, %v13559_v25  ;;  %v1343_v51 = vsel %vm1337_vm6, %v1332_v26, %v1334_v41 }
 0x123   :  { %2422 = vrot.lane.b32.xlu0 %v13099_v0, %s12918_s27 }
 0x124   :  { %v1547_v45 = vpop.permute.xlu1 %1546 }
 0x125   :  { %v1545_v30 = vpop.permute.xlu0 %1544  ;;  %2219 = vrot.lane.b32.xlu2 %v13289_v24, %s12911_s21  ;;  %2426 = vrot.lane.b32.xlu1 %v13104_v1, %s12917_s10 }
 0x126   :  { %v1560_v52 = vsel %vm1558_vm7, %v1545_v30, %v1547_v45 }
 0x128   :  { %11488 = vmatmul.msk.f32.gmra.mxu1 %vm302_vm2, %v13418_v47  ;;  %11496 = vmatmul.msk.f32.vlgmr.msrb.gmra.mxu0 %vm302_vm2, %v13466_v56 }
 0x129   :  { %11491 = vmatmul.msk.f32.gmra.mxu2 %vm302_vm2, %v13418_v47  ;;  %11505 = vmatmul.msk.f32.vlgmr.msrb.gmra.mxu3 %vm302_vm2, %v13466_v56  ;;  %v13625_v48 = vpop.permute.xlu2 %1538 }
 0x12a   :  { %11519 = vmatpush.msk.msrb.mxu0 %vm307_vm1, %v1339_v32  ;;  %11528 = vmatpush.msk.msrb.mxu3 %vm307_vm1, %v1342_v33 }
 0x12b   :  { %2432 = vrot.lane.b32.xlu0 %v13119_v3, %s12917_s10 }
 0x12c   :  { %v1336_v55 = vpop.permute.xlu1 %1335 }
 0x12d   :  { %v1543_v38 = vpop.permute.xlu0 %1542  ;;  %2436 = vrot.lane.b32.xlu2 %v13136_v6, %s12917_s10  ;;  %2424 = vrot.lane.b32.xlu1 %v13126_v5, %s12918_s27  ;;  %v1344_v10 = vsel %vm1337_vm6, %v1334_v41, %v1336_v55 }
 0x12e   :  { %v1559_v13 = vsel %vm1558_vm7, %v1543_v38, %v1545_v30 }
 0x130   :  { %11499 = vmatmul.msk.f32.vlgmr.msrb.gmra.mxu1 %vm302_vm2, %v13466_v56  ;;  %11497 = vmatmul.msk.f32.gmra.mxu0 %vm302_vm2, %v13498_v62 }
 0x131   :  { %11502 = vmatmul.msk.f32.vlgmr.msrb.gmra.mxu2 %vm302_vm2, %v13466_v56  ;;  %11506 = vmatmul.msk.f32.gmra.mxu3 %vm302_vm2, %v13498_v62  ;;  %v1549_v9 = vpop.permute.xlu2 %1548 }
 0x132   :  { %11522 = vmatpush.msk.msrb.mxu1 %vm307_vm1, %v1340_v42  ;;  %11525 = vmatpush.msk.msrb.mxu2 %vm307_vm1, %v1341_v43  ;;  %v1561_v31 = vsel %vm1558_vm7, %v1547_v45, %v1549_v9 }
 0x133   :  { %2438 = vrot.lane.b32.xlu0 %v13146_v8, %s12917_s10 }
 0x135   :  { %v339_v46 = vpop.f32.mrf.mxu0  ;;  %v13621_v47 = vpop.permute.xlu0 %1540  ;;  %2440 = vrot.lane.b32.xlu2 %v13289_v24, %s12917_s10  ;;  %2434 = vrot.lane.b32.xlu1 %v13112_v2, %s12917_s10 }
 0x137   :  { %v1553_v33 = vpop.permute.xlu1 %1552 }
 0x138   :  { %11500 = vmatmul.msk.f32.gmra.mxu1 %vm302_vm2, %v13498_v62  ;;  %11508 = vmatmul.msk.f32.vlgmr.msra.gmra.mxu0 %vm302_vm2, %v13466_v56 }
 0x139   :  { %11503 = vmatmul.msk.f32.gmra.mxu2 %vm302_vm2, %v13498_v62  ;;  %11517 = vmatmul.msk.f32.vlgmr.msra.gmra.mxu3 %vm302_vm2, %v13536_v14  ;;  %v1555_v32 = vpop.permute.xlu2 %1554 }
 0x13a   :  { %11531 = vmatpush.msk.msra.mxu0 %vm307_vm1, %v1343_v51  ;;  %v13640_v54 = vpop.f32.mrf.mxu3  ;;  %11540 = vmatpush.msk.msra.mxu3 %vm307_vm1, %v1560_v52  ;;  %v1564_v37 = vsel %vm1558_vm7, %v1553_v33, %v1555_v32 }
 0x13b   :  { %2651 = vrot.lane.b32.xlu0 %v13141_v7, %s12919_s28 }
 0x13d   :  { %v13645_v59 = vpop.f32.mrf.mxu1  ;;  %v1551_v60 = vpop.permute.xlu0 %1550  ;;  %2643 = vrot.lane.b32.xlu2 %v13099_v0, %s12920_s29  ;;  %2653 = vrot.lane.b32.xlu1 %v13119_v3, %s12919_s28 }
 0x13e   :  { %v342_v61 = vpop.f32.mrf.mxu0  ;;  %v1562_v51 = vsel %vm1558_vm7, %v1549_v9, %v1551_v60 }
 0x13f   :  { %v1557_v55 = vpop.permute.xlu1 %1556 }
 0x140   :  { %11511 = vmatmul.msk.f32.vlgmr.msra.gmra.mxu1 %vm302_vm2, %v13466_v56  ;;  %11509 = vmatmul.msk.f32.gmra.mxu0 %vm302_vm2, %v13498_v62 }
 0x141   :  { %11514 = vmatmul.msk.f32.vlgmr.msra.gmra.mxu2 %vm302_vm2, %v13466_v56  ;;  %11518 = vmatmul.msk.f32.gmra.mxu3 %vm302_vm2, %v13563_v27  ;;  %v1768_v52 = vpop.permute.xlu2 %1767 }
 0x142   :  { %11534 = vmatpush.msk.msra.mxu1 %vm307_vm1, %v1344_v10  ;;  %11537 = vmatpush.msk.msra.mxu2 %vm307_vm1, %v1559_v13  ;;  %v1563_v10 = vsel %vm1558_vm7, %v1551_v60, %v1553_v33 }
 0x143   :  { %2649 = vrot.lane.b32.xlu0 %v13124_v4, %s12919_s28 }
 0x144   :  { %v13665_v15 = vpop.f32.mrf.mxu2  ;;  %v13667_v19 = vpop.f32.mrf.mxu3 }
 0x145   :  { %v13669_v26 = vpop.f32.mrf.mxu1  ;;  %v13673_v30 = vpop.permute.xlu0 %1769  ;;  %2655 = vrot.lane.b32.xlu2 %v13112_v2, %s12919_s28  ;;  %2647 = vrot.lane.b32.xlu1 %v13104_v1, %s12919_s28 }
 0x146   :  { %v431_v56 = vpop.f32.mrf.mxu0 }
 0x148   :  { %11512 = vmatmul.msk.f32.gmra.mxu1 %vm302_vm2, %v13498_v62  ;;  %11520 = vmatmul.msk.f32.vlgmr.msrb.gmra.mxu0 %vm302_vm2, %v13536_v14 }
 0x149   :  { %11515 = vmatmul.msk.f32.gmra.mxu2 %vm302_vm2, %v13498_v62  ;;  %11529 = vmatmul.msk.f32.vlgmr.msrb.gmra.mxu3 %vm302_vm2, %v13536_v14 }
 0x14a   :  { %11543 = vmatpush.msk.msrb.mxu0 %vm307_vm1, %v1561_v31  ;;  %11552 = vmatpush.msk.msrb.mxu3 %vm307_vm1, %v1564_v37  ;;  %v1565_v37 = vsel %vm1558_vm7, %v1555_v32, %v1557_v55  ;;  %vm3547_vm7 = vcmask 261120  }
 0x14b   :  { %2645 = vrot.lane.b32.xlu0 %v13126_v5, %s12920_s29 }
 0x14c   :  { %v13691_v38 = vpop.f32.mrf.mxu2  ;;  %v518_v41 = vpop.f32.mrf.mxu3 }
 0x14d   :  { %v13693_v42 = vpop.f32.mrf.mxu1  ;;  %v13697_v62 = vadd.f32 %v518_v41, %v339_v46  ;;  %v1764_v45 = vpop.permute.xlu0 %1763  ;;  %2661 = vrot.lane.b32.xlu2 %v13289_v24, %s12919_s28  ;;  %2659 = vrot.lane.b32.xlu1 %v13146_v8, %s12919_s28 }
 0x14e   :  { %v434_v43 = vpop.f32.mrf.mxu0  ;;  %v1766_v41 = vpop.permute.xlu2 %1765 }
 0x14f   :  { %v1780_v12 = vsel %vm1779_vm8, %v1764_v45, %v1766_v41 }
 0x150   :  { %11523 = vmatmul.msk.f32.vlgmr.msrb.gmra.mxu1 %vm302_vm2, %v13536_v14  ;;  %11521 = vmatmul.msk.f32.gmra.mxu0 %vm302_vm2, %v13563_v27 }
 0x151   :  { %11526 = vmatmul.msk.f32.vlgmr.msrb.gmra.mxu2 %vm302_vm2, %v13536_v14  ;;  %11530 = vmatmul.msk.f32.gmra.mxu3 %vm302_vm2, %v13563_v27 }
 0x152   :  { %11546 = vmatpush.msk.msrb.mxu1 %vm307_vm1, %v1562_v51  ;;  %11549 = vmatpush.msk.msrb.mxu2 %vm307_vm1, %v1563_v10  ;;  %v13728_v51 = vpop.permute.xlu1 %1759  ;;  %v1782_v10 = vsel %vm1779_vm8, %v1768_v52, %v13673_v30 }
 0x153   :  { %2657 = vrot.lane.b32.xlu0 %v13136_v6, %s12919_s28  ;;  %s12934_s28 = smov 2  }
 0x154   :  { %v13715_v46 = vpop.f32.mrf.mxu2  ;;  %v521_v9 = vpop.f32.mrf.mxu3 }
 0x155   :  { %v13717_v60 = vpop.f32.mrf.mxu1  ;;  %v13721_v13 = vadd.f32 %v521_v9, %v342_v61  ;;  %v13723_v33 = vpop.permute.xlu0 %1775  ;;  %2870 = vrot.lane.b32.xlu2 %v13124_v4, %s12920_s29  ;;  %2868 = vrot.lane.b32.xlu1 %v13104_v1, %s12920_s29 }
 0x156   :  { %v541_v31 = vpop.f32.mrf.mxu0  ;;  %v13757_v63 = vpop.permute.xlu2 %1761 }
 0x158   :  { %11524 = vmatmul.msk.f32.gmra.mxu1 %vm302_vm2, %v13563_v27  ;;  %11532 = vmatmul.msk.f32.vlgmr.msra.gmra.mxu0 %vm302_vm2, %v13536_v14 }
 0x159   :  { %11527 = vmatmul.msk.f32.gmra.mxu2 %vm302_vm2, %v13563_v27  ;;  %11541 = vmatmul.msk.f32.vlgmr.msra.gmra.mxu3 %vm302_vm2, %v13625_v48 }
 0x15a   :  { %11555 = vmatpush.msk.msra.mxu0 %vm307_vm1, %v1565_v37  ;;  %11564 = vmatpush.msk.msra.mxu3 %vm307_vm1, %v1782_v10  ;;  %v1781_v37 = vsel %vm1779_vm8, %v1766_v41, %v1768_v52  ;;  %v1772_v10 = vpop.permute.xlu1 %1771 }
 0x15b   :  { %2864 = vrot.lane.b32.xlu0 %v13099_v0, %s12894_s23 }
 0x15c   :  { %v13744_v61 = vpop.f32.mrf.mxu2  ;;  %v610_v32 = vpop.f32.mrf.mxu3 }
 0x15d   :  { %v13746_v55 = vpop.f32.mrf.mxu1  ;;  %v13750_v9 = vadd.f32 %v610_v32, %v431_v56  ;;  %v13752_v29 = vpop.permute.xlu0 %1984  ;;  %2876 = vrot.lane.b32.xlu2 %v13112_v2, %s12920_s29  ;;  %2874 = vrot.lane.b32.xlu1 %v13119_v3, %s12920_s29 }
 0x15e   :  { %v544_v25 = vpop.f32.mrf.mxu0 }
 0x160   :  { %11535 = vmatmul.msk.f32.vlgmr.msra.gmra.mxu1 %vm302_vm2, %v13536_v14  ;;  %11533 = vmatmul.msk.f32.gmra.mxu0 %vm302_vm2, %v13563_v27 }
 0x161   :  { %11538 = vmatmul.msk.f32.vlgmr.msra.gmra.mxu2 %vm302_vm2, %v13625_v48  ;;  %11542 = vmatmul.msk.f32.gmra.mxu3 %vm302_vm2, %v13621_v47 }
 0x162   :  { %11561 = vmatpush.msk.msra.mxu2 %vm307_vm1, %v1781_v37  ;;  %11558 = vmatpush.msk.msra.mxu1 %vm307_vm1, %v1780_v12  ;;  %v1783_v12 = vsel %vm1779_vm8, %v13673_v30, %v1772_v10  ;;  %v1774_v37 = vpop.permute.xlu2 %1773 }
 0x163   :  { %2866 = vrot.lane.b32.xlu0 %v13126_v5, %s12894_s23 }
 0x164   :  { %v587_v56 = vpop.f32.mrf.mxu2  ;;  %v613_v45 = vpop.f32.mrf.mxu3 }
 0x165   :  { %v13773_v14 = vadd.f32 %v587_v56, %v13640_v54  ;;  %v13775_v52 = vpop.f32.mrf.mxu1  ;;  %v13779_v41 = vadd.f32 %v613_v45, %v434_v43  ;;  %v13781_v18 = vpop.permute.xlu0 %1990  ;;  %2878 = vrot.lane.b32.xlu2 %v13136_v6, %s12920_s29  ;;  %2872 = vrot.lane.b32.xlu1 %v13141_v7, %s12920_s29 }
 0x166   :  { %v633_v32 = vpop.f32.mrf.mxu0  ;;  %v1778_v54 = vpop.permute.xlu1 %1777 }
 0x167   :  { %v1786_v56 = vsel %vm1779_vm8, %v13723_v33, %v1778_v54 }
 0x168   :  { %11536 = vmatmul.msk.f32.gmra.mxu1 %vm302_vm2, %v13563_v27  ;;  %11544 = vmatmul.msk.f32.vlgmr.msrb.gmra.mxu0 %vm302_vm2, %v13625_v48  ;;  %v542_v27 = vadd.f32 %v541_v31, %v13645_v59  ;;  %v1785_v31 = vsel %vm1779_vm8, %v1774_v37, %v13723_v33 }
 0x169   :  { %11539 = vmatmul.msk.f32.gmra.mxu2 %vm302_vm2, %v13621_v47  ;;  %11553 = vmatmul.msk.f32.vlgmr.msrb.gmra.mxu3 %vm302_vm2, %v13625_v48 }
 0x16a   :  { %11567 = vmatpush.msk.msrb.mxu0 %vm307_vm1, %v1783_v12  ;;  %11576 = vmatpush.msk.msrb.mxu3 %vm307_vm1, %v1786_v56  ;;  %v13814_v59 = vpop.permute.xlu2 %1980 }
 0x16b   :  { %3089 = vrot.lane.b32.xlu0 %v13104_v1, %s12921_s12  ;;  %v1784_v1 = vsel %vm1779_vm8, %v1772_v10, %v1774_v37  ;;  %vm3768_vm8 = vcmask 252928  }
 0x16c   :  { %v590_v30 = vpop.f32.mrf.mxu2  ;;  %v745_v45 = vpop.f32.mrf.mxu3 }
 0x16d   :  { %v13803_v43 = vadd.f32 %v590_v30, %v13667_v19  ;;  %v13805_v54 = vpop.f32.mrf.mxu1  ;;  %v13809_v11 = vadd.f32 %v745_v45, %v542_v27  ;;  %v1989_v58 = vpop.permute.xlu0 %1988  ;;  %3085 = vrot.lane.b32.xlu2 %v13099_v0, %s12922_s4  ;;  %v545_v0 = vadd.f32 %v544_v25, %v13669_v26  ;;  %3091 = vrot.lane.b32.xlu1 %v13124_v4, %s12921_s12 }
 0x16e   :  { %v636_v12 = vpop.f32.mrf.mxu0  ;;  %v1987_v19 = vpop.permute.xlu1 %1986 }
 0x170   :  { %11547 = vmatmul.msk.f32.vlgmr.msrb.gmra.mxu1 %vm302_vm2, %v13625_v48  ;;  %11545 = vmatmul.msk.f32.gmra.mxu0 %vm302_vm2, %v13621_v47 }
 0x171   :  { %11550 = vmatmul.msk.f32.vlgmr.msrb.gmra.mxu2 %vm302_vm2, %v13625_v48  ;;  %11554 = vmatmul.msk.f32.gmra.mxu3 %vm302_vm2, %v13621_v47 }
 0x172   :  { %11570 = vmatpush.msk.msrb.mxu1 %vm307_vm1, %v1784_v1  ;;  %11573 = vmatpush.msk.msrb.mxu2 %vm307_vm1, %v1785_v31  ;;  %v13846_v25 = vpop.permute.xlu2 %1982 }
 0x173   :  { %2880 = vrot.lane.b32.xlu0 %v13146_v8, %s12920_s29  ;;  %v2001_v8 = vsel %vm2000_vm9, %v13752_v29, %v1987_v19  ;;  %v634_v29 = vadd.f32 %v633_v32, %v13693_v42 }
 0x174   :  { %v722_v33 = vpop.f32.mrf.mxu2  ;;  %v748_v37 = vpop.f32.mrf.mxu3 }
 0x175   :  { %v13832_v10 = vadd.f32 %v722_v33, %v13697_v62  ;;  %v13834_v56 = vpop.f32.mrf.mxu1  ;;  %v13838_v27 = vadd.f32 %v748_v37, %v545_v0  ;;  %v13840_v45 = vpop.permute.xlu0 %2207  ;;  %3093 = vrot.lane.b32.xlu2 %v13141_v7, %s12921_s12  ;;  %2882 = vrot.lane.b32.xlu1 %v13289_v24, %s12920_s29  ;;  %s12935_s29 = smov 118  }
 0x176   :  { %v768_v30 = vpop.f32.mrf.mxu0  ;;  %v1993_v26 = vpop.permute.xlu1 %1992 }
 0x177   :  { %v2004_v62 = vsel %vm2000_vm9, %v13781_v18, %v1993_v26 }
 0x178   :  { %11548 = vmatmul.msk.f32.gmra.mxu1 %vm302_vm2, %v13621_v47  ;;  %11556 = vmatmul.msk.f32.vlgmr.msra.gmra.mxu0 %vm302_vm2, %v13625_v48 }
 0x179   :  { %11551 = vmatmul.msk.f32.gmra.mxu2 %vm302_vm2, %v13621_v47  ;;  %11565 = vmatmul.msk.f32.vlgmr.msra.gmra.mxu3 %vm302_vm2, %v13728_v51 }
 0x17a   :  { %11579 = vmatpush.msk.msra.mxu0 %vm307_vm1, %v2001_v8  ;;  %11588 = vmatpush.msk.msra.mxu3 %vm307_vm1, %v2004_v62  ;;  %v2206_v42 = vpop.permute.xlu2 %2205 }
 0x17b   :  { %3087 = vrot.lane.b32.xlu0 %v13126_v5, %s12922_s4  ;;  %v2002_v5 = vsel %vm2000_vm9, %v1987_v19, %v1989_v58  ;;  %s12928_s4 = smov 30  }
 0x17c   :  { %v725_v1 = vpop.f32.mrf.mxu2  ;;  %v837_v0 = vpop.f32.mrf.mxu3 }
 0x17d   :  { %v13864_v31 = vadd.f32 %v725_v1, %v13721_v13  ;;  %v13866_v33 = vpop.f32.mrf.mxu1  ;;  %v13870_v48 = vadd.f32 %v837_v0, %v634_v29  ;;  %v1999_v8 = vpop.permute.xlu0 %1998  ;;  %3099 = vrot.lane.b32.xlu2 %v13136_v6, %s12921_s12  ;;  %v2003_v13 = vsel %vm2000_vm9, %v1989_v58, %v13781_v18  ;;  %v637_v6 = vadd.f32 %v636_v12, %v13717_v60 }
 0x17e   :  { %v771_v37 = vpop.f32.mrf.mxu0  ;;  %v1995_v32 = vpop.permute.xlu1 %1994  ;;  %3097 = vrot.lane.b32.xlu1 %v13112_v2, %s12921_s12  ;;  %v2222_v2 = vsel %vm2221_vm10, %v2206_v42, %v13840_v45 }
 0x17f   :  { %v2005_v60 = vsel %vm2000_vm9, %v1993_v26, %v1995_v32 }
 0x180   :  { %11559 = vmatmul.msk.f32.vlgmr.msra.gmra.mxu1 %vm302_vm2, %v13728_v51  ;;  %11557 = vmatmul.msk.f32.gmra.mxu0 %vm302_vm2, %v13621_v47 }
 0x181   :  { %11562 = vmatmul.msk.f32.vlgmr.msra.gmra.mxu2 %vm302_vm2, %v13728_v51  ;;  %11566 = vmatmul.msk.f32.gmra.mxu3 %vm302_vm2, %v13757_v63 }
 0x182   :  { %11582 = vmatpush.msk.msra.mxu1 %vm307_vm1, %v2002_v5  ;;  %11585 = vmatpush.msk.msra.mxu2 %vm307_vm1, %v2003_v13 }
 0x183   :  { %3095 = vrot.lane.b32.xlu0 %v13119_v3, %s12921_s12 }
 0x184   :  { %v814_v58 = vpop.f32.mrf.mxu2  ;;  %v840_v47 = vpop.f32.mrf.mxu3 }
 0x185   :  { %v13891_v18 = vadd.f32 %v814_v58, %v13750_v9  ;;  %v13893_v19 = vpop.f32.mrf.mxu1  ;;  %v13897_v62 = vadd.f32 %v840_v47, %v637_v6  ;;  %v13901_v3 = vpop.permute.xlu0 %2213  ;;  %3312 = vrot.lane.b32.xlu2 %v13124_v4, %s12923_s5  ;;  %v565_v4 = vadd.f32 %v13746_v55, %v13665_v15  ;;  %v13932_v15 = vld [vmem:[%s17909_s0 + $0x30] sm:$0x3f] }
 0x186   :  { %v13899_v29 = vpop.f32.mrf.mxu0  ;;  %v1997_v9 = vpop.permute.xlu2 %1996  ;;  %3101 = vrot.lane.b32.xlu1 %v13932_v15, %s12921_s12 }
 0x187   :  { %v13906_v12 = vpop.permute.xlu1 %2201  ;;  %v868_v26 = vadd.f32 %v768_v30, %v565_v4  ;;  %v2006_v13 = vsel %vm2000_vm9, %v1995_v32, %v1997_v9  ;;  %v2007_v47 = vsel %vm2000_vm9, %v1997_v9, %v1999_v8  ;;  %v13972_v4 = vld [vmem:[#allocation2] sm:$0xff]  ;;  %vm3989_vm9 = vcmask 244736  }
 0x188   :  { %11560 = vmatmul.msk.f32.gmra.mxu1 %vm302_vm2, %v13757_v63  ;;  %11568 = vmatmul.msk.f32.vlgmr.msrb.gmra.mxu0 %vm302_vm2, %v13728_v51 }
 0x189   :  { %11563 = vmatmul.msk.f32.gmra.mxu2 %vm302_vm2, %v13757_v63  ;;  %11577 = vmatmul.msk.f32.vlgmr.msrb.gmra.mxu3 %vm302_vm2, %v13728_v51 }
 0x18a   :  { %11591 = vmatpush.msk.msrb.mxu0 %vm307_vm1, %v2005_v60  ;;  %11600 = vmatpush.msk.msrb.mxu3 %vm307_vm1, %v2222_v2  ;;  %v568_v60 = vadd.f32 %v13775_v52, %v13691_v38 }
 0x18b   :  { %3314 = vrot.lane.b32.xlu0 %v13141_v7, %s12923_s5 }
 0x18c   :  { %v817_v1 = vpop.f32.mrf.mxu2  ;;  %v986_v5 = vpop.f32.mrf.mxu3  ;;  %v875_v8 = vadd.f32 %v771_v37, %v568_v60  ;;  %v13982_v37 = vld [vmem:[#allocation2 + $0x10] sm:$0xf] }
 0x18d   :  { %v13925_v0 = vadd.f32 %v817_v1, %v13779_v41  ;;  %v13927_v42 = vpop.f32.mrf.mxu1  ;;  %v13936_v55 = vadd.f32 %v986_v5, %v868_v26  ;;  %v13940_v30 = vpop.permute.xlu0 %2217  ;;  %v13945_v41 = vld [vmem:[%s17909_s0] sm:$0x3f] }
 0x18e   :  { %v13938_v7 = vpop.f32.mrf.mxu0  ;;  %3310 = vrot.lane.b32.xlu2 %v13945_v41, %s12923_s5  ;;  %v13950_v6 = vpop.permute.xlu2 %2203  ;;  %3306 = vrot.lane.b32.xlu1 %v13972_v4, %s12924_s24 }
 0x18f   :  { %v2210_v58 = vpop.permute.xlu1 %2209 }
 0x190   :  { %11571 = vmatmul.msk.f32.vlgmr.msrb.gmra.mxu1 %vm302_vm2, %v13728_v51  ;;  %11569 = vmatmul.msk.f32.gmra.mxu0 %vm302_vm2, %v13757_v63 }
 0x191   :  { %11574 = vmatmul.msk.f32.vlgmr.msrb.gmra.mxu2 %vm302_vm2, %v13728_v51  ;;  %11578 = vmatmul.msk.f32.gmra.mxu3 %vm302_vm2, %v13757_v63 }
 0x192   :  { %11594 = vmatpush.msk.msrb.mxu1 %vm307_vm1, %v2006_v13  ;;  %11597 = vmatpush.msk.msrb.mxu2 %vm307_vm1, %v2007_v47  ;;  %v657_v47 = vadd.f32 %v13805_v54, %v13715_v46 }
 0x193   :  { %3103 = vrot.lane.b32.xlu0 %v13289_v24, %s12921_s12  ;;  %s12927_s12 = smov 31  }
 0x194   :  { %v963_v32 = vpop.f32.mrf.mxu2  ;;  %v989_v2 = vpop.f32.mrf.mxu3 }
 0x195   :  { %v13968_v9 = vadd.f32 %v963_v32, %v13809_v11  ;;  %v13970_v51 = vpop.f32.mrf.mxu1  ;;  %v13976_v38 = vadd.f32 %v989_v2, %v875_v8  ;;  %v13980_v26 = vpop.permute.xlu0 %2422  ;;  %v2223_v11 = vsel %vm2221_vm10, %v13840_v45, %v2210_v58  ;;  %v14004_v45 = vld [vmem:[%s17909_s0 + $0x28] sm:$0x3f]  ;;  %v14018_v32 = vld [vmem:[%s17909_s0 + $0x18] sm:$0x3f] }
 0x196   :  { %v13978_v52 = vpop.f32.mrf.mxu0  ;;  %3308 = vrot.lane.b32.xlu2 %v13982_v37, %s12924_s24  ;;  %v2212_v5 = vpop.permute.xlu2 %2211  ;;  %3316 = vrot.lane.b32.xlu1 %v14018_v32, %s12923_s5 }
 0x197   :  { %v2216_v1 = vpop.permute.xlu1 %2215 }
 0x198   :  { %11572 = vmatmul.msk.f32.gmra.mxu1 %vm302_vm2, %v13757_v63  ;;  %v2226_v13 = vsel %vm2221_vm10, %v13901_v3, %v2216_v1  ;;  %11580 = vmatmul.msk.f32.vlgmr.msra.gmra.mxu0 %vm302_vm2, %v13814_v59 }
 0x199   :  { %11575 = vmatmul.msk.f32.gmra.mxu2 %vm302_vm2, %v13757_v63  ;;  %11589 = vmatmul.msk.f32.vlgmr.msra.gmra.mxu3 %vm302_vm2, %v13814_v59  ;;  %v872_v63 = vadd.f32 %v13899_v29, %v657_v47 }
 0x19a   :  { %11603 = vmatpush.msk.msra.mxu0 %vm307_vm1, %v2223_v11  ;;  %11612 = vmatpush.msk.msra.mxu3 %vm307_vm1, %v2226_v13  ;;  %v2224_v13 = vsel %vm2221_vm10, %v2210_v58, %v2212_v5 }
 0x19b   :  { %3320 = vrot.lane.b32.xlu0 %v14004_v45, %s12923_s5 }
 0x19c   :  { %v966_v60 = vpop.f32.mrf.mxu2  ;;  %v1078_v54 = vpop.f32.mrf.mxu3 }
 0x19d   :  { %v14011_v46 = vadd.f32 %v966_v60, %v13838_v27  ;;  %v14013_v8 = vpop.f32.mrf.mxu1  ;;  %v14022_v2 = vadd.f32 %v1078_v54, %v872_v63  ;;  %v14026_v29 = vpop.permute.xlu0 %2432  ;;  %v14031_v27 = vld [vmem:[%s17909_s0 + $0x20] sm:$0x3f]  ;;  %v2225_v63 = vsel %vm2221_vm10, %v2212_v5, %v13901_v3  ;;  %v660_v60 = vadd.f32 %v13834_v56, %v13744_v61 }
 0x19e   :  { %v14024_v11 = vpop.f32.mrf.mxu0  ;;  %3318 = vrot.lane.b32.xlu2 %v14031_v27, %s12923_s5  ;;  %v2431_v58 = vpop.permute.xlu2 %2430  ;;  %3322 = vrot.lane.b32.xlu1 %v13932_v15, %s12923_s5 }
 0x19f   :  { %v2429_v47 = vpop.permute.xlu1 %2428  ;;  %v879_v3 = vadd.f32 %v13938_v7, %v660_v60 }
 0x1a0   :  { %11583 = vmatmul.msk.f32.vlgmr.msra.gmra.mxu1 %vm302_vm2, %v13814_v59  ;;  %11581 = vmatmul.msk.f32.gmra.mxu0 %vm302_vm2, %v13846_v25 }
 0x1a1   :  { %11586 = vmatmul.msk.f32.vlgmr.msra.gmra.mxu2 %vm302_vm2, %v13814_v59  ;;  %11590 = vmatmul.msk.f32.gmra.mxu3 %vm302_vm2, %v13846_v25 }
 0x1a2   :  { %11606 = vmatpush.msk.msra.mxu1 %vm307_vm1, %v2224_v13  ;;  %11609 = vmatpush.msk.msra.mxu2 %vm307_vm1, %v2225_v63  ;;  %v2444_v13 = vsel %vm2442_vm11, %v2429_v47, %v2431_v58 }
 0x1a3   :  { %3324 = vrot.lane.b32.xlu0 %v13289_v24, %s12923_s5 }
 0x1a4   :  { %v1055_v5 = vpop.f32.mrf.mxu2  ;;  %v1081_v50 = vpop.f32.mrf.mxu3 }
 0x1a5   :  { %v14054_v54 = vadd.f32 %v1055_v5, %v13870_v48  ;;  %v14056_v57 = vpop.f32.mrf.mxu1  ;;  %v14060_v61 = vadd.f32 %v1081_v50, %v879_v3  ;;  %v14064_v24 = vpop.permute.xlu0 %2438  ;;  %v2227_v48 = vsel %vm2221_vm10, %v2216_v1, %v13940_v30  ;;  %v869_v50 = vadd.f32 %v13866_v33, %v13773_v14  ;;  %v14094_v33 = vld [vmem:[%s17909_s0 + $0x10] sm:$0x3f] }
 0x1a6   :  { %v14062_v56 = vpop.f32.mrf.mxu0  ;;  %3537 = vrot.lane.b32.xlu2 %v14018_v32, %s12925_s30  ;;  %v2220_v60 = vpop.permute.xlu2 %2219  ;;  %3535 = vrot.lane.b32.xlu1 %v14094_v33, %s12925_s30 }
 0x1a7   :  { %v2427_v7 = vpop.permute.xlu1 %2426  ;;  %v1087_v1 = vadd.f32 %v13978_v52, %v869_v50 }
 0x1a8   :  { %11584 = vmatmul.msk.f32.gmra.mxu1 %vm302_vm2, %v13846_v25  ;;  %11592 = vmatmul.msk.f32.vlgmr.msrb.gmra.mxu0 %vm302_vm2, %v13814_v59 }
 0x1a9   :  { %11587 = vmatmul.msk.f32.gmra.mxu2 %vm302_vm2, %v13846_v25  ;;  %11601 = vmatmul.msk.f32.vlgmr.msrb.gmra.mxu3 %vm302_vm2, %v13906_v12 }
 0x1aa   :  { %11615 = vmatpush.msk.msrb.mxu0 %vm307_vm1, %v2227_v48  ;;  %11624 = vmatpush.msk.msrb.mxu3 %vm307_vm1, %v2444_v13 }
 0x1ab   :  { %3527 = vrot.lane.b32.xlu0 %v13972_v4, %s12926_s6 }
 0x1ac   :  { %v1058_v63 = vpop.f32.mrf.mxu2  ;;  %v1227_v5 = vpop.f32.mrf.mxu3 }
 0x1ad   :  { %v14087_v3 = vadd.f32 %v1058_v63, %v13897_v62  ;;  %v14089_v14 = vpop.f32.mrf.mxu1  ;;  %v14098_v48 = vadd.f32 %v1227_v5, %v1087_v1  ;;  %v14100_v52 = vpop.permute.xlu0 %2651  ;;  %v2228_v62 = vsel %vm2221_vm10, %v13940_v30, %v2220_v60  ;;  %v2443_v63 = vsel %vm2442_vm11, %v2427_v7, %v2429_v47 }
 0x1ae   :  { %v1161_v13 = vpop.f32.mrf.mxu0  ;;  %3531 = vrot.lane.b32.xlu2 %v13945_v41, %s12925_s30  ;;  %v876_v1 = vadd.f32 %v13893_v19, %v13803_v43  ;;  %v14132_v43 = vld [vmem:[%s17909_s0 + $0x8] sm:$0x3f]  ;;  %vm4210_vm10 = vcmask 236544  }
 0x1af   :  { %v14106_v50 = vpop.permute.xlu1 %2424  ;;  %3533 = vrot.lane.b32.xlu1 %v14132_v43, %s12925_s30 }
 0x1b0   :  { %11595 = vmatmul.msk.f32.vlgmr.msrb.gmra.mxu1 %vm302_vm2, %v13814_v59  ;;  %11593 = vmatmul.msk.f32.gmra.mxu0 %vm302_vm2, %v13846_v25  ;;  %v1094_v30 = vadd.f32 %v14024_v11, %v876_v1  ;;  %v2437_v11 = vpop.permute.xlu2 %2436 }
 0x1b1   :  { %11598 = vmatmul.msk.f32.vlgmr.msrb.gmra.mxu2 %vm302_vm2, %v13814_v59  ;;  %11602 = vmatmul.msk.f32.gmra.mxu3 %vm302_vm2, %v13950_v6  ;;  %v2448_v1 = vsel %vm2442_vm11, %v2437_v11, %v14064_v24 }
 0x1b2   :  { %11618 = vmatpush.msk.msrb.mxu1 %vm307_vm1, %v2228_v62  ;;  %11621 = vmatpush.msk.msrb.mxu2 %vm307_vm1, %v2443_v63 }
 0x1b3   :  { %3539 = vrot.lane.b32.xlu0 %v14031_v27, %s12925_s30 }
 0x1b4   :  { %v1204_v47 = vpop.f32.mrf.mxu2  ;;  %v1230_v59 = vpop.f32.mrf.mxu3 }
 0x1b5   :  { %v14125_v7 = vadd.f32 %v1204_v47, %v13936_v55  ;;  %v14127_v60 = vpop.f32.mrf.mxu1  ;;  %v14136_v19 = vadd.f32 %v1230_v59, %v1094_v30  ;;  %v14138_v62 = vpop.permute.xlu0 %2649  ;;  %v2445_v55 = vsel %vm2442_vm11, %v2431_v58, %v14026_v29  ;;  %v1084_v30 = vadd.f32 %v13927_v42, %v13832_v10  ;;  %v14160_v58 = vld [vmem:[%s17909_s0 + $0x38] sm:$0x3f] }
 0x1b6   :  { %v1250_v5 = vpop.f32.mrf.mxu0  ;;  %3543 = vrot.lane.b32.xlu2 %v13932_v15, %s12925_s30 }
 0x1b7   :  { %v2435_v63 = vpop.permute.xlu1 %2434  ;;  %3529 = vrot.lane.b32.xlu1 %v13982_v37, %s12926_s6  ;;  %s12929_s6 = smov 26  }
 0x1b8   :  { %11596 = vmatmul.msk.f32.gmra.mxu1 %vm302_vm2, %v13846_v25  ;;  %11604 = vmatmul.msk.f32.vlgmr.msra.gmra.mxu0 %vm302_vm2, %v13906_v12 }
 0x1b9   :  { %11599 = vmatmul.msk.f32.gmra.mxu2 %vm302_vm2, %v13846_v25  ;;  %11613 = vmatmul.msk.f32.vlgmr.msra.gmra.mxu3 %vm302_vm2, %v13906_v12  ;;  %v1302_v25 = vadd.f32 %v14062_v56, %v1084_v30  ;;  %v2446_v56 = vsel %vm2442_vm11, %v14026_v29, %v2435_v63  ;;  %v2447_v30 = vsel %vm2442_vm11, %v2435_v63, %v2437_v11 }
 0x1ba   :  { %11627 = vmatpush.msk.msra.mxu0 %vm307_vm1, %v2445_v55  ;;  %11636 = vmatpush.msk.msra.mxu3 %vm307_vm1, %v2448_v1 }
 0x1bb   :  { %3545 = vrot.lane.b32.xlu0 %v14160_v58, %s12925_s30 }
 0x1bc   :  { %v1207_v47 = vpop.f32.mrf.mxu2  ;;  %v1380_v42 = vpop.f32.mrf.mxu3 }
 0x1bd   :  { %v14167_v10 = vadd.f32 %v1207_v47, %v13976_v38  ;;  %v14169_v59 = vpop.f32.mrf.mxu1  ;;  %v14173_v55 = vadd.f32 %v1380_v42, %v1302_v25  ;;  %v14175_v49 = vpop.permute.xlu0 %2645  ;;  %v1091_v25 = vadd.f32 %v13970_v51, %v13864_v31 }
 0x1be   :  { %v1253_v44 = vpop.f32.mrf.mxu0  ;;  %3752 = vrot.lane.b32.xlu2 %v13945_v41, %s12927_s12  ;;  %v2441_v38 = vpop.permute.xlu2 %2440 }
 0x1bf   :  { %v14181_v1 = vpop.permute.xlu1 %2653  ;;  %v1309_v29 = vadd.f32 %v1161_v13, %v1091_v25  ;;  %3541 = vrot.lane.b32.xlu1 %v14004_v45, %s12925_s30  ;;  %v2449_v13 = vsel %vm2442_vm11, %v14064_v24, %v2441_v38  ;;  %vm4431_vm11 = vcmask 228352  }
 0x1c0   :  { %11607 = vmatmul.msk.f32.vlgmr.msra.gmra.mxu1 %vm302_vm2, %v13906_v12  ;;  %11605 = vmatmul.msk.f32.gmra.mxu0 %vm302_vm2, %v13950_v6  ;;  %v2666_v25 = vsel %vm2663_vm12, %v14100_v52, %v14181_v1 }
 0x1c1   :  { %11610 = vmatmul.msk.f32.vlgmr.msra.gmra.mxu2 %vm302_vm2, %v13906_v12  ;;  %11614 = vmatmul.msk.f32.gmra.mxu3 %vm302_vm2, %v13950_v6 }
 0x1c2   :  { %11630 = vmatpush.msk.msra.mxu1 %vm307_vm1, %v2446_v56  ;;  %11633 = vmatpush.msk.msra.mxu2 %vm307_vm1, %v2447_v30 }
 0x1c3   :  { %3754 = vrot.lane.b32.xlu0 %v14132_v43, %s12927_s12 }
 0x1c4   :  { %v1296_v11 = vpop.f32.mrf.mxu2  ;;  %v1383_v47 = vpop.f32.mrf.mxu3 }
 0x1c5   :  { %v14199_v63 = vadd.f32 %v1296_v11, %v14022_v2  ;;  %v14201_v42 = vpop.f32.mrf.mxu1  ;;  %v14205_v31 = vadd.f32 %v1383_v47, %v1309_v29  ;;  %v14207_v56 = vpop.permute.xlu0 %2657  ;;  %v1088_v29 = vadd.f32 %v14013_v8, %v13891_v18 }
 0x1c6   :  { %v1403_v51 = vpop.f32.mrf.mxu0  ;;  %3758 = vrot.lane.b32.xlu2 %v14018_v32, %s12927_s12  ;;  %v14213_v30 = vpop.permute.xlu2 %2643 }
 0x1c7   :  { %v2648_v2 = vpop.permute.xlu1 %2647  ;;  %v1306_v24 = vadd.f32 %v1250_v5, %v1088_v29  ;;  %3748 = vrot.lane.b32.xlu1 %v13972_v4, %s12925_s30  ;;  %v2665_v5 = vsel %vm2663_vm12, %v14138_v62, %v14100_v52 }
 0x1c8   :  { %11608 = vmatmul.msk.f32.gmra.mxu1 %vm302_vm2, %v13950_v6  ;;  %11616 = vmatmul.msk.f32.vlgmr.msrb.gmra.mxu0 %vm302_vm2, %v13906_v12  ;;  %v2664_v29 = vsel %vm2663_vm12, %v2648_v2, %v14138_v62 }
 0x1c9   :  { %11611 = vmatmul.msk.f32.gmra.mxu2 %vm302_vm2, %v13950_v6  ;;  %11625 = vmatmul.msk.f32.vlgmr.msrb.gmra.mxu3 %vm302_vm2, %v13980_v26 }
 0x1ca   :  { %11639 = vmatpush.msk.msrb.mxu0 %vm307_vm1, %v2449_v13  ;;  %11648 = vmatpush.msk.msrb.mxu3 %vm307_vm1, %v2666_v25 }
 0x1cb   :  { %3760 = vrot.lane.b32.xlu0 %v14031_v27, %s12927_s12 }
 0x1cc   :  { %v1299_v38 = vpop.f32.mrf.mxu2  ;;  %v1472_v47 = vpop.f32.mrf.mxu3 }
 0x1cd   :  { %v14233_v11 = vadd.f32 %v1299_v38, %v14060_v61  ;;  %v14235_v53 = vpop.f32.mrf.mxu1  ;;  %v14239_v18 = vadd.f32 %v1472_v47, %v1306_v24  ;;  %v14241_v13 = vpop.permute.xlu0 %2864  ;;  %v1095_v24 = vadd.f32 %v14056_v57, %v13925_v0 }
 0x1ce   :  { %v1406_v8 = vpop.f32.mrf.mxu0  ;;  %3756 = vrot.lane.b32.xlu2 %v14094_v33, %s12927_s12  ;;  %v2656_v61 = vpop.permute.xlu2 %2655 }
 0x1cf   :  { %v2660_v25 = vpop.permute.xlu1 %2659  ;;  %3750 = vrot.lane.b32.xlu1 %v13982_v37, %s12925_s30 }
 0x1d0   :  { %11619 = vmatmul.msk.f32.vlgmr.msrb.gmra.mxu1 %vm302_vm2, %v13906_v12  ;;  %11617 = vmatmul.msk.f32.gmra.mxu0 %vm302_vm2, %v13950_v6  ;;  %v1313_v12 = vadd.f32 %v1253_v44, %v1095_v24  ;;  %v2667_v44 = vsel %vm2663_vm12, %v14181_v1, %v2656_v61  ;;  %v1303_v24 = vadd.f32 %v14089_v14, %v13968_v9 }
 0x1d1   :  { %11622 = vmatmul.msk.f32.vlgmr.msrb.gmra.mxu2 %vm302_vm2, %v13980_v26  ;;  %11626 = vmatmul.msk.f32.gmra.mxu3 %vm302_vm2, %v14106_v50 }
 0x1d2   :  { %11645 = vmatpush.msk.msrb.mxu2 %vm307_vm1, %v2665_v5  ;;  %11642 = vmatpush.msk.msrb.mxu1 %vm307_vm1, %v2664_v29 }
 0x1d3   :  { %3762 = vrot.lane.b32.xlu0 %v14004_v45, %s12927_s12 }
 0x1d4   :  { %v1449_v52 = vpop.f32.mrf.mxu2  ;;  %v1475_v2 = vpop.f32.mrf.mxu3 }
 0x1d5   :  { %v14265_v62 = vadd.f32 %v1449_v52, %v14098_v48  ;;  %v14267_v38 = vpop.f32.mrf.mxu1  ;;  %v14271_v57 = vadd.f32 %v1475_v2, %v1313_v12  ;;  %v14273_v47 = vpop.permute.xlu0 %2866 }
 0x1d6   :  { %v1495_v0 = vpop.f32.mrf.mxu0  ;;  %3975 = vrot.lane.b32.xlu2 %v14132_v43, %s12928_s4  ;;  %v2662_v48 = vpop.permute.xlu2 %2661 }
 0x1d7   :  { %v2670_v5 = vsel %vm2663_vm12, %v2660_v25, %v2662_v48  ;;  %v2869_v29 = vpop.permute.xlu1 %2868  ;;  %3973 = vrot.lane.b32.xlu1 %v13945_v41, %s12928_s4 }
 0x1d8   :  { %11620 = vmatmul.msk.f32.gmra.mxu1 %vm302_vm2, %v13950_v6  ;;  %11628 = vmatmul.msk.f32.vlgmr.msra.gmra.mxu0 %vm302_vm2, %v13980_v26  ;;  %v1525_v6 = vadd.f32 %v1403_v51, %v1303_v24  ;;  %v2668_v51 = vsel %vm2663_vm12, %v2656_v61, %v14207_v56 }
 0x1d9   :  { %11623 = vmatmul.msk.f32.gmra.mxu2 %vm302_vm2, %v14106_v50  ;;  %11637 = vmatmul.msk.f32.vlgmr.msra.gmra.mxu3 %vm302_vm2, %v13980_v26 }
 0x1da   :  { %11651 = vmatpush.msk.msra.mxu0 %vm307_vm1, %v2667_v44  ;;  %11660 = vmatpush.msk.msra.mxu3 %vm307_vm1, %v2670_v5  ;;  %v1310_v5 = vadd.f32 %v14127_v60, %v14011_v46 }
 0x1db   :  { %3969 = vrot.lane.b32.xlu0 %v13972_v4, %s12929_s6 }
 0x1dc   :  { %v1452_v1 = vpop.f32.mrf.mxu2  ;;  %v1624_v52 = vpop.f32.mrf.mxu3 }
 0x1dd   :  { %v14295_v12 = vadd.f32 %v1452_v1, %v14136_v19  ;;  %v14297_v2 = vpop.f32.mrf.mxu1  ;;  %v14301_v9 = vadd.f32 %v1624_v52, %v1525_v6  ;;  %v14303_v44 = vpop.permute.xlu0 %3089  ;;  %v2669_v19 = vsel %vm2663_vm12, %v14207_v56, %v2660_v25  ;;  %v1532_v56 = vadd.f32 %v1406_v8, %v1310_v5 }
 0x1de   :  { %v1498_v14 = vpop.f32.mrf.mxu0  ;;  %3766 = vrot.lane.b32.xlu2 %v14160_v58, %s12927_s12  ;;  %v2871_v48 = vpop.permute.xlu2 %2870  ;;  %vm4827_vm12 = vcmask 15360  }
 0x1df   :  { %v2875_v61 = vpop.permute.xlu1 %2874  ;;  %3764 = vrot.lane.b32.xlu1 %v13932_v15, %s12927_s12  ;;  %v2885_v8 = vsel %vm2884_vm13, %v2869_v29, %v2871_v48  ;;  %s12936_s12 = smov 112  }
 0x1e0   :  { %11631 = vmatmul.msk.f32.vlgmr.msra.gmra.mxu1 %vm302_vm2, %v13980_v26  ;;  %11629 = vmatmul.msk.f32.gmra.mxu0 %vm302_vm2, %v14106_v50 }
 0x1e1   :  { %11634 = vmatmul.msk.f32.vlgmr.msra.gmra.mxu2 %vm302_vm2, %v13980_v26  ;;  %11638 = vmatmul.msk.f32.gmra.mxu3 %vm302_vm2, %v14106_v50 }
 0x1e2   :  { %11654 = vmatpush.msk.msra.mxu1 %vm307_vm1, %v2668_v51  ;;  %11657 = vmatpush.msk.msra.mxu2 %vm307_vm1, %v2669_v19  ;;  %v1307_v19 = vadd.f32 %v14169_v59, %v14054_v54 }
 0x1e3   :  { %3977 = vrot.lane.b32.xlu0 %v14094_v33, %s12928_s4 }
 0x1e4   :  { %v1601_v25 = vpop.f32.mrf.mxu2  ;;  %v1627_v6 = vpop.f32.mrf.mxu3  ;;  %v1529_v29 = vadd.f32 %v1495_v0, %v1307_v19  ;;  %v1314_v19 = vadd.f32 %v14201_v42, %v14087_v3 }
 0x1e5   :  { %v14326_v24 = vadd.f32 %v1601_v25, %v14173_v55  ;;  %v14328_v1 = vpop.f32.mrf.mxu1  ;;  %v14332_v46 = vadd.f32 %v1627_v6, %v1532_v56  ;;  %v14334_v52 = vpop.permute.xlu0 %2880 }
 0x1e6   :  { %v1647_v60 = vpop.f32.mrf.mxu0  ;;  %3981 = vrot.lane.b32.xlu2 %v14031_v27, %s12928_s4  ;;  %v2877_v51 = vpop.permute.xlu2 %2876 }
 0x1e7   :  { %v2888_v55 = vsel %vm2884_vm13, %v2875_v61, %v2877_v51  ;;  %v2873_v56 = vpop.permute.xlu1 %2872  ;;  %3971 = vrot.lane.b32.xlu1 %v13982_v37, %s12929_s6 }
 0x1e8   :  { %11632 = vmatmul.msk.f32.gmra.mxu1 %vm302_vm2, %v14106_v50  ;;  %11640 = vmatmul.msk.f32.vlgmr.msrb.gmra.mxu0 %vm302_vm2, %v13980_v26  ;;  %v2886_v0 = vsel %vm2884_vm13, %v2871_v48, %v2873_v56  ;;  %v1536_v48 = vadd.f32 %v1498_v14, %v1314_v19 }
 0x1e9   :  { %11635 = vmatmul.msk.f32.gmra.mxu2 %vm302_vm2, %v14106_v50  ;;  %11649 = vmatmul.msk.f32.vlgmr.msrb.gmra.mxu3 %vm302_vm2, %v14213_v30 }
 0x1ea   :  { %11663 = vmatpush.msk.msrb.mxu0 %vm307_vm1, %v2885_v8  ;;  %11672 = vmatpush.msk.msrb.mxu3 %vm307_vm1, %v2888_v55 }
 0x1eb   :  { %3983 = vrot.lane.b32.xlu0 %v14004_v45, %s12928_s4 }
 0x1ec   :  { %v1604_v5 = vpop.f32.mrf.mxu2  ;;  %v1716_v26 = vpop.f32.mrf.mxu3 }
 0x1ed   :  { %v14355_v25 = vadd.f32 %v1604_v5, %v14205_v31  ;;  %v14357_v6 = vpop.f32.mrf.mxu1  ;;  %v14361_v54 = vadd.f32 %v1716_v26, %v1529_v29  ;;  %v14363_v8 = vpop.permute.xlu0 %3087  ;;  %v2887_v31 = vsel %vm2884_vm13, %v2873_v56, %v2875_v61 }
 0x1ee   :  { %v1650_v59 = vpop.f32.mrf.mxu0  ;;  %3985 = vrot.lane.b32.xlu2 %v13932_v15, %s12928_s4  ;;  %v2879_v55 = vpop.permute.xlu2 %2878 }
 0x1ef   :  { %3979 = vrot.lane.b32.xlu1 %v14018_v32, %s12928_s4  ;;  %v2889_v14 = vsel %vm2884_vm13, %v2877_v51, %v2879_v55  ;;  %v3092_v26 = vpop.permute.xlu1 %3091 }
 0x1f0   :  { %11643 = vmatmul.msk.f32.vlgmr.msrb.gmra.mxu1 %vm302_vm2, %v14213_v30  ;;  %11641 = vmatmul.msk.f32.gmra.mxu0 %vm302_vm2, %v14106_v50 }
 0x1f1   :  { %11646 = vmatmul.msk.f32.vlgmr.msrb.gmra.mxu2 %vm302_vm2, %v14213_v30  ;;  %11650 = vmatmul.msk.f32.gmra.mxu3 %vm302_vm2, %v14175_v49 }
 0x1f2   :  { %11666 = vmatpush.msk.msrb.mxu1 %vm307_vm1, %v2886_v0  ;;  %11669 = vmatpush.msk.msrb.mxu2 %vm307_vm1, %v2887_v31  ;;  %v3106_v0 = vsel %vm3105_vm14, %v14303_v44, %v3092_v26  ;;  %v1526_v31 = vadd.f32 %v14235_v53, %v14125_v7 }
 0x1f3   :  { %4196 = vrot.lane.b32.xlu0 %v14132_v43, %s12930_s11 }
 0x1f4   :  { %v1693_v61 = vpop.f32.mrf.mxu2  ;;  %v1719_v29 = vpop.f32.mrf.mxu3  ;;  %v1747_v44 = vadd.f32 %v1647_v60, %v1526_v31  ;;  %v2890_v60 = vsel %vm2884_vm13, %v2879_v55, %v14334_v52  ;;  %v1533_v31 = vadd.f32 %v14267_v38, %v14167_v10 }
 0x1f5   :  { %v14384_v50 = vadd.f32 %v1693_v61, %v14239_v18  ;;  %v14386_v5 = vpop.f32.mrf.mxu1  ;;  %v14390_v3 = vadd.f32 %v1719_v29, %v1536_v48  ;;  %v14392_v56 = vpop.permute.xlu0 %3095 }
 0x1f6   :  { %v1739_v42 = vpop.f32.mrf.mxu0  ;;  %4190 = vrot.lane.b32.xlu2 %v13972_v4, %s12931_s13  ;;  %v14397_v18 = vpop.permute.xlu2 %3085 }
 0x1f7   :  { %4198 = vrot.lane.b32.xlu1 %v14094_v33, %s12930_s11 }
 0x1f8   :  { %11644 = vmatmul.msk.f32.gmra.mxu1 %vm302_vm2, %v14175_v49  ;;  %11652 = vmatmul.msk.f32.vlgmr.msra.gmra.mxu0 %vm302_vm2, %v14213_v30 }
 0x1f9   :  { %11647 = vmatmul.msk.f32.gmra.mxu2 %vm302_vm2, %v14175_v49  ;;  %11661 = vmatmul.msk.f32.vlgmr.msra.gmra.mxu3 %vm302_vm2, %v14213_v30 }
 0x1fa   :  { %11675 = vmatpush.msk.msra.mxu0 %vm307_vm1, %v2889_v14  ;;  %11684 = vmatpush.msk.msra.mxu3 %vm307_vm1, %v3106_v0 }
 0x1fb   :  { %4194 = vrot.lane.b32.xlu0 %v13945_v41, %s12930_s11 }
 0x1fc   :  { %v1696_v51 = vpop.f32.mrf.mxu2  ;;  %v1868_v48 = vpop.f32.mrf.mxu3 }
 0x1fd   :  { %v14416_v19 = vadd.f32 %v1696_v51, %v14271_v57  ;;  %v14418_v61 = vpop.f32.mrf.mxu1  ;;  %v14422_v53 = vadd.f32 %v1868_v48, %v1747_v44  ;;  %v14424_v29 = vpop.permute.xlu0 %3314 }
 0x1fe   :  { %v1742_v7 = vpop.f32.mrf.mxu0  ;;  %4200 = vrot.lane.b32.xlu2 %v14018_v32, %s12930_s11  ;;  %v3094_v14 = vpop.permute.xlu2 %3093 }
 0x1ff   :  { %v2883_v57 = vpop.permute.xlu1 %2882  ;;  %3987 = vrot.lane.b32.xlu1 %v14160_v58, %s12928_s4 }
 0x200   :  { %11655 = vmatmul.msk.f32.vlgmr.msra.gmra.mxu1 %vm302_vm2, %v14213_v30  ;;  %v2891_v0 = vsel %vm2884_vm13, %v14334_v52, %v2883_v57  ;;  %11653 = vmatmul.msk.f32.gmra.mxu0 %vm302_vm2, %v14175_v49  ;;  %v1754_v52 = vadd.f32 %v1650_v59, %v1533_v31  ;;  %v3107_v59 = vsel %vm3105_vm14, %v3092_v26, %v3094_v14  ;;  %vm7637_vm13 = vcmask 982016  }
 0x201   :  { %11658 = vmatmul.msk.f32.vlgmr.msra.gmra.mxu2 %vm302_vm2, %v14213_v30  ;;  %11662 = vmatmul.msk.f32.gmra.mxu3 %vm302_vm2, %v14175_v49 }
 0x202   :  { %11678 = vmatpush.msk.msra.mxu1 %vm307_vm1, %v2890_v60  ;;  %11681 = vmatpush.msk.msra.mxu2 %vm307_vm1, %v2891_v0  ;;  %v1530_v0 = vadd.f32 %v14297_v2, %v14199_v63 }
 0x203   :  { %4192 = vrot.lane.b32.xlu0 %v13982_v37, %s12931_s13 }
 0x204   :  { %v1845_v55 = vpop.f32.mrf.mxu2  ;;  %v1871_v51 = vpop.f32.mrf.mxu3  ;;  %v1751_v26 = vadd.f32 %v1739_v42, %v1530_v0  ;;  %v3108_v42 = vsel %vm3105_vm14, %v3094_v14, %v14392_v56 }
 0x205   :  { %v14447_v44 = vadd.f32 %v1845_v55, %v14301_v9  ;;  %v14449_v30 = vpop.f32.mrf.mxu1  ;;  %v14453_v10 = vadd.f32 %v1871_v51, %v1754_v52  ;;  %v14455_v48 = vpop.permute.xlu0 %3103 }
 0x206   :  { %v1891_v38 = vpop.f32.mrf.mxu0  ;;  %4206 = vrot.lane.b32.xlu2 %v13932_v15, %s12930_s11  ;;  %v3100_v60 = vpop.permute.xlu2 %3099 }
 0x207   :  { %v3098_v57 = vpop.permute.xlu1 %3097  ;;  %4204 = vrot.lane.b32.xlu1 %v14004_v45, %s12930_s11 }
 0x208   :  { %11656 = vmatmul.msk.f32.gmra.mxu1 %vm302_vm2, %v14175_v49  ;;  %v3110_v9 = vsel %vm3105_vm14, %v3098_v57, %v3100_v60  ;;  %11664 = vmatmul.msk.f32.vlgmr.msrb.gmra.mxu0 %vm302_vm2, %v14241_v13 }
 0x209   :  { %11659 = vmatmul.msk.f32.gmra.mxu2 %vm302_vm2, %v14175_v49  ;;  %11673 = vmatmul.msk.f32.vlgmr.msrb.gmra.mxu3 %vm302_vm2, %v14241_v13 }
 0x20a   :  { %11687 = vmatpush.msk.msrb.mxu0 %vm307_vm1, %v3107_v59  ;;  %11696 = vmatpush.msk.msrb.mxu3 %vm307_vm1, %v3110_v9  ;;  %v3109_v9 = vsel %vm3105_vm14, %v14392_v56, %v3098_v57 }
 0x20b   :  { %4202 = vrot.lane.b32.xlu0 %v14031_v27, %s12930_s11 }
 0x20c   :  { %v1848_v31 = vpop.f32.mrf.mxu2  ;;  %v1960_v52 = vpop.f32.mrf.mxu3 }
 0x20d   :  { %v14476_v49 = vadd.f32 %v1848_v31, %v14332_v46  ;;  %v14478_v55 = vpop.f32.mrf.mxu1  ;;  %v14482_v63 = vadd.f32 %v1960_v52, %v1751_v26  ;;  %v14484_v51 = vpop.permute.xlu0 %3320 }
 0x20e   :  { %v1894_v2 = vpop.f32.mrf.mxu0  ;;  %4419 = vrot.lane.b32.xlu2 %v14094_v33, %s12932_s25  ;;  %v3313_v46 = vpop.permute.xlu2 %3312  ;;  %v1537_v33 = vadd.f32 %v14328_v1, %v14233_v11 }
 0x20f   :  { %v3102_v59 = vpop.permute.xlu1 %3101  ;;  %4208 = vrot.lane.b32.xlu1 %v14160_v58, %s12930_s11  ;;  %v3328_v52 = vsel %vm3326_vm15, %v3313_v46, %v14424_v29 }
 0x210   :  { %11667 = vmatmul.msk.f32.vlgmr.msrb.gmra.mxu1 %vm302_vm2, %v14241_v13  ;;  %11665 = vmatmul.msk.f32.gmra.mxu0 %vm302_vm2, %v14273_v47  ;;  %v1758_v56 = vadd.f32 %v1742_v7, %v1537_v33 }
 0x211   :  { %11670 = vmatmul.msk.f32.vlgmr.msrb.gmra.mxu2 %vm302_vm2, %v14241_v13  ;;  %11674 = vmatmul.msk.f32.gmra.mxu3 %vm302_vm2, %v14273_v47 }
 0x212   :  { %11690 = vmatpush.msk.msrb.mxu1 %vm307_vm1, %v3108_v42  ;;  %11693 = vmatpush.msk.msrb.mxu2 %vm307_vm1, %v3109_v9 }
 0x213   :  { %4421 = vrot.lane.b32.xlu0 %v14018_v32, %s12932_s25  ;;  %v3111_v32 = vsel %vm3105_vm14, %v3100_v60, %v3102_v59 }
 0x214   :  { %v1937_v14 = vpop.f32.mrf.mxu2  ;;  %v1963_v0 = vpop.f32.mrf.mxu3 }
 0x215   :  { %v14507_v57 = vadd.f32 %v1937_v14, %v14361_v54  ;;  %v14509_v26 = vpop.f32.mrf.mxu1  ;;  %v14513_v11 = vadd.f32 %v1963_v0, %v1758_v56  ;;  %v14515_v31 = vpop.permute.xlu0 %3324 }
 0x216   :  { %v2043_v1 = vpop.f32.mrf.mxu0  ;;  %4417 = vrot.lane.b32.xlu2 %v14132_v43, %s12932_s25  ;;  %v3311_v7 = vpop.permute.xlu2 %3310  ;;  %v1748_v43 = vadd.f32 %v14357_v6, %v14265_v62 }
 0x217   :  { %v14520_v54 = vpop.permute.xlu1 %3306  ;;  %4411 = vrot.lane.b32.xlu1 %v13972_v4, %s12933_s26  ;;  %v3327_v0 = vsel %vm3326_vm15, %v3311_v7, %v3313_v46 }
 0x218   :  { %11668 = vmatmul.msk.f32.gmra.mxu1 %vm302_vm2, %v14273_v47  ;;  %11676 = vmatmul.msk.f32.vlgmr.msra.gmra.mxu0 %vm302_vm2, %v14241_v13  ;;  %v1969_v60 = vadd.f32 %v1891_v38, %v1748_v43 }
 0x219   :  { %11671 = vmatmul.msk.f32.gmra.mxu2 %vm302_vm2, %v14273_v47  ;;  %11685 = vmatmul.msk.f32.vlgmr.msra.gmra.mxu3 %vm302_vm2, %v14397_v18 }
 0x21a   :  { %11699 = vmatpush.msk.msra.mxu0 %vm307_vm1, %v3111_v32  ;;  %11708 = vmatpush.msk.msra.mxu3 %vm307_vm1, %v3328_v52  ;;  %v1755_v32 = vadd.f32 %v14386_v5, %v14295_v12 }
 0x21b   :  { %4415 = vrot.lane.b32.xlu0 %v13945_v41, %s12932_s25  ;;  %v3112_v41 = vsel %vm3105_vm14, %v3102_v59, %v14455_v48  ;;  %vm7676_vm14 = vcmask 97280  }
 0x21c   :  { %v1940_v42 = vpop.f32.mrf.mxu2  ;;  %v2112_v33 = vpop.f32.mrf.mxu3  ;;  %v1976_v48 = vadd.f32 %v1894_v2, %v1755_v32 }
 0x21d   :  { %v14539_v9 = vadd.f32 %v1940_v42, %v14390_v3  ;;  %v14541_v56 = vpop.f32.mrf.mxu1  ;;  %v14544_v62 = vadd.f32 %v2112_v33, %v1969_v60  ;;  %v14546_v14 = vpop.permute.xlu0 %3527 }
 0x21e   :  { %v2046_v6 = vpop.f32.mrf.mxu0  ;;  %4413 = vrot.lane.b32.xlu2 %v13982_v37, %s12933_s26  ;;  %v14551_v38 = vpop.permute.xlu2 %3308 }
 0x21f   :  { %v3317_v3 = vpop.permute.xlu1 %3316  ;;  %4423 = vrot.lane.b32.xlu1 %v14031_v27, %s12932_s25 }
 0x220   :  { %11679 = vmatmul.msk.f32.vlgmr.msra.gmra.mxu1 %vm302_vm2, %v14241_v13  ;;  %11677 = vmatmul.msk.f32.gmra.mxu0 %vm302_vm2, %v14273_v47 }
 0x221   :  { %11682 = vmatmul.msk.f32.vlgmr.msra.gmra.mxu2 %vm302_vm2, %v14241_v13  ;;  %11686 = vmatmul.msk.f32.gmra.mxu3 %vm302_vm2, %v14363_v8 }
 0x222   :  { %11702 = vmatpush.msk.msra.mxu1 %vm307_vm1, %v3112_v41  ;;  %11705 = vmatpush.msk.msra.mxu2 %vm307_vm1, %v3327_v0 }
 0x223   :  { %4427 = vrot.lane.b32.xlu0 %v13932_v15, %s12932_s25  ;;  %v3329_v15 = vsel %vm3326_vm15, %v14424_v29, %v3317_v3 }
 0x224   :  { %v2089_v46 = vpop.f32.mrf.mxu2  ;;  %v2115_v7 = vpop.f32.mrf.mxu3 }
 0x225   :  { %v14569_v59 = vadd.f32 %v2089_v46, %v14422_v53  ;;  %v14571_v13 = vpop.f32.mrf.mxu1  ;;  %v14575_v12 = vadd.f32 %v2115_v7, %v1976_v48  ;;  %v14581_v43 = vpop.permute.xlu0 %3539 }
 0x226   :  { %v2135_v5 = vpop.f32.mrf.mxu0  ;;  %4425 = vrot.lane.b32.xlu2 %v14004_v45, %s12932_s25  ;;  %v3319_v2 = vpop.permute.xlu2 %3318  ;;  %v1966_v45 = vadd.f32 %v14418_v61, %v14326_v24 }
 0x227   :  { %v3323_v52 = vpop.permute.xlu1 %3322  ;;  %4429 = vrot.lane.b32.xlu1 %v14160_v58, %s12932_s25  ;;  %v3330_v33 = vsel %vm3326_vm15, %v3317_v3, %v3319_v2  ;;  %v3331_v0 = vsel %vm3326_vm15, %v3319_v2, %v14484_v51 }
 0x228   :  { %11680 = vmatmul.msk.f32.gmra.mxu1 %vm302_vm2, %v14273_v47  ;;  %v3332_v53 = vsel %vm3326_vm15, %v14484_v51, %v3323_v52  ;;  %11688 = vmatmul.msk.f32.vlgmr.msrb.gmra.mxu0 %vm302_vm2, %v14397_v18  ;;  %v2187_v27 = vadd.f32 %v2043_v1, %v1966_v45 }
 0x229   :  { %11683 = vmatmul.msk.f32.gmra.mxu2 %vm302_vm2, %v14273_v47  ;;  %11697 = vmatmul.msk.f32.vlgmr.msrb.gmra.mxu3 %vm302_vm2, %v14397_v18 }
 0x22a   :  { %11711 = vmatpush.msk.msrb.mxu0 %vm307_vm1, %v3329_v15  ;;  %11720 = vmatpush.msk.msrb.mxu3 %vm307_vm1, %v3332_v53  ;;  %v3333_v15 = vsel %vm3326_vm15, %v3323_v52, %v14515_v31 }
 0x22b   :  { %4632 = vrot.lane.b32.xlu0 %v13972_v4, %s12881_s22 }
 0x22c   :  { %v2092_v29 = vpop.f32.mrf.mxu2  ;;  %v2264_v60 = vpop.f32.mrf.mxu3 }
 0x22d   :  { %v14600_v47 = vadd.f32 %v2092_v29, %v14453_v10  ;;  %v14602_v42 = vpop.f32.mrf.mxu1  ;;  %v14606_v24 = vadd.f32 %v2264_v60, %v2187_v27  ;;  %v14615_v10 = vld [vmem:[#allocation2 + $0x8] sm:$0xff]  ;;  %v3546_v3 = vpop.permute.xlu0 %3545 }
 0x22e   :  { %v2138_v61 = vpop.f32.mrf.mxu0  ;;  %4819 = vrot.lane.b32.xlu2 %v13972_v4, %s12934_s28  ;;  %v14611_v1 = vpop.permute.xlu2 %3537  ;;  %v1973_v4 = vadd.f32 %v14449_v30, %v14355_v25 }
 0x22f   :  { %v3536_v41 = vpop.permute.xlu1 %3535  ;;  %4634 = vrot.lane.b32.xlu1 %v13982_v37, %s12881_s22 }
 0x230   :  { %11691 = vmatmul.msk.f32.vlgmr.msrb.gmra.mxu1 %vm302_vm2, %v14397_v18  ;;  %11689 = vmatmul.msk.f32.gmra.mxu0 %vm302_vm2, %v14363_v8  ;;  %v2194_v51 = vadd.f32 %v2046_v6, %v1973_v4  ;;  %v1970_v6 = vadd.f32 %v14478_v55, %v14384_v50 }
 0x231   :  { %11694 = vmatmul.msk.f32.vlgmr.msrb.gmra.mxu2 %vm302_vm2, %v14397_v18  ;;  %11698 = vmatmul.msk.f32.gmra.mxu3 %vm302_vm2, %v14363_v8 }
 0x232   :  { %11714 = vmatpush.msk.msrb.mxu1 %vm307_vm1, %v3330_v33  ;;  %11717 = vmatpush.msk.msrb.mxu2 %vm307_vm1, %v3331_v0  ;;  %v2191_v31 = vadd.f32 %v2135_v5, %v1970_v6 }
 0x233   :  { %4821 = vrot.lane.b32.xlu0 %v14615_v10, %s12934_s28 }
 0x234   :  { %v2181_v32 = vpop.f32.mrf.mxu2  ;;  %v2267_v46 = vpop.f32.mrf.mxu3 }
 0x235   :  { %v14632_v48 = vadd.f32 %v2181_v32, %v14482_v63  ;;  %v14634_v7 = vpop.f32.mrf.mxu1  ;;  %v14638_v25 = vadd.f32 %v2267_v46, %v2194_v51  ;;  %v3550_v63 = vsel %vm3547_vm7, %v3536_v41, %v14611_v1  ;;  %v14658_v52 = vpop.permute.xlu0 %3754 }
 0x236   :  { %v2287_v30 = vpop.f32.mrf.mxu0  ;;  %v3532_v2 = vpop.permute.xlu2 %3531 }
 0x237   :  { %v3534_v53 = vpop.permute.xlu1 %3533  ;;  %4823 = vrot.lane.b32.xlu1 %v13982_v37, %s12934_s28  ;;  %v1977_v37 = vadd.f32 %v14509_v26, %v14416_v19 }
 0x238   :  { %11692 = vmatmul.msk.f32.gmra.mxu1 %vm302_vm2, %v14363_v8  ;;  %11700 = vmatmul.msk.f32.vlgmr.msra.gmra.mxu0 %vm302_vm2, %v14397_v18  ;;  %v3549_v33 = vsel %vm3547_vm7, %v3534_v53, %v3536_v41 }
 0x239   :  { %11695 = vmatmul.msk.f32.gmra.mxu2 %vm302_vm2, %v14363_v8  ;;  %11709 = vmatmul.msk.f32.vlgmr.msra.gmra.mxu3 %vm302_vm2, %v14520_v54 }
 0x23a   :  { %11723 = vmatpush.msk.msra.mxu0 %vm307_vm1, %v3333_v15  ;;  %11732 = vmatpush.msk.msra.mxu3 %vm307_vm1, %v3550_v63  ;;  %v3551_v15 = vsel %vm3547_vm7, %v14611_v1, %v14581_v43 }
 0x23b   :  { %4830 = vrot.lane.b32.xlu0 %v14160_v58, %s12901_s8 }
 0x23c   :  { %v2184_v45 = vpop.f32.mrf.mxu2  ;;  %v2356_v29 = vpop.f32.mrf.mxu3 }
 0x23d   :  { %v14661_v27 = vadd.f32 %v2184_v45, %v14513_v11  ;;  %v14663_v60 = vpop.f32.mrf.mxu1  ;;  %v14667_v50 = vadd.f32 %v2356_v29, %v2191_v31  ;;  %v3548_v11 = vsel %vm3547_vm7, %v3532_v2, %v3534_v53  ;;  %v14696_v46 = vpop.permute.xlu0 %3760  ;;  %v2188_v53 = vadd.f32 %v14541_v56, %v14447_v44 }
 0x23e   :  { %v2290_v55 = vpop.f32.mrf.mxu0  ;;  %v3544_v0 = vpop.permute.xlu2 %3543  ;;  %v2195_v29 = vadd.f32 %v14571_v13, %v14476_v49 }
 0x23f   :  { %v14670_v4 = vpop.permute.xlu1 %3529  ;;  %5016 = vrot.lane.b32.xlu1 %v14615_v10, %s12906_s19 }
 0x240   :  { %11703 = vmatmul.msk.f32.vlgmr.msra.gmra.mxu1 %vm302_vm2, %v14397_v18  ;;  %11701 = vmatmul.msk.f32.gmra.mxu0 %vm302_vm2, %v14363_v8  ;;  %v2198_v18 = vadd.f32 %v2138_v61, %v1977_v37 }
 0x241   :  { %11706 = vmatmul.msk.f32.vlgmr.msra.gmra.mxu2 %vm302_vm2, %v14520_v54  ;;  %11710 = vmatmul.msk.f32.gmra.mxu3 %vm302_vm2, %v14551_v38 }
 0x242   :  { %11729 = vmatpush.msk.msra.mxu2 %vm307_vm1, %v3549_v33  ;;  %11726 = vmatpush.msk.msra.mxu1 %vm307_vm1, %v3548_v11  ;;  %v2416_v33 = vadd.f32 %v2290_v55, %v2195_v29 }
 0x243   :  { %5020 = vrot.lane.b32.xlu0 %v14160_v58, %s12902_s7 }
 0x244   :  { %v2333_v5 = vpop.f32.mrf.mxu2  ;;  %v2359_v51 = vpop.f32.mrf.mxu3 }
 0x245   :  { %v14688_v41 = vadd.f32 %v2333_v5, %v14544_v62  ;;  %v14690_v32 = vpop.f32.mrf.mxu1  ;;  %v14694_v19 = vadd.f32 %v2359_v51, %v2198_v18  ;;  %v3554_v62 = vsel %vm3547_vm7, %v3544_v0, %v3546_v3 }
 0x246   :  { %v2379_v26 = vpop.f32.mrf.mxu0  ;;  %v3753_v2 = vpop.permute.xlu2 %3752 }
 0x247   :  { %v3542_v61 = vpop.permute.xlu1 %3541  ;;  %5206 = vrot.lane.b32.xlu1 %v14615_v10, %s12935_s29  ;;  %v3769_v5 = vsel %vm3768_vm8, %v3753_v2, %v14658_v52 }
 0x248   :  { %11704 = vmatmul.msk.f32.gmra.mxu1 %vm302_vm2, %v14363_v8  ;;  %11712 = vmatmul.msk.f32.vlgmr.msrb.gmra.mxu0 %vm302_vm2, %v14520_v54  ;;  %v2409_v8 = vadd.f32 %v2287_v30, %v2188_v53  ;;  %v3552_v31 = vsel %vm3547_vm7, %v14581_v43, %v3542_v61  ;;  %v14732_v30 = vpop.permute.xlu0 %3762 }
 0x249   :  { %11707 = vmatmul.msk.f32.gmra.mxu2 %vm302_vm2, %v14551_v38  ;;  %11721 = vmatmul.msk.f32.vlgmr.msrb.gmra.mxu3 %vm302_vm2, %v14520_v54 }
 0x24a   :  { %11735 = vmatpush.msk.msrb.mxu0 %vm307_vm1, %v3551_v15  ;;  %11744 = vmatpush.msk.msrb.mxu3 %vm307_vm1, %v3554_v62 }
 0x24b   :  { %5210 = vrot.lane.b32.xlu0 %v14160_v58, %s12904_s18 }
 0x24c   :  { %v2336_v1 = vpop.f32.mrf.mxu2  ;;  %v2508_v63 = vpop.f32.mrf.mxu3 }
 0x24d   :  { %v14717_v3 = vadd.f32 %v2336_v1, %v14575_v12  ;;  %v14719_v6 = vpop.f32.mrf.mxu1  ;;  %v14723_v44 = vadd.f32 %v2508_v63, %v2409_v8  ;;  %v3553_v12 = vsel %vm3547_vm7, %v3542_v61, %v3544_v0 }
 0x24e   :  { %v2382_v56 = vpop.f32.mrf.mxu0  ;;  %v3759_v43 = vpop.permute.xlu2 %3758 }
 0x24f   :  { %v14727_v45 = vpop.permute.xlu1 %3748  ;;  %5396 = vrot.lane.b32.xlu1 %v14615_v10, %s12936_s12 }
 0x250   :  { %11715 = vmatmul.msk.f32.vlgmr.msrb.gmra.mxu1 %vm302_vm2, %v14520_v54  ;;  %11713 = vmatmul.msk.f32.gmra.mxu0 %vm302_vm2, %v14551_v38  ;;  %v14770_v55 = vpop.permute.xlu0 %3969 }
 0x251   :  { %11718 = vmatmul.msk.f32.vlgmr.msrb.gmra.mxu2 %vm302_vm2, %v14520_v54  ;;  %11722 = vmatmul.msk.f32.gmra.mxu3 %vm302_vm2, %v14551_v38 }
 0x252   :  { %11738 = vmatpush.msk.msrb.mxu1 %vm307_vm1, %v3552_v31  ;;  %11741 = vmatpush.msk.msrb.mxu2 %vm307_vm1, %v3553_v12 }
 0x253   :  { %5400 = vrot.lane.b32.xlu0 %v14160_v58, %s12906_s19  ;;  %v3772_v58 = vsel %vm3768_vm8, %v3759_v43, %v14696_v46 }
 0x254   :  { %v2485_v0 = vpop.f32.mrf.mxu2  ;;  %v2511_v37 = vpop.f32.mrf.mxu3 }
 0x255   :  { %v14747_v11 = vadd.f32 %v2485_v0, %v14606_v24  ;;  %v14749_v18 = vpop.f32.mrf.mxu1  ;;  %v14751_v49 = vadd.f32 %v2511_v37, %v2416_v33  ;;  %v2192_v24 = vadd.f32 %v14602_v42, %v14507_v57 }
 0x256   :  { %v2531_v13 = vpop.f32.mrf.mxu0  ;;  %v3757_v62 = vpop.permute.xlu2 %3756 }
 0x257   :  { %v14755_v51 = vpop.permute.xlu1 %3750  ;;  %v2413_v15 = vadd.f32 %v2379_v26, %v2192_v24  ;;  %v3770_v42 = vsel %vm3768_vm8, %v14658_v52, %v3757_v62  ;;  %v3771_v26 = vsel %vm3768_vm8, %v3757_v62, %v3759_v43 }
 0x258   :  { %11716 = vmatmul.msk.f32.gmra.mxu1 %vm302_vm2, %v14551_v38  ;;  %11724 = vmatmul.msk.f32.vlgmr.msra.gmra.mxu0 %vm302_vm2, %v14520_v54  ;;  %v14800_v29 = vpop.permute.xlu0 %3977 }
 0x259   :  { %11719 = vmatmul.msk.f32.gmra.mxu2 %vm302_vm2, %v14551_v38  ;;  %11733 = vmatmul.msk.f32.vlgmr.msra.gmra.mxu3 %vm302_vm2, %v14546_v14 }
 0x25a   :  { %11747 = vmatpush.msk.msra.mxu0 %vm307_vm1, %v3769_v5  ;;  %11756 = vmatpush.msk.msra.mxu3 %vm307_vm1, %v3772_v58 }
 0x25c   :  { %v2488_v61 = vpop.f32.mrf.mxu2  ;;  %v2600_v53 = vpop.f32.mrf.mxu3 }
 0x25d   :  { %v14774_v2 = vadd.f32 %v2488_v61, %v14638_v25  ;;  %v14776_v54 = vpop.f32.mrf.mxu1  ;;  %v14778_v8 = vadd.f32 %v2600_v53, %v2413_v15  ;;  %v2199_v25 = vadd.f32 %v14634_v7, %v14539_v9  ;;  %v3773_v7 = vsel %vm3768_vm8, %v14696_v46, %v14732_v30 }
 0x25e   :  { %v2534_v57 = vpop.f32.mrf.mxu0  ;;  %v3976_v33 = vpop.permute.xlu2 %3975  ;;  %v2410_v46 = vadd.f32 %v14663_v60, %v14569_v59 }
 0x25f   :  { %v3974_v1 = vpop.permute.xlu1 %3973  ;;  %v2420_v52 = vadd.f32 %v2382_v56, %v2199_v25 }
 0x260   :  { %11727 = vmatmul.msk.f32.vlgmr.msra.gmra.mxu1 %vm302_vm2, %v14546_v14  ;;  %11725 = vmatmul.msk.f32.gmra.mxu0 %vm302_vm2, %v14551_v38  ;;  %v2631_v10 = vadd.f32 %v2531_v13, %v2410_v46  ;;  %v3984_v62 = vpop.permute.xlu0 %3983 }
 0x261   :  { %11730 = vmatmul.msk.f32.vlgmr.msra.gmra.mxu2 %vm302_vm2, %v14546_v14  ;;  %11734 = vmatmul.msk.f32.gmra.mxu3 %vm302_vm2, %v14670_v4 }
 0x262   :  { %11750 = vmatpush.msk.msra.mxu1 %vm307_vm1, %v3770_v42  ;;  %11753 = vmatpush.msk.msra.mxu2 %vm307_vm1, %v3771_v26 }
 0x264   :  { %v2577_v63 = vpop.f32.mrf.mxu2  ;;  %v2603_v12 = vpop.f32.mrf.mxu3 }
 0x265   :  { %v14796_v31 = vadd.f32 %v2577_v63, %v14667_v50  ;;  %v14798_v38 = vpop.f32.mrf.mxu1  ;;  %v14802_v43 = vadd.f32 %v2603_v12, %v2420_v52  ;;  %v3990_v50 = vsel %vm3989_vm9, %v3974_v1, %v3976_v33 }
 0x266   :  { %v2623_v9 = vpop.f32.mrf.mxu0  ;;  %v3767_v60 = vpop.permute.xlu2 %3766 }
 0x267   :  { %v3765_v0 = vpop.permute.xlu1 %3764 }
 0x268   :  { %11728 = vmatmul.msk.f32.gmra.mxu1 %vm302_vm2, %v14670_v4  ;;  %11736 = vmatmul.msk.f32.vlgmr.msrb.gmra.mxu0 %vm302_vm2, %v14546_v14  ;;  %v3774_v59 = vsel %vm3768_vm8, %v14732_v30, %v3765_v0  ;;  %v3775_v13 = vsel %vm3768_vm8, %v3765_v0, %v3767_v60  ;;  %v4197_v63 = vpop.permute.xlu0 %4196  ;;  %vm8738_vm8 = vcmask 809984  }
 0x269   :  { %11731 = vmatmul.msk.f32.gmra.mxu2 %vm302_vm2, %v14670_v4  ;;  %11745 = vmatmul.msk.f32.vlgmr.msrb.gmra.mxu3 %vm302_vm2, %v14546_v14 }
 0x26a   :  { %11759 = vmatpush.msk.msrb.mxu0 %vm307_vm1, %v3773_v7  ;;  %11768 = vmatpush.msk.msrb.mxu3 %vm307_vm1, %v3990_v50 }
 0x26c   :  { %v2580_v56 = vpop.f32.mrf.mxu2  ;;  %v2752_v5 = vpop.f32.mrf.mxu3 }
 0x26d   :  { %v14823_v37 = vadd.f32 %v2580_v56, %v14694_v19  ;;  %v14825_v58 = vpop.f32.mrf.mxu1  ;;  %v14827_v24 = vadd.f32 %v2752_v5, %v2631_v10  ;;  %v2417_v19 = vadd.f32 %v14690_v32, %v14600_v47  ;;  %v3991_v47 = vsel %vm3989_vm9, %v3976_v33, %v14800_v29 }
 0x26e   :  { %v2626_v15 = vpop.f32.mrf.mxu0  ;;  %v3982_v32 = vpop.permute.xlu2 %3981 }
 0x26f   :  { %v14831_v61 = vpop.permute.xlu1 %3971  ;;  %v2638_v30 = vadd.f32 %v2534_v57, %v2417_v19  ;;  %v3994_v52 = vsel %vm3989_vm9, %v3982_v32, %v3984_v62  ;;  %v255_v19 = vld [vmem:[#allocation2 + $0x18] sm:$0xf] }
 0x270   :  { %11739 = vmatmul.msk.f32.vlgmr.msrb.gmra.mxu1 %vm302_vm2, %v14546_v14  ;;  %11737 = vmatmul.msk.f32.gmra.mxu0 %vm302_vm2, %v14670_v4  ;;  %v4195_v56 = vpop.permute.xlu0 %4194 }
 0x271   :  { %11742 = vmatmul.msk.f32.vlgmr.msrb.gmra.mxu2 %vm302_vm2, %v14546_v14  ;;  %11746 = vmatmul.msk.f32.gmra.mxu3 %vm302_vm2, %v14670_v4 }
 0x272   :  { %11762 = vmatpush.msk.msrb.mxu1 %vm307_vm1, %v3774_v59  ;;  %11765 = vmatpush.msk.msrb.mxu2 %vm307_vm1, %v3775_v13 }
 0x273   :  { %4825 = vrot.lane.b32.xlu2 %v255_v19, %s12934_s28 }
 0x274   :  { %v2729_v53 = vpop.f32.mrf.mxu2  ;;  %v2755_v1 = vpop.f32.mrf.mxu3 }
 0x275   :  { %v14847_v42 = vadd.f32 %v2729_v53, %v14723_v44  ;;  %v14849_v26 = vpop.f32.mrf.mxu1  ;;  %v14851_v25 = vadd.f32 %v2755_v1, %v2638_v30  ;;  %v2414_v44 = vadd.f32 %v14719_v6, %v14632_v48 }
 0x276   :  { %v2775_v14 = vpop.f32.mrf.mxu0  ;;  %v3986_v6 = vpop.permute.xlu2 %3985 }
 0x277   :  { %v3980_v57 = vpop.permute.xlu1 %3979  ;;  %v2635_v12 = vadd.f32 %v2623_v9, %v2414_v44  ;;  %v3995_v30 = vsel %vm3989_vm9, %v3984_v62, %v3986_v6 }
 0x278   :  { %11740 = vmatmul.msk.f32.gmra.mxu1 %vm302_vm2, %v14670_v4  ;;  %11748 = vmatmul.msk.f32.vlgmr.msra.gmra.mxu0 %vm302_vm2, %v14727_v45  ;;  %v3992_v48 = vsel %vm3989_vm9, %v14800_v29, %v3980_v57  ;;  %v3993_v10 = vsel %vm3989_vm9, %v3980_v57, %v3982_v32  ;;  %v14919_v44 = vpop.permute.xlu0 %4192 }
 0x279   :  { %11743 = vmatmul.msk.f32.gmra.mxu2 %vm302_vm2, %v14670_v4  ;;  %11757 = vmatmul.msk.f32.vlgmr.msra.gmra.mxu3 %vm302_vm2, %v14727_v45 }
 0x27a   :  { %11771 = vmatpush.msk.msra.mxu0 %vm307_vm1, %v3991_v47  ;;  %11780 = vmatpush.msk.msra.mxu3 %vm307_vm1, %v3994_v52 }
 0x27b   :  { %5018 = vrot.lane.b32.xlu2 %v255_v19, %s12906_s19 }
 0x27c   :  { %v2732_v7 = vpop.f32.mrf.mxu2  ;;  %v2844_v4 = vpop.f32.mrf.mxu3 }
 0x27d   :  { %v14869_v33 = vadd.f32 %v2732_v7, %v14751_v49  ;;  %v14871_v0 = vpop.f32.mrf.mxu1  ;;  %v14873_v50 = vadd.f32 %v2844_v4, %v2635_v12  ;;  %v2421_v49 = vadd.f32 %v14749_v18, %v14661_v27 }
 0x27e   :  { %v2778_v46 = vpop.f32.mrf.mxu0  ;;  %v14899_v53 = vpop.permute.xlu2 %4190 }
 0x27f   :  { %v4199_v29 = vpop.permute.xlu1 %4198  ;;  %v2642_v9 = vadd.f32 %v2626_v15, %v2421_v49 }
 0x280   :  { %11751 = vmatmul.msk.f32.vlgmr.msra.gmra.mxu1 %vm302_vm2, %v14727_v45  ;;  %11749 = vmatmul.msk.f32.gmra.mxu0 %vm302_vm2, %v14755_v51  ;;  %v4212_v15 = vsel %vm4210_vm10, %v4197_v63, %v4199_v29 }
 0x281   :  { %11754 = vmatmul.msk.f32.vlgmr.msra.gmra.mxu2 %vm302_vm2, %v14727_v45  ;;  %11758 = vmatmul.msk.f32.gmra.mxu3 %vm302_vm2, %v14755_v51 }
 0x282   :  { %11774 = vmatpush.msk.msra.mxu1 %vm307_vm1, %v3992_v48  ;;  %11777 = vmatpush.msk.msra.mxu2 %vm307_vm1, %v3993_v10 }
 0x283   :  { %5208 = vrot.lane.b32.xlu2 %v255_v19, %s12935_s29  ;;  %s11395_s29 = sshll.u32 %s17923_s14, 4  ;;  %s11396_s29 = int_to_ptr.hbm [resolvable:$true] %s11395_s29 }
 0x284   :  { %v2821_v5 = vpop.f32.mrf.mxu2  ;;  %v2847_v60 = vpop.f32.mrf.mxu3 }
 0x285   :  { %v14891_v59 = vadd.f32 %v2821_v5, %v14778_v8  ;;  %v14893_v13 = vpop.f32.mrf.mxu1  ;;  %v14895_v27 = vadd.f32 %v2847_v60, %v2642_v9  ;;  %v2632_v8 = vadd.f32 %v14776_v54, %v14688_v41 }
 0x286   :  { %v2927_v18 = vpop.f32.mrf.mxu0  ;;  %v4201_v7 = vpop.permute.xlu2 %4200 }
 0x287   :  { %v2853_v62 = vadd.f32 %v2775_v14, %v2632_v8  ;;  %v3988_v47 = vpop.permute.xlu1 %3987  ;;  %v4211_v14 = vsel %vm4210_vm10, %v4195_v56, %v4197_v63  ;;  %v4203_v56 = vpop.permute.xlu0 %4202 }
 0x288   :  { %11752 = vmatmul.msk.f32.gmra.mxu1 %vm302_vm2, %v14755_v51  ;;  %11760 = vmatmul.msk.f32.vlgmr.msrb.gmra.mxu0 %vm302_vm2, %v14727_v45  ;;  %v3996_v54 = vsel %vm3989_vm9, %v3986_v6, %v3988_v47  ;;  %vm8626_vm9 = vcmask 64512  }
 0x289   :  { %11755 = vmatmul.msk.f32.gmra.mxu2 %vm302_vm2, %v14755_v51  ;;  %11769 = vmatmul.msk.f32.vlgmr.msrb.gmra.mxu3 %vm302_vm2, %v14770_v55 }
 0x28a   :  { %11783 = vmatpush.msk.msrb.mxu0 %vm307_vm1, %v3995_v30  ;;  %11792 = vmatpush.msk.msrb.mxu3 %vm307_vm1, %v4212_v15 }
 0x28b   :  { %5398 = vrot.lane.b32.xlu2 %v255_v19, %s12936_s12 }
 0x28c   :  { %v2824_v1 = vpop.f32.mrf.mxu2  ;;  %v2996_v52 = vpop.f32.mrf.mxu3 }
 0x28d   :  { %v14915_v32 = vadd.f32 %v2824_v1, %v14802_v43  ;;  %v14917_v57 = vpop.f32.mrf.mxu1  ;;  %v14921_v12 = vadd.f32 %v2996_v52, %v2853_v62  ;;  %v2639_v43 = vadd.f32 %v14798_v38, %v14717_v3  ;;  %v4213_v3 = vsel %vm4210_vm10, %v4199_v29, %v4201_v7 }
 0x28e   :  { %v2930_v41 = vpop.f32.mrf.mxu0  ;;  %v4207_v9 = vpop.permute.xlu2 %4206 }
 0x28f   :  { %v2860_v63 = vadd.f32 %v2778_v46, %v2639_v43  ;;  %v4205_v38 = vpop.permute.xlu1 %4204  ;;  %v4422_v1 = vpop.permute.xlu0 %4421 }
 0x290   :  { %11763 = vmatmul.msk.f32.vlgmr.msrb.gmra.mxu1 %vm302_vm2, %v14727_v45  ;;  %11761 = vmatmul.msk.f32.gmra.mxu0 %vm302_vm2, %v14755_v51  ;;  %v4216_v46 = vsel %vm4210_vm10, %v4205_v38, %v4207_v9 }
 0x291   :  { %11766 = vmatmul.msk.f32.vlgmr.msrb.gmra.mxu2 %vm302_vm2, %v14727_v45  ;;  %11770 = vmatmul.msk.f32.gmra.mxu3 %vm302_vm2, %v14831_v61 }
 0x292   :  { %11786 = vmatpush.msk.msrb.mxu1 %vm307_vm1, %v3996_v54  ;;  %11789 = vmatpush.msk.msrb.mxu2 %vm307_vm1, %v4211_v14 }
 0x294   :  { %v2973_v4 = vpop.f32.mrf.mxu2  ;;  %v2999_v6 = vpop.f32.mrf.mxu3 }
 0x295   :  { %v14939_v48 = vadd.f32 %v2973_v4, %v14827_v24  ;;  %v14941_v10 = vpop.f32.mrf.mxu1  ;;  %v14943_v49 = vadd.f32 %v2999_v6, %v2860_v63  ;;  %v2850_v24 = vadd.f32 %v14825_v58, %v14747_v11  ;;  %v4214_v11 = vsel %vm4210_vm10, %v4201_v7, %v4203_v56 }
 0x296   :  { %v3019_v45 = vpop.f32.mrf.mxu0  ;;  %v4420_v62 = vpop.permute.xlu2 %4419 }
 0x297   :  { %v3071_v29 = vadd.f32 %v2927_v18, %v2850_v24  ;;  %v4209_v58 = vpop.permute.xlu1 %4208  ;;  %v4215_v18 = vsel %vm4210_vm10, %v4203_v56, %v4205_v38  ;;  %v4416_v4 = vpop.permute.xlu0 %4415 }
 0x298   :  { %11764 = vmatmul.msk.f32.gmra.mxu1 %vm302_vm2, %v14755_v51  ;;  %11772 = vmatmul.msk.f32.vlgmr.msra.gmra.mxu0 %vm302_vm2, %v14770_v55 }
 0x299   :  { %11767 = vmatmul.msk.f32.gmra.mxu2 %vm302_vm2, %v14755_v51  ;;  %11781 = vmatmul.msk.f32.vlgmr.msra.gmra.mxu3 %vm302_vm2, %v14770_v55 }
 0x29a   :  { %11795 = vmatpush.msk.msra.mxu0 %vm307_vm1, %v4213_v3  ;;  %11804 = vmatpush.msk.msra.mxu3 %vm307_vm1, %v4216_v46 }
 0x29c   :  { %v2976_v5 = vpop.f32.mrf.mxu2  ;;  %v3148_v30 = vpop.f32.mrf.mxu3 }
 0x29d   :  { %v14961_v60 = vadd.f32 %v2976_v5, %v14851_v25  ;;  %v14963_v51 = vpop.f32.mrf.mxu1  ;;  %v14965_v15 = vadd.f32 %v3148_v30, %v3071_v29  ;;  %v2857_v25 = vadd.f32 %v14849_v26, %v14774_v2  ;;  %v4217_v26 = vsel %vm4210_vm10, %v4207_v9, %v4209_v58 }
 0x29e   :  { %v3022_v8 = vpop.f32.mrf.mxu0  ;;  %v4418_v63 = vpop.permute.xlu2 %4417  ;;  %vm8523_vm10 = vcmask 900096  }
 0x29f   :  { %v3078_v19 = vadd.f32 %v2930_v41, %v2857_v25  ;;  %v14990_v43 = vpop.permute.xlu1 %4411  ;;  %v4434_v41 = vsel %vm4431_vm11, %v4420_v62, %v4422_v1  ;;  %v4433_v29 = vsel %vm4431_vm11, %v4418_v63, %v4420_v62 }
 0x2a0   :  { %11775 = vmatmul.msk.f32.vlgmr.msra.gmra.mxu1 %vm302_vm2, %v14770_v55  ;;  %11773 = vmatmul.msk.f32.gmra.mxu0 %vm302_vm2, %v14831_v61 }
 0x2a1   :  { %11778 = vmatmul.msk.f32.vlgmr.msra.gmra.mxu2 %vm302_vm2, %v14770_v55  ;;  %11782 = vmatmul.msk.f32.gmra.mxu3 %vm302_vm2, %v14831_v61 }
 0x2a2   :  { %11798 = vmatpush.msk.msra.mxu1 %vm307_vm1, %v4214_v11  ;;  %11801 = vmatpush.msk.msra.mxu2 %vm307_vm1, %v4215_v18 }
 0x2a4   :  { %v3065_v47 = vpop.f32.mrf.mxu2  ;;  %v3151_v54 = vpop.f32.mrf.mxu3 }
 0x2a5   :  { %v14983_v52 = vadd.f32 %v3065_v47, %v14873_v50  ;;  %v14985_v7 = vpop.f32.mrf.mxu1  ;;  %v14987_v14 = vadd.f32 %v3151_v54, %v3078_v19  ;;  %v2854_v50 = vadd.f32 %v14871_v0, %v14796_v31  ;;  %v4432_v31 = vsel %vm4431_vm11, %v4416_v4, %v4418_v63 }
 0x2a6   :  { %v3171_v2 = vpop.f32.mrf.mxu0 }
 0x2a7   :  { %v3075_v6 = vadd.f32 %v3019_v45, %v2854_v50  ;;  %v4424_v0 = vpop.permute.xlu1 %4423  ;;  %v15024_v45 = vpop.permute.xlu2 %4413 }
 0x2a8   :  { %11776 = vmatmul.msk.f32.gmra.mxu1 %vm302_vm2, %v14831_v61  ;;  %11784 = vmatmul.msk.f32.vlgmr.msrb.gmra.mxu0 %vm302_vm2, %v14770_v55  ;;  %v4435_v18 = vsel %vm4431_vm11, %v4422_v1, %v4424_v0 }
 0x2a9   :  { %11779 = vmatmul.msk.f32.gmra.mxu2 %vm302_vm2, %v14831_v61  ;;  %11793 = vmatmul.msk.f32.vlgmr.msrb.gmra.mxu3 %vm302_vm2, %v14899_v53 }
 0x2aa   :  { %11807 = vmatpush.msk.msrb.mxu0 %vm307_vm1, %v4217_v26  ;;  %11816 = vmatpush.msk.msrb.mxu3 %vm307_vm1, %v4434_v41 }
 0x2ac   :  { %v3068_v3 = vpop.f32.mrf.mxu2  ;;  %v3240_v9 = vpop.f32.mrf.mxu3 }
 0x2ad   :  { %v15006_v38 = vadd.f32 %v3068_v3, %v14895_v27  ;;  %v15008_v56 = vpop.f32.mrf.mxu1  ;;  %v15010_v46 = vadd.f32 %v3240_v9, %v3075_v6  ;;  %v2861_v27 = vadd.f32 %v14893_v13, %v14823_v37  ;;  %v4428_v13 = vpop.permute.xlu0 %4427 }
 0x2ae   :  { %v3174_v24 = vpop.f32.mrf.mxu0 }
 0x2af   :  { %v4430_v25 = vpop.permute.xlu1 %4429  ;;  %v4426_v1 = vpop.permute.xlu2 %4425 }
 0x2b0   :  { %11787 = vmatmul.msk.f32.vlgmr.msrb.gmra.mxu1 %vm302_vm2, %v14770_v55  ;;  %11785 = vmatmul.msk.f32.gmra.mxu0 %vm302_vm2, %v14831_v61  ;;  %v3082_v55 = vadd.f32 %v3022_v8, %v2861_v27  ;;  %v4438_v19 = vsel %vm4431_vm11, %v4428_v13, %v4430_v25  ;;  %v3294_v25 = vadd.f32 %v15008_v56, %v14939_v48 }
 0x2b1   :  { %11790 = vmatmul.msk.f32.vlgmr.msrb.gmra.mxu2 %vm302_vm2, %v14899_v53  ;;  %11794 = vmatmul.msk.f32.gmra.mxu3 %vm302_vm2, %v14919_v44 }
 0x2b2   :  { %11810 = vmatpush.msk.msrb.mxu1 %vm307_vm1, %v4432_v31  ;;  %11813 = vmatpush.msk.msrb.mxu2 %vm307_vm1, %v4433_v29 }
 0x2b4   :  { %v3217_v5 = vpop.f32.mrf.mxu2  ;;  %v3243_v11 = vpop.f32.mrf.mxu3 }
 0x2b5   :  { %v15029_v30 = vadd.f32 %v3217_v5, %v14921_v12  ;;  %v15031_v58 = vpop.f32.mrf.mxu1  ;;  %v15033_v62 = vadd.f32 %v3243_v11, %v3082_v55  ;;  %v3072_v12 = vadd.f32 %v14917_v57, %v14847_v42  ;;  %v4436_v42 = vsel %vm4431_vm11, %v4424_v0, %v4426_v1  ;;  %v12523_v5 = vld [vmem:[%s17909_s0 + $0x18] sm:$0x3f] }
 0x2b6   :  { %v3263_v37 = vpop.f32.mrf.mxu0  ;;  %v4437_v57 = vsel %vm4431_vm11, %v4426_v1, %v4428_v13  ;;  %v3083_v55 = vadd.f32 %v14985_v7, %v14915_v32  ;;  %vm8837_vm11 = vcmask 801792  }
 0x2b7   :  { %v3293_v8 = vadd.f32 %v3171_v2, %v3072_v12 }
 0x2b8   :  { %11788 = vmatmul.msk.f32.gmra.mxu1 %vm302_vm2, %v14831_v61  ;;  %11796 = vmatmul.msk.f32.vlgmr.msra.gmra.mxu0 %vm302_vm2, %v14899_v53 }
 0x2b9   :  { %11791 = vmatmul.msk.f32.gmra.mxu2 %vm302_vm2, %v14919_v44  ;;  %11805 = vmatmul.msk.f32.vlgmr.msra.gmra.mxu3 %vm302_vm2, %v14899_v53 }
 0x2ba   :  { %11819 = vmatpush.msk.msra.mxu0 %vm307_vm1, %v4435_v18  ;;  %11828 = vmatpush.msk.msra.mxu3 %vm307_vm1, %v4438_v19 }
 0x2bc   :  { %v3220_v61 = vpop.f32.mrf.mxu2  ;;  %v3392_v54 = vpop.f32.mrf.mxu3 }
 0x2bd   :  { %v15050_v47 = vadd.f32 %v3220_v61, %v14943_v49  ;;  %v15052_v26 = vpop.f32.mrf.mxu1  ;;  %v15054_v41 = vadd.f32 %v3392_v54, %v3293_v8  ;;  %v3079_v49 = vadd.f32 %v14941_v10, %v14869_v33  ;;  %v3076_v33 = vadd.f32 %v14963_v51, %v14891_v59  ;;  %v12520_v10 = vld [vmem:[%s17909_s0 + $0x8] sm:$0x3f]  ;;  %v12525_v54 = vld [vmem:[%s17909_s0 + $0x30] sm:$0x3f] }
 0x2be   :  { %v3266_v63 = vpop.f32.mrf.mxu0 }
 0x2bf   :  { %v3300_v2 = vadd.f32 %v3174_v24, %v3079_v49  ;;  %v3297_v24 = vadd.f32 %v3263_v37, %v3076_v33 }
 0x2c0   :  { %11799 = vmatmul.msk.f32.vlgmr.msra.gmra.mxu1 %vm302_vm2, %v14899_v53  ;;  %11797 = vmatmul.msk.f32.gmra.mxu0 %vm302_vm2, %v14919_v44 }
 0x2c1   :  { %11802 = vmatmul.msk.f32.vlgmr.msra.gmra.mxu2 %vm302_vm2, %v14899_v53  ;;  %11806 = vmatmul.msk.f32.gmra.mxu3 %vm302_vm2, %v14919_v44 }
 0x2c2   :  { %11822 = vmatpush.msk.msra.mxu1 %vm307_vm1, %v4436_v42  ;;  %11825 = vmatpush.msk.msra.mxu2 %vm307_vm1, %v4437_v57 }
 0x2c4   :  { %v3369_v50 = vpop.f32.mrf.mxu2  ;;  %v3395_v6 = vpop.f32.mrf.mxu3 }
 0x2c5   :  { %v15071_v4 = vadd.f32 %v3369_v50, %v14965_v15  ;;  %v15073_v3 = vpop.f32.mrf.mxu1  ;;  %v15075_v9 = vadd.f32 %v3395_v6, %v3300_v2  ;;  %v12521_v15 = vld [vmem:[%s17909_s0 + $0x20] sm:$0x3f]  ;;  %v3298_v50 = vadd.f32 %v15052_v26, %v14983_v52  ;;  %v4635_v26 = vpop.permute.xlu1 %4634 }
 0x2c6   :  { %v3415_v31 = vpop.f32.mrf.mxu0 }
 0x2c7   :  { %v3515_v19 = vadd.f32 %v3415_v31, %v3294_v25 }
 0x2c8   :  { %11800 = vmatmul.msk.f32.gmra.mxu1 %vm302_vm2, %v14919_v44  ;;  %11808 = vmatmul.msk.f32.vlgmr.msrb.gmra.mxu0 %vm302_vm2, %v14899_v53 }
 0x2c9   :  { %11803 = vmatmul.msk.f32.gmra.mxu2 %vm302_vm2, %v14919_v44  ;;  %11817 = vmatmul.msk.f32.vlgmr.msrb.gmra.mxu3 %vm302_vm2, %v14990_v43 }
 0x2ca   :  { %11831 = vmatpush.msk.msrb.mxu0 %vm307_vm1, %v12520_v10  ;;  %11840 = vmatpush.msk.msrb.mxu3 %vm307_vm1, %v12521_v15 }
 0x2cc   :  { %v3372_v53 = vpop.f32.mrf.mxu2  ;;  %v3484_v59 = vpop.f32.mrf.mxu3 }
 0x2cd   :  { %v15096_v0 = vadd.f32 %v3372_v53, %v14987_v14  ;;  %v15098_v51 = vpop.f32.mrf.mxu1  ;;  %v15100_v29 = vadd.f32 %v3484_v59, %v3297_v24  ;;  %v12522_v14 = vld [vmem:[%s17909_s0 + $0x10] sm:$0x3f] }
 0x2ce   :  { %v3418_v27 = vpop.f32.mrf.mxu0 }
 0x2d0   :  { %11811 = vmatmul.msk.f32.vlgmr.msrb.gmra.mxu1 %vm302_vm2, %v14990_v43  ;;  %11809 = vmatmul.msk.f32.gmra.mxu0 %vm302_vm2, %v14919_v44  ;;  %v3304_v44 = vadd.f32 %v3266_v63, %v3083_v55  ;;  %v12526_v63 = vld [vmem:[%s17909_s0 + $0x38] sm:$0x3f] }
 0x2d1   :  { %11814 = vmatmul.msk.f32.vlgmr.msrb.gmra.mxu2 %vm302_vm2, %v14990_v43  ;;  %11818 = vmatmul.msk.f32.gmra.mxu3 %vm302_vm2, %v15024_v45 }
 0x2d2   :  { %11834 = vmatpush.msk.msrb.mxu1 %vm307_vm1, %v12522_v14  ;;  %11837 = vmatpush.msk.msrb.mxu2 %vm307_vm1, %v12523_v5 }
 0x2d4   :  { %v3461_v11 = vpop.f32.mrf.mxu2  ;;  %v3487_v32 = vpop.f32.mrf.mxu3 }
 0x2d5   :  { %v15121_v37 = vadd.f32 %v3461_v11, %v15010_v46  ;;  %v15123_v7 = vpop.f32.mrf.mxu1  ;;  %v15125_v13 = vadd.f32 %v3487_v32, %v3304_v44  ;;  %v12524_v46 = vld [vmem:[%s17909_s0 + $0x28] sm:$0x3f]  ;;  %s12938_s0 = smov 120  }
 0x2d6   :  { %v3507_v18 = vpop.f32.mrf.mxu0 }
 0x2d7   :  { %v3519_v6 = vadd.f32 %v3507_v18, %v3298_v50 }
 0x2d8   :  { %11812 = vmatmul.msk.f32.gmra.mxu1 %vm302_vm2, %v15024_v45  ;;  %11820 = vmatmul.msk.f32.vlgmr.msra.gmra.mxu0 %vm302_vm2, %v14990_v43 }
 0x2d9   :  { %11815 = vmatmul.msk.f32.gmra.mxu2 %vm302_vm2, %v15024_v45  ;;  %11829 = vmatmul.msk.f32.vlgmr.msra.gmra.mxu3 %vm302_vm2, %v14990_v43 }
 0x2da   :  { %11843 = vmatpush.msk.msra.mxu0 %vm307_vm1, %v12524_v46  ;;  %11852 = vmatpush.msk.msra.mxu3 %vm307_vm1, %v13258_v20  ;;  %v15156_v20 = vpop.permute.xlu0 %4632 }
 0x2dc   :  { %v3464_v12 = vpop.f32.mrf.mxu2  ;;  %v3636_v61 = vpop.f32.mrf.mxu3 }
 0x2dd   :  { %v15144_v8 = vadd.f32 %v3464_v12, %v15033_v62  ;;  %v15146_v1 = vpop.f32.mrf.mxu1  ;;  %v15148_v48 = vadd.f32 %v3636_v61, %v3515_v19  ;;  %v3301_v62 = vadd.f32 %v15031_v58, %v14961_v60 }
 0x2de   :  { %v3510_v56 = vpop.f32.mrf.mxu0 }
 0x2e0   :  { %11823 = vmatmul.msk.f32.vlgmr.msra.gmra.mxu1 %vm302_vm2, %v14990_v43  ;;  %11821 = vmatmul.msk.f32.gmra.mxu0 %vm302_vm2, %v15024_v45 }
 0x2e1   :  { %11826 = vmatmul.msk.f32.vlgmr.msra.gmra.mxu2 %vm302_vm2, %v14990_v43  ;;  %11830 = vmatmul.msk.f32.gmra.mxu3 %vm302_vm2, %v15024_v45  ;;  %v3522_v43 = vadd.f32 %v3418_v27, %v3301_v62 }
 0x2e2   :  { %11846 = vmatpush.msk.msra.mxu1 %vm307_vm1, %v12525_v54  ;;  %11849 = vmatpush.msk.msra.mxu2 %vm307_vm1, %v12526_v63 }
 0x2e4   :  { %v3613_v42 = vpop.f32.mrf.mxu2  ;;  %v3639_v60 = vpop.f32.mrf.mxu3 }
 0x2e5   :  { %v15171_v57 = vadd.f32 %v3613_v42, %v15054_v41  ;;  %v15173_v58 = vpop.f32.mrf.mxu1  ;;  %v15175_v49 = vadd.f32 %v3639_v60, %v3522_v43  ;;  %v4822_v41 = vpop.permute.xlu0 %4821 }
 0x2e6   :  { %v3659_v2 = vpop.f32.mrf.mxu0 }
 0x2e8   :  { %11824 = vmatmul.msk.f32.gmra.mxu1 %vm302_vm2, %v15024_v45  ;;  %11832 = vmatmul.msk.f32.vlgmr.msrb.gmra.mxu0 %vm302_vm2, %v15156_v20 }
 0x2e9   :  { %11827 = vmatmul.msk.f32.gmra.mxu2 %vm302_vm2, %v15024_v45  ;;  %11841 = vmatmul.msk.f32.vlgmr.msrb.gmra.mxu3 %vm302_vm2, %v15156_v20 }
 0x2ea   :  { %11855 = vmatpush.msk.msrb.mxu0 %vm307_vm1, %v13261_v21  ;;  %11864 = vmatpush.msk.msrb.mxu3 %vm307_vm1, %v13272_v23  ;;  %v3305_v21 = vadd.f32 %v15073_v3, %v15006_v38  ;;  %v4820_v23 = vpop.permute.xlu2 %4819 }
 0x2eb   :  { %v15218_v14 = vsel %vm4827_vm12, %v4820_v23, %v4822_v41  ;;  %v17954_v23 = vld [vmem:[#allocation32_spill] sm:$0xff] }
 0x2ec   :  { %v3616_v31 = vpop.f32.mrf.mxu2  ;;  %v3728_v33 = vpop.f32.mrf.mxu3 }
 0x2ed   :  { %v15192_v45 = vadd.f32 %v3616_v31, %v15075_v9  ;;  %v15194_v10 = vpop.f32.mrf.mxu1  ;;  %v15196_v15 = vadd.f32 %v3728_v33, %v3519_v6  ;;  %v3526_v9 = vadd.f32 %v3510_v56, %v3305_v21  ;;  %v4831_v55 = vpop.permute.xlu0 %4830  ;;  %v17953_v21 = vld [vmem:[#allocation33_spill] sm:$0xff] }
 0x2ee   :  { %v3662_v52 = vpop.f32.mrf.mxu0 }
 0x2f0   :  { %11835 = vmatmul.msk.f32.vlgmr.msrb.gmra.mxu1 %vm302_vm2, %v15156_v20  ;;  %11833 = vmatmul.msk.f32.gmra.mxu0 %vm302_vm2, %v4635_v26 }
 0x2f1   :  { %11838 = vmatmul.msk.f32.vlgmr.msrb.gmra.mxu2 %vm302_vm2, %v15156_v20  ;;  %11842 = vmatmul.msk.f32.gmra.mxu3 %vm302_vm2, %v4635_v26 }
 0x2f2   :  { %11858 = vmatpush.msk.msrb.mxu1 %vm307_vm1, %v13238_v16  ;;  %11861 = vmatpush.msk.msrb.mxu2 %vm307_vm1, %v13264_v22  ;;  %v4832_v16 = vsel %vm295_vm0, %v13253_v17, %v4831_v55  ;;  %v3516_v22 = vadd.f32 %v15098_v51, %v15029_v30  ;;  %v4826_v17 = vpop.permute.xlu2 %4825 }
 0x2f4   :  { %v3705_v24 = vpop.f32.mrf.mxu2  ;;  %v3731_v59 = vpop.f32.mrf.mxu3  ;;  %v3737_v5 = vadd.f32 %v3659_v2, %v3516_v22 }
 0x2f5   :  { %v15211_v53 = vadd.f32 %v3705_v24, %v15100_v29  ;;  %v15213_v27 = vpop.f32.mrf.mxu1  ;;  %v15215_v38 = vadd.f32 %v3731_v59, %v3526_v9  ;;  %v4824_v29 = vpop.permute.xlu1 %4823 }
 0x2f6   :  { %v3811_v3 = vpop.f32.mrf.mxu0  ;;  %v15241_v51 = vsel %vm4827_vm12, %v4824_v29, %v4826_v17  ;;  %v17957_v17 = vld [vmem:[#allocation34_spill] sm:$0xff]  ;;  %vm9133_vm12 = vcmask 703488  }
 0x2f8   :  { %11836 = vmatmul.msk.f32.gmra.mxu1 %vm302_vm2, %v4635_v26  ;;  %11844 = vmatmul.msk.f32.vlgmr.msra.gmra.mxu0 %vm302_vm2, %v15156_v20 }
 0x2f9   :  { %11839 = vmatmul.msk.f32.gmra.mxu2 %vm302_vm2, %v4635_v26  ;;  %11853 = vmatmul.msk.f32.vlgmr.msra.gmra.mxu3 %vm302_vm2, %v15218_v14 }
 0x2fa   :  { %11867 = vmatpush.msk.msra.mxu0 %vm307_vm1, %v4832_v16  ;;  %11876 = vmatpush.msk.msra.mxu3 %vm307_vm1, %v13351_v35  ;;  %v3523_v35 = vadd.f32 %v15123_v7, %v15050_v47  ;;  %v5021_v47 = vpop.permute.xlu0 %5020  ;;  %v3734_v7 = vadd.f32 %v15146_v1, %v15071_v4 }
 0x2fc   :  { %v3708_v44 = vpop.f32.mrf.mxu2  ;;  %v3880_v32 = vpop.f32.mrf.mxu3 }
 0x2fd   :  { %v15234_v11 = vadd.f32 %v3708_v44, %v15125_v13  ;;  %v15236_v18 = vpop.f32.mrf.mxu1  ;;  %v15238_v25 = vadd.f32 %v3880_v32, %v3737_v5  ;;  %v3744_v13 = vadd.f32 %v3662_v52, %v3523_v35 }
 0x2fe   :  { %v3814_v30 = vpop.f32.mrf.mxu0 }
 0x300   :  { %11847 = vmatmul.msk.f32.vlgmr.msra.gmra.mxu1 %vm302_vm2, %v15156_v20  ;;  %11845 = vmatmul.msk.f32.gmra.mxu0 %vm302_vm2, %v4635_v26 }
 0x301   :  { %11850 = vmatmul.msk.f32.vlgmr.msra.gmra.mxu2 %vm302_vm2, %v15156_v20  ;;  %11854 = vmatmul.msk.f32.gmra.mxu3 %vm302_vm2, %v15241_v51 }
 0x302   :  { %11873 = vmatpush.msk.msra.mxu2 %vm307_vm1, %v13310_v28  ;;  %11870 = vmatpush.msk.msra.mxu1 %vm307_vm1, %v4831_v55  ;;  %v5022_v28 = vsel %vm680_vm3, %v13344_v34, %v5021_v47 }
 0x304   :  { %v3857_v46 = vpop.f32.mrf.mxu2  ;;  %v3883_v12 = vpop.f32.mrf.mxu3 }
 0x305   :  { %v15256_v19 = vadd.f32 %v3857_v46, %v15148_v48  ;;  %v15258_v61 = vpop.f32.mrf.mxu1  ;;  %v15260_v56 = vadd.f32 %v3883_v12, %v3744_v13  ;;  %v3955_v48 = vadd.f32 %v3811_v3, %v3734_v7 }
 0x306   :  { %v3903_v20 = vpop.f32.mrf.mxu0 }
 0x308   :  { %11848 = vmatmul.msk.f32.gmra.mxu1 %vm302_vm2, %v4635_v26  ;;  %11856 = vmatmul.msk.f32.vlgmr.msrb.gmra.mxu0 %vm302_vm2, %v15218_v14 }
 0x309   :  { %11851 = vmatmul.msk.f32.gmra.mxu2 %vm302_vm2, %v4635_v26  ;;  %11865 = vmatmul.msk.f32.vlgmr.msrb.gmra.mxu3 %vm302_vm2, %v15218_v14 }
 0x30a   :  { %11879 = vmatpush.msk.msrb.mxu0 %vm307_vm1, %v13376_v39  ;;  %11888 = vmatpush.msk.msrb.mxu3 %vm307_vm1, %v5022_v28  ;;  %v3741_v39 = vadd.f32 %v15173_v58, %v15096_v0  ;;  %v5017_v58 = vpop.permute.xlu1 %5016 }
 0x30c   :  { %v3860_v62 = vpop.f32.mrf.mxu2  ;;  %v4032_v63 = vpop.f32.mrf.mxu3  ;;  %v3962_v4 = vadd.f32 %v3814_v30, %v3741_v39 }
 0x30d   :  { %v15276_v54 = vadd.f32 %v3860_v62, %v15175_v49  ;;  %v15278_v43 = vpop.f32.mrf.mxu1  ;;  %v15280_v34 = vadd.f32 %v4032_v63, %v3955_v48 }
 0x30e   :  { %v3906_v42 = vpop.f32.mrf.mxu0 }
 0x310   :  { %11859 = vmatmul.msk.f32.vlgmr.msrb.gmra.mxu1 %vm302_vm2, %v15218_v14  ;;  %11857 = vmatmul.msk.f32.gmra.mxu0 %vm302_vm2, %v15241_v51 }
 0x311   :  { %11862 = vmatmul.msk.f32.vlgmr.msrb.gmra.mxu2 %vm302_vm2, %v15218_v14  ;;  %11866 = vmatmul.msk.f32.gmra.mxu3 %vm302_vm2, %v15241_v51 }
 0x312   :  { %11882 = vmatpush.msk.msrb.mxu1 %vm307_vm1, %v13381_v40  ;;  %11885 = vmatpush.msk.msrb.mxu2 %vm307_vm1, %v13357_v36  ;;  %v3738_v36 = vadd.f32 %v15194_v10, %v15121_v37  ;;  %v17951_v40 = vld [vmem:[#allocation35_spill] sm:$0xff]  ;;  %v5019_v37 = vpop.permute.xlu2 %5018  ;;  %v3745_v10 = vadd.f32 %v15213_v27, %v15144_v8  ;;  %v5211_v8 = vpop.permute.xlu0 %5210  ;;  %v17956_v27 = vld [vmem:[#allocation36_spill] sm:$0xff] }
 0x313   :  { %v5212_v32 = vsel %vm898_vm4, %v17957_v17, %v5211_v8  ;;  %v5207_v12 = vpop.permute.xlu1 %5206 }
 0x314   :  { %v3949_v1 = vpop.f32.mrf.mxu2  ;;  %v4035_v49 = vpop.f32.mrf.mxu3  ;;  %v3959_v41 = vadd.f32 %v3903_v20, %v3738_v36  ;;  %v3966_v9 = vadd.f32 %v3906_v42, %v3745_v10  ;;  %v17961_v20 = vld [vmem:[#allocation41_spill] sm:$0xff]  ;;  %v17963_v42 = vld [vmem:[#allocation38_spill] sm:$0xff]  ;;  %v17966_v36 = vld [vmem:[#allocation43_spill] sm:$0xff] }
 0x315   :  { %v15297_v60 = vadd.f32 %v3949_v1, %v15196_v15  ;;  %v15299_v2 = vpop.f32.mrf.mxu1  ;;  %v15301_v50 = vadd.f32 %v4035_v49, %v3962_v4  ;;  %v17969_v10 = vld [vmem:[#allocation42_spill] sm:$0xff] }
 0x316   :  { %v15303_v0 = vpop.f32.mrf.mxu0 }
 0x318   :  { %11860 = vmatmul.msk.f32.gmra.mxu1 %vm302_vm2, %v15241_v51  ;;  %11868 = vmatmul.msk.f32.vlgmr.msra.gmra.mxu0 %vm302_vm2, %v15218_v14 }
 0x319   :  { %11863 = vmatmul.msk.f32.gmra.mxu2 %vm302_vm2, %v15241_v51  ;;  %11877 = vmatmul.msk.f32.vlgmr.msra.gmra.mxu3 %vm302_vm2, %v5017_v58 }
 0x31a   :  { %11891 = vmatpush.msk.msra.mxu0 %vm307_vm1, %v5021_v47  ;;  %11900 = vmatpush.msk.msra.mxu3 %vm307_vm1, %v17951_v40  ;;  %v5209_v63 = vpop.permute.xlu2 %5208 }
 0x31c   :  { %v3952_v6 = vpop.f32.mrf.mxu2  ;;  %v4124_v33 = vpop.f32.mrf.mxu3 }
 0x31d   :  { %v15318_v31 = vadd.f32 %v3952_v6, %v15215_v38  ;;  %v15320_v15 = vpop.f32.mrf.mxu1  ;;  %v15322_v52 = vadd.f32 %v4124_v33, %v3959_v41  ;;  %v5401_v33 = vpop.permute.xlu0 %5400 }
 0x31e   :  { %v15324_v26 = vpop.f32.mrf.mxu0 }
 0x31f   :  { %17952 = vst [vmem:[#allocation35_spill] sm:$0xff] %v15318_v31  ;;  %v5717_v31 = vld [vmem:[#allocation7 + $0x2d8] sm:$0xff] }
 0x320   :  { %11871 = vmatmul.msk.f32.vlgmr.msra.gmra.mxu1 %vm302_vm2, %v15218_v14  ;;  %11869 = vmatmul.msk.f32.gmra.mxu0 %vm302_vm2, %v15241_v51 }
 0x321   :  { %11874 = vmatmul.msk.f32.vlgmr.msra.gmra.mxu2 %vm302_vm2, %v5017_v58  ;;  %11878 = vmatmul.msk.f32.gmra.mxu3 %vm302_vm2, %v5019_v37 }
 0x322   :  { %11894 = vmatpush.msk.msra.mxu1 %vm307_vm1, %v17953_v21  ;;  %11897 = vmatpush.msk.msra.mxu2 %vm307_vm1, %v17954_v23  ;;  %v5402_v21 = vsel %vm1116_vm5, %v17969_v10, %v5401_v33 }
 0x324   :  { %v4101_v24 = vpop.f32.mrf.mxu2  ;;  %v4127_v55 = vpop.f32.mrf.mxu3 }
 0x325   :  { %v15339_v59 = vadd.f32 %v4101_v24, %v15238_v25  ;;  %v15341_v38 = vpop.f32.mrf.mxu1  ;;  %v15343_v3 = vadd.f32 %v4127_v55, %v3966_v9  ;;  %v17958_v25 = vld [vmem:[#allocation37_spill] sm:$0xff] }
 0x326   :  { %v15345_v14 = vpop.f32.mrf.mxu0 }
 0x327   :  { %17955 = vst [vmem:[#allocation33_spill] sm:$0xff] %v15343_v3  ;;  %v6389_v3 = vld [vmem:[#allocation7 + $0x17d8] sm:$0xff] }
 0x328   :  { %11872 = vmatmul.msk.f32.gmra.mxu1 %vm302_vm2, %v15241_v51  ;;  %11880 = vmatmul.msk.f32.vlgmr.msrb.gmra.mxu0 %vm302_vm2, %v5017_v58 }
 0x329   :  { %11875 = vmatmul.msk.f32.gmra.mxu2 %vm302_vm2, %v5019_v37  ;;  %11889 = vmatmul.msk.f32.vlgmr.msrb.gmra.mxu3 %vm302_vm2, %v5017_v58 }
 0x32a   :  { %11903 = vmatpush.msk.msrb.mxu0 %vm307_vm1, %v17956_v27  ;;  %11912 = vmatpush.msk.msrb.mxu3 %vm307_vm1, %v5211_v8  ;;  %v5397_v8 = vpop.permute.xlu1 %5396 }
 0x32c   :  { %v4104_v16 = vpop.f32.mrf.mxu2  ;;  %v15358_v29 = vpop.f32.mrf.mxu3 }
 0x32d   :  { %v15356_v22 = vadd.f32 %v4104_v16, %v15260_v56  ;;  %v15360_v5 = vpop.f32.mrf.mxu1  ;;  %v17960_v56 = vld [vmem:[#allocation39_spill] sm:$0xff] }
 0x32e   :  { %v15362_v44 = vpop.f32.mrf.mxu0 }
 0x330   :  { %11883 = vmatmul.msk.f32.vlgmr.msrb.gmra.mxu1 %vm302_vm2, %v5017_v58  ;;  %11881 = vmatmul.msk.f32.gmra.mxu0 %vm302_vm2, %v5019_v37 }
 0x331   :  { %11886 = vmatmul.msk.f32.vlgmr.msrb.gmra.mxu2 %vm302_vm2, %v5017_v58  ;;  %11890 = vmatmul.msk.f32.gmra.mxu3 %vm302_vm2, %v5019_v37 }
 0x332   :  { %11906 = vmatpush.msk.msrb.mxu1 %vm307_vm1, %v17958_v25  ;;  %11909 = vmatpush.msk.msrb.mxu2 %vm307_vm1, %v5212_v32  ;;  %v5399_v25 = vpop.permute.xlu2 %5398 }
 0x334   :  { %v4253_v30 = vpop.f32.mrf.mxu2  ;;  %v15376_v35 = vpop.f32.mrf.mxu3 }
 0x335   :  { %v15374_v51 = vadd.f32 %v4253_v30, %v15280_v34  ;;  %v15378_v13 = vpop.f32.mrf.mxu1  ;;  %v17962_v34 = vld [vmem:[#allocation40_spill] sm:$0xff] }
 0x336   :  { %17959 = vst [vmem:[#allocation32_spill] sm:$0xff] %v15378_v13  ;;  %v15380_v46 = vpop.f32.mrf.mxu0  ;;  %v5724_v13 = vld [vmem:[#allocation7 + $0x310] sm:$0xff] }
 0x338   :  { %11884 = vmatmul.msk.f32.gmra.mxu1 %vm302_vm2, %v5019_v37  ;;  %11892 = vmatmul.msk.f32.vlgmr.msra.gmra.mxu0 %vm302_vm2, %v5017_v58  ;;  %v12937_v58 = vmov 0  }
 0x339   :  { %11887 = vmatmul.msk.f32.gmra.mxu2 %vm302_vm2, %v5019_v37  ;;  %11901 = vmatmul.msk.f32.vlgmr.msra.gmra.mxu3 %vm302_vm2, %v5207_v12 }
 0x33a   :  { %11915 = vmatpush.msk.msra.mxu0 %vm307_vm1, %v17960_v56  ;;  %11924 = vmatpush.msk.msra.mxu3 %vm307_vm1, %v17961_v20 }
 0x33b   :  { %12344 = vset.pattern.permute.xlu1 %v12937_v58  ;;  %12345 = vset.pattern.permute.xlu2 %v12937_v58 }
 0x33c   :  { %v4256_v47 = vpop.f32.mrf.mxu2  ;;  %v15393_v7 = vpop.f32.mrf.mxu3  ;;  %12486 = vset.pattern.permute.xlu0 %v12937_v58 }
 0x33d   :  { %v15391_v28 = vadd.f32 %v4256_v47, %v15301_v50  ;;  %v15395_v48 = vpop.f32.mrf.mxu1  ;;  %v5586_v50 = vld [vmem:[#allocation5] sm:$0xff]  ;;  %v5587_v47 = vld [vmem:[#allocation5 + $0x8] sm:$0xf] }
 0x33e   :  { %v15397_v62 = vpop.f32.mrf.mxu0  ;;  %5590 = vperm.xlu1 %12344, %v5586_v50   ;;  %5595 = vperm.xlu2 %12345, %v5587_v47  }
 0x340   :  { %11895 = vmatmul.msk.f32.vlgmr.msra.gmra.mxu1 %vm302_vm2, %v5207_v12  ;;  %11893 = vmatmul.msk.f32.gmra.mxu0 %vm302_vm2, %v5019_v37 }
 0x341   :  { %11898 = vmatmul.msk.f32.vlgmr.msra.gmra.mxu2 %vm302_vm2, %v5207_v12  ;;  %11902 = vmatmul.msk.f32.gmra.mxu3 %vm302_vm2, %v5209_v63 }
 0x342   :  { %11918 = vmatpush.msk.msra.mxu1 %vm307_vm1, %v17962_v34  ;;  %11921 = vmatpush.msk.msra.mxu2 %vm307_vm1, %v17963_v42 }
 0x344   :  { %v15407_v39 = vpop.f32.mrf.mxu2  ;;  %v15409_v4 = vpop.f32.mrf.mxu3 }
 0x345   :  { %17964 = vst [vmem:[#allocation36_spill] sm:$0xff] %v15409_v4  ;;  %v15411_v1 = vpop.f32.mrf.mxu1 }
 0x346   :  { %v15413_v49 = vpop.f32.mrf.mxu0 }
 0x347   :  { %17965 = vst [vmem:[#allocation34_spill] sm:$0xff] %v15413_v49  ;;  %v5710_v49 = vld [vmem:[#allocation7 + $0x2a0] sm:$0xff] }
 0x348   :  { %11896 = vmatmul.msk.f32.gmra.mxu1 %vm302_vm2, %v5209_v63  ;;  %11904 = vmatmul.msk.f32.vlgmr.msrb.gmra.mxu0 %vm302_vm2, %v5207_v12 }
 0x349   :  { %11899 = vmatmul.msk.f32.gmra.mxu2 %vm302_vm2, %v5209_v63  ;;  %11913 = vmatmul.msk.f32.vlgmr.msrb.gmra.mxu3 %vm302_vm2, %v5207_v12 }
 0x34a   :  { %11927 = vmatpush.msk.msrb.mxu0 %vm307_vm1, %v17966_v36 }
 0x34c   :  { %v15421_v40 = vpop.f32.mrf.mxu2  ;;  %v15423_v41 = vpop.f32.mrf.mxu3 }
 0x34d   :  { %17967 = vst [vmem:[#allocation37_spill] sm:$0xff] %v15421_v40  ;;  %v15425_v6 = vpop.f32.mrf.mxu1  ;;  %v6291_v40 = vld [vmem:[#allocation7 + $0x14c8] sm:$0xff] }
 0x34e   :  { %v15427_v37 = vpop.f32.mrf.mxu0 }
 0x34f   :  { %17968 = vst [vmem:[#allocation39_spill] sm:$0xff] %v15427_v37 }
 0x350   :  { %11907 = vmatmul.msk.f32.vlgmr.msrb.gmra.mxu1 %vm302_vm2, %v5207_v12  ;;  %11905 = vmatmul.msk.f32.gmra.mxu0 %vm302_vm2, %v5209_v63 }
 0x351   :  { %11910 = vmatmul.msk.f32.vlgmr.msrb.gmra.mxu2 %vm302_vm2, %v5207_v12  ;;  %11914 = vmatmul.msk.f32.gmra.mxu3 %vm302_vm2, %v5209_v63 }
 0x352   :  { %11930 = vmatpush.msk.msrb.mxu1 %vm307_vm1, %v5402_v21  ;;  %11933 = vmatpush.msk.msrb.mxu2 %vm307_vm1, %v5401_v33 }
 0x354   :  { %v15437_v23 = vpop.f32.mrf.mxu2  ;;  %v15439_v9 = vpop.f32.mrf.mxu3 }
 0x355   :  { %17970 = vst [vmem:[#allocation41_spill] sm:$0xff] %v15439_v9  ;;  %v15441_v24 = vpop.f32.mrf.mxu1  ;;  %v5682_v9 = vld [vmem:[#allocation7 + $0x1c0] sm:$0xff] }
 0x356   :  { %v15443_v55 = vpop.f32.mrf.mxu0 }
 0x358   :  { %11908 = vmatmul.msk.f32.gmra.mxu1 %vm302_vm2, %v5209_v63  ;;  %11916 = vmatmul.msk.f32.vlgmr.msra.gmra.mxu0 %vm302_vm2, %v5397_v8 }
 0x359   :  { %11911 = vmatmul.msk.f32.gmra.mxu2 %vm302_vm2, %v5209_v63  ;;  %11925 = vmatmul.msk.f32.vlgmr.msra.gmra.mxu3 %vm302_vm2, %v5397_v8 }
 0x35c   :  { %v15449_v27 = vpop.f32.mrf.mxu2  ;;  %v15451_v16 = vpop.f32.mrf.mxu3 }
 0x35d   :  { %17971 = vst [vmem:[#allocation40_spill] sm:$0xff] %v15449_v27  ;;  %v15453_v17 = vpop.f32.mrf.mxu1  ;;  %v6326_v27 = vld [vmem:[#allocation7 + $0x15e0] sm:$0xff] }
 0x35e   :  { %17972 = vst [vmem:[#allocation38_spill] sm:$0xff] %v15451_v16  ;;  %v15455_v32 = vpop.f32.mrf.mxu0 }
 0x35f   :  { %17973 = vst [vmem:[#allocation43_spill] sm:$0xff] %v15453_v17  ;;  %v6172_v17 = vld [vmem:[#allocation7 + $0x1110] sm:$0xff] }
 0x360   :  { %17974 = vst [vmem:[#allocation42_spill] sm:$0xff] %v15455_v32  ;;  %11919 = vmatmul.msk.f32.vlgmr.msra.gmra.mxu1 %vm302_vm2, %v5397_v8  ;;  %11917 = vmatmul.msk.f32.gmra.mxu0 %vm302_vm2, %v5399_v25  ;;  %v5690_v32 = vld [vmem:[#allocation7 + $0x200] sm:$0xff] }
 0x361   :  { %11922 = vmatmul.msk.f32.vlgmr.msra.gmra.mxu2 %vm302_vm2, %v5397_v8  ;;  %11926 = vmatmul.msk.f32.gmra.mxu3 %vm302_vm2, %v5399_v25 }
 0x364   :  { %v15461_v30 = vpop.f32.mrf.mxu2  ;;  %v15463_v12 = vpop.f32.mrf.mxu3 }
 0x365   :  { %17975 = vst [vmem:[#allocation44_spill] sm:$0xff] %v15461_v30  ;;  %v15465_v56 = vpop.f32.mrf.mxu1  ;;  %v5836_v30 = vld [vmem:[#allocation7 + $0x690] sm:$0xff] }
 0x366   :  { %17976 = vst [vmem:[#allocation45_spill] sm:$0xff] %v15463_v12  ;;  %v15467_v20 = vpop.f32.mrf.mxu0 }
 0x367   :  { %17977 = vst [vmem:[#allocation46_spill] sm:$0xff] %v15465_v56  ;;  %v6060_v56 = vld [vmem:[#allocation7 + $0xd90] sm:$0xff] }
 0x368   :  { %11920 = vmatmul.msk.f32.gmra.mxu1 %vm302_vm2, %v5399_v25  ;;  %11928 = vmatmul.msk.f32.vlgmr.msrb.gmra.mxu0 %vm302_vm2, %v5397_v8 }
 0x369   :  { %11923 = vmatmul.msk.f32.gmra.mxu2 %vm302_vm2, %v5399_v25 }
 0x36c   :  { %v15472_v63 = vpop.f32.mrf.mxu2  ;;  %v15474_v34 = vpop.f32.mrf.mxu3 }
 0x36d   :  { %17978 = vst [vmem:[#allocation47_spill] sm:$0xff] %v15472_v63  ;;  %v15476_v42 = vpop.f32.mrf.mxu1 }
 0x36e   :  { %v15478_v50 = vpop.f32.mrf.mxu0 }
 0x370   :  { %11931 = vmatmul.msk.f32.vlgmr.msrb.gmra.mxu1 %vm302_vm2, %v5397_v8  ;;  %11929 = vmatmul.msk.f32.gmra.mxu0 %vm302_vm2, %v5399_v25 }
 0x371   :  { %11934 = vmatmul.msk.f32.vlgmr.msrb.gmra.mxu2 %vm302_vm2, %v5397_v8  ;;  %v5731_v8 = vld [vmem:[#allocation7 + $0x348] sm:$0xff] }
 0x372   :  { %6438 = vmatpush.msrb.mxu3 %v5731_v8  ;;  %v5696_v8 = vld [vmem:[#allocation7 + $0x230] sm:$0xff] }
 0x374   :  { %v15483_v58 = vpop.f32.mrf.mxu2  ;;  %v15485_v36 = vpop.f32.mrf.mxu3  ;;  %6439 = vmatpush.msrb.mxu3 %v5724_v13  ;;  %v6053_v13 = vld [vmem:[#allocation7 + $0xd58] sm:$0xff] }
 0x375   :  { %17979 = vst [vmem:[#allocation48_spill] sm:$0xff] %v15483_v58  ;;  %v15487_v33 = vpop.f32.mrf.mxu1  ;;  %v5787_v58 = vld [vmem:[#allocation7 + $0x508] sm:$0xff] }
 0x376   :  { %17980 = vst [vmem:[#allocation49_spill] sm:$0xff] %v15485_v36  ;;  %v15489_v10 = vpop.f32.mrf.mxu0  ;;  %6440 = vmatpush.msrb.mxu3 %v5717_v31  ;;  %v5829_v31 = vld [vmem:[#allocation7 + $0x658] sm:$0xff] }
 0x377   :  { %17981 = vst [vmem:[#allocation50_spill] sm:$0xff] %v15487_v33  ;;  %v5675_v33 = vld [vmem:[#allocation7 + $0x188] sm:$0xff] }
 0x378   :  { %17982 = vst [vmem:[#allocation51_spill] sm:$0xff] %v15489_v10  ;;  %11932 = vmatmul.msk.f32.gmra.mxu1 %vm302_vm2, %v5399_v25  ;;  %6441 = vmatpush.msrb.mxu3 %v5710_v49  ;;  %v6046_v10 = vld [vmem:[#allocation7 + $0xd20] sm:$0xff] }
 0x379   :  { %11935 = vmatmul.msk.f32.gmra.mxu2 %vm302_vm2, %v5399_v25  ;;  %vm6416_vm2 = vcmask 1043456  }
 0x37c   :  { %v15493_v21 = vpop.f32.mrf.mxu2  ;;  %v15495_v47 = vpop.f32.mrf.mxu3 }
 0x37d   :  { %17983 = vst [vmem:[#allocation52_spill] sm:$0xff] %v15493_v21  ;;  %v15497_v12 = vpop.f32.mrf.mxu1  ;;  %v6067_v21 = vld [vmem:[#allocation7 + $0xdc8] sm:$0xff] }
 0x37e   :  { %17984 = vst [vmem:[#allocation53_spill] sm:$0xff] %v15497_v12  ;;  %v15499_v37 = vpop.f32.mrf.mxu0  ;;  %6507 = vmatpush.msra.mxu2 %v6067_v21  ;;  %v5703_v12 = vld [vmem:[#allocation7 + $0x268] sm:$0xff] }
 0x37f   :  { %17985 = vst [vmem:[#allocation54_spill] sm:$0xff] %v15499_v37  ;;  %v5843_v37 = vld [vmem:[#allocation7 + $0x6c8] sm:$0xff]  ;;  %6442 = vmatpush.msrb.mxu3 %v5703_v12  ;;  %v5822_v12 = vld [vmem:[#allocation7 + $0x620] sm:$0xff] }
 0x380   :  { %6461 = vmatpush.msra.mxu0 %v5843_v37  ;;  %6508 = vmatpush.msra.mxu2 %v6060_v56  ;;  %v5955_v56 = vld [vmem:[#allocation7 + $0xa48] sm:$0xff] }
 0x381   :  { %6443 = vmatpush.msrb.mxu3 %v5696_v8  ;;  %v5815_v8 = vld [vmem:[#allocation7 + $0x5e8] sm:$0xff]  ;;  %6484 = vmatpush.msra.mxu1 %v5955_v56 }
 0x382   :  { %6462 = vmatpush.msra.mxu0 %v5836_v30  ;;  %6509 = vmatpush.msra.mxu2 %v6053_v13  ;;  %v6039_v30 = vld [vmem:[#allocation7 + $0xce8] sm:$0xff]  ;;  %v5948_v13 = vld [vmem:[#allocation7 + $0xa10] sm:$0xff] }
 0x383   :  { %6485 = vmatpush.msra.mxu1 %v5948_v13  ;;  %v5794_v13 = vld [vmem:[#allocation7 + $0x540] sm:$0xff] }
 0x384   :  { %v15501_v63 = vpop.f32.mrf.mxu2  ;;  %v15503_v16 = vpop.f32.mrf.mxu3  ;;  %6463 = vmatpush.msra.mxu0 %v5829_v31  ;;  %6510 = vmatpush.msra.mxu2 %v6046_v10  ;;  %v6032_v31 = vld [vmem:[#allocation7 + $0xcb0] sm:$0xff]  ;;  %v6025_v10 = vld [vmem:[#allocation7 + $0xc78] sm:$0xff] }
 0x385   :  { %17986 = vst [vmem:[#allocation55_spill] sm:$0xff] %v15501_v63  ;;  %v15505_v4 = vpop.f32.mrf.mxu1  ;;  %v5689_v63 = vld [vmem:[#allocation7 + $0x1f8] sm:$0xff] }
 0x386   :  { %17987 = vst [vmem:[#allocation56_spill] sm:$0xff] %v15505_v4  ;;  %v15507_v25 = vpop.f32.mrf.mxu0  ;;  %6444 = vmatpush.msrb.mxu3 %v5689_v63  ;;  %6464 = vmatpush.msra.mxu0 %v5822_v12  ;;  %v5941_v63 = vld [vmem:[#allocation7 + $0x9d8] sm:$0xff]  ;;  %v6018_v12 = vld [vmem:[#allocation7 + $0xc40] sm:$0xff] }
 0x387   :  { %6511 = vmatpush.msra.mxu2 %v6039_v30  ;;  %6486 = vmatpush.msra.mxu1 %v5941_v63  ;;  %v5920_v63 = vld [vmem:[#allocation7 + $0x930] sm:$0xff] }
 0x388   :  { %6445 = vmatpush.msrb.mxu3 %v5682_v9  ;;  %6465 = vmatpush.msra.mxu0 %v5815_v8  ;;  %v5934_v9 = vld [vmem:[#allocation7 + $0x9a0] sm:$0xff] }
 0x389   :  { %6512 = vmatpush.msra.mxu2 %v6032_v31  ;;  %6487 = vmatpush.msra.mxu1 %v5934_v9  ;;  %v5654_v8 = vld [vmem:[#allocation7 + $0xe0] sm:$0xff]  ;;  %v5647_v31 = vld [vmem:[#allocation7 + $0xa8] sm:$0xff]  ;;  %v5633_v9 = vld [vmem:[#allocation7 + $0x38] sm:$0xff] }
 0x38a   :  { %6446 = vmatpush.msrb.mxu3 %v5675_v33 }
 0x38b   :  { %6513 = vmatpush.msra.mxu2 %v6025_v10  ;;  %v6004_v10 = vld [vmem:[#allocation7 + $0xbd0] sm:$0xff] }
 0x38c   :  { %v15509_v4 = vpop.f32.mrf.mxu2  ;;  %v15511_v49 = vpop.f32.mrf.mxu3 }
 0x38d   :  { %17988 = vst [vmem:[#allocation57_spill] sm:$0xff] %v15509_v4  ;;  %v15513_v21 = vpop.f32.mrf.mxu1  ;;  %v5668_v4 = vld [vmem:[#allocation7 + $0x150] sm:$0xff]  ;;  %6514 = vmatpush.msra.mxu2 %v6018_v12  ;;  %v5773_v12 = vld [vmem:[#allocation7 + $0x498] sm:$0xff] }
 0x38e   :  { %17989 = vst [vmem:[#allocation58_spill] sm:$0xff] %v15511_v49  ;;  %v15515_v37 = vpop.f32.mrf.mxu0  ;;  %v5808_v49 = vld [vmem:[#allocation7 + $0x5b0] sm:$0xff]  ;;  %6447 = vmatpush.msrb.mxu3 %v5668_v4  ;;  %v5927_v4 = vld [vmem:[#allocation7 + $0x968] sm:$0xff] }
 0x38f   :  { %17990 = vst [vmem:[#allocation59_spill] sm:$0xff] %v15513_v21  ;;  %v5801_v21 = vld [vmem:[#allocation7 + $0x578] sm:$0xff]  ;;  %6466 = vmatpush.msra.mxu0 %v5808_v49  ;;  %v6011_v49 = vld [vmem:[#allocation7 + $0xc08] sm:$0xff]  ;;  %6488 = vmatpush.msra.mxu1 %v5927_v4 }
 0x390   :  { %17991 = vst [vmem:[#allocation60_spill] sm:$0xff] %v15515_v37  ;;  %v5661_v37 = vld [vmem:[#allocation7 + $0x118] sm:$0xff]  ;;  %6515 = vmatpush.msra.mxu2 %v6011_v49 }
 0x391   :  { %6448 = vmatpush.msrb.mxu3 %v5661_v37  ;;  %6467 = vmatpush.msra.mxu0 %v5801_v21  ;;  %v5780_v21 = vld [vmem:[#allocation7 + $0x4d0] sm:$0xff]  ;;  %v5913_v37 = vld [vmem:[#allocation7 + $0x8f8] sm:$0xff] }
 0x392   :  { %6489 = vmatpush.msra.mxu1 %v5920_v63  ;;  %6516 = vmatpush.msra.mxu2 %v6004_v10  ;;  %v5766_v63 = vld [vmem:[#allocation7 + $0x460] sm:$0xff]  ;;  %v5983_v10 = vld [vmem:[#allocation7 + $0xb28] sm:$0xff] }
 0x393   :  { %6449 = vmatpush.msrb.mxu3 %v5654_v8  ;;  %6468 = vmatpush.msra.mxu0 %v5794_v13  ;;  %v5906_v8 = vld [vmem:[#allocation7 + $0x8c0] sm:$0xff] }
 0x394   :  { %v15517_v36 = vpop.f32.mrf.mxu2  ;;  %v15519_v56 = vpop.f32.mrf.mxu3  ;;  %v5990_v13 = vld [vmem:[#allocation7 + $0xb60] sm:$0xff]  ;;  %6490 = vmatpush.msra.mxu1 %v5913_v37  ;;  %v5976_v37 = vld [vmem:[#allocation7 + $0xaf0] sm:$0xff] }
 0x395   :  { %17992 = vst [vmem:[#allocation61_spill] sm:$0xff] %v15519_v56  ;;  %v15521_v30 = vpop.f32.mrf.mxu1  ;;  %v5640_v56 = vld [vmem:[#allocation7 + $0x70] sm:$0xff]  ;;  %6450 = vmatpush.msrb.mxu3 %v5647_v31  ;;  %6469 = vmatpush.msra.mxu0 %v5787_v58  ;;  %v5626_v31 = vld [vmem:[#allocation7] sm:$0xff] }
 0x396   :  { %17993 = vst [vmem:[#allocation62_spill] sm:$0xff] %v15521_v30  ;;  %v15523_v33 = vpop.f32.mrf.mxu0  ;;  %6491 = vmatpush.msra.mxu1 %v5906_v8  ;;  %v6165_v8 = vld [vmem:[#allocation7 + $0x10d8] sm:$0xff] }
 0x397   :  { %17994 = vst [vmem:[#allocation63_spill] sm:$0xff] %v15523_v33  ;;  %v5997_v33 = vld [vmem:[#allocation7 + $0xb98] sm:$0xff]  ;;  %6451 = vmatpush.msrb.mxu3 %v5640_v56  ;;  %6470 = vmatpush.msra.mxu0 %v5780_v21  ;;  %v5899_v56 = vld [vmem:[#allocation7 + $0x888] sm:$0xff] }
 0x398   :  { %6517 = vmatpush.msra.mxu2 %v5997_v33  ;;  %v6179_v21 = vld [vmem:[#allocation7 + $0x1148] sm:$0xff]  ;;  %6492 = vmatpush.msra.mxu1 %v5899_v56  ;;  %v5892_v33 = vld [vmem:[#allocation7 + $0x850] sm:$0xff] }
 0x399   :  { %6452 = vmatpush.msrb.mxu3 %v5633_v9  ;;  %6471 = vmatpush.msra.mxu0 %v5773_v12  ;;  %v5752_v9 = vld [vmem:[#allocation7 + $0x3f0] sm:$0xff]  ;;  %v5885_v12 = vld [vmem:[#allocation7 + $0x818] sm:$0xff] }
 0x39a   :  { %6518 = vmatpush.msra.mxu2 %v5990_v13  ;;  %6493 = vmatpush.msra.mxu1 %v5892_v33  ;;  %v5745_v13 = vld [vmem:[#allocation7 + $0x3b8] sm:$0xff] }
 0x39b   :  { %6453 = vmatpush.msrb.mxu3 %v5626_v31  ;;  %6472 = vmatpush.msra.mxu0 %v5766_v63  ;;  %v5878_v31 = vld [vmem:[#allocation7 + $0x7e0] sm:$0xff] }
 0x39c   :  { %v15525_v30 = vpop.f32.mrf.mxu2  ;;  %v15527_v4 = vpop.f32.mrf.mxu3  ;;  %6519 = vmatpush.msra.mxu2 %v5983_v10  ;;  %v5962_v63 = vld [vmem:[#allocation7 + $0xa80] sm:$0xff]  ;;  %6494 = vmatpush.msra.mxu1 %v5885_v12  ;;  %v5725_v12 = vld [vmem:[#allocation7 + $0x318] sm:$0xff] }
 0x39d   :  { %17995 = vst [vmem:[#allocation64_spill] sm:$0xff] %v15525_v30  ;;  %v15529_v49 = vpop.f32.mrf.mxu1  ;;  %v5759_v30 = vld [vmem:[#allocation7 + $0x428] sm:$0xff]  ;;  %6530 = vmatpush.msra.mxu3 %v6179_v21  ;;  %v5732_v21 = vld [vmem:[#allocation7 + $0x350] sm:$0xff] }
 0x39e   :  { %17996 = vst [vmem:[#allocation65_spill] sm:$0xff] %v15529_v49  ;;  %v15531_v58 = vpop.f32.mrf.mxu0  ;;  %6473 = vmatpush.msra.mxu0 %v5759_v30  ;;  %6520 = vmatpush.msra.mxu2 %v5976_v37  ;;  %v6158_v30 = vld [vmem:[#allocation7 + $0x10a0] sm:$0xff]  ;;  %v5871_v37 = vld [vmem:[#allocation7 + $0x7a8] sm:$0xff] }
 0x39f   :  { %17997 = vst [vmem:[#allocation66_spill] sm:$0xff] %v15531_v58  ;;  %v5969_v58 = vld [vmem:[#allocation7 + $0xab8] sm:$0xff]  ;;  %6531 = vmatpush.msra.mxu3 %v6172_v17  ;;  %6495 = vmatpush.msra.mxu1 %v5878_v31  ;;  %v5738_v17 = vld [vmem:[#allocation7 + $0x380] sm:$0xff] }
 0x3a0   :  { %6474 = vmatpush.msra.mxu0 %v5752_v9  ;;  %6521 = vmatpush.msra.mxu2 %v5969_v58  ;;  %v6151_v9 = vld [vmem:[#allocation7 + $0x1068] sm:$0xff]  ;;  %v5864_v58 = vld [vmem:[#allocation7 + $0x770] sm:$0xff]  ;;  %v6137_v31 = vld [vmem:[#allocation7 + $0xff8] sm:$0xff] }
 0x3a1   :  { %6532 = vmatpush.msra.mxu3 %v6165_v8  ;;  %6496 = vmatpush.msra.mxu1 %v5871_v37  ;;  %v5718_v8 = vld [vmem:[#allocation7 + $0x2e0] sm:$0xff] }
 0x3a2   :  { %6475 = vmatpush.msra.mxu0 %v5745_v13  ;;  %6522 = vmatpush.msra.mxu2 %v5962_v63  ;;  %v5857_v13 = vld [vmem:[#allocation7 + $0x738] sm:$0xff] }
 0x3a3   :  { %6533 = vmatpush.msra.mxu3 %v6158_v30  ;;  %6497 = vmatpush.msra.mxu1 %v5864_v58  ;;  %v6277_v63 = vld [vmem:[#allocation7 + $0x1458] sm:$0xff]  ;;  %v5711_v30 = vld [vmem:[#allocation7 + $0x2a8] sm:$0xff] }
 0x3a4   :  { %v15533_v49 = vpop.f32.mrf.mxu2  ;;  %v15535_v56 = vpop.f32.mrf.mxu3  ;;  %6599 = vmatpush.msrb.mxu2 %v5732_v21  ;;  %6476 = vmatpush.msra.mxu0 %v5738_v17  ;;  %v5850_v21 = vld [vmem:[#allocation7 + $0x700] sm:$0xff] }
 0x3a5   :  { %17998 = vst [vmem:[#allocation67_spill] sm:$0xff] %v15535_v56  ;;  %v15537_v10 = vpop.f32.mrf.mxu1  ;;  %v6144_v56 = vld [vmem:[#allocation7 + $0x1030] sm:$0xff]  ;;  %6534 = vmatpush.msra.mxu3 %v6151_v9  ;;  %6498 = vmatpush.msra.mxu1 %v5857_v13  ;;  %v6270_v9 = vld [vmem:[#allocation7 + $0x1420] sm:$0xff] }
 0x3a6   :  { %17999 = vst [vmem:[#allocation68_spill] sm:$0xff] %v15537_v10  ;;  %v15539_v33 = vpop.f32.mrf.mxu0  ;;  %v6284_v10 = vld [vmem:[#allocation7 + $0x1490] sm:$0xff]  ;;  %6553 = vmatpush.msrb.mxu0 %v6291_v40  ;;  %6600 = vmatpush.msrb.mxu2 %v5725_v12  ;;  %v6130_v40 = vld [vmem:[#allocation7 + $0xfc0] sm:$0xff]  ;;  %v6403_v12 = vld [vmem:[#allocation7 + $0x1848] sm:$0xf] }
 0x3a7   :  { %18000 = vst [vmem:[#allocation69_spill] sm:$0xff] %v15539_v33  ;;  %6535 = vmatpush.msra.mxu3 %v6144_v56  ;;  %6499 = vmatpush.msra.mxu1 %v5850_v21  ;;  %v5704_v56 = vld [vmem:[#allocation7 + $0x270] sm:$0xff]  ;;  %v6249_v21 = vld [vmem:[#allocation7 + $0x1378] sm:$0xff] }
 0x3a8   :  { %6554 = vmatpush.msrb.mxu0 %v6284_v10  ;;  %6601 = vmatpush.msrb.mxu2 %v5718_v8  ;;  %v6123_v10 = vld [vmem:[#allocation7 + $0xf88] sm:$0xff]  ;;  %v6396_v13 = vld [vmem:[#allocation7 + $0x1810] sm:$0xff] }
 0x3a9   :  { %6536 = vmatpush.msra.mxu3 %v6137_v31  ;;  %v6263_v8 = vld [vmem:[#allocation7 + $0x13e8] sm:$0xff]  ;;  %11936 = vmatpush.msk.msrb.mxu1 %vm6416_vm2, %v6403_v12  ;;  %v6116_v31 = vld [vmem:[#allocation7 + $0xf50] sm:$0xff] }
 0x3aa   :  { %6555 = vmatpush.msrb.mxu0 %v6277_v63  ;;  %6602 = vmatpush.msrb.mxu2 %v5711_v30  ;;  %v6256_v63 = vld [vmem:[#allocation7 + $0x13b0] sm:$0xff]  ;;  %v6109_v30 = vld [vmem:[#allocation7 + $0xf18] sm:$0xff] }
 0x3ab   :  { %6537 = vmatpush.msra.mxu3 %v6130_v40  ;;  %6577 = vmatpush.msrb.mxu1 %v6396_v13  ;;  %v6382_v40 = vld [vmem:[#allocation7 + $0x17a0] sm:$0xff]  ;;  %v6375_v13 = vld [vmem:[#allocation7 + $0x1768] sm:$0xff] }
 0x3ac   :  { %v15541_v33 = vpop.f32.mrf.mxu2  ;;  %v15543_v17 = vpop.f32.mrf.mxu3  ;;  %6556 = vmatpush.msrb.mxu0 %v6270_v9  ;;  %6603 = vmatpush.msrb.mxu2 %v5704_v56  ;;  %v5683_v9 = vld [vmem:[#allocation7 + $0x1c8] sm:$0xff] }
 0x3ad   :  { %18001 = vst [vmem:[#allocation70_spill] sm:$0xff] %v15543_v17  ;;  %v15545_v37 = vpop.f32.mrf.mxu1  ;;  %v5697_v17 = vld [vmem:[#allocation7 + $0x238] sm:$0xff]  ;;  %6538 = vmatpush.msra.mxu3 %v6123_v10  ;;  %6578 = vmatpush.msrb.mxu1 %v6389_v3  ;;  %v6102_v10 = vld [vmem:[#allocation7 + $0xee0] sm:$0xff]  ;;  %v6368_v3 = vld [vmem:[#allocation7 + $0x1730] sm:$0xff] }
 0x3ae   :  { %v15547_v58 = vpop.f32.mrf.mxu0  ;;  %6557 = vmatpush.msrb.mxu0 %v6263_v8  ;;  %6604 = vmatpush.msrb.mxu2 %v5697_v17  ;;  %v6242_v8 = vld [vmem:[#allocation7 + $0x1340] sm:$0xff] }
 0x3af   :  { %18002 = vst [vmem:[#allocation71_spill] sm:$0xff] %v15547_v58  ;;  %6539 = vmatpush.msra.mxu3 %v6116_v31  ;;  %6579 = vmatpush.msrb.mxu1 %v6382_v40  ;;  %v5676_v31 = vld [vmem:[#allocation7 + $0x190] sm:$0xff]  ;;  %v6081_v40 = vld [vmem:[#allocation7 + $0xe38] sm:$0xff] }
 0x3b0   :  { %6558 = vmatpush.msrb.mxu0 %v6256_v63  ;;  %6605 = vmatpush.msrb.mxu2 %v5690_v32  ;;  %v6095_v63 = vld [vmem:[#allocation7 + $0xea8] sm:$0xff]  ;;  %v5669_v32 = vld [vmem:[#allocation7 + $0x158] sm:$0xff] }
 0x3b1   :  { %6540 = vmatpush.msra.mxu3 %v6109_v30  ;;  %6580 = vmatpush.msrb.mxu1 %v6375_v13  ;;  %v6088_v30 = vld [vmem:[#allocation7 + $0xe70] sm:$0xff]  ;;  %v5655_v13 = vld [vmem:[#allocation7 + $0xe8] sm:$0xff] }
 0x3b2   :  { %6559 = vmatpush.msrb.mxu0 %v6249_v21  ;;  %6606 = vmatpush.msrb.mxu2 %v5683_v9  ;;  %v6228_v21 = vld [vmem:[#allocation7 + $0x12d0] sm:$0xff]  ;;  %v6221_v9 = vld [vmem:[#allocation7 + $0x1298] sm:$0xff] }
 0x3b3   :  { %6541 = vmatpush.msra.mxu3 %v6102_v10  ;;  %6581 = vmatpush.msrb.mxu1 %v6368_v3  ;;  %v6354_v10 = vld [vmem:[#allocation7 + $0x16c0] sm:$0xff] }
 0x3b4   :  { %v15550_v58 = vpop.f32.mrf.mxu2  ;;  %v15552_v12 = vpop.f32.mrf.mxu3  ;;  %6560 = vmatpush.msrb.mxu0 %v6242_v8  ;;  %6607 = vmatpush.msrb.mxu2 %v5676_v31  ;;  %v6214_v3 = vld [vmem:[#allocation7 + $0x1260] sm:$0xff] }
 0x3b5   :  { %18003 = vst [vmem:[#allocation72_spill] sm:$0xff] %v15550_v58  ;;  %v15554_v56 = vpop.f32.mrf.mxu1  ;;  %v6235_v58 = vld [vmem:[#allocation7 + $0x1308] sm:$0xff]  ;;  %6542 = vmatpush.msra.mxu3 %v6095_v63 }
 0x3b6   :  { %18004 = vst [vmem:[#allocation73_spill] sm:$0xff] %v15552_v12  ;;  %v15556_v17 = vpop.f32.mrf.mxu0  ;;  %6561 = vmatpush.msrb.mxu0 %v6235_v58  ;;  %v6361_v12 = vld [vmem:[#allocation7 + $0x16f8] sm:$0xff]  ;;  %6608 = vmatpush.msrb.mxu2 %v5669_v32  ;;  %v6074_v58 = vld [vmem:[#allocation7 + $0xe00] sm:$0xff]  ;;  %v6347_v32 = vld [vmem:[#allocation7 + $0x1688] sm:$0xff] }
 0x3b7   :  { %18005 = vst [vmem:[#allocation74_spill] sm:$0xff] %v15554_v56  ;;  %v5662_v56 = vld [vmem:[#allocation7 + $0x120] sm:$0xff]  ;;  %6543 = vmatpush.msra.mxu3 %v6088_v30  ;;  %6582 = vmatpush.msrb.mxu1 %v6361_v12  ;;  %v5648_v30 = vld [vmem:[#allocation7 + $0xb0] sm:$0xff] }
 0x3b8   :  { %18006 = vst [vmem:[#allocation75_spill] sm:$0xff] %v15556_v17  ;;  %6562 = vmatpush.msrb.mxu0 %v6228_v21  ;;  %6609 = vmatpush.msrb.mxu2 %v5662_v56  ;;  %v6207_v21 = vld [vmem:[#allocation7 + $0x1228] sm:$0xff]  ;;  %v6340_v12 = vld [vmem:[#allocation7 + $0x1650] sm:$0xff]  ;;  %v5641_v56 = vld [vmem:[#allocation7 + $0x78] sm:$0xff] }
 0x3b9   :  { %6544 = vmatpush.msra.mxu3 %v6081_v40  ;;  %6583 = vmatpush.msrb.mxu1 %v6354_v10  ;;  %v5634_v40 = vld [vmem:[#allocation7 + $0x40] sm:$0xff] }
 0x3ba   :  { %6563 = vmatpush.msrb.mxu0 %v6221_v9  ;;  %6610 = vmatpush.msrb.mxu2 %v5655_v13  ;;  %v6193_v9 = vld [vmem:[#allocation7 + $0x11b8] sm:$0xff] }
 0x3bb   :  { %6545 = vmatpush.msra.mxu3 %v6074_v58  ;;  %6584 = vmatpush.msrb.mxu1 %v6347_v32  ;;  %v6319_v32 = vld [vmem:[#allocation7 + $0x15a8] sm:$0xff] }
 0x3bc   :  { %v15558_v8 = vpop.f32.mrf.mxu2  ;;  %v15560_v31 = vpop.f32.mrf.mxu3  ;;  %6564 = vmatpush.msrb.mxu0 %v6214_v3  ;;  %6611 = vmatpush.msrb.mxu2 %v5648_v30  ;;  %v6186_v3 = vld [vmem:[#allocation7 + $0x1180] sm:$0xff] }
 0x3bd   :  { %18007 = vst [vmem:[#allocation76_spill] sm:$0xff] %v15558_v8  ;;  %v15562_v63 = vpop.f32.mrf.mxu1  ;;  %v6200_v8 = vld [vmem:[#allocation7 + $0x11f0] sm:$0xff]  ;;  %6585 = vmatpush.msrb.mxu1 %v6340_v12  ;;  %v6298_v12 = vld [vmem:[#allocation7 + $0x1500] sm:$0xff] }
 0x3be   :  { %18008 = vst [vmem:[#allocation77_spill] sm:$0xff] %v15560_v31  ;;  %v15564_v17 = vpop.f32.mrf.mxu0  ;;  %6565 = vmatpush.msrb.mxu0 %v6207_v21  ;;  %v6333_v31 = vld [vmem:[#allocation7 + $0x1618] sm:$0xff]  ;;  %6612 = vmatpush.msrb.mxu2 %v5641_v56 }
 0x3bf   :  { %18009 = vst [vmem:[#allocation78_spill] sm:$0xff] %v15564_v17  ;;  %v5627_v17 = vld [vmem:[#allocation7 + $0x8] sm:$0xff]  ;;  %6586 = vmatpush.msrb.mxu1 %v6333_v31  ;;  %v6305_v21 = vld [vmem:[#allocation7 + $0x1538] sm:$0xff]  ;;  %v4618_v31 = vadd.f32 %v15425_v6, %v15374_v51  ;;  %v4400_v51 = vadd.f32 %v15395_v48, %v15339_v59  ;;  %v4178_v59 = vadd.f32 %v15320_v15, %v15256_v19  ;;  %v15617_v19 = vpop.permute.xlu1 %5590 }
 0x3c0   :  { %6566 = vmatpush.msrb.mxu0 %v6200_v8  ;;  %6613 = vmatpush.msrb.mxu2 %v5634_v40  ;;  %v6312_v8 = vld [vmem:[#allocation7 + $0x1570] sm:$0xff]  ;;  %v4625_v48 = vadd.f32 %v15441_v24, %v15391_v28  ;;  %v15622_v28 = vadd.f32 %v15360_v5, %v15297_v60 }
 0x3c1   :  { %6587 = vmatpush.msrb.mxu1 %v6326_v27  ;;  %v3956_v27 = vadd.f32 %v15236_v18, %v15171_v57  ;;  %v3960_v57 = vadd.f32 %v15278_v43, %v15211_v53 }
 0x3c2   :  { %6567 = vmatpush.msrb.mxu0 %v6193_v9  ;;  %6614 = vmatpush.msrb.mxu2 %v5627_v17  ;;  %v4810_v24 = vadd.f32 %v15478_v50, %v4625_v48 }
 0x3c3   :  { %6588 = vmatpush.msrb.mxu1 %v6319_v32  ;;  %v4177_v32 = vadd.f32 %v15303_v0, %v3956_v27  ;;  %v4181_v15 = vadd.f32 %v15345_v14, %v3960_v57  ;;  %v18016_v27 = vld [vmem:[#allocation48_spill] sm:$0xff] }
 0x3c4   :  { %v15566_v10 = vpop.f32.mrf.mxu2  ;;  %v15568_v13 = vpop.f32.mrf.mxu3  ;;  %6568 = vmatpush.msrb.mxu0 %v6186_v3  ;;  %v4803_v3 = vadd.f32 %v15467_v20, %v4618_v31  ;;  %v4621_v20 = vadd.f32 %v15443_v55, %v4400_v51  ;;  %v18017_v51 = vld [vmem:[#allocation49_spill] sm:$0xff] }
 0x3c5   :  { %v15570_v58 = vpop.f32.mrf.mxu1  ;;  %6589 = vmatpush.msrb.mxu1 %v6312_v8  ;;  %v4402_v14 = vadd.f32 %v15393_v7, %v4181_v15 }
 0x3c6   :  { %v15572_v30 = vpop.f32.mrf.mxu0  ;;  %v5002_v8 = vadd.f32 %v15495_v47, %v4803_v3  ;;  %v4806_v55 = vadd.f32 %v15474_v34, %v4621_v20 }
 0x3c7   :  { %6590 = vmatpush.msrb.mxu1 %v6305_v21  ;;  %v4398_v21 = vadd.f32 %v15358_v29, %v4177_v32  ;;  %v3967_v29 = vadd.f32 %v15299_v2, %v15234_v11 }
 0x3c8   :  { %v5192_v6 = vadd.f32 %v15533_v49, %v5002_v8  ;;  %v5005_v34 = vadd.f32 %v15517_v36, %v4806_v55  ;;  %v5009_v49 = vadd.f32 %v15503_v16, %v4810_v24  ;;  %v4401_v36 = vadd.f32 %v15407_v39, %v15322_v52  ;;  %v5844_v16 = vld [vmem:[#allocation7 + $0x6d0] sm:$0xff]  ;;  %v18015_v39 = vld [vmem:[#allocation43_spill] sm:$0xff]  ;;  %v18023_v24 = vld [vmem:[#allocation64_spill] sm:$0xff] }
 0x3c9   :  { %6591 = vmatpush.msrb.mxu1 %v6298_v12  ;;  %v4619_v18 = vadd.f32 %v15437_v23, %v4398_v21  ;;  %v4185_v23 = vadd.f32 %v15341_v38, %v15276_v54  ;;  %v5837_v21 = vld [vmem:[#allocation7 + $0x698] sm:$0xff] }
 0x3ca   :  { %v5199_v7 = vadd.f32 %v15541_v33, %v5009_v49  ;;  %v18025_v49 = vld [vmem:[#allocation58_spill] sm:$0xff] }
 0x3cb   :  { %v4804_v11 = vadd.f32 %v15476_v42, %v4619_v18  ;;  %v4399_v42 = vadd.f32 %v15380_v46, %v4178_v59  ;;  %v4406_v5 = vadd.f32 %v15397_v62, %v4185_v23  ;;  %v18012_v62 = vld [vmem:[#allocation42_spill] sm:$0xff]  ;;  %v18019_v59 = vld [vmem:[#allocation41_spill] sm:$0xff] }
 0x3cc   :  { %v15574_v56 = vpop.f32.mrf.mxu2  ;;  %v15578_v40 = vpop.f32.mrf.mxu3  ;;  %v5389_v3 = vadd.f32 %v15570_v58, %v5199_v7  ;;  %v18021_v58 = vld [vmem:[#allocation59_spill] sm:$0xff]  ;;  %v18028_v7 = vld [vmem:[#allocation74_spill] sm:$0xff] }
 0x3cd   :  { %18010 = vst [vmem:[#allocation79_spill] sm:$0xff] %v15578_v40  ;;  %v15580_v9 = vpop.f32.mrf.mxu1  ;;  %v3963_v40 = vadd.f32 %v15258_v61, %v15192_v45  ;;  %v5382_v45 = vadd.f32 %v15562_v63, %v5192_v6  ;;  %v5003_v38 = vadd.f32 %v15507_v25, %v4804_v11  ;;  %v4620_v46 = vadd.f32 %v15423_v41, %v4399_v42  ;;  %v18011_v63 = vld [vmem:[#allocation40_spill] sm:$0xff]  ;;  %v18018_v6 = vld [vmem:[#allocation50_spill] sm:$0xff] }
 0x3ce   :  { %v15584_v17 = vpop.f32.mrf.mxu0  ;;  %v4622_v41 = vadd.f32 %v18015_v39, %v4401_v36  ;;  %v4627_v48 = vadd.f32 %v18019_v59, %v4406_v5  ;;  %v5830_v11 = vld [vmem:[#allocation7 + $0x660] sm:$0xff]  ;;  %v18026_v5 = vld [vmem:[#allocation69_spill] sm:$0xff]  ;;  %v18027_v36 = vld [vmem:[#allocation67_spill] sm:$0xff] }
 0x3cf   :  { %v4184_v43 = vadd.f32 %v15324_v26, %v3963_v40  ;;  %v15626_v26 = vadd.f32 %v15362_v44, %v3967_v29  ;;  %v4407_v44 = vadd.f32 %v15411_v1, %v15356_v22  ;;  %v5193_v50 = vadd.f32 %v15527_v4, %v5003_v38  ;;  %v18014_v40 = vld [vmem:[#allocation37_spill] sm:$0xff]  ;;  %v15660_v29 = vpop.permute.xlu2 %5595 }
 0x3d0   :  { %v4805_v33 = vadd.f32 %v18016_v27, %v4620_v46  ;;  %v18032_v27 = vld [vmem:[#allocation52_spill] sm:$0xff] }
 0x3d1   :  { %v4405_v54 = vadd.f32 %v15376_v35, %v4184_v43  ;;  %v5195_v35 = vadd.f32 %v15545_v37, %v5005_v34  ;;  %v4628_v31 = vadd.f32 %v18012_v62, %v4407_v44  ;;  %v5383_v22 = vadd.f32 %v15566_v10, %v5193_v50  ;;  %v18013_v37 = vld [vmem:[#allocation33_spill] sm:$0xff]  ;;  %v18024_v34 = vld [vmem:[#allocation44_spill] sm:$0xff]  ;;  %v6180_v62 = vld [vmem:[#allocation7 + $0x1150] sm:$0xff] }
 0x3d2   :  { %v4408_v52 = vadd.f32 %v18014_v40, %v18013_v37  ;;  %v5004_v23 = vadd.f32 %v18021_v58, %v4805_v33  ;;  %v4623_v42 = vadd.f32 %v18024_v34, %v4402_v14  ;;  %v18030_v14 = vld [vmem:[#allocation72_spill] sm:$0xff]  ;;  %v18031_v37 = vld [vmem:[#allocation77_spill] sm:$0xff]  ;;  %v4812_v33 = vadd.f32 %v18032_v27, %v4627_v48 }
 0x3d3   :  { %v4626_v12 = vadd.f32 %v18011_v63, %v4405_v54  ;;  %v5385_v1 = vadd.f32 %v15572_v30, %v5195_v35  ;;  %v4813_v10 = vadd.f32 %v18017_v51, %v4628_v31  ;;  %v5823_v35 = vld [vmem:[#allocation7 + $0x628] sm:$0xff]  ;;  %v18029_v31 = vld [vmem:[#allocation46_spill] sm:$0xff]  ;;  %v6173_v51 = vld [vmem:[#allocation7 + $0x1118] sm:$0xff] }
 0x3d4   :  { %v15599_v0 = vpop.f32.mrf.mxu2  ;;  %v15608_v61 = vpop.f32.mrf.mxu3  ;;  %v5194_v44 = vadd.f32 %v18026_v5, %v5004_v23  ;;  %v6166_v58 = vld [vmem:[#allocation7 + $0x10e0] sm:$0xff]  ;;  %v18035_v23 = vld [vmem:[#allocation62_spill] sm:$0xff] }
 0x3d5   :  { %v15610_v53 = vpop.f32.mrf.mxu1  ;;  %v4811_v30 = vadd.f32 %v18018_v6, %v4626_v12 }
 0x3d6   :  { %v5428_v2 = vpop.f32.mrf.mxu0  ;;  %v5384_v40 = vadd.f32 %v18031_v37, %v5194_v44  ;;  %v18039_v44 = vld [vmem:[#allocation71_spill] sm:$0xff]  ;;  %v18043_v37 = vld [vmem:[#allocation76_spill] sm:$0xff] }
 0x3d7   :  { %v5572_v47 = vadd.f32 %v5428_v2, %v5382_v45  ;;  %v18020_v45 = vld [vmem:[#allocation51_spill] sm:$0xff]  ;;  %v18022_v2 = vld [vmem:[#allocation60_spill] sm:$0xff] }
 0x3d8   :  { %v4807_v43 = vadd.f32 %v18020_v45, %v4622_v41  ;;  %v5010_v15 = vadd.f32 %v18022_v2, %v4811_v30  ;;  %v5816_v41 = vld [vmem:[#allocation7 + $0x5f0] sm:$0xff]  ;;  %v5802_v2 = vld [vmem:[#allocation7 + $0x580] sm:$0xff] }
 0x3d9   :  { %v5598_v60 = vadd.f32 %v15617_v19, %v5572_v47  ;;  %v5012_v47 = vadd.f32 %v18023_v24, %v4813_v10 }
 0x3da   :  { %v5200_v46 = vadd.f32 %v18027_v36, %v5010_v15  ;;  %v18036_v15 = vld [vmem:[#allocation34_spill] sm:$0xff] }
 0x3db   :  { %v15644_v25 = vmax.f32 %v5598_v60, 0.0  ;;  %v5006_v60 = vadd.f32 %v18025_v49, %v4807_v43  ;;  %v5949_v43 = vld [vmem:[#allocation7 + $0xa18] sm:$0xff]  ;;  %v4403_v24 = vadd.f32 %v18036_v15, %v15622_v28  ;;  %v6159_v49 = vld [vmem:[#allocation7 + $0x10a8] sm:$0xff]  ;;  %v18040_v28 = vld [vmem:[#allocation36_spill] sm:$0xff] }
 0x3dc   :  { %v15650_v4 = vpop.f32.mrf.mxu2  ;;  %v5497_v32 = vpop.f32.mrf.mxu3  ;;  %v18050_v15 = vld [vmem:[#allocation66_spill] sm:$0xff] }
 0x3dd   :  { %6454 = vmatmul.f32.vlgmr.msrb.gmra.mxu3 %v15644_v25  ;;  %v5451_v8 = vpop.f32.mrf.mxu1  ;;  %v5575_v57 = vadd.f32 %v5497_v32, %v5385_v1  ;;  %v5196_v1 = vadd.f32 %v18030_v14, %v5006_v60  ;;  %v18038_v60 = vld [vmem:[#allocation61_spill] sm:$0xff] }
 0x3de   :  { %6622 = vmatpush.msrb.mxu3 %v5844_v16  ;;  %v5431_v18 = vpop.f32.mrf.mxu0  ;;  %v5573_v20 = vadd.f32 %v5451_v8, %v5383_v22  ;;  %v5202_v16 = vadd.f32 %v18028_v7, %v5012_v47  ;;  %v4629_v22 = vadd.f32 %v18029_v31, %v4408_v52  ;;  %v18033_v52 = vld [vmem:[#allocation53_spill] sm:$0xff]  ;;  %v18037_v47 = vld [vmem:[#allocation63_spill] sm:$0xff]  ;;  %v18041_v7 = vld [vmem:[#allocation38_spill] sm:$0xff] }
 0x3df   :  { %v5579_v55 = vadd.f32 %v5431_v18, %v5389_v3  ;;  %v5601_v54 = vadd.f32 %v15617_v19, %v5575_v57  ;;  %v5390_v3 = vadd.f32 %v15574_v56, %v5200_v46  ;;  %v4808_v10 = vadd.f32 %v18033_v52, %v4623_v42  ;;  %v18034_v56 = vld [vmem:[#allocation54_spill] sm:$0xff]  ;;  %v5942_v42 = vld [vmem:[#allocation7 + $0x9e0] sm:$0xff]  ;;  %v5795_v14 = vld [vmem:[#allocation7 + $0x548] sm:$0xff] }
 0x3e0   :  { %v5599_v38 = vadd.f32 %v15617_v19, %v5573_v20  ;;  %6623 = vmatpush.msrb.mxu3 %v5837_v21  ;;  %v5392_v32 = vadd.f32 %v15584_v17, %v5202_v16  ;;  %v5956_v21 = vld [vmem:[#allocation7 + $0xa50] sm:$0xff]  ;;  %v5386_v6 = vadd.f32 %v15580_v9, %v5196_v1  ;;  %v5809_v20 = vld [vmem:[#allocation7 + $0x5b8] sm:$0xff]  ;;  %v4814_v59 = vadd.f32 %v18034_v56, %v4629_v22  ;;  %v5935_v1 = vld [vmem:[#allocation7 + $0x9a8] sm:$0xff] }
 0x3e1   :  { %v5605_v50 = vadd.f32 %v15660_v29, %v5579_v55  ;;  %v15675_v63 = vmax.f32 %v5601_v54, 0.0  ;;  %v5011_v55 = vadd.f32 %v18035_v23, %v4812_v33  ;;  %v5007_v54 = vadd.f32 %v18037_v47, %v4808_v10  ;;  %v18045_v52 = vld [vmem:[#allocation55_spill] sm:$0xff]  ;;  %v6054_v47 = vld [vmem:[#allocation7 + $0xd60] sm:$0xff] }
 0x3e2   :  { %v15677_v12 = vmax.f32 %v5599_v38, 0.0  ;;  %6624 = vmatpush.msrb.mxu3 %v5830_v11  ;;  %v5013_v5 = vadd.f32 %v18038_v60, %v4814_v59  ;;  %v4409_v46 = vadd.f32 %v18040_v28, %v15626_v26  ;;  %v4624_v16 = vadd.f32 %v18041_v7, %v4403_v24  ;;  %v6068_v26 = vld [vmem:[#allocation7 + $0xdd0] sm:$0xff]  ;;  %v6145_v59 = vld [vmem:[#allocation7 + $0x1038] sm:$0xff]  ;;  %v5774_v60 = vld [vmem:[#allocation7 + $0x4a0] sm:$0xff] }
 0x3e3   :  { %v15682_v39 = vmax.f32 %v5605_v50, 0.0  ;;  %6523 = vmatmul.f32.vlgmr.msra.gmra.mxu2 %v15675_v63  ;;  %v5201_v50 = vadd.f32 %v18039_v44, %v5011_v55  ;;  %v5781_v23 = vld [vmem:[#allocation7 + $0x4d8] sm:$0xff]  ;;  %v6047_v28 = vld [vmem:[#allocation7 + $0xd28] sm:$0xff] }
 0x3e4   :  { %6625 = vmatpush.msrb.mxu3 %v5823_v35  ;;  %v5474_v8 = vpop.f32.mrf.mxu2  ;;  %6691 = vmatpush.msra.mxu2 %v6180_v62  ;;  %v5500_v57 = vpop.f32.mrf.mxu3  ;;  %v18042_v62 = vld [vmem:[#allocation70_spill] sm:$0xff]  ;;  %v4809_v10 = vadd.f32 %v18045_v52, %v4624_v16  ;;  %v5921_v55 = vld [vmem:[#allocation7 + $0x938] sm:$0xff]  ;;  %v18053_v7 = vld [vmem:[#allocation73_spill] sm:$0xff] }
 0x3e5   :  { %v5574_v30 = vadd.f32 %v5474_v8, %v5384_v40  ;;  %6457 = vmatmul.f32.gmra.mxu3 %v15682_v39  ;;  %v5454_v18 = vpop.f32.mrf.mxu1  ;;  %v5582_v17 = vadd.f32 %v5500_v57, %v5392_v32  ;;  %6477 = vmatmul.f32.vlgmr.msra.gmra.mxu0 %v15677_v12  ;;  %v5197_v31 = vadd.f32 %v18042_v62, %v5007_v54  ;;  %v18044_v32 = vld [vmem:[#allocation47_spill] sm:$0xff]  ;;  %v5928_v57 = vld [vmem:[#allocation7 + $0x970] sm:$0xff]  ;;  %v6138_v54 = vld [vmem:[#allocation7 + $0x1000] sm:$0xff] }
 0x3e6   :  { %6626 = vmatpush.msrb.mxu3 %v5816_v41  ;;  %v5580_v48 = vadd.f32 %v5454_v18, %v5390_v3  ;;  %v5520_v45 = vpop.f32.mrf.mxu0  ;;  %6645 = vmatpush.msra.mxu0 %v5956_v21  ;;  %v5203_v40 = vadd.f32 %v18043_v37, %v5013_v5  ;;  %v5391_v41 = vadd.f32 %v15568_v13, %v5201_v50  ;;  %v6152_v3 = vld [vmem:[#allocation7 + $0x1070] sm:$0xff]  ;;  %v5914_v5 = vld [vmem:[#allocation7 + $0x900] sm:$0xff]  ;;  %v18052_v44 = vld [vmem:[#allocation39_spill] sm:$0xff] }
 0x3e7   :  { %v5600_v9 = vadd.f32 %v15617_v19, %v5574_v30  ;;  %6692 = vmatpush.msra.mxu2 %v6173_v51  ;;  %v5576_v11 = vadd.f32 %v5520_v45, %v5386_v6  ;;  %v5608_v38 = vadd.f32 %v15660_v29, %v5582_v17  ;;  %v4630_v8 = vadd.f32 %v18044_v32, %v4409_v46  ;;  %v5788_v30 = vld [vmem:[#allocation7 + $0x510] sm:$0xff]  ;;  %v18047_v45 = vld [vmem:[#allocation65_spill] sm:$0xff]  ;;  %v18054_v62 = vld [vmem:[#allocation79_spill] sm:$0xff] }
 0x3e8   :  { %v5606_v34 = vadd.f32 %v15660_v29, %v5580_v48  ;;  %6627 = vmatpush.msrb.mxu3 %v5809_v20  ;;  %6646 = vmatpush.msra.mxu0 %v5949_v43  ;;  %v5387_v21 = vadd.f32 %v15599_v0, %v5197_v31  ;;  %v5393_v13 = vadd.f32 %v15610_v53, %v5203_v40  ;;  %v18046_v20 = vld [vmem:[#allocation56_spill] sm:$0xff]  ;;  %v6061_v0 = vld [vmem:[#allocation7 + $0xd98] sm:$0xff]  ;;  %v6131_v46 = vld [vmem:[#allocation7 + $0xfc8] sm:$0xff] }
 0x3e9   :  { %v15702_v35 = vmax.f32 %v5600_v9, 0.0  ;;  %v5602_v36 = vadd.f32 %v15617_v19, %v5576_v11  ;;  %6693 = vmatpush.msra.mxu2 %v6166_v58  ;;  %v15709_v22 = vmax.f32 %v5608_v38, 0.0  ;;  %v4815_v56 = vadd.f32 %v18046_v20, %v4630_v8  ;;  %v18048_v9 = vld [vmem:[#allocation35_spill] sm:$0xff]  ;;  %v18049_v11 = vld [vmem:[#allocation32_spill] sm:$0xff]  ;;  %v5767_v37 = vld [vmem:[#allocation7 + $0x468] sm:$0xff] }
 0x3ea   :  { %6628 = vmatpush.msrb.mxu3 %v5802_v2  ;;  %v15713_v27 = vmax.f32 %v5606_v34, 0.0  ;;  %6647 = vmatpush.msra.mxu0 %v5942_v42  ;;  %v5008_v43 = vadd.f32 %v18047_v45, %v4809_v10  ;;  %v4189_v2 = vadd.f32 %v18049_v11, %v18048_v9  ;;  %v18051_v38 = vld [vmem:[#allocation75_spill] sm:$0xff]  ;;  %v5907_v40 = vld [vmem:[#allocation7 + $0x8c8] sm:$0xff]  ;;  %v6040_v8 = vld [vmem:[#allocation7 + $0xcf0] sm:$0xff] }
 0x3eb   :  { %v15715_v33 = vmax.f32 %v5602_v36, 0.0  ;;  %6694 = vmatpush.msra.mxu2 %v6159_v49  ;;  %6500 = vmatmul.f32.vlgmr.msra.gmra.mxu1 %v15702_v35  ;;  %v5014_v24 = vadd.f32 %v18050_v15, %v4815_v56  ;;  %v18056_v10 = vld [vmem:[#allocation57_spill] sm:$0xff]  ;;  %v6117_v20 = vld [vmem:[#allocation7 + $0xf58] sm:$0xff]  ;;  %v18057_v56 = vld [vmem:[#allocation68_spill] sm:$0xff] }
 0x3ec   :  { %6526 = vmatmul.f32.gmra.mxu2 %v15709_v22  ;;  %v5477_v51 = vpop.f32.mrf.mxu2  ;;  %6629 = vmatpush.msrb.mxu3 %v5795_v14  ;;  %v5198_v34 = vadd.f32 %v18051_v38, %v5008_v43  ;;  %v4410_v50 = vadd.f32 %v18052_v44, %v4189_v2  ;;  %v18055_v14 = vld [vmem:[#allocation45_spill] sm:$0xff]  ;;  %v6110_v45 = vld [vmem:[#allocation7 + $0xf20] sm:$0xff]  ;;  %v18058_v43 = vld [vmem:[#allocation78_spill] sm:$0xff] }
 0x3ed   :  { %6648 = vmatpush.msra.mxu0 %v5935_v1  ;;  %v5581_v6 = vadd.f32 %v5477_v51, %v5391_v41  ;;  %v5543_v18 = vpop.f32.mrf.mxu1  ;;  %6668 = vmatpush.msra.mxu1 %v6068_v26  ;;  %v5204_v16 = vadd.f32 %v18053_v7, %v5014_v24  ;;  %v6019_v9 = vld [vmem:[#allocation7 + $0xc48] sm:$0xff]  ;;  %v6012_v38 = vld [vmem:[#allocation7 + $0xc10] sm:$0xff]  ;;  %v6082_v7 = vld [vmem:[#allocation7 + $0xe40] sm:$0xff] }
 0x3ee   :  { %6695 = vmatpush.msra.mxu2 %v6152_v3  ;;  %v5523_v17 = vpop.f32.mrf.mxu0  ;;  %v5577_v48 = vadd.f32 %v5543_v18, %v5387_v21  ;;  %6480 = vmatmul.f32.gmra.mxu0 %v15713_v27  ;;  %v5388_v31 = vadd.f32 %v18054_v62, %v5198_v34  ;;  %v4631_v1 = vadd.f32 %v18055_v14, %v4410_v50  ;;  %v6124_v21 = vld [vmem:[#allocation7 + $0xf90] sm:$0xff]  ;;  %v6033_v18 = vld [vmem:[#allocation7 + $0xcb8] sm:$0xff]  ;;  %v6103_v11 = vld [vmem:[#allocation7 + $0xee8] sm:$0xff] }
 0x3ef   :  { %v5607_v58 = vadd.f32 %v15660_v29, %v5581_v6  ;;  %6546 = vmatmul.f32.vlgmr.msra.gmra.mxu3 %v15715_v33  ;;  %v5583_v53 = vadd.f32 %v5523_v17, %v5393_v13  ;;  %6649 = vmatpush.msra.mxu0 %v5928_v57  ;;  %v5394_v26 = vadd.f32 %v15650_v4, %v5204_v16  ;;  %v5760_v6 = vld [vmem:[#allocation7 + $0x430] sm:$0xff]  ;;  %v5893_v17 = vld [vmem:[#allocation7 + $0x858] sm:$0xff]  ;;  %v5739_v24 = vld [vmem:[#allocation7 + $0x388] sm:$0xff] }
 0x3f0   :  { %6630 = vmatpush.msrb.mxu3 %v5788_v30  ;;  %6669 = vmatpush.msra.mxu1 %v6061_v0  ;;  %v5603_v49 = vadd.f32 %v15617_v19, %v5577_v48  ;;  %v4816_v13 = vadd.f32 %v18056_v10, %v4631_v1  ;;  %v5900_v4 = vld [vmem:[#allocation7 + $0x890] sm:$0xff]  ;;  %v6026_v48 = vld [vmem:[#allocation7 + $0xc80] sm:$0xff]  ;;  %v6285_v50 = vld [vmem:[#allocation7 + $0x1498] sm:$0xff] }
 0x3f1   :  { %6696 = vmatpush.msra.mxu2 %v6145_v59  ;;  %v5609_v42 = vadd.f32 %v15660_v29, %v5583_v53  ;;  %v15735_v36 = vmax.f32 %v5607_v58, 0.0  ;;  %6650 = vmatpush.msra.mxu0 %v5921_v55  ;;  %v5753_v59 = vld [vmem:[#allocation7 + $0x3f8] sm:$0xff]  ;;  %v5746_v53 = vld [vmem:[#allocation7 + $0x3c0] sm:$0xff]  ;;  %v6096_v34 = vld [vmem:[#allocation7 + $0xeb0] sm:$0xff] }
 0x3f2   :  { %6631 = vmatpush.msrb.mxu3 %v5781_v23  ;;  %6670 = vmatpush.msra.mxu1 %v6054_v47  ;;  %v15743_v32 = vmax.f32 %v5603_v49, 0.0  ;;  %v5015_v0 = vadd.f32 %v18057_v56, %v4816_v13  ;;  %v5886_v23 = vld [vmem:[#allocation7 + $0x820] sm:$0xff]  ;;  %v5879_v47 = vld [vmem:[#allocation7 + $0x7e8] sm:$0xff]  ;;  %v6292_v49 = vld [vmem:[#allocation7 + $0x14d0] sm:$0xff] }
 0x3f3   :  { %6697 = vmatpush.msra.mxu2 %v6138_v54  ;;  %6651 = vmatpush.msra.mxu0 %v5914_v5  ;;  %v15741_v3 = vmax.f32 %v5609_v42, 0.0  ;;  %v6089_v5 = vld [vmem:[#allocation7 + $0xe78] sm:$0xff]  ;;  %v6278_v16 = vld [vmem:[#allocation7 + $0x1460] sm:$0xff]  ;;  %v6075_v14 = vld [vmem:[#allocation7 + $0xe08] sm:$0xff] }
 0x3f4   :  { %6632 = vmatpush.msrb.mxu3 %v5774_v60  ;;  %v5566_v41 = vpop.f32.mrf.mxu2  ;;  %6671 = vmatpush.msra.mxu1 %v6047_v28  ;;  %v5205_v58 = vadd.f32 %v18058_v43, %v5015_v0  ;;  %v6005_v60 = vld [vmem:[#allocation7 + $0xbd8] sm:$0xff]  ;;  %v5858_v62 = vld [vmem:[#allocation7 + $0x740] sm:$0xff]  ;;  %v5831_v13 = vld [vmem:[#allocation7 + $0x668] sm:$0xff] }
 0x3f5   :  { %6698 = vmatpush.msra.mxu2 %v6131_v46  ;;  %v5578_v51 = vadd.f32 %v5566_v41, %v5388_v31  ;;  %v5546_v52 = vpop.f32.mrf.mxu1  ;;  %6503 = vmatmul.f32.gmra.mxu1 %v15735_v36  ;;  %v5865_v28 = vld [vmem:[#allocation7 + $0x778] sm:$0xff]  ;;  %v5998_v46 = vld [vmem:[#allocation7 + $0xba0] sm:$0xff]  ;;  %v5991_v31 = vld [vmem:[#allocation7 + $0xb68] sm:$0xff] }
 0x3f6   :  { %6615 = vmatmul.f32.vlgmr.msrb.gmra.mxu2 %v15644_v25  ;;  %6633 = vmatpush.msrb.mxu3 %v5767_v37  ;;  %v5584_v30 = vadd.f32 %v5546_v52, %v5394_v26  ;;  %v5395_v15 = vadd.f32 %v15608_v61, %v5205_v58  ;;  %v5872_v61 = vld [vmem:[#allocation7 + $0x7b0] sm:$0xff]  ;;  %v5845_v37 = vld [vmem:[#allocation7 + $0x6d8] sm:$0xff]  ;;  %v6383_v56 = vld [vmem:[#allocation7 + $0x17a8] sm:$0xff] }
 0x3f7   :  { %6652 = vmatpush.msra.mxu0 %v5907_v40  ;;  %6672 = vmatpush.msra.mxu1 %v6040_v8  ;;  %v5604_v57 = vadd.f32 %v15617_v19, %v5578_v51  ;;  %v5851_v40 = vld [vmem:[#allocation7 + $0x708] sm:$0xff]  ;;  %v5984_v41 = vld [vmem:[#allocation7 + $0xb30] sm:$0xff]  ;;  %v5977_v51 = vld [vmem:[#allocation7 + $0xaf8] sm:$0xff] }
 0x3f8   :  { %6699 = vmatpush.msra.mxu2 %v6124_v21  ;;  %6549 = vmatmul.f32.gmra.mxu3 %v15741_v3  ;;  %v5610_v19 = vadd.f32 %v15660_v29, %v5584_v30  ;;  %v6264_v26 = vld [vmem:[#allocation7 + $0x13f0] sm:$0xff]  ;;  %v5838_v21 = vld [vmem:[#allocation7 + $0x6a0] sm:$0xff]  ;;  %v6257_v52 = vld [vmem:[#allocation7 + $0x13b8] sm:$0xff] }
 0x3f9   :  { %6569 = vmatmul.f32.vlgmr.msrb.gmra.mxu0 %v15743_v32  ;;  %6634 = vmatpush.msrb.mxu3 %v5760_v6  ;;  %v15754_v55 = vmax.f32 %v5604_v57, 0.0  ;;  %v6404_v8 = vld [vmem:[#allocation7 + $0x1850] sm:$0xf]  ;;  %v6397_v10 = vld [vmem:[#allocation7 + $0x1818] sm:$0xff]  ;;  %v5970_v6 = vld [vmem:[#allocation7 + $0xac0] sm:$0xff] }
 0x3fa   :  { %6653 = vmatpush.msra.mxu0 %v5900_v4  ;;  %6673 = vmatpush.msra.mxu1 %v6033_v18  ;;  %v15757_v54 = vmax.f32 %v5610_v19, 0.0  ;;  %v6250_v4 = vld [vmem:[#allocation7 + $0x1380] sm:$0xff]  ;;  %v5824_v57 = vld [vmem:[#allocation7 + $0x630] sm:$0xff]  ;;  %v5963_v18 = vld [vmem:[#allocation7 + $0xa88] sm:$0xff] }
 0x3fb   :  { %6700 = vmatpush.msra.mxu2 %v6117_v20  ;;  %6635 = vmatpush.msrb.mxu3 %v5753_v59  ;;  %v6390_v30 = vld [vmem:[#allocation7 + $0x17e0] sm:$0xff]  ;;  %v6243_v20 = vld [vmem:[#allocation7 + $0x1348] sm:$0xff]  ;;  %v5733_v0 = vld [vmem:[#allocation7 + $0x358] sm:$0xff] }
 0x3fc   :  { %6654 = vmatpush.msra.mxu0 %v5893_v17  ;;  %v5569_v2 = vpop.f32.mrf.mxu2  ;;  %6674 = vmatpush.msra.mxu1 %v6026_v48  ;;  %v5817_v59 = vld [vmem:[#allocation7 + $0x5f8] sm:$0xff]  ;;  %v6236_v17 = vld [vmem:[#allocation7 + $0x1310] sm:$0xff]  ;;  %v5810_v43 = vld [vmem:[#allocation7 + $0x5c0] sm:$0xff] }
 0x3fd   :  { %6701 = vmatpush.msra.mxu2 %v6110_v45  ;;  %6636 = vmatpush.msrb.mxu3 %v5746_v53  ;;  %v5585_v42 = vadd.f32 %v5569_v2, %v5395_v15  ;;  %v6376_v48 = vld [vmem:[#allocation7 + $0x1770] sm:$0xff]  ;;  %v5726_v45 = vld [vmem:[#allocation7 + $0x320] sm:$0xff]  ;;  %v6229_v58 = vld [vmem:[#allocation7 + $0x12d8] sm:$0xff] }
 0x3fe   :  { %6655 = vmatpush.msra.mxu0 %v5886_v23  ;;  %6675 = vmatpush.msra.mxu1 %v6019_v9  ;;  %v6369_v19 = vld [vmem:[#allocation7 + $0x1738] sm:$0xff]  ;;  %v5719_v53 = vld [vmem:[#allocation7 + $0x2e8] sm:$0xff]  ;;  %v6222_v9 = vld [vmem:[#allocation7 + $0x12a0] sm:$0xff] }
 0x3ff   :  { %6702 = vmatpush.msra.mxu2 %v6103_v11  ;;  %11937 = vmatmul.msk.f32.vlgmr.msrb.gmra.mxu1 %vm1116_vm5, %v15754_v55  ;;  %v5611_v44 = vadd.f32 %v15660_v29, %v5585_v42  ;;  %v6271_v29 = vld [vmem:[#allocation7 + $0x1428] sm:$0xff]  ;;  %v6362_v11 = vld [vmem:[#allocation7 + $0x1700] sm:$0xff]  ;;  %v5712_v2 = vld [vmem:[#allocation7 + $0x2b0] sm:$0xff] }
 0x400   :  { %6618 = vmatmul.f32.gmra.mxu2 %v15682_v39  ;;  %6637 = vmatpush.msrb.mxu3 %v5739_v24  ;;  %v5803_v23 = vld [vmem:[#allocation7 + $0x588] sm:$0xff]  ;;  %v5796_v15 = vld [vmem:[#allocation7 + $0x550] sm:$0xff] }
 0x401   :  { %6656 = vmatpush.msra.mxu0 %v5879_v47  ;;  %6676 = vmatpush.msra.mxu1 %v6012_v38  ;;  %v15765_v1 = vmax.f32 %v5611_v44, 0.0  ;;  %v6215_v24 = vld [vmem:[#allocation7 + $0x1268] sm:$0xff]  ;;  %v5705_v38 = vld [vmem:[#allocation7 + $0x278] sm:$0xff]  ;;  %v6208_v42 = vld [vmem:[#allocation7 + $0x1230] sm:$0xff] }
 0x402   :  { %6703 = vmatpush.msra.mxu2 %v6096_v34  ;;  %6714 = vmatpush.msra.mxu3 %v6292_v49  ;;  %v6355_v47 = vld [vmem:[#allocation7 + $0x16c8] sm:$0xff]  ;;  %v5789_v34 = vld [vmem:[#allocation7 + $0x518] sm:$0xff]  ;;  %v6348_v49 = vld [vmem:[#allocation7 + $0x1690] sm:$0xff] }
 0x403   :  { %6572 = vmatmul.f32.gmra.mxu0 %v15757_v54  ;;  %6638 = vmatmul.f32.vlgmr.msrb.gmra.mxu3 %v15677_v12  ;;  %v6341_v44 = vld [vmem:[#allocation7 + $0x1658] sm:$0xff] }
 0x404   :  { %6657 = vmatpush.msra.mxu0 %v5872_v61  ;;  %6677 = vmatpush.msra.mxu1 %v6005_v60  ;;  %v5698_v61 = vld [vmem:[#allocation7 + $0x240] sm:$0xff] }
 0x405   :  { %6704 = vmatpush.msra.mxu2 %v6089_v5  ;;  %6715 = vmatpush.msra.mxu3 %v6285_v50  ;;  %v5782_v60 = vld [vmem:[#allocation7 + $0x4e0] sm:$0xff]  ;;  %v6201_v5 = vld [vmem:[#allocation7 + $0x11f8] sm:$0xff]  ;;  %v5691_v50 = vld [vmem:[#allocation7 + $0x208] sm:$0xff] }
 0x406   :  { %6658 = vmatpush.msra.mxu0 %v5865_v28  ;;  %6678 = vmatpush.msra.mxu1 %v5998_v46  ;;  %v5775_v28 = vld [vmem:[#allocation7 + $0x4a8] sm:$0xff]  ;;  %v6194_v46 = vld [vmem:[#allocation7 + $0x11c0] sm:$0xff] }
 0x407   :  { %6705 = vmatpush.msra.mxu2 %v6082_v7  ;;  %6716 = vmatpush.msra.mxu3 %v6278_v16  ;;  %v6334_v7 = vld [vmem:[#allocation7 + $0x1620] sm:$0xff]  ;;  %v5684_v16 = vld [vmem:[#allocation7 + $0x1d0] sm:$0xff] }
 0x408   :  { %6659 = vmatpush.msra.mxu0 %v5858_v62  ;;  %6679 = vmatpush.msra.mxu1 %v5991_v31  ;;  %v5768_v62 = vld [vmem:[#allocation7 + $0x470] sm:$0xff]  ;;  %v6187_v31 = vld [vmem:[#allocation7 + $0x1188] sm:$0xff] }
 0x409   :  { %6706 = vmatpush.msra.mxu2 %v6075_v14  ;;  %6717 = vmatpush.msra.mxu3 %v6271_v29  ;;  %v6327_v14 = vld [vmem:[#allocation7 + $0x15e8] sm:$0xff]  ;;  %v5677_v29 = vld [vmem:[#allocation7 + $0x198] sm:$0xff] }
 0x40a   :  { %11938 = vmatmul.msk.f32.gmra.mxu1 %vm1116_vm5, %v15765_v1  ;;  %6660 = vmatpush.msra.mxu0 %v5851_v40  ;;  %v6320_v40 = vld [vmem:[#allocation7 + $0x15b0] sm:$0xff] }
 0x40b   :  { %6783 = vmatpush.msrb.mxu2 %v5845_v37  ;;  %6680 = vmatpush.msra.mxu1 %v5984_v41  ;;  %v5761_v37 = vld [vmem:[#allocation7 + $0x438] sm:$0xff] }
 0x40c   :  { %6707 = vmatmul.f32.vlgmr.msra.gmra.mxu2 %v15715_v33  ;;  %6718 = vmatpush.msra.mxu3 %v6264_v26  ;;  %v5957_v41 = vld [vmem:[#allocation7 + $0xa58] sm:$0xff]  ;;  %v5670_v26 = vld [vmem:[#allocation7 + $0x160] sm:$0xff] }
 0x40d   :  { %11939 = vmatpush.msk.msrb.mxu0 %vm6416_vm2, %v6404_v8  ;;  %6784 = vmatpush.msrb.mxu2 %v5838_v21  ;;  %v5754_v8 = vld [vmem:[#allocation7 + $0x400] sm:$0xff]  ;;  %v6313_v21 = vld [vmem:[#allocation7 + $0x1578] sm:$0xff] }
 0x40e   :  { %6641 = vmatmul.f32.gmra.mxu3 %v15713_v27  ;;  %6661 = vmatmul.f32.vlgmr.msra.gmra.mxu0 %v15702_v35 }
 0x40f   :  { %6681 = vmatpush.msra.mxu1 %v5977_v51  ;;  %6719 = vmatpush.msra.mxu3 %v6257_v52  ;;  %v5950_v51 = vld [vmem:[#allocation7 + $0xa20] sm:$0xff]  ;;  %v5663_v52 = vld [vmem:[#allocation7 + $0x128] sm:$0xff] }
 0x410   :  { %6738 = vmatpush.msrb.mxu0 %v6397_v10  ;;  %6785 = vmatpush.msrb.mxu2 %v5831_v13  ;;  %v5747_v10 = vld [vmem:[#allocation7 + $0x3c8] sm:$0xff]  ;;  %v6306_v13 = vld [vmem:[#allocation7 + $0x1540] sm:$0xff] }
 0x411   :  { %6682 = vmatpush.msra.mxu1 %v5970_v6  ;;  %6720 = vmatpush.msra.mxu3 %v6250_v4  ;;  %v5943_v6 = vld [vmem:[#allocation7 + $0x9e8] sm:$0xff]  ;;  %v5656_v4 = vld [vmem:[#allocation7 + $0xf0] sm:$0xff] }
 0x412   :  { %6739 = vmatpush.msrb.mxu0 %v6390_v30  ;;  %6786 = vmatpush.msrb.mxu2 %v5824_v57  ;;  %v5740_v30 = vld [vmem:[#allocation7 + $0x390] sm:$0xff]  ;;  %v6299_v57 = vld [vmem:[#allocation7 + $0x1508] sm:$0xff] }
 0x413   :  { %6683 = vmatpush.msra.mxu1 %v5963_v18  ;;  %6721 = vmatpush.msra.mxu3 %v6243_v20  ;;  %v5936_v18 = vld [vmem:[#allocation7 + $0x9b0] sm:$0xff]  ;;  %v6293_v20 = vld [vmem:[#allocation7 + $0x14d8] sm:$0xff] }
 0x414   :  { %6740 = vmatpush.msrb.mxu0 %v6383_v56  ;;  %6787 = vmatpush.msrb.mxu2 %v5817_v59  ;;  %v5649_v56 = vld [vmem:[#allocation7 + $0xb8] sm:$0xff] }
 0x415   :  { %6760 = vmatpush.msrb.mxu1 %v5733_v0  ;;  %6710 = vmatmul.f32.gmra.mxu2 %v15741_v3  ;;  %v5929_v0 = vld [vmem:[#allocation7 + $0x978] sm:$0xff] }
 0x416   :  { %6684 = vmatmul.f32.vlgmr.msra.gmra.mxu1 %v15675_v63  ;;  %6722 = vmatpush.msra.mxu3 %v6236_v17  ;;  %v6069_v59 = vld [vmem:[#allocation7 + $0xdd8] sm:$0xff]  ;;  %v6286_v17 = vld [vmem:[#allocation7 + $0x14a0] sm:$0xff] }
 0x417   :  { %6741 = vmatpush.msrb.mxu0 %v6376_v48  ;;  %6761 = vmatpush.msrb.mxu1 %v5726_v45  ;;  %v5642_v48 = vld [vmem:[#allocation7 + $0x80] sm:$0xff] }
 0x418   :  { %6788 = vmatpush.msrb.mxu2 %v5810_v43  ;;  %6664 = vmatmul.f32.gmra.mxu0 %v15735_v36  ;;  %v5922_v45 = vld [vmem:[#allocation7 + $0x940] sm:$0xff] }
 0x419   :  { %6723 = vmatpush.msra.mxu3 %v6229_v58  ;;  %6742 = vmatpush.msrb.mxu0 %v6369_v19  ;;  %v6062_v43 = vld [vmem:[#allocation7 + $0xda0] sm:$0xff]  ;;  %v6279_v58 = vld [vmem:[#allocation7 + $0x1468] sm:$0xff] }
 0x41a   :  { %6762 = vmatpush.msrb.mxu1 %v5719_v53  ;;  %6789 = vmatpush.msrb.mxu2 %v5803_v23  ;;  %v5635_v19 = vld [vmem:[#allocation7 + $0x48] sm:$0xff] }
 0x41b   :  { %6724 = vmatpush.msra.mxu3 %v6222_v9  ;;  %6743 = vmatpush.msrb.mxu0 %v6362_v11  ;;  %v5915_v53 = vld [vmem:[#allocation7 + $0x908] sm:$0xff]  ;;  %v6272_v9 = vld [vmem:[#allocation7 + $0x1430] sm:$0xff] }
 0x41c   :  { %6763 = vmatpush.msrb.mxu1 %v5712_v2  ;;  %6790 = vmatpush.msrb.mxu2 %v5796_v15  ;;  %v6055_v23 = vld [vmem:[#allocation7 + $0xd68] sm:$0xff]  ;;  %v5628_v11 = vld [vmem:[#allocation7 + $0x10] sm:$0xff] }
 0x41d   :  { %6725 = vmatpush.msra.mxu3 %v6215_v24  ;;  %6744 = vmatpush.msrb.mxu0 %v6355_v47  ;;  %v5908_v2 = vld [vmem:[#allocation7 + $0x8d0] sm:$0xff]  ;;  %v6181_v24 = vld [vmem:[#allocation7 + $0x1158] sm:$0xff] }
 0x41e   :  { %6764 = vmatpush.msrb.mxu1 %v5705_v38  ;;  %6791 = vmatpush.msrb.mxu2 %v5789_v34  ;;  %v6048_v15 = vld [vmem:[#allocation7 + $0xd30] sm:$0xff]  ;;  %v6265_v47 = vld [vmem:[#allocation7 + $0x13f8] sm:$0xff] }
 0x41f   :  { %6687 = vmatmul.f32.gmra.mxu1 %v15709_v22  ;;  %6726 = vmatpush.msra.mxu3 %v6208_v42  ;;  %v5901_v38 = vld [vmem:[#allocation7 + $0x898] sm:$0xff]  ;;  %v6174_v42 = vld [vmem:[#allocation7 + $0x1120] sm:$0xff] }
 0x420   :  { %6745 = vmatpush.msrb.mxu0 %v6348_v49  ;;  %6765 = vmatpush.msrb.mxu1 %v5698_v61  ;;  %v6041_v34 = vld [vmem:[#allocation7 + $0xcf8] sm:$0xff]  ;;  %v6258_v49 = vld [vmem:[#allocation7 + $0x13c0] sm:$0xff] }
 0x421   :  { %6792 = vmatpush.msrb.mxu2 %v5782_v60  ;;  %6727 = vmatpush.msra.mxu3 %v6201_v5  ;;  %v5894_v61 = vld [vmem:[#allocation7 + $0x860] sm:$0xff]  ;;  %v6167_v5 = vld [vmem:[#allocation7 + $0x10e8] sm:$0xff] }
 0x422   :  { %6746 = vmatpush.msrb.mxu0 %v6341_v44  ;;  %6766 = vmatpush.msrb.mxu1 %v5691_v50  ;;  %v6034_v60 = vld [vmem:[#allocation7 + $0xcc0] sm:$0xff]  ;;  %v6251_v44 = vld [vmem:[#allocation7 + $0x1388] sm:$0xff] }
 0x423   :  { %6793 = vmatpush.msrb.mxu2 %v5775_v28  ;;  %6728 = vmatpush.msra.mxu3 %v6194_v46  ;;  %v5887_v50 = vld [vmem:[#allocation7 + $0x828] sm:$0xff]  ;;  %v6160_v46 = vld [vmem:[#allocation7 + $0x10b0] sm:$0xff] }
 0x424   :  { %6747 = vmatpush.msrb.mxu0 %v6334_v7  ;;  %6767 = vmatpush.msrb.mxu1 %v5684_v16  ;;  %v6027_v28 = vld [vmem:[#allocation7 + $0xc88] sm:$0xff]  ;;  %v6244_v7 = vld [vmem:[#allocation7 + $0x1350] sm:$0xff] }
 0x425   :  { %6794 = vmatpush.msrb.mxu2 %v5768_v62  ;;  %6729 = vmatpush.msra.mxu3 %v6187_v31  ;;  %v5880_v16 = vld [vmem:[#allocation7 + $0x7f0] sm:$0xff]  ;;  %v6153_v31 = vld [vmem:[#allocation7 + $0x1078] sm:$0xff] }
 0x426   :  { %6748 = vmatpush.msrb.mxu0 %v6327_v14  ;;  %6768 = vmatpush.msrb.mxu1 %v5677_v29  ;;  %v6020_v62 = vld [vmem:[#allocation7 + $0xc50] sm:$0xff]  ;;  %v6237_v14 = vld [vmem:[#allocation7 + $0x1318] sm:$0xff] }
 0x427   :  { %6795 = vmatpush.msrb.mxu2 %v5761_v37  ;;  %6730 = vmatmul.f32.vlgmr.msra.gmra.mxu3 %v15743_v32  ;;  %v5873_v29 = vld [vmem:[#allocation7 + $0x7b8] sm:$0xff] }
 0x428   :  { %6749 = vmatpush.msrb.mxu0 %v6320_v40  ;;  %6806 = vmatpush.msrb.mxu3 %v5957_v41  ;;  %v6013_v37 = vld [vmem:[#allocation7 + $0xc18] sm:$0xff]  ;;  %v6146_v40 = vld [vmem:[#allocation7 + $0x1040] sm:$0xff] }
 0x429   :  { %6769 = vmatpush.msrb.mxu1 %v5670_v26  ;;  %6796 = vmatpush.msrb.mxu2 %v5754_v8  ;;  %v6230_v41 = vld [vmem:[#allocation7 + $0x12e0] sm:$0xff] }
 0x42a   :  { %6750 = vmatpush.msrb.mxu0 %v6313_v21  ;;  %6807 = vmatpush.msrb.mxu3 %v5950_v51  ;;  %v5866_v26 = vld [vmem:[#allocation7 + $0x780] sm:$0xff]  ;;  %v6139_v21 = vld [vmem:[#allocation7 + $0x1008] sm:$0xff] }
 0x42b   :  { %6770 = vmatpush.msrb.mxu1 %v5663_v52  ;;  %6797 = vmatpush.msrb.mxu2 %v5747_v10  ;;  %v6006_v8 = vld [vmem:[#allocation7 + $0xbe0] sm:$0xff]  ;;  %v6223_v51 = vld [vmem:[#allocation7 + $0x12a8] sm:$0xff] }
 0x42c   :  { %6751 = vmatpush.msrb.mxu0 %v6306_v13  ;;  %6808 = vmatpush.msrb.mxu3 %v5943_v6  ;;  %v5859_v52 = vld [vmem:[#allocation7 + $0x748] sm:$0xff]  ;;  %v6132_v13 = vld [vmem:[#allocation7 + $0xfd0] sm:$0xff] }
 0x42d   :  { %6771 = vmatpush.msrb.mxu1 %v5656_v4  ;;  %6798 = vmatpush.msrb.mxu2 %v5740_v30  ;;  %v5999_v10 = vld [vmem:[#allocation7 + $0xba8] sm:$0xff]  ;;  %v6216_v6 = vld [vmem:[#allocation7 + $0x1270] sm:$0xff] }
 0x42e   :  { %6752 = vmatpush.msrb.mxu0 %v6299_v57  ;;  %6799 = vmatmul.f32.vlgmr.msrb.gmra.mxu2 %v15677_v12  ;;  %v5852_v4 = vld [vmem:[#allocation7 + $0x710] sm:$0xff]  ;;  %v6125_v57 = vld [vmem:[#allocation7 + $0xf98] sm:$0xff] }
 0x42f   :  { %6809 = vmatpush.msrb.mxu3 %v5936_v18  ;;  %6875 = vmatpush.msra.mxu2 %v6293_v20  ;;  %v5992_v30 = vld [vmem:[#allocation7 + $0xb70] sm:$0xff]  ;;  %v6209_v18 = vld [vmem:[#allocation7 + $0x1238] sm:$0xff] }
 0x430   :  { %6772 = vmatpush.msrb.mxu1 %v5649_v56  ;;  %6733 = vmatmul.f32.gmra.mxu3 %v15757_v54  ;;  %v5985_v20 = vld [vmem:[#allocation7 + $0xb38] sm:$0xff] }
 0x431   :  { %11940 = vmatmul.msk.f32.vlgmr.msrb.gmra.mxu0 %vm1116_vm5, %v15754_v55  ;;  %6810 = vmatpush.msrb.mxu3 %v5929_v0  ;;  %v6405_v56 = vld [vmem:[#allocation7 + $0x1858] sm:$0xf]  ;;  %v6118_v0 = vld [vmem:[#allocation7 + $0xf60] sm:$0xff] }
 0x432   :  { %6829 = vmatpush.msra.mxu0 %v6069_v59  ;;  %6876 = vmatpush.msra.mxu2 %v6286_v17  ;;  %v6202_v59 = vld [vmem:[#allocation7 + $0x1200] sm:$0xff] }
 0x433   :  { %6773 = vmatpush.msrb.mxu1 %v5642_v48  ;;  %6811 = vmatpush.msrb.mxu3 %v5922_v45  ;;  %v5978_v17 = vld [vmem:[#allocation7 + $0xb00] sm:$0xff]  ;;  %v6111_v45 = vld [vmem:[#allocation7 + $0xf28] sm:$0xff] }
 0x434   :  { %6830 = vmatpush.msra.mxu0 %v6062_v43  ;;  %6877 = vmatpush.msra.mxu2 %v6279_v58  ;;  %v6398_v48 = vld [vmem:[#allocation7 + $0x1820] sm:$0xff]  ;;  %v6195_v43 = vld [vmem:[#allocation7 + $0x11c8] sm:$0xff] }
 0x435   :  { %6774 = vmatpush.msrb.mxu1 %v5635_v19  ;;  %6812 = vmatpush.msrb.mxu3 %v5915_v53  ;;  %v5971_v58 = vld [vmem:[#allocation7 + $0xac8] sm:$0xff]  ;;  %v6104_v53 = vld [vmem:[#allocation7 + $0xef0] sm:$0xff] }
 0x436   :  { %6831 = vmatpush.msra.mxu0 %v6055_v23  ;;  %6878 = vmatpush.msra.mxu2 %v6272_v9  ;;  %v6391_v19 = vld [vmem:[#allocation7 + $0x17e8] sm:$0xff]  ;;  %v6188_v23 = vld [vmem:[#allocation7 + $0x1190] sm:$0xff] }
 0x437   :  { %6775 = vmatpush.msrb.mxu1 %v5628_v11  ;;  %6802 = vmatmul.f32.gmra.mxu2 %v15713_v27  ;;  %v5964_v9 = vld [vmem:[#allocation7 + $0xa90] sm:$0xff] }
 0x438   :  { %6776 = vmatmul.f32.vlgmr.msrb.gmra.mxu1 %v15644_v25  ;;  %6813 = vmatpush.msrb.mxu3 %v5908_v2  ;;  %v6384_v11 = vld [vmem:[#allocation7 + $0x17b0] sm:$0xff]  ;;  %v5958_v2 = vld [vmem:[#allocation7 + $0xa60] sm:$0xff] }
 0x439   :  { %6832 = vmatpush.msra.mxu0 %v6048_v15  ;;  %6852 = vmatpush.msra.mxu1 %v6181_v24  ;;  %v6097_v15 = vld [vmem:[#allocation7 + $0xeb8] sm:$0xff] }
 0x43a   :  { %6879 = vmatpush.msra.mxu2 %v6265_v47  ;;  %11941 = vmatmul.msk.f32.gmra.mxu0 %vm1116_vm5, %v15765_v1  ;;  %v6377_v24 = vld [vmem:[#allocation7 + $0x1778] sm:$0xff]  ;;  %v5734_v47 = vld [vmem:[#allocation7 + $0x360] sm:$0xff] }
 0x43b   :  { %6814 = vmatpush.msrb.mxu3 %v5901_v38  ;;  %6833 = vmatpush.msra.mxu0 %v6041_v34  ;;  %v5951_v38 = vld [vmem:[#allocation7 + $0xa28] sm:$0xff]  ;;  %v6090_v34 = vld [vmem:[#allocation7 + $0xe80] sm:$0xff] }
 0x43c   :  { %6853 = vmatpush.msra.mxu1 %v6174_v42  ;;  %6880 = vmatpush.msra.mxu2 %v6258_v49  ;;  %v6370_v42 = vld [vmem:[#allocation7 + $0x1740] sm:$0xff]  ;;  %v5727_v49 = vld [vmem:[#allocation7 + $0x328] sm:$0xff] }
 0x43d   :  { %6815 = vmatpush.msrb.mxu3 %v5894_v61  ;;  %6834 = vmatpush.msra.mxu0 %v6034_v60  ;;  %v5944_v61 = vld [vmem:[#allocation7 + $0x9f0] sm:$0xff]  ;;  %v6083_v60 = vld [vmem:[#allocation7 + $0xe48] sm:$0xff] }
 0x43e   :  { %6854 = vmatpush.msra.mxu1 %v6167_v5  ;;  %6881 = vmatpush.msra.mxu2 %v6251_v44  ;;  %v6363_v5 = vld [vmem:[#allocation7 + $0x1708] sm:$0xff]  ;;  %v5720_v44 = vld [vmem:[#allocation7 + $0x2f0] sm:$0xff] }
 0x43f   :  { %6816 = vmatpush.msrb.mxu3 %v5887_v50  ;;  %6835 = vmatpush.msra.mxu0 %v6027_v28  ;;  %v5937_v50 = vld [vmem:[#allocation7 + $0x9b8] sm:$0xff]  ;;  %v6076_v28 = vld [vmem:[#allocation7 + $0xe10] sm:$0xff] }
 0x440   :  { %6855 = vmatpush.msra.mxu1 %v6160_v46  ;;  %6882 = vmatpush.msra.mxu2 %v6244_v7  ;;  %v6356_v46 = vld [vmem:[#allocation7 + $0x16d0] sm:$0xff]  ;;  %v5713_v7 = vld [vmem:[#allocation7 + $0x2b8] sm:$0xff] }
 0x441   :  { %6779 = vmatmul.f32.gmra.mxu1 %v15682_v39  ;;  %6817 = vmatpush.msrb.mxu3 %v5880_v16  ;;  %v5846_v16 = vld [vmem:[#allocation7 + $0x6e0] sm:$0xff] }
 0x442   :  { %6836 = vmatpush.msra.mxu0 %v6020_v62  ;;  %6856 = vmatpush.msra.mxu1 %v6153_v31  ;;  %v5930_v62 = vld [vmem:[#allocation7 + $0x980] sm:$0xff]  ;;  %v6349_v31 = vld [vmem:[#allocation7 + $0x1698] sm:$0xff] }
 0x443   :  { %6883 = vmatpush.msra.mxu2 %v6237_v14  ;;  %6818 = vmatpush.msrb.mxu3 %v5873_v29  ;;  %v5706_v14 = vld [vmem:[#allocation7 + $0x280] sm:$0xff]  ;;  %v5839_v29 = vld [vmem:[#allocation7 + $0x6a8] sm:$0xff] }
 0x444   :  { %6837 = vmatpush.msra.mxu0 %v6013_v37  ;;  %6857 = vmatpush.msra.mxu1 %v6146_v40  ;;  %v5923_v37 = vld [vmem:[#allocation7 + $0x948] sm:$0xff]  ;;  %v6342_v40 = vld [vmem:[#allocation7 + $0x1660] sm:$0xff] }
 0x445   :  { %6884 = vmatpush.msra.mxu2 %v6230_v41  ;;  %6819 = vmatpush.msrb.mxu3 %v5866_v26  ;;  %v5699_v41 = vld [vmem:[#allocation7 + $0x248] sm:$0xff]  ;;  %v5832_v26 = vld [vmem:[#allocation7 + $0x670] sm:$0xff] }
 0x446   :  { %6838 = vmatpush.msra.mxu0 %v6006_v8  ;;  %6858 = vmatpush.msra.mxu1 %v6139_v21  ;;  %v5916_v8 = vld [vmem:[#allocation7 + $0x910] sm:$0xff]  ;;  %v6335_v21 = vld [vmem:[#allocation7 + $0x1628] sm:$0xff] }
 0x447   :  { %6885 = vmatpush.msra.mxu2 %v6223_v51  ;;  %6820 = vmatpush.msrb.mxu3 %v5859_v52  ;;  %v5692_v51 = vld [vmem:[#allocation7 + $0x210] sm:$0xff]  ;;  %v5825_v52 = vld [vmem:[#allocation7 + $0x638] sm:$0xff] }
 0x448   :  { %6839 = vmatpush.msra.mxu0 %v5999_v10  ;;  %6859 = vmatpush.msra.mxu1 %v6132_v13  ;;  %v5909_v10 = vld [vmem:[#allocation7 + $0x8d8] sm:$0xff]  ;;  %v6328_v13 = vld [vmem:[#allocation7 + $0x15f0] sm:$0xff] }
 0x449   :  { %6886 = vmatpush.msra.mxu2 %v6216_v6  ;;  %6821 = vmatpush.msrb.mxu3 %v5852_v4  ;;  %v5685_v6 = vld [vmem:[#allocation7 + $0x1d8] sm:$0xff]  ;;  %v5818_v4 = vld [vmem:[#allocation7 + $0x600] sm:$0xff] }
 0x44a   :  { %6840 = vmatpush.msra.mxu0 %v5992_v30  ;;  %6860 = vmatpush.msra.mxu1 %v6125_v57  ;;  %v5902_v30 = vld [vmem:[#allocation7 + $0x8a0] sm:$0xff]  ;;  %v6321_v57 = vld [vmem:[#allocation7 + $0x15b8] sm:$0xff] }
 0x44b   :  { %6887 = vmatpush.msra.mxu2 %v6209_v18  ;;  %6822 = vmatmul.f32.vlgmr.msrb.gmra.mxu3 %v15702_v35  ;;  %v5678_v18 = vld [vmem:[#allocation7 + $0x1a0] sm:$0xff] }
 0x44c   :  { %6841 = vmatpush.msra.mxu0 %v5985_v20  ;;  %11942 = vmatpush.msk.msra.mxu3 %vm6416_vm2, %v6405_v56  ;;  %v5811_v20 = vld [vmem:[#allocation7 + $0x5c8] sm:$0xff] }
 0x44d   :  { %6861 = vmatpush.msra.mxu1 %v6118_v0  ;;  %6888 = vmatpush.msra.mxu2 %v6202_v59  ;;  %v5895_v56 = vld [vmem:[#allocation7 + $0x868] sm:$0xff]  ;;  %v6314_v0 = vld [vmem:[#allocation7 + $0x1580] sm:$0xff] }
 0x44e   :  { %6842 = vmatpush.msra.mxu0 %v5978_v17  ;;  %6899 = vmatpush.msra.mxu3 %v6398_v48  ;;  %v5671_v59 = vld [vmem:[#allocation7 + $0x168] sm:$0xff]  ;;  %v5804_v17 = vld [vmem:[#allocation7 + $0x590] sm:$0xff] }
 0x44f   :  { %6862 = vmatpush.msra.mxu1 %v6111_v45  ;;  %6889 = vmatpush.msra.mxu2 %v6195_v43  ;;  %v5888_v48 = vld [vmem:[#allocation7 + $0x830] sm:$0xff]  ;;  %v6307_v45 = vld [vmem:[#allocation7 + $0x1548] sm:$0xff] }
 0x450   :  { %6843 = vmatpush.msra.mxu0 %v5971_v58  ;;  %6900 = vmatpush.msra.mxu3 %v6391_v19  ;;  %v5664_v43 = vld [vmem:[#allocation7 + $0x130] sm:$0xff]  ;;  %v5797_v58 = vld [vmem:[#allocation7 + $0x558] sm:$0xff] }
 0x451   :  { %6863 = vmatpush.msra.mxu1 %v6104_v53  ;;  %6890 = vmatpush.msra.mxu2 %v6188_v23  ;;  %v5881_v19 = vld [vmem:[#allocation7 + $0x7f8] sm:$0xff]  ;;  %v6300_v53 = vld [vmem:[#allocation7 + $0x1510] sm:$0xff] }
 0x452   :  { %6844 = vmatpush.msra.mxu0 %v5964_v9  ;;  %6891 = vmatmul.f32.vlgmr.msra.gmra.mxu2 %v15743_v32  ;;  %v5657_v23 = vld [vmem:[#allocation7 + $0xf8] sm:$0xff]  ;;  %v5790_v9 = vld [vmem:[#allocation7 + $0x520] sm:$0xff] }
 0x453   :  { %6901 = vmatpush.msra.mxu3 %v6384_v11  ;;  %6967 = vmatpush.msrb.mxu2 %v5958_v2  ;;  %v5874_v11 = vld [vmem:[#allocation7 + $0x7c0] sm:$0xff] }
 0x454   :  { %6864 = vmatpush.msra.mxu1 %v6097_v15  ;;  %6825 = vmatmul.f32.gmra.mxu3 %v15735_v36  ;;  %v5650_v2 = vld [vmem:[#allocation7 + $0xc0] sm:$0xff] }
 0x455   :  { %6845 = vmatmul.f32.vlgmr.msra.gmra.mxu0 %v15675_v63  ;;  %6902 = vmatpush.msra.mxu3 %v6377_v24  ;;  %v6070_v15 = vld [vmem:[#allocation7 + $0xde0] sm:$0xff]  ;;  %v5783_v24 = vld [vmem:[#allocation7 + $0x4e8] sm:$0xff] }
 0x456   :  { %6921 = vmatpush.msrb.mxu0 %v5734_v47  ;;  %6968 = vmatpush.msrb.mxu2 %v5951_v38  ;;  %v5867_v47 = vld [vmem:[#allocation7 + $0x788] sm:$0xff] }
 0x457   :  { %6865 = vmatpush.msra.mxu1 %v6090_v34  ;;  %6903 = vmatpush.msra.mxu3 %v6370_v42  ;;  %v5643_v38 = vld [vmem:[#allocation7 + $0x88] sm:$0xff]  ;;  %v5776_v42 = vld [vmem:[#allocation7 + $0x4b0] sm:$0xff] }
 0x458   :  { %6922 = vmatpush.msrb.mxu0 %v5727_v49  ;;  %6969 = vmatpush.msrb.mxu2 %v5944_v61  ;;  %v6063_v34 = vld [vmem:[#allocation7 + $0xda8] sm:$0xff]  ;;  %v5860_v49 = vld [vmem:[#allocation7 + $0x750] sm:$0xff] }
 0x459   :  { %6866 = vmatpush.msra.mxu1 %v6083_v60  ;;  %6904 = vmatpush.msra.mxu3 %v6363_v5  ;;  %v5636_v61 = vld [vmem:[#allocation7 + $0x50] sm:$0xff]  ;;  %v5769_v5 = vld [vmem:[#allocation7 + $0x478] sm:$0xff] }
 0x45a   :  { %6923 = vmatpush.msrb.mxu0 %v5720_v44  ;;  %6970 = vmatpush.msrb.mxu2 %v5937_v50  ;;  %v6056_v60 = vld [vmem:[#allocation7 + $0xd70] sm:$0xff]  ;;  %v5853_v44 = vld [vmem:[#allocation7 + $0x718] sm:$0xff] }
 0x45b   :  { %6867 = vmatpush.msra.mxu1 %v6076_v28  ;;  %6894 = vmatmul.f32.gmra.mxu2 %v15757_v54  ;;  %v5629_v50 = vld [vmem:[#allocation7 + $0x18] sm:$0xff] }
 0x45c   :  { %6868 = vmatmul.f32.vlgmr.msra.gmra.mxu1 %v15715_v33  ;;  %6905 = vmatpush.msra.mxu3 %v6356_v46  ;;  %v6049_v28 = vld [vmem:[#allocation7 + $0xd38] sm:$0xff]  ;;  %v6406_v46 = vld [vmem:[#allocation7 + $0x1860] sm:$0xf] }
 0x45d   :  { %6924 = vmatpush.msrb.mxu0 %v5713_v7  ;;  %6944 = vmatpush.msrb.mxu1 %v5846_v16  ;;  %v5762_v7 = vld [vmem:[#allocation7 + $0x440] sm:$0xff] }
 0x45e   :  { %6971 = vmatpush.msrb.mxu2 %v5930_v62  ;;  %6848 = vmatmul.f32.gmra.mxu0 %v15709_v22  ;;  %v6042_v16 = vld [vmem:[#allocation7 + $0xd00] sm:$0xff] }
 0x45f   :  { %6906 = vmatpush.msra.mxu3 %v6349_v31  ;;  %6925 = vmatpush.msrb.mxu0 %v5706_v14  ;;  %v6182_v62 = vld [vmem:[#allocation7 + $0x1160] sm:$0xff]  ;;  %v6399_v31 = vld [vmem:[#allocation7 + $0x1828] sm:$0xff] }
 0x460   :  { %6945 = vmatpush.msrb.mxu1 %v5839_v29  ;;  %6972 = vmatpush.msrb.mxu2 %v5923_v37  ;;  %v5755_v14 = vld [vmem:[#allocation7 + $0x408] sm:$0xff] }
 0x461   :  { %6907 = vmatpush.msra.mxu3 %v6342_v40  ;;  %6926 = vmatpush.msrb.mxu0 %v5699_v41  ;;  %v6035_v29 = vld [vmem:[#allocation7 + $0xcc8] sm:$0xff]  ;;  %v6392_v40 = vld [vmem:[#allocation7 + $0x17f0] sm:$0xff] }
 0x462   :  { %6946 = vmatpush.msrb.mxu1 %v5832_v26  ;;  %6973 = vmatpush.msrb.mxu2 %v5916_v8  ;;  %v6175_v37 = vld [vmem:[#allocation7 + $0x1128] sm:$0xff]  ;;  %v5748_v41 = vld [vmem:[#allocation7 + $0x3d0] sm:$0xff] }
 0x463   :  { %6908 = vmatpush.msra.mxu3 %v6335_v21  ;;  %6927 = vmatpush.msrb.mxu0 %v5692_v51  ;;  %v6028_v26 = vld [vmem:[#allocation7 + $0xc90] sm:$0xff]  ;;  %v6385_v21 = vld [vmem:[#allocation7 + $0x17b8] sm:$0xff] }
 0x464   :  { %6947 = vmatpush.msrb.mxu1 %v5825_v52  ;;  %6974 = vmatpush.msrb.mxu2 %v5909_v10  ;;  %v6168_v8 = vld [vmem:[#allocation7 + $0x10f0] sm:$0xff]  ;;  %v5741_v51 = vld [vmem:[#allocation7 + $0x398] sm:$0xff] }
 0x465   :  { %6871 = vmatmul.f32.gmra.mxu1 %v15741_v3  ;;  %6909 = vmatpush.msra.mxu3 %v6328_v13  ;;  %v6021_v52 = vld [vmem:[#allocation7 + $0xc58] sm:$0xff]  ;;  %v6294_v13 = vld [vmem:[#allocation7 + $0x14e0] sm:$0xff] }
 0x466   :  { %6928 = vmatpush.msrb.mxu0 %v5685_v6  ;;  %6948 = vmatpush.msrb.mxu1 %v5818_v4  ;;  %v6161_v10 = vld [vmem:[#allocation7 + $0x10b8] sm:$0xff]  ;;  %v6378_v6 = vld [vmem:[#allocation7 + $0x1780] sm:$0xff] }
 0x467   :  { %6975 = vmatpush.msrb.mxu2 %v5902_v30  ;;  %6910 = vmatpush.msra.mxu3 %v6321_v57  ;;  %v6014_v4 = vld [vmem:[#allocation7 + $0xc20] sm:$0xff]  ;;  %v6287_v57 = vld [vmem:[#allocation7 + $0x14a8] sm:$0xff] }
 0x468   :  { %6929 = vmatpush.msrb.mxu0 %v5678_v18  ;;  %6949 = vmatpush.msrb.mxu1 %v5811_v20  ;;  %v6154_v30 = vld [vmem:[#allocation7 + $0x1080] sm:$0xff]  ;;  %v15805_v18 = vpop.f32.mrf.mxu3  ;;  %v6371_v20 = vld [vmem:[#allocation7 + $0x1748] sm:$0xff] }
 0x469   :  { %6976 = vmatpush.msrb.mxu2 %v5895_v56  ;;  %6911 = vmatpush.msra.mxu3 %v6314_v0  ;;  %18059 = vst [vmem:[#allocation40_spill] sm:$0xff] %v15805_v18  ;;  %v6007_v56 = vld [vmem:[#allocation7 + $0xbe8] sm:$0xff] }
 0x46a   :  { %6930 = vmatpush.msrb.mxu0 %v5671_v59  ;;  %6950 = vmatpush.msrb.mxu1 %v5804_v17  ;;  %v6147_v0 = vld [vmem:[#allocation7 + $0x1048] sm:$0xff]  ;;  %v6280_v59 = vld [vmem:[#allocation7 + $0x1470] sm:$0xff] }
 0x46b   :  { %6977 = vmatpush.msrb.mxu2 %v5888_v48  ;;  %6912 = vmatpush.msra.mxu3 %v6307_v45  ;;  %v6364_v17 = vld [vmem:[#allocation7 + $0x1710] sm:$0xff] }
 0x46c   :  { %6931 = vmatpush.msrb.mxu0 %v5664_v43  ;;  %6951 = vmatpush.msrb.mxu1 %v5797_v58  ;;  %v6000_v48 = vld [vmem:[#allocation7 + $0xbb0] sm:$0xff]  ;;  %v6273_v43 = vld [vmem:[#allocation7 + $0x1438] sm:$0xff]  ;;  %v15808_v58 = vpop.f32.mrf.mxu0 }
 0x46d   :  { %6978 = vmatpush.msrb.mxu2 %v5881_v19  ;;  %6913 = vmatpush.msra.mxu3 %v6300_v53  ;;  %v6140_v45 = vld [vmem:[#allocation7 + $0x1010] sm:$0xff]  ;;  %18060 = vst [vmem:[#allocation42_spill] sm:$0xff] %v15808_v58  ;;  %v6357_v19 = vld [vmem:[#allocation7 + $0x16d8] sm:$0xff] }
 0x46e   :  { %6932 = vmatpush.msrb.mxu0 %v5657_v23  ;;  %6952 = vmatpush.msrb.mxu1 %v5790_v9  ;;  %v5993_v53 = vld [vmem:[#allocation7 + $0xb78] sm:$0xff]  ;;  %v6266_v9 = vld [vmem:[#allocation7 + $0x1400] sm:$0xff] }
 0x46f   :  { %6979 = vmatpush.msrb.mxu2 %v5874_v11  ;;  %11943 = vmatmul.msk.f32.vlgmr.msra.gmra.mxu3 %vm1116_vm5, %v15754_v55  ;;  %v6133_v23 = vld [vmem:[#allocation7 + $0xfd8] sm:$0xff]  ;;  %v6350_v11 = vld [vmem:[#allocation7 + $0x16a0] sm:$0xff] }
 0x470   :  { %6933 = vmatpush.msrb.mxu0 %v5650_v2  ;;  %6990 = vmatpush.msrb.mxu3 %v6070_v15  ;;  %v5986_v2 = vld [vmem:[#allocation7 + $0xb40] sm:$0xff] }
 0x471   :  { %6953 = vmatpush.msrb.mxu1 %v5783_v24  ;;  %6980 = vmatpush.msrb.mxu2 %v5867_v47  ;;  %v6126_v15 = vld [vmem:[#allocation7 + $0xfa0] sm:$0xff]  ;;  %v6259_v24 = vld [vmem:[#allocation7 + $0x13c8] sm:$0xff] }
 0x472   :  { %6934 = vmatpush.msrb.mxu0 %v5643_v38  ;;  %6991 = vmatpush.msrb.mxu3 %v6063_v34  ;;  %v6343_v47 = vld [vmem:[#allocation7 + $0x1668] sm:$0xff] }
 0x473   :  { %6954 = vmatpush.msrb.mxu1 %v5776_v42  ;;  %6981 = vmatpush.msrb.mxu2 %v5860_v49  ;;  %v5979_v38 = vld [vmem:[#allocation7 + $0xb08] sm:$0xff]  ;;  %v15811_v42 = vpop.f32.mrf.mxu3  ;;  %v6252_v49 = vld [vmem:[#allocation7 + $0x1390] sm:$0xff] }
 0x474   :  { %6935 = vmatpush.msrb.mxu0 %v5636_v61  ;;  %6992 = vmatpush.msrb.mxu3 %v6056_v60  ;;  %v6119_v34 = vld [vmem:[#allocation7 + $0xf68] sm:$0xff]  ;;  %18061 = vst [vmem:[#allocation33_spill] sm:$0xff] %v15811_v42  ;;  %v6336_v61 = vld [vmem:[#allocation7 + $0x1630] sm:$0xff] }
 0x475   :  { %6955 = vmatpush.msrb.mxu1 %v5769_v5  ;;  %6982 = vmatpush.msrb.mxu2 %v5853_v44  ;;  %v5972_v60 = vld [vmem:[#allocation7 + $0xad0] sm:$0xff]  ;;  %v15813_v44 = vpop.f32.mrf.mxu1 }
 0x476   :  { %6936 = vmatpush.msrb.mxu0 %v5629_v50  ;;  %6983 = vmatmul.f32.vlgmr.msrb.gmra.mxu2 %v15702_v35  ;;  %v6112_v5 = vld [vmem:[#allocation7 + $0xf30] sm:$0xff]  ;;  %18062 = vst [vmem:[#allocation37_spill] sm:$0xff] %v15813_v44  ;;  %v6245_v50 = vld [vmem:[#allocation7 + $0x1358] sm:$0xff] }
 0x477   :  { %6993 = vmatpush.msrb.mxu3 %v6049_v28  ;;  %11945 = vmatpush.msk.msra.mxu2 %vm6416_vm2, %v6406_v46  ;;  %v6329_v28 = vld [vmem:[#allocation7 + $0x15f8] sm:$0xff] }
 0x478   :  { %6956 = vmatpush.msrb.mxu1 %v5762_v7  ;;  %11944 = vmatmul.msk.f32.gmra.mxu3 %vm1116_vm5, %v15765_v1  ;;  %v5965_v46 = vld [vmem:[#allocation7 + $0xa98] sm:$0xff] }
 0x479   :  { %6937 = vmatmul.f32.vlgmr.msrb.gmra.mxu0 %v15644_v25  ;;  %6994 = vmatpush.msrb.mxu3 %v6042_v16  ;;  %v6105_v7 = vld [vmem:[#allocation7 + $0xef8] sm:$0xff]  ;;  %v15815_v16 = vpop.f32.mrf.mxu0 }
 0x47a   :  { %7013 = vmatpush.msra.mxu0 %v6182_v62  ;;  %7060 = vmatpush.msra.mxu2 %v6399_v31  ;;  %18063 = vst [vmem:[#allocation43_spill] sm:$0xff] %v15815_v16  ;;  %v6238_v62 = vld [vmem:[#allocation7 + $0x1320] sm:$0xff] }
 0x47b   :  { %6957 = vmatpush.msrb.mxu1 %v5755_v14  ;;  %6995 = vmatpush.msrb.mxu3 %v6035_v29  ;;  %v6322_v31 = vld [vmem:[#allocation7 + $0x15c0] sm:$0xff]  ;;  %v5735_v29 = vld [vmem:[#allocation7 + $0x368] sm:$0xff] }
 0x47c   :  { %7014 = vmatpush.msra.mxu0 %v6175_v37  ;;  %7061 = vmatpush.msra.mxu2 %v6392_v40  ;;  %v6098_v14 = vld [vmem:[#allocation7 + $0xec0] sm:$0xff]  ;;  %v6231_v37 = vld [vmem:[#allocation7 + $0x12e8] sm:$0xff] }
 0x47d   :  { %6958 = vmatpush.msrb.mxu1 %v5748_v41  ;;  %6996 = vmatpush.msrb.mxu3 %v6028_v26  ;;  %v6315_v40 = vld [vmem:[#allocation7 + $0x1588] sm:$0xff]  ;;  %v15817_v26 = vpop.f32.mrf.mxu2 }
 0x47e   :  { %7015 = vmatpush.msra.mxu0 %v6168_v8  ;;  %7062 = vmatpush.msra.mxu2 %v6385_v21  ;;  %v6091_v41 = vld [vmem:[#allocation7 + $0xe88] sm:$0xff]  ;;  %18064 = vst [vmem:[#allocation48_spill] sm:$0xff] %v15817_v26  ;;  %v5728_v8 = vld [vmem:[#allocation7 + $0x330] sm:$0xff] }
 0x47f   :  { %6959 = vmatpush.msrb.mxu1 %v5741_v51  ;;  %6986 = vmatmul.f32.gmra.mxu2 %v15735_v36  ;;  %v6224_v21 = vld [vmem:[#allocation7 + $0x12b0] sm:$0xff] }
 0x480   :  { %6960 = vmatmul.f32.vlgmr.msrb.gmra.mxu1 %v15677_v12  ;;  %6997 = vmatpush.msrb.mxu3 %v6021_v52  ;;  %v6308_v51 = vld [vmem:[#allocation7 + $0x1550] sm:$0xff] }
 0x481   :  { %7016 = vmatpush.msra.mxu0 %v6161_v10  ;;  %7036 = vmatpush.msra.mxu1 %v6294_v13  ;;  %v6084_v52 = vld [vmem:[#allocation7 + $0xe50] sm:$0xff]  ;;  %v15820_v10 = vpop.f32.mrf.mxu3  ;;  %v5721_v13 = vld [vmem:[#allocation7 + $0x2f8] sm:$0xff] }
 0x482   :  { %7063 = vmatpush.msra.mxu2 %v6378_v6  ;;  %6940 = vmatmul.f32.gmra.mxu0 %v15682_v39  ;;  %18065 = vst [vmem:[#allocation49_spill] sm:$0xff] %v15820_v10  ;;  %v6217_v6 = vld [vmem:[#allocation7 + $0x1278] sm:$0xff] }
 0x483   :  { %6998 = vmatpush.msrb.mxu3 %v6014_v4  ;;  %7017 = vmatpush.msra.mxu0 %v6154_v30  ;;  %v6301_v4 = vld [vmem:[#allocation7 + $0x1518] sm:$0xff] }
 0x484   :  { %7037 = vmatpush.msra.mxu1 %v6287_v57  ;;  %7064 = vmatpush.msra.mxu2 %v6371_v20  ;;  %v6077_v30 = vld [vmem:[#allocation7 + $0xe18] sm:$0xff]  ;;  %v15822_v57 = vpop.f32.mrf.mxu1  ;;  %v5714_v20 = vld [vmem:[#allocation7 + $0x2c0] sm:$0xff] }
 0x485   :  { %6999 = vmatpush.msrb.mxu3 %v6007_v56  ;;  %7018 = vmatpush.msra.mxu0 %v6147_v0  ;;  %18066 = vst [vmem:[#allocation50_spill] sm:$0xff] %v15822_v57  ;;  %v6071_v56 = vld [vmem:[#allocation7 + $0xde8] sm:$0xff]  ;;  %v6210_v0 = vld [vmem:[#allocation7 + $0x1240] sm:$0xff] }
 0x486   :  { %7038 = vmatpush.msra.mxu1 %v6280_v59  ;;  %7065 = vmatpush.msra.mxu2 %v6364_v17  ;;  %v15824_v59 = vpop.f32.mrf.mxu0  ;;  %v5707_v17 = vld [vmem:[#allocation7 + $0x288] sm:$0xff] }
 0x487   :  { %7000 = vmatpush.msrb.mxu3 %v6000_v48  ;;  %7019 = vmatpush.msra.mxu0 %v6140_v45  ;;  %18067 = vst [vmem:[#allocation41_spill] sm:$0xff] %v15824_v59  ;;  %v5847_v48 = vld [vmem:[#allocation7 + $0x6e8] sm:$0xff]  ;;  %v6064_v45 = vld [vmem:[#allocation7 + $0xdb0] sm:$0xff] }
 0x488   :  { %7039 = vmatpush.msra.mxu1 %v6273_v43  ;;  %7066 = vmatpush.msra.mxu2 %v6357_v19  ;;  %v6203_v43 = vld [vmem:[#allocation7 + $0x1208] sm:$0xff]  ;;  %v5700_v19 = vld [vmem:[#allocation7 + $0x250] sm:$0xff] }
 0x489   :  { %6963 = vmatmul.f32.gmra.mxu1 %v15713_v27  ;;  %7001 = vmatpush.msrb.mxu3 %v5993_v53  ;;  %v5840_v53 = vld [vmem:[#allocation7 + $0x6b0] sm:$0xff] }
 0x48a   :  { %7020 = vmatpush.msra.mxu0 %v6133_v23  ;;  %7040 = vmatpush.msra.mxu1 %v6266_v9  ;;  %v15830_v23 = vpop.f32.mrf.mxu2  ;;  %v6057_v9 = vld [vmem:[#allocation7 + $0xd78] sm:$0xff] }
 0x48b   :  { %7067 = vmatpush.msra.mxu2 %v6350_v11  ;;  %7002 = vmatpush.msrb.mxu3 %v5986_v2  ;;  %18068 = vst [vmem:[#allocation51_spill] sm:$0xff] %v15830_v23  ;;  %v6196_v11 = vld [vmem:[#allocation7 + $0x11d0] sm:$0xff]  ;;  %v5693_v2 = vld [vmem:[#allocation7 + $0x218] sm:$0xff] }
 0x48c   :  { %7021 = vmatpush.msra.mxu0 %v6126_v15  ;;  %7041 = vmatpush.msra.mxu1 %v6259_v24  ;;  %v5833_v15 = vld [vmem:[#allocation7 + $0x678] sm:$0xff]  ;;  %v15832_v24 = vpop.f32.mrf.mxu3 }
 0x48d   :  { %7068 = vmatpush.msra.mxu2 %v6343_v47  ;;  %7003 = vmatpush.msrb.mxu3 %v5979_v38  ;;  %18069 = vst [vmem:[#allocation59_spill] sm:$0xff] %v15832_v24  ;;  %v6050_v47 = vld [vmem:[#allocation7 + $0xd40] sm:$0xff]  ;;  %v6189_v38 = vld [vmem:[#allocation7 + $0x1198] sm:$0xff] }
 0x48e   :  { %7022 = vmatpush.msra.mxu0 %v6119_v34  ;;  %7042 = vmatpush.msra.mxu1 %v6252_v49  ;;  %v15834_v34 = vpop.f32.mrf.mxu1  ;;  %v5686_v49 = vld [vmem:[#allocation7 + $0x1e0] sm:$0xff] }
 0x48f   :  { %7069 = vmatpush.msra.mxu2 %v6336_v61  ;;  %7004 = vmatpush.msrb.mxu3 %v5972_v60  ;;  %18070 = vst [vmem:[#allocation60_spill] sm:$0xff] %v15834_v34  ;;  %v5826_v61 = vld [vmem:[#allocation7 + $0x640] sm:$0xff]  ;;  %v5959_v60 = vld [vmem:[#allocation7 + $0xa68] sm:$0xff] }
 0x490   :  { %7023 = vmatpush.msra.mxu0 %v6112_v5  ;;  %7043 = vmatpush.msra.mxu1 %v6245_v50  ;;  %v6043_v5 = vld [vmem:[#allocation7 + $0xd08] sm:$0xff]  ;;  %v15836_v50 = vpop.f32.mrf.mxu0 }
 0x491   :  { %7070 = vmatpush.msra.mxu2 %v6329_v28  ;;  %7005 = vmatpush.msrb.mxu3 %v5965_v46  ;;  %18071 = vst [vmem:[#allocation64_spill] sm:$0xff] %v15836_v50  ;;  %v5679_v28 = vld [vmem:[#allocation7 + $0x1a8] sm:$0xff]  ;;  %v6213_v50 = vld [vmem:[#allocation7 + $0x1258] sm:$0xff] }
 0x492   :  { %7024 = vmatpush.msra.mxu0 %v6105_v7  ;;  %7044 = vmatpush.msra.mxu1 %v6238_v62  ;;  %v5819_v46 = vld [vmem:[#allocation7 + $0x608] sm:$0xff]  ;;  %v5952_v7 = vld [vmem:[#allocation7 + $0xa30] sm:$0xff] }
 0x493   :  { %7071 = vmatpush.msra.mxu2 %v6322_v31  ;;  %7006 = vmatmul.f32.vlgmr.msrb.gmra.mxu3 %v15675_v63  ;;  %v6036_v62 = vld [vmem:[#allocation7 + $0xcd0] sm:$0xff] }
 0x494   :  { %7025 = vmatpush.msra.mxu0 %v6098_v14  ;;  %7082 = vmatpush.msra.mxu3 %v5735_v29  ;;  %v5672_v31 = vld [vmem:[#allocation7 + $0x170] sm:$0xff]  ;;  %v5945_v29 = vld [vmem:[#allocation7 + $0x9f8] sm:$0xff] }
 0x495   :  { %7045 = vmatpush.msra.mxu1 %v6231_v37  ;;  %7072 = vmatpush.msra.mxu2 %v6315_v40  ;;  %v5812_v14 = vld [vmem:[#allocation7 + $0x5d0] sm:$0xff]  ;;  %v15842_v37 = vpop.f32.mrf.mxu2  ;;  %v6029_v40 = vld [vmem:[#allocation7 + $0xc98] sm:$0xff] }
 0x496   :  { %7026 = vmatpush.msra.mxu0 %v6091_v41  ;;  %7083 = vmatpush.msra.mxu3 %v5728_v8  ;;  %v5665_v41 = vld [vmem:[#allocation7 + $0x138] sm:$0xff] }
 0x497   :  { %7046 = vmatpush.msra.mxu1 %v6224_v21  ;;  %7073 = vmatpush.msra.mxu2 %v6308_v51  ;;  %v5805_v8 = vld [vmem:[#allocation7 + $0x598] sm:$0xff]  ;;  %v5938_v21 = vld [vmem:[#allocation7 + $0x9c0] sm:$0xff]  ;;  %v15844_v51 = vpop.f32.mrf.mxu3 }
 0x498   :  { %7027 = vmatpush.msra.mxu0 %v6084_v52  ;;  %7084 = vmatpush.msra.mxu3 %v5721_v13  ;;  %v6022_v52 = vld [vmem:[#allocation7 + $0xc60] sm:$0xff] }
 0x499   :  { %7047 = vmatpush.msra.mxu1 %v6217_v6  ;;  %7074 = vmatpush.msra.mxu2 %v6301_v4  ;;  %v5658_v13 = vld [vmem:[#allocation7 + $0x100] sm:$0xff]  ;;  %v15846_v4 = vpop.f32.mrf.mxu1 }
 0x49a   :  { %7028 = vmatpush.msra.mxu0 %v6077_v30  ;;  %11946 = vmatmul.msk.f32.vlgmr.msra.gmra.mxu2 %vm1116_vm5, %v15754_v55  ;;  %v5798_v6 = vld [vmem:[#allocation7 + $0x560] sm:$0xff]  ;;  %18072 = vst [vmem:[#allocation44_spill] sm:$0xff] %v15846_v4  ;;  %v5931_v30 = vld [vmem:[#allocation7 + $0x988] sm:$0xff] }
 0x49b   :  { %7085 = vmatpush.msra.mxu3 %v5714_v20  ;;  %7151 = vmatpush.msrb.mxu2 %v6071_v56  ;;  %v6015_v20 = vld [vmem:[#allocation7 + $0xc28] sm:$0xff] }
 0x49c   :  { %7048 = vmatpush.msra.mxu1 %v6210_v0  ;;  %7009 = vmatmul.f32.gmra.mxu3 %v15709_v22  ;;  %v5651_v56 = vld [vmem:[#allocation7 + $0xc8] sm:$0xff] }
 0x49d   :  { %7029 = vmatmul.f32.vlgmr.msra.gmra.mxu0 %v15715_v33  ;;  %7086 = vmatpush.msra.mxu3 %v5707_v17  ;;  %v5791_v0 = vld [vmem:[#allocation7 + $0x528] sm:$0xff]  ;;  %v15849_v17 = vpop.f32.mrf.mxu0 }
 0x49e   :  { %7105 = vmatpush.msrb.mxu0 %v5847_v48  ;;  %7152 = vmatpush.msrb.mxu2 %v6064_v45  ;;  %v5924_v48 = vld [vmem:[#allocation7 + $0x950] sm:$0xff] }
 0x49f   :  { %7049 = vmatpush.msra.mxu1 %v6203_v43  ;;  %7087 = vmatpush.msra.mxu3 %v5700_v19  ;;  %v6008_v45 = vld [vmem:[#allocation7 + $0xbf0] sm:$0xff] }
 0x4a0   :  { %7106 = vmatpush.msrb.mxu0 %v5840_v53  ;;  %7153 = vmatpush.msrb.mxu2 %v6057_v9  ;;  %v5644_v43 = vld [vmem:[#allocation7 + $0x90] sm:$0xff]  ;;  %v5917_v53 = vld [vmem:[#allocation7 + $0x918] sm:$0xff] }
 0x4a1   :  { %7050 = vmatpush.msra.mxu1 %v6196_v11  ;;  %7088 = vmatpush.msra.mxu3 %v5693_v2  ;;  %v5784_v19 = vld [vmem:[#allocation7 + $0x4f0] sm:$0xff]  ;;  %v6001_v9 = vld [vmem:[#allocation7 + $0xbb8] sm:$0xff] }
 0x4a2   :  { %7107 = vmatpush.msrb.mxu0 %v5833_v15  ;;  %7154 = vmatpush.msrb.mxu2 %v6050_v47  ;;  %v5637_v11 = vld [vmem:[#allocation7 + $0x58] sm:$0xff]  ;;  %v6619_v15 = vpop.f32.mrf.mxu2  ;;  %v5910_v47 = vld [vmem:[#allocation7 + $0x8e0] sm:$0xff] }
 0x4a3   :  { %7051 = vmatpush.msra.mxu1 %v6189_v38  ;;  %11947 = vmatmul.msk.f32.gmra.mxu2 %vm1116_vm5, %v15765_v1  ;;  %v5777_v2 = vld [vmem:[#allocation7 + $0x4b8] sm:$0xff]  ;;  %v5994_v38 = vld [vmem:[#allocation7 + $0xb80] sm:$0xff] }
 0x4a4   :  { %7052 = vmatmul.f32.vlgmr.msra.gmra.mxu1 %v15743_v32  ;;  %7089 = vmatpush.msra.mxu3 %v5686_v49  ;;  %v5630_v49 = vld [vmem:[#allocation7 + $0x20] sm:$0xff] }
 0x4a5   :  { %7108 = vmatpush.msrb.mxu0 %v5826_v61  ;;  %7128 = vmatpush.msrb.mxu1 %v5959_v60  ;;  %v5770_v61 = vld [vmem:[#allocation7 + $0x480] sm:$0xff]  ;;  %v6642_v60 = vpop.f32.mrf.mxu3 }
 0x4a6   :  { %7155 = vmatpush.msrb.mxu2 %v6043_v5  ;;  %7032 = vmatmul.f32.gmra.mxu0 %v15741_v3  ;;  %v5903_v5 = vld [vmem:[#allocation7 + $0x8a8] sm:$0xff] }
 0x4a7   :  { %7090 = vmatpush.msra.mxu3 %v5679_v28  ;;  %7109 = vmatpush.msrb.mxu0 %v5819_v46  ;;  %v5987_v28 = vld [vmem:[#allocation7 + $0xb48] sm:$0xff] }
 0x4a8   :  { %7129 = vmatpush.msrb.mxu1 %v5952_v7  ;;  %7156 = vmatpush.msrb.mxu2 %v6036_v62  ;;  %v5763_v46 = vld [vmem:[#allocation7 + $0x448] sm:$0xff]  ;;  %v15851_v7 = vpop.f32.mrf.mxu1 }
 0x4a9   :  { %7091 = vmatpush.msra.mxu3 %v5672_v31  ;;  %7110 = vmatpush.msrb.mxu0 %v5812_v14  ;;  %v6183_v62 = vld [vmem:[#allocation7 + $0x1168] sm:$0xff]  ;;  %v5896_v31 = vld [vmem:[#allocation7 + $0x870] sm:$0xff] }
 0x4aa   :  { %7130 = vmatpush.msrb.mxu1 %v5945_v29  ;;  %7157 = vmatpush.msrb.mxu2 %v6029_v40  ;;  %v5980_v14 = vld [vmem:[#allocation7 + $0xb10] sm:$0xff]  ;;  %v6665_v40 = vpop.f32.mrf.mxu0 }
 0x4ab   :  { %7092 = vmatpush.msra.mxu3 %v5665_v41  ;;  %7111 = vmatpush.msrb.mxu0 %v5805_v8  ;;  %v5756_v29 = vld [vmem:[#allocation7 + $0x410] sm:$0xff]  ;;  %v5889_v8 = vld [vmem:[#allocation7 + $0x838] sm:$0xff] }
 0x4ac   :  { %7131 = vmatpush.msrb.mxu1 %v5938_v21  ;;  %7158 = vmatpush.msrb.mxu2 %v6022_v52  ;;  %v6176_v41 = vld [vmem:[#allocation7 + $0x1130] sm:$0xff]  ;;  %v5973_v21 = vld [vmem:[#allocation7 + $0xad8] sm:$0xff] }
 0x4ad   :  { %7055 = vmatmul.f32.gmra.mxu1 %v15757_v54  ;;  %7093 = vmatpush.msra.mxu3 %v5658_v13  ;;  %v5749_v52 = vld [vmem:[#allocation7 + $0x3d8] sm:$0xff] }
 0x4ae   :  { %7112 = vmatpush.msrb.mxu0 %v5798_v6  ;;  %7132 = vmatpush.msrb.mxu1 %v5931_v30  ;;  %v6169_v13 = vld [vmem:[#allocation7 + $0x10f8] sm:$0xff]  ;;  %v5882_v6 = vld [vmem:[#allocation7 + $0x800] sm:$0xff] }
 0x4af   :  { %7159 = vmatpush.msrb.mxu2 %v6015_v20  ;;  %7094 = vmatpush.msra.mxu3 %v5651_v56  ;;  %v5966_v30 = vld [vmem:[#allocation7 + $0xaa0] sm:$0xff]  ;;  %v15854_v56 = vpop.f32.mrf.mxu2 }
 0x4b0   :  { %7113 = vmatpush.msrb.mxu0 %v5791_v0  ;;  %7133 = vmatpush.msrb.mxu1 %v5924_v48  ;;  %v5742_v20 = vld [vmem:[#allocation7 + $0x3a0] sm:$0xff]  ;;  %v15856_v48 = vpop.f32.mrf.mxu3 }
 0x4b1   :  { %7160 = vmatpush.msrb.mxu2 %v6008_v45  ;;  %7095 = vmatpush.msra.mxu3 %v5644_v43  ;;  %v6162_v0 = vld [vmem:[#allocation7 + $0x10c0] sm:$0xff]  ;;  %v6643_v45 = vadd.f32 %v6642_v60, %v6619_v15  ;;  %v5736_v43 = vld [vmem:[#allocation7 + $0x370] sm:$0xff] }
 0x4b2   :  { %7114 = vmatpush.msrb.mxu0 %v5784_v19  ;;  %7134 = vmatpush.msrb.mxu1 %v5917_v53  ;;  %v5875_v19 = vld [vmem:[#allocation7 + $0x7c8] sm:$0xff]  ;;  %v6148_v15 = vld [vmem:[#allocation7 + $0x1050] sm:$0xff]  ;;  %v5722_v60 = vld [vmem:[#allocation7 + $0x300] sm:$0xff] }
 0x4b3   :  { %7161 = vmatpush.msrb.mxu2 %v6001_v9  ;;  %7096 = vmatpush.msra.mxu3 %v5637_v11  ;;  %v6155_v53 = vld [vmem:[#allocation7 + $0x1088] sm:$0xff]  ;;  %v6688_v11 = vpop.f32.mrf.mxu1 }
 0x4b4   :  { %7115 = vmatpush.msrb.mxu0 %v5777_v2  ;;  %7135 = vmatpush.msrb.mxu1 %v5910_v47  ;;  %v6295_v9 = vld [vmem:[#allocation7 + $0x14e8] sm:$0xff]  ;;  %v5729_v2 = vld [vmem:[#allocation7 + $0x338] sm:$0xff]  ;;  %v15859_v47 = vpop.f32.mrf.mxu0 }
 0x4b5   :  { %7162 = vmatpush.msrb.mxu2 %v5994_v38  ;;  %7097 = vmatpush.msra.mxu3 %v5630_v49  ;;  %v5868_v38 = vld [vmem:[#allocation7 + $0x790] sm:$0xff]  ;;  %v6666_v49 = vadd.f32 %v6665_v40, %v6643_v45  ;;  %v6134_v40 = vld [vmem:[#allocation7 + $0xfe0] sm:$0xff]  ;;  %v5701_v45 = vld [vmem:[#allocation7 + $0x258] sm:$0xff] }
 0x4b6   :  { %7116 = vmatpush.msrb.mxu0 %v5770_v61  ;;  %7136 = vmatpush.msrb.mxu1 %v5903_v5  ;;  %v6288_v61 = vld [vmem:[#allocation7 + $0x14b0] sm:$0xff]  ;;  %v5861_v5 = vld [vmem:[#allocation7 + $0x758] sm:$0xff] }
 0x4b7   :  { %7163 = vmatpush.msrb.mxu2 %v5987_v28  ;;  %7098 = vmatmul.f32.vlgmr.msra.gmra.mxu3 %v15644_v25  ;;  %v6689_v28 = vadd.f32 %v6688_v11, %v6666_v49  ;;  %v5694_v11 = vld [vmem:[#allocation7 + $0x220] sm:$0xff]  ;;  %v6253_v49 = vld [vmem:[#allocation7 + $0x1398] sm:$0xff] }
 0x4b8   :  { %7117 = vmatpush.msrb.mxu0 %v5763_v46  ;;  %7174 = vmatpush.msrb.mxu3 %v6183_v62  ;;  %v6141_v46 = vld [vmem:[#allocation7 + $0x1018] sm:$0xff] }
 0x4b9   :  { %7137 = vmatpush.msrb.mxu1 %v5896_v31  ;;  %7164 = vmatpush.msrb.mxu2 %v5980_v14  ;;  %v6281_v62 = vld [vmem:[#allocation7 + $0x1478] sm:$0xff]  ;;  %v5715_v31 = vld [vmem:[#allocation7 + $0x2c8] sm:$0xff]  ;;  %v5854_v14 = vld [vmem:[#allocation7 + $0x720] sm:$0xff] }
 0x4ba   :  { %7118 = vmatpush.msrb.mxu0 %v5756_v29  ;;  %7175 = vmatpush.msrb.mxu3 %v6176_v41  ;;  %v6711_v29 = vpop.f32.mrf.mxu2  ;;  %v6274_v41 = vld [vmem:[#allocation7 + $0x1440] sm:$0xff] }
 0x4bb   :  { %7138 = vmatpush.msrb.mxu1 %v5889_v8  ;;  %7165 = vmatpush.msrb.mxu2 %v5973_v21  ;;  %v6734_v8 = vpop.f32.mrf.mxu3  ;;  %v6407_v21 = vld [vmem:[#allocation7 + $0x1868] sm:$0xf] }
 0x4bc   :  { %7119 = vmatpush.msrb.mxu0 %v5749_v52  ;;  %7176 = vmatpush.msrb.mxu3 %v6169_v13  ;;  %v5708_v52 = vld [vmem:[#allocation7 + $0x290] sm:$0xff]  ;;  %v6712_v13 = vadd.f32 %v6711_v29, %v6689_v28  ;;  %v6379_v28 = vld [vmem:[#allocation7 + $0x1788] sm:$0xff]  ;;  %v5673_v29 = vld [vmem:[#allocation7 + $0x178] sm:$0xff] }
 0x4bd   :  { %7139 = vmatpush.msrb.mxu1 %v5882_v6  ;;  %7166 = vmatpush.msrb.mxu2 %v5966_v30  ;;  %v6127_v6 = vld [vmem:[#allocation7 + $0xfa8] sm:$0xff] }
 0x4be   :  { %7120 = vmatpush.msrb.mxu0 %v5742_v20  ;;  %7167 = vmatmul.f32.vlgmr.msrb.gmra.mxu2 %v15675_v63  ;;  %v6735_v30 = vadd.f32 %v6734_v8, %v6712_v13  ;;  %v6267_v20 = vld [vmem:[#allocation7 + $0x1408] sm:$0xff]  ;;  %v6365_v8 = vld [vmem:[#allocation7 + $0x1718] sm:$0xff] }
 0x4bf   :  { %7177 = vmatpush.msrb.mxu3 %v6162_v0  ;;  %7243 = vmatpush.msra.mxu2 %v5736_v43  ;;  %v6400_v0 = vld [vmem:[#allocation7 + $0x1830] sm:$0xff]  ;;  %v6757_v43 = vpop.f32.mrf.mxu0  ;;  %v6225_v13 = vld [vmem:[#allocation7 + $0x12b8] sm:$0xff] }
 0x4c0   :  { %7140 = vmatpush.msrb.mxu1 %v5875_v19  ;;  %7101 = vmatmul.f32.gmra.mxu3 %v15682_v39  ;;  %v6120_v19 = vld [vmem:[#allocation7 + $0xf70] sm:$0xff] }
 0x4c1   :  { %7121 = vmatmul.f32.vlgmr.msrb.gmra.mxu0 %v15677_v12  ;;  %7178 = vmatpush.msrb.mxu3 %v6155_v53  ;;  %v6260_v53 = vld [vmem:[#allocation7 + $0x13d0] sm:$0xff] }
 0x4c2   :  { %7197 = vmatpush.msra.mxu0 %v6295_v9  ;;  %7244 = vmatpush.msra.mxu2 %v5729_v2  ;;  %v6393_v9 = vld [vmem:[#allocation7 + $0x17f8] sm:$0xff] }
 0x4c3   :  { %7141 = vmatpush.msrb.mxu1 %v5868_v38  ;;  %7179 = vmatpush.msrb.mxu3 %v6148_v15  ;;  %v6113_v2 = vld [vmem:[#allocation7 + $0xf38] sm:$0xff]  ;;  %v15867_v38 = vadd.f32 %v6757_v43, %v6735_v30  ;;  %v6386_v15 = vld [vmem:[#allocation7 + $0x17c0] sm:$0xff]  ;;  %v5659_v30 = vld [vmem:[#allocation7 + $0x108] sm:$0xff] }
 0x4c4   :  { %7198 = vmatpush.msra.mxu0 %v6288_v61  ;;  %7245 = vmatpush.msra.mxu2 %v5722_v60  ;;  %v5687_v61 = vld [vmem:[#allocation7 + $0x1e8] sm:$0xff]  ;;  %v6106_v60 = vld [vmem:[#allocation7 + $0xf00] sm:$0xff]  ;;  %v5652_v43 = vld [vmem:[#allocation7 + $0xd0] sm:$0xff] }
 0x4c5   :  { %7142 = vmatpush.msrb.mxu1 %v5861_v5  ;;  %7180 = vmatpush.msrb.mxu3 %v6141_v46  ;;  %18073 = vst [vmem:[#allocation58_spill] sm:$0xff] %v15867_v38  ;;  %v6246_v5 = vld [vmem:[#allocation7 + $0x1360] sm:$0xff]  ;;  %v5680_v46 = vld [vmem:[#allocation7 + $0x1b0] sm:$0xff] }
 0x4c6   :  { %7199 = vmatpush.msra.mxu0 %v6281_v62  ;;  %7246 = vmatpush.msra.mxu2 %v5715_v31  ;;  %v6099_v62 = vld [vmem:[#allocation7 + $0xec8] sm:$0xff] }
 0x4c7   :  { %7143 = vmatpush.msrb.mxu1 %v5854_v14  ;;  %7170 = vmatmul.f32.gmra.mxu2 %v15709_v22  ;;  %v6239_v31 = vld [vmem:[#allocation7 + $0x1328] sm:$0xff]  ;;  %v6372_v14 = vld [vmem:[#allocation7 + $0x1750] sm:$0xff] }
 0x4c8   :  { %7144 = vmatmul.f32.vlgmr.msrb.gmra.mxu1 %v15702_v35  ;;  %7181 = vmatpush.msrb.mxu3 %v6134_v40  ;;  %v6092_v40 = vld [vmem:[#allocation7 + $0xe90] sm:$0xff] }
 0x4c9   :  { %7200 = vmatpush.msra.mxu0 %v6274_v41  ;;  %11948 = vmatpush.msk.msra.mxu1 %vm6416_vm2, %v6407_v21  ;;  %v6232_v41 = vld [vmem:[#allocation7 + $0x12f0] sm:$0xff]  ;;  %v5666_v21 = vld [vmem:[#allocation7 + $0x140] sm:$0xff] }
 0x4ca   :  { %7247 = vmatpush.msra.mxu2 %v5708_v52  ;;  %7124 = vmatmul.f32.gmra.mxu0 %v15713_v27  ;;  %v6085_v52 = vld [vmem:[#allocation7 + $0xe58] sm:$0xff] }
 0x4cb   :  { %7182 = vmatpush.msrb.mxu3 %v6127_v6  ;;  %7201 = vmatpush.msra.mxu0 %v6267_v20  ;;  %v6358_v6 = vld [vmem:[#allocation7 + $0x16e0] sm:$0xff] }
 0x4cc   :  { %7221 = vmatpush.msra.mxu1 %v6400_v0  ;;  %7248 = vmatpush.msra.mxu2 %v5701_v45  ;;  %v6078_v20 = vld [vmem:[#allocation7 + $0xe20] sm:$0xff]  ;;  %v6351_v45 = vld [vmem:[#allocation7 + $0x16a8] sm:$0xff] }
 0x4cd   :  { %7183 = vmatpush.msrb.mxu3 %v6120_v19  ;;  %7202 = vmatpush.msra.mxu0 %v6260_v53  ;;  %v6218_v0 = vld [vmem:[#allocation7 + $0x1280] sm:$0xff]  ;;  %v5848_v19 = vld [vmem:[#allocation7 + $0x6f0] sm:$0xff]  ;;  %v6211_v53 = vld [vmem:[#allocation7 + $0x1248] sm:$0xff] }
 0x4ce   :  { %7222 = vmatpush.msra.mxu1 %v6393_v9  ;;  %7249 = vmatpush.msra.mxu2 %v5694_v11  ;;  %v6344_v9 = vld [vmem:[#allocation7 + $0x1670] sm:$0xff]  ;;  %v5645_v11 = vld [vmem:[#allocation7 + $0x98] sm:$0xff] }
 0x4cf   :  { %7184 = vmatpush.msrb.mxu3 %v6113_v2  ;;  %7203 = vmatpush.msra.mxu0 %v6253_v49  ;;  %v5841_v2 = vld [vmem:[#allocation7 + $0x6b8] sm:$0xff]  ;;  %v6204_v49 = vld [vmem:[#allocation7 + $0x1210] sm:$0xff] }
 0x4d0   :  { %7223 = vmatpush.msra.mxu1 %v6386_v15  ;;  %7250 = vmatpush.msra.mxu2 %v5687_v61  ;;  %v6337_v15 = vld [vmem:[#allocation7 + $0x1638] sm:$0xff]  ;;  %v5638_v61 = vld [vmem:[#allocation7 + $0x60] sm:$0xff] }
 0x4d1   :  { %7577 = vrot.lane.b32.xlu2 %v15867_v38, %s12923_s5  ;;  %7147 = vmatmul.f32.gmra.mxu1 %v15735_v36 }
 0x4d2   :  { %7185 = vmatpush.msrb.mxu3 %v6106_v60  ;;  %7204 = vmatpush.msra.mxu0 %v6246_v5  ;;  %v5834_v60 = vld [vmem:[#allocation7 + $0x680] sm:$0xff]  ;;  %v6197_v5 = vld [vmem:[#allocation7 + $0x11d8] sm:$0xff] }
 0x4d3   :  { %7224 = vmatpush.msra.mxu1 %v6379_v28  ;;  %7251 = vmatpush.msra.mxu2 %v5680_v46  ;;  %v6330_v28 = vld [vmem:[#allocation7 + $0x1600] sm:$0xff]  ;;  %v5631_v46 = vld [vmem:[#allocation7 + $0x28] sm:$0xff] }
 0x4d4   :  { %7186 = vmatpush.msrb.mxu3 %v6099_v62  ;;  %7205 = vmatpush.msra.mxu0 %v6239_v31  ;;  %v5827_v62 = vld [vmem:[#allocation7 + $0x648] sm:$0xff]  ;;  %v6184_v31 = vld [vmem:[#allocation7 + $0x1170] sm:$0xff] }
 0x4d5   :  { %7225 = vmatpush.msra.mxu1 %v6372_v14  ;;  %7252 = vmatpush.msra.mxu2 %v5673_v29  ;;  %v6190_v14 = vld [vmem:[#allocation7 + $0x11a0] sm:$0xff]  ;;  %v6323_v29 = vld [vmem:[#allocation7 + $0x15c8] sm:$0xff] }
 0x4d6   :  { %7187 = vmatpush.msrb.mxu3 %v6092_v40  ;;  %7206 = vmatpush.msra.mxu0 %v6232_v41  ;;  %v5820_v40 = vld [vmem:[#allocation7 + $0x610] sm:$0xff] }
 0x4d7   :  { %7226 = vmatpush.msra.mxu1 %v6365_v8  ;;  %7253 = vmatpush.msra.mxu2 %v5666_v21  ;;  %v5960_v41 = vld [vmem:[#allocation7 + $0xa70] sm:$0xff]  ;;  %v6177_v8 = vld [vmem:[#allocation7 + $0x1138] sm:$0xff] }
 0x4d8   :  { %7188 = vmatpush.msrb.mxu3 %v6085_v52  ;;  %7207 = vmatpush.msra.mxu0 %v6225_v13  ;;  %v6316_v21 = vld [vmem:[#allocation7 + $0x1590] sm:$0xff]  ;;  %v5813_v52 = vld [vmem:[#allocation7 + $0x5d8] sm:$0xff] }
 0x4d9   :  { %7227 = vmatpush.msra.mxu1 %v6358_v6  ;;  %7254 = vmatpush.msra.mxu2 %v5659_v30  ;;  %v5953_v13 = vld [vmem:[#allocation7 + $0xa38] sm:$0xff]  ;;  %v6170_v6 = vld [vmem:[#allocation7 + $0x1100] sm:$0xff] }
 0x4da   :  { %7189 = vmatpush.msrb.mxu3 %v6078_v20  ;;  %7208 = vmatpush.msra.mxu0 %v6218_v0  ;;  %v6309_v30 = vld [vmem:[#allocation7 + $0x1558] sm:$0xff]  ;;  %v5806_v20 = vld [vmem:[#allocation7 + $0x5a0] sm:$0xff] }
 0x4db   :  { %7228 = vmatpush.msra.mxu1 %v6351_v45  ;;  %7255 = vmatpush.msra.mxu2 %v5652_v43  ;;  %v5946_v0 = vld [vmem:[#allocation7 + $0xa00] sm:$0xff]  ;;  %v6163_v45 = vld [vmem:[#allocation7 + $0x10c8] sm:$0xff] }
 0x4dc   :  { %7190 = vmatmul.f32.vlgmr.msrb.gmra.mxu3 %v15715_v33  ;;  %7209 = vmatpush.msra.mxu0 %v6211_v53  ;;  %v6302_v43 = vld [vmem:[#allocation7 + $0x1520] sm:$0xff]  ;;  %v5939_v53 = vld [vmem:[#allocation7 + $0x9c8] sm:$0xff] }
 0x4dd   :  { %7266 = vmatpush.msra.mxu3 %v5848_v19  ;;  %7229 = vmatpush.msra.mxu1 %v6344_v9  ;;  %v5799_v19 = vld [vmem:[#allocation7 + $0x568] sm:$0xff]  ;;  %v6072_v9 = vld [vmem:[#allocation7 + $0xdf0] sm:$0xff] }
 0x4de   :  { %7256 = vmatpush.msra.mxu2 %v5645_v11  ;;  %7210 = vmatpush.msra.mxu0 %v6204_v49  ;;  %v6156_v11 = vld [vmem:[#allocation7 + $0x1090] sm:$0xff] }
 0x4df   :  { %7267 = vmatpush.msra.mxu3 %v5841_v2  ;;  %7230 = vmatpush.msra.mxu1 %v6337_v15  ;;  %v5792_v2 = vld [vmem:[#allocation7 + $0x530] sm:$0xff]  ;;  %v6065_v15 = vld [vmem:[#allocation7 + $0xdb8] sm:$0xff] }
 0x4e0   :  { %7257 = vmatpush.msra.mxu2 %v5638_v61  ;;  %7211 = vmatpush.msra.mxu0 %v6197_v5  ;;  %v5932_v49 = vld [vmem:[#allocation7 + $0x990] sm:$0xff]  ;;  %v6149_v61 = vld [vmem:[#allocation7 + $0x1058] sm:$0xff] }
 0x4e1   :  { %7268 = vmatpush.msra.mxu3 %v5834_v60  ;;  %7231 = vmatpush.msra.mxu1 %v6330_v28  ;;  %v5785_v60 = vld [vmem:[#allocation7 + $0x4f8] sm:$0xff]  ;;  %v6058_v28 = vld [vmem:[#allocation7 + $0xd80] sm:$0xff] }
 0x4e2   :  { %7258 = vmatpush.msra.mxu2 %v5631_v46  ;;  %7212 = vmatpush.msra.mxu0 %v6190_v14  ;;  %v5925_v5 = vld [vmem:[#allocation7 + $0x958] sm:$0xff]  ;;  %v6142_v46 = vld [vmem:[#allocation7 + $0x1020] sm:$0xff]  ;;  %v6051_v14 = vld [vmem:[#allocation7 + $0xd48] sm:$0xff] }
 0x4e3   :  { %7259 = vmatmul.f32.vlgmr.msra.gmra.mxu2 %v15644_v25  ;;  %7269 = vmatpush.msra.mxu3 %v5827_v62  ;;  %v5778_v62 = vld [vmem:[#allocation7 + $0x4c0] sm:$0xff] }
 0x4e4   :  { %7335 = vmatpush.msrb.mxu2 %v6184_v31  ;;  %7232 = vmatpush.msra.mxu1 %v6323_v29  ;;  %v5918_v31 = vld [vmem:[#allocation7 + $0x920] sm:$0xff]  ;;  %v6135_v29 = vld [vmem:[#allocation7 + $0xfe8] sm:$0xff] }
 0x4e5   :  { %7193 = vmatmul.f32.gmra.mxu3 %v15741_v3  ;;  %7213 = vmatmul.f32.vlgmr.msra.gmra.mxu0 %v15743_v32 }
 0x4e6   :  { %7270 = vmatpush.msra.mxu3 %v5820_v40  ;;  %7289 = vmatpush.msrb.mxu0 %v5960_v41  ;;  %v5771_v40 = vld [vmem:[#allocation7 + $0x488] sm:$0xff] }
 0x4e7   :  { %7336 = vmatpush.msrb.mxu2 %v6177_v8  ;;  %7233 = vmatpush.msra.mxu1 %v6316_v21  ;;  %v5911_v41 = vld [vmem:[#allocation7 + $0x8e8] sm:$0xff]  ;;  %v6044_v8 = vld [vmem:[#allocation7 + $0xd10] sm:$0xff] }
 0x4e8   :  { %7271 = vmatpush.msra.mxu3 %v5813_v52  ;;  %7290 = vmatpush.msrb.mxu0 %v5953_v13  ;;  %v6128_v21 = vld [vmem:[#allocation7 + $0xfb0] sm:$0xff] }
 0x4e9   :  { %7337 = vmatpush.msrb.mxu2 %v6170_v6  ;;  %7234 = vmatpush.msra.mxu1 %v6309_v30  ;;  %v5764_v52 = vld [vmem:[#allocation7 + $0x450] sm:$0xff]  ;;  %v6037_v6 = vld [vmem:[#allocation7 + $0xcd8] sm:$0xff] }
 0x4ea   :  { %7272 = vmatpush.msra.mxu3 %v5806_v20  ;;  %7291 = vmatpush.msrb.mxu0 %v5946_v0  ;;  %v5904_v13 = vld [vmem:[#allocation7 + $0x8b0] sm:$0xff]  ;;  %v6121_v30 = vld [vmem:[#allocation7 + $0xf78] sm:$0xff] }
 0x4eb   :  { %7338 = vmatpush.msrb.mxu2 %v6163_v45  ;;  %7235 = vmatpush.msra.mxu1 %v6302_v43  ;;  %v5757_v20 = vld [vmem:[#allocation7 + $0x418] sm:$0xff]  ;;  %v6030_v45 = vld [vmem:[#allocation7 + $0xca0] sm:$0xff] }
 0x4ec   :  { %7262 = vmatmul.f32.gmra.mxu2 %v15682_v39  ;;  %11949 = vmatmul.msk.f32.vlgmr.msra.gmra.mxu1 %vm1116_vm5, %v15754_v55  ;;  %v5897_v0 = vld [vmem:[#allocation7 + $0x878] sm:$0xff]  ;;  %v6114_v43 = vld [vmem:[#allocation7 + $0xf40] sm:$0xff] }
 0x4ed   :  { %7273 = vmatpush.msra.mxu3 %v5799_v19  ;;  %7292 = vmatpush.msrb.mxu0 %v5939_v53  ;;  %v5750_v19 = vld [vmem:[#allocation7 + $0x3e0] sm:$0xff] }
 0x4ee   :  { %7312 = vmatpush.msrb.mxu1 %v6072_v9  ;;  %7339 = vmatpush.msrb.mxu2 %v6156_v11  ;;  %v5890_v53 = vld [vmem:[#allocation7 + $0x840] sm:$0xff]  ;;  %v6023_v9 = vld [vmem:[#allocation7 + $0xc68] sm:$0xff] }
 0x4ef   :  { %7216 = vmatmul.f32.gmra.mxu0 %v15757_v54  ;;  %7274 = vmatpush.msra.mxu3 %v5792_v2  ;;  %v6107_v11 = vld [vmem:[#allocation7 + $0xf08] sm:$0xff] }
 0x4f0   :  { %7293 = vmatpush.msrb.mxu0 %v5932_v49  ;;  %7313 = vmatpush.msrb.mxu1 %v6065_v15  ;;  %v5743_v2 = vld [vmem:[#allocation7 + $0x3a8] sm:$0xff]  ;;  %v6016_v15 = vld [vmem:[#allocation7 + $0xc30] sm:$0xff] }
 0x4f1   :  { %7340 = vmatpush.msrb.mxu2 %v6149_v61  ;;  %7275 = vmatpush.msra.mxu3 %v5785_v60  ;;  %v5883_v49 = vld [vmem:[#allocation7 + $0x808] sm:$0xff]  ;;  %v6100_v61 = vld [vmem:[#allocation7 + $0xed0] sm:$0xff] }
 0x4f2   :  { %7294 = vmatpush.msrb.mxu0 %v5925_v5  ;;  %7314 = vmatpush.msrb.mxu1 %v6058_v28  ;;  %v6296_v60 = vld [vmem:[#allocation7 + $0x14f0] sm:$0xff]  ;;  %v6009_v28 = vld [vmem:[#allocation7 + $0xbf8] sm:$0xff] }
 0x4f3   :  { %7341 = vmatpush.msrb.mxu2 %v6142_v46  ;;  %7276 = vmatpush.msra.mxu3 %v5778_v62  ;;  %v5876_v5 = vld [vmem:[#allocation7 + $0x7d0] sm:$0xff]  ;;  %v6093_v46 = vld [vmem:[#allocation7 + $0xe98] sm:$0xff] }
 0x4f4   :  { %7295 = vmatpush.msrb.mxu0 %v5918_v31  ;;  %7315 = vmatpush.msrb.mxu1 %v6051_v14  ;;  %v6289_v62 = vld [vmem:[#allocation7 + $0x14b8] sm:$0xff]  ;;  %v6002_v14 = vld [vmem:[#allocation7 + $0xbc0] sm:$0xff] }
 0x4f5   :  { %7342 = vmatpush.msrb.mxu2 %v6135_v29  ;;  %11950 = vmatmul.msk.f32.gmra.mxu1 %vm1116_vm5, %v15765_v1  ;;  %v5869_v31 = vld [vmem:[#allocation7 + $0x798] sm:$0xff]  ;;  %v6086_v29 = vld [vmem:[#allocation7 + $0xe60] sm:$0xff] }
 0x4f6   :  { %7277 = vmatpush.msra.mxu3 %v5771_v40  ;;  %7296 = vmatpush.msrb.mxu0 %v5911_v41  ;;  %v6282_v40 = vld [vmem:[#allocation7 + $0x1480] sm:$0xff] }
 0x4f7   :  { %7316 = vmatpush.msrb.mxu1 %v6044_v8  ;;  %7343 = vmatpush.msrb.mxu2 %v6128_v21  ;;  %v5862_v41 = vld [vmem:[#allocation7 + $0x760] sm:$0xff]  ;;  %v5995_v8 = vld [vmem:[#allocation7 + $0xb88] sm:$0xff] }
 0x4f8   :  { %7278 = vmatpush.msra.mxu3 %v5764_v52  ;;  %7297 = vmatpush.msrb.mxu0 %v5904_v13  ;;  %v6079_v21 = vld [vmem:[#allocation7 + $0xe28] sm:$0xff]  ;;  %v5849_v13 = vld [vmem:[#allocation7 + $0x6f8] sm:$0xff] }
 0x4f9   :  { %7317 = vmatpush.msrb.mxu1 %v6037_v6  ;;  %7344 = vmatpush.msrb.mxu2 %v6121_v30  ;;  %v6275_v52 = vld [vmem:[#allocation7 + $0x1448] sm:$0xff]  ;;  %v5988_v30 = vld [vmem:[#allocation7 + $0xb50] sm:$0xff] }
 0x4fa   :  { %7279 = vmatpush.msra.mxu3 %v5757_v20  ;;  %7298 = vmatpush.msrb.mxu0 %v5897_v0  ;;  %v5855_v6 = vld [vmem:[#allocation7 + $0x728] sm:$0xff]  ;;  %v6268_v20 = vld [vmem:[#allocation7 + $0x1410] sm:$0xff] }
 0x4fb   :  { %7318 = vmatpush.msrb.mxu1 %v6030_v45  ;;  %7345 = vmatpush.msrb.mxu2 %v6114_v43  ;;  %v6408_v0 = vld [vmem:[#allocation7 + $0x1870] sm:$0xf]  ;;  %v5842_v45 = vld [vmem:[#allocation7 + $0x6c0] sm:$0xff]  ;;  %v5981_v43 = vld [vmem:[#allocation7 + $0xb18] sm:$0xff] }
 0x4fc   :  { %7280 = vmatpush.msra.mxu3 %v5750_v19  ;;  %7299 = vmatpush.msrb.mxu0 %v5890_v53  ;;  %v6261_v19 = vld [vmem:[#allocation7 + $0x13d8] sm:$0xff] }
 0x4fd   :  { %7319 = vmatpush.msrb.mxu1 %v6023_v9  ;;  %7346 = vmatpush.msrb.mxu2 %v6107_v11  ;;  %v6401_v53 = vld [vmem:[#allocation7 + $0x1838] sm:$0xff]  ;;  %v5835_v9 = vld [vmem:[#allocation7 + $0x688] sm:$0xff]  ;;  %v5974_v11 = vld [vmem:[#allocation7 + $0xae0] sm:$0xff] }
 0x4fe   :  { %7281 = vmatpush.msra.mxu3 %v5743_v2  ;;  %7300 = vmatpush.msrb.mxu0 %v5883_v49  ;;  %v6254_v2 = vld [vmem:[#allocation7 + $0x13a0] sm:$0xff] }
 0x4ff   :  { %7320 = vmatpush.msrb.mxu1 %v6016_v15  ;;  %7347 = vmatpush.msrb.mxu2 %v6100_v61  ;;  %v6394_v49 = vld [vmem:[#allocation7 + $0x1800] sm:$0xff]  ;;  %v5828_v15 = vld [vmem:[#allocation7 + $0x650] sm:$0xff]  ;;  %v5967_v61 = vld [vmem:[#allocation7 + $0xaa8] sm:$0xff] }
 0x500   :  { %7282 = vmatmul.f32.vlgmr.msra.gmra.mxu3 %v15677_v12  ;;  %7301 = vmatpush.msrb.mxu0 %v5876_v5  ;;  %v6387_v5 = vld [vmem:[#allocation7 + $0x17c8] sm:$0xff] }
 0x501   :  { %7358 = vmatpush.msrb.mxu3 %v6296_v60  ;;  %7321 = vmatpush.msrb.mxu1 %v6009_v28  ;;  %v6247_v60 = vld [vmem:[#allocation7 + $0x1368] sm:$0xff]  ;;  %v5737_v28 = vld [vmem:[#allocation7 + $0x378] sm:$0xff] }
 0x502   :  { %7348 = vmatpush.msrb.mxu2 %v6093_v46  ;;  %7302 = vmatpush.msrb.mxu0 %v5869_v31  ;;  %v15887_v46 = vpop.f32.mrf.mxu1  ;;  %v6240_v31 = vld [vmem:[#allocation7 + $0x1330] sm:$0xff] }
 0x503   :  { %7359 = vmatpush.msrb.mxu3 %v6289_v62  ;;  %7322 = vmatpush.msrb.mxu1 %v6002_v14  ;;  %v5821_v62 = vld [vmem:[#allocation7 + $0x618] sm:$0xff]  ;;  %v6380_v14 = vld [vmem:[#allocation7 + $0x1790] sm:$0xff] }
 0x504   :  { %7349 = vmatpush.msrb.mxu2 %v6086_v29  ;;  %7303 = vmatpush.msrb.mxu0 %v5862_v41  ;;  %v5730_v29 = vld [vmem:[#allocation7 + $0x340] sm:$0xff]  ;;  %v6233_v41 = vld [vmem:[#allocation7 + $0x12f8] sm:$0xff] }
 0x505   :  { %7360 = vmatpush.msrb.mxu3 %v6282_v40  ;;  %7323 = vmatpush.msrb.mxu1 %v5995_v8  ;;  %v5814_v40 = vld [vmem:[#allocation7 + $0x5e0] sm:$0xff]  ;;  %v6373_v8 = vld [vmem:[#allocation7 + $0x1758] sm:$0xff] }
 0x506   :  { %7350 = vmatpush.msrb.mxu2 %v6079_v21  ;;  %7304 = vmatpush.msrb.mxu0 %v5855_v6  ;;  %v5723_v21 = vld [vmem:[#allocation7 + $0x308] sm:$0xff]  ;;  %v6366_v6 = vld [vmem:[#allocation7 + $0x1720] sm:$0xff] }
 0x507   :  { %7351 = vmatmul.f32.vlgmr.msrb.gmra.mxu2 %v15715_v33  ;;  %7361 = vmatpush.msrb.mxu3 %v6275_v52  ;;  %v5807_v52 = vld [vmem:[#allocation7 + $0x5a8] sm:$0xff] }
 0x508   :  { %7427 = vmatpush.msra.mxu2 %v5849_v13  ;;  %7324 = vmatpush.msrb.mxu1 %v5988_v30  ;;  %v6226_v13 = vld [vmem:[#allocation7 + $0x12c0] sm:$0xff]  ;;  %v5716_v30 = vld [vmem:[#allocation7 + $0x2d0] sm:$0xff] }
 0x509   :  { %7285 = vmatmul.f32.gmra.mxu3 %v15713_v27  ;;  %7305 = vmatmul.f32.vlgmr.msrb.gmra.mxu0 %v15702_v35 }
 0x50a   :  { %7362 = vmatpush.msrb.mxu3 %v6268_v20  ;;  %11951 = vmatpush.msk.msra.mxu0 %vm6416_vm2, %v6408_v0  ;;  %v5800_v20 = vld [vmem:[#allocation7 + $0x570] sm:$0xff]  ;;  %v6219_v0 = vld [vmem:[#allocation7 + $0x1288] sm:$0xff] }
 0x50b   :  { %7428 = vmatpush.msra.mxu2 %v5842_v45  ;;  %7325 = vmatpush.msrb.mxu1 %v5981_v43  ;;  %v6359_v45 = vld [vmem:[#allocation7 + $0x16e8] sm:$0xff]  ;;  %v5709_v43 = vld [vmem:[#allocation7 + $0x298] sm:$0xff] }
 0x50c   :  { %7363 = vmatpush.msrb.mxu3 %v6261_v19  ;;  %7382 = vmatpush.msra.mxu0 %v6401_v53  ;;  %v15892_v19 = vpop.f32.mrf.mxu2  ;;  %v15894_v53 = vpop.f32.mrf.mxu3 }
 0x50d   :  { %7429 = vmatpush.msra.mxu2 %v5835_v9  ;;  %7326 = vmatpush.msrb.mxu1 %v5974_v11  ;;  %v5793_v9 = vld [vmem:[#allocation7 + $0x538] sm:$0xff]  ;;  %v6212_v11 = vld [vmem:[#allocation7 + $0x1250] sm:$0xff] }
 0x50e   :  { %7364 = vmatpush.msrb.mxu3 %v6254_v2  ;;  %7383 = vmatpush.msra.mxu0 %v6394_v49  ;;  %v15896_v2 = vpop.f32.mrf.mxu1  ;;  %v6352_v49 = vld [vmem:[#allocation7 + $0x16b0] sm:$0xff] }
 0x50f   :  { %7430 = vmatpush.msra.mxu2 %v5828_v15  ;;  %7327 = vmatpush.msrb.mxu1 %v5967_v61  ;;  %v5702_v15 = vld [vmem:[#allocation7 + $0x260] sm:$0xff] }
 0x510   :  { %7354 = vmatmul.f32.gmra.mxu2 %v15741_v3  ;;  %7328 = vmatmul.f32.vlgmr.msrb.gmra.mxu1 %v15675_v63  ;;  %v5786_v61 = vld [vmem:[#allocation7 + $0x500] sm:$0xff] }
 0x511   :  { %7365 = vmatpush.msrb.mxu3 %v6247_v60  ;;  %7384 = vmatpush.msra.mxu0 %v6387_v5  ;;  %v6205_v60 = vld [vmem:[#allocation7 + $0x1218] sm:$0xff] }
 0x512   :  { %7404 = vmatpush.msra.mxu1 %v5737_v28  ;;  %7431 = vmatpush.msra.mxu2 %v5821_v62  ;;  %v6345_v5 = vld [vmem:[#allocation7 + $0x1678] sm:$0xff]  ;;  %v5695_v28 = vld [vmem:[#allocation7 + $0x228] sm:$0xff]  ;;  %v15899_v62 = vpop.f32.mrf.mxu0 }
 0x513   :  { %7308 = vmatmul.f32.gmra.mxu0 %v15735_v36  ;;  %7366 = vmatpush.msrb.mxu3 %v6240_v31  ;;  %v5779_v31 = vld [vmem:[#allocation7 + $0x4c8] sm:$0xff] }
 0x514   :  { %7385 = vmatpush.msra.mxu0 %v6380_v14  ;;  %7405 = vmatpush.msra.mxu1 %v5730_v29  ;;  %v6198_v14 = vld [vmem:[#allocation7 + $0x11e0] sm:$0xff] }
 0x515   :  { %7432 = vmatpush.msra.mxu2 %v5814_v40  ;;  %7367 = vmatpush.msrb.mxu3 %v6233_v41  ;;  %v6338_v29 = vld [vmem:[#allocation7 + $0x1640] sm:$0xff]  ;;  %v5688_v40 = vld [vmem:[#allocation7 + $0x1f0] sm:$0xff] }
 0x516   :  { %7386 = vmatpush.msra.mxu0 %v6373_v8  ;;  %7406 = vmatpush.msra.mxu1 %v5723_v21  ;;  %v5772_v41 = vld [vmem:[#allocation7 + $0x490] sm:$0xff]  ;;  %v6191_v8 = vld [vmem:[#allocation7 + $0x11a8] sm:$0xff] }
 0x517   :  { %7433 = vmatpush.msra.mxu2 %v5807_v52  ;;  %7368 = vmatpush.msrb.mxu3 %v6226_v13  ;;  %v6331_v21 = vld [vmem:[#allocation7 + $0x1608] sm:$0xff]  ;;  %v5681_v52 = vld [vmem:[#allocation7 + $0x1b8] sm:$0xff] }
 0x518   :  { %7387 = vmatpush.msra.mxu0 %v6366_v6  ;;  %7407 = vmatpush.msra.mxu1 %v5716_v30  ;;  %v5765_v13 = vld [vmem:[#allocation7 + $0x458] sm:$0xff]  ;;  %v15901_v6 = vpop.f32.mrf.mxu1 }
 0x519   :  { %7434 = vmatpush.msra.mxu2 %v5800_v20  ;;  %7331 = vmatmul.f32.gmra.mxu1 %v15709_v22  ;;  %v5961_v30 = vld [vmem:[#allocation7 + $0xa78] sm:$0xff]  ;;  %v6324_v20 = vld [vmem:[#allocation7 + $0x15d0] sm:$0xff] }
 0x51a   :  { %7369 = vmatpush.msrb.mxu3 %v6219_v0  ;;  %7388 = vmatpush.msra.mxu0 %v6359_v45  ;;  %v15903_v0 = vpop.f32.mrf.mxu2  ;;  %v15905_v45 = vpop.f32.mrf.mxu3 }
 0x51b   :  { %7408 = vmatpush.msra.mxu1 %v5709_v43  ;;  %7435 = vmatpush.msra.mxu2 %v5793_v9  ;;  %v5674_v43 = vld [vmem:[#allocation7 + $0x180] sm:$0xff]  ;;  %v6804_v42 = vadd.f32 %v15903_v0, %v15896_v2 }
 0x51c   :  { %7370 = vmatpush.msrb.mxu3 %v6212_v11  ;;  %7389 = vmatpush.msra.mxu0 %v6352_v49  ;;  %v5758_v9 = vld [vmem:[#allocation7 + $0x420] sm:$0xff]  ;;  %v6317_v49 = vld [vmem:[#allocation7 + $0x1598] sm:$0xff] }
 0x51d   :  { %7409 = vmatpush.msra.mxu1 %v5702_v15  ;;  %7436 = vmatpush.msra.mxu2 %v5786_v61  ;;  %v5954_v11 = vld [vmem:[#allocation7 + $0xa40] sm:$0xff]  ;;  %v5667_v15 = vld [vmem:[#allocation7 + $0x148] sm:$0xff] }
 0x51e   :  { %7371 = vmatpush.msrb.mxu3 %v6205_v60  ;;  %7390 = vmatpush.msra.mxu0 %v6345_v5  ;;  %v5751_v61 = vld [vmem:[#allocation7 + $0x3e8] sm:$0xff]  ;;  %v6310_v5 = vld [vmem:[#allocation7 + $0x1560] sm:$0xff] }
 0x51f   :  { %7410 = vmatpush.msra.mxu1 %v5695_v28  ;;  %7437 = vmatpush.msra.mxu2 %v5779_v31  ;;  %v5947_v60 = vld [vmem:[#allocation7 + $0xa08] sm:$0xff]  ;;  %v15908_v28 = vpop.f32.mrf.mxu0  ;;  %v5660_v31 = vld [vmem:[#allocation7 + $0x110] sm:$0xff] }
 0x520   :  { %7372 = vmatpush.msrb.mxu3 %v6198_v14  ;;  %7391 = vmatpush.msra.mxu0 %v6338_v29  ;;  %v5744_v14 = vld [vmem:[#allocation7 + $0x3b0] sm:$0xff] }
 0x521   :  { %7411 = vmatpush.msra.mxu1 %v5688_v40  ;;  %7438 = vmatpush.msra.mxu2 %v5772_v41  ;;  %v5940_v29 = vld [vmem:[#allocation7 + $0x9d0] sm:$0xff]  ;;  %v6297_v40 = vld [vmem:[#allocation7 + $0x14f8] sm:$0xff]  ;;  %v6303_v41 = vld [vmem:[#allocation7 + $0x1528] sm:$0xff] }
 0x522   :  { %7373 = vmatpush.msrb.mxu3 %v6191_v8  ;;  %7392 = vmatpush.msra.mxu0 %v6331_v21  ;;  %v5653_v8 = vld [vmem:[#allocation7 + $0xd8] sm:$0xff]  ;;  %v15910_v21 = vpop.f32.mrf.mxu2 }
 0x523   :  { %7412 = vmatpush.msra.mxu1 %v5681_v52  ;;  %7439 = vmatpush.msra.mxu2 %v5765_v13  ;;  %v15912_v52 = vpop.f32.mrf.mxu3  ;;  %v5933_v13 = vld [vmem:[#allocation7 + $0x998] sm:$0xff] }
 0x524   :  { %7374 = vmatmul.f32.vlgmr.msrb.gmra.mxu3 %v15743_v32  ;;  %7393 = vmatpush.msra.mxu0 %v6324_v20  ;;  %v6073_v20 = vld [vmem:[#allocation7 + $0xdf8] sm:$0xff] }
 0x525   :  { %7450 = vmatpush.msra.mxu3 %v5961_v30  ;;  %7413 = vmatpush.msra.mxu1 %v5674_v43  ;;  %v15915_v30 = vpop.f32.mrf.mxu1  ;;  %v6290_v43 = vld [vmem:[#allocation7 + $0x14c0] sm:$0xff] }
 0x526   :  { %7440 = vmatpush.msra.mxu2 %v5758_v9  ;;  %7394 = vmatpush.msra.mxu0 %v6317_v49  ;;  %v5646_v9 = vld [vmem:[#allocation7 + $0xa0] sm:$0xff] }
 0x527   :  { %7451 = vmatpush.msra.mxu3 %v5954_v11  ;;  %7414 = vmatpush.msra.mxu1 %v5667_v15  ;;  %v5926_v11 = vld [vmem:[#allocation7 + $0x960] sm:$0xff]  ;;  %v6283_v15 = vld [vmem:[#allocation7 + $0x1488] sm:$0xff] }
 0x528   :  { %7441 = vmatpush.msra.mxu2 %v5751_v61  ;;  %7395 = vmatpush.msra.mxu0 %v6310_v5  ;;  %v6066_v49 = vld [vmem:[#allocation7 + $0xdc0] sm:$0xff]  ;;  %v5639_v61 = vld [vmem:[#allocation7 + $0x68] sm:$0xff] }
 0x529   :  { %7452 = vmatpush.msra.mxu3 %v5947_v60  ;;  %7415 = vmatpush.msra.mxu1 %v5660_v31  ;;  %v5919_v60 = vld [vmem:[#allocation7 + $0x928] sm:$0xff]  ;;  %v6276_v31 = vld [vmem:[#allocation7 + $0x1450] sm:$0xff] }
 0x52a   :  { %7442 = vmatpush.msra.mxu2 %v5744_v14  ;;  %7396 = vmatpush.msra.mxu0 %v6303_v41  ;;  %v6059_v5 = vld [vmem:[#allocation7 + $0xd88] sm:$0xff]  ;;  %v5632_v14 = vld [vmem:[#allocation7 + $0x30] sm:$0xff]  ;;  %v6185_v41 = vld [vmem:[#allocation7 + $0x1178] sm:$0xff] }
 0x52b   :  { %7443 = vmatmul.f32.vlgmr.msra.gmra.mxu2 %v15677_v12  ;;  %7453 = vmatpush.msra.mxu3 %v5940_v29  ;;  %v15920_v12 = vpop.f32.mrf.mxu0  ;;  %v5912_v29 = vld [vmem:[#allocation7 + $0x8f0] sm:$0xff] }
 0x52c   :  { %7519 = vmatpush.msrb.mxu2 %v6297_v40  ;;  %7416 = vmatpush.msra.mxu1 %v5653_v8  ;;  %v6052_v40 = vld [vmem:[#allocation7 + $0xd50] sm:$0xff] }
 0x52d   :  { %7377 = vmatmul.f32.gmra.mxu3 %v15757_v54  ;;  %11952 = vmatmul.msk.f32.vlgmr.msra.gmra.mxu0 %vm1116_vm5, %v15754_v55  ;;  %v15922_v8 = vpop.f32.mrf.mxu1 }
 0x52e   :  { %7454 = vmatpush.msra.mxu3 %v5933_v13  ;;  %7473 = vmatpush.msrb.mxu0 %v6073_v20  ;;  %v6269_v13 = vld [vmem:[#allocation7 + $0x1418] sm:$0xff]  ;;  %v15925_v20 = vpop.f32.mrf.mxu2 }
 0x52f   :  { %7520 = vmatpush.msrb.mxu2 %v6290_v43  ;;  %7417 = vmatpush.msra.mxu1 %v5646_v9  ;;  %v15927_v43 = vpop.f32.mrf.mxu3  ;;  %v5905_v9 = vld [vmem:[#allocation7 + $0x8b8] sm:$0xff] }
 0x530   :  { %7455 = vmatpush.msra.mxu3 %v5926_v11  ;;  %7474 = vmatpush.msrb.mxu0 %v6066_v49  ;;  %v6045_v11 = vld [vmem:[#allocation7 + $0xd18] sm:$0xff]  ;;  %v6178_v49 = vld [vmem:[#allocation7 + $0x1140] sm:$0xff] }
 0x531   :  { %7521 = vmatpush.msrb.mxu2 %v6283_v15  ;;  %7418 = vmatpush.msra.mxu1 %v5639_v61  ;;  %v6262_v15 = vld [vmem:[#allocation7 + $0x13e0] sm:$0xff] }
 0x532   :  { %7456 = vmatpush.msra.mxu3 %v5919_v60  ;;  %7475 = vmatpush.msrb.mxu0 %v6059_v5  ;;  %v5898_v61 = vld [vmem:[#allocation7 + $0x880] sm:$0xff]  ;;  %v6171_v60 = vld [vmem:[#allocation7 + $0x1108] sm:$0xff] }
 0x533   :  { %7522 = vmatpush.msrb.mxu2 %v6276_v31  ;;  %7419 = vmatpush.msra.mxu1 %v5632_v14  ;;  %v6255_v5 = vld [vmem:[#allocation7 + $0x13a8] sm:$0xff]  ;;  %v15932_v31 = vpop.f32.mrf.mxu0 }
 0x534   :  { %7446 = vmatmul.f32.gmra.mxu2 %v15713_v27  ;;  %7420 = vmatmul.f32.vlgmr.msra.gmra.mxu1 %v15644_v25  ;;  %v6038_v27 = vld [vmem:[#allocation7 + $0xce0] sm:$0xff]  ;;  %v5891_v25 = vld [vmem:[#allocation7 + $0x848] sm:$0xff] }
 0x535   :  { %7457 = vmatpush.msra.mxu3 %v5912_v29  ;;  %7476 = vmatpush.msrb.mxu0 %v6052_v40  ;;  %v6031_v14 = vld [vmem:[#allocation7 + $0xca8] sm:$0xff]  ;;  %v6164_v29 = vld [vmem:[#allocation7 + $0x10d0] sm:$0xff]  ;;  %v15938_v4 = vpop.f32.mrf.mxu1 }
 0x536   :  { %7496 = vmatpush.msrb.mxu1 %v6185_v41  ;;  %7523 = vmatpush.msrb.mxu2 %v6269_v13  ;;  %v6248_v40 = vld [vmem:[#allocation7 + $0x1370] sm:$0xff] }
 0x537   :  { %11953 = vmatmul.msk.f32.gmra.mxu0 %vm1116_vm5, %v15765_v1  ;;  %7458 = vmatpush.msra.mxu3 %v5905_v9  ;;  %v5884_v41 = vld [vmem:[#allocation7 + $0x810] sm:$0xff]  ;;  %v6157_v9 = vld [vmem:[#allocation7 + $0x1098] sm:$0xff]  ;;  %v15936_v38 = vpop.f32.mrf.mxu3 }
 0x538   :  { %7477 = vmatpush.msrb.mxu0 %v6045_v11  ;;  %7497 = vmatpush.msrb.mxu1 %v6178_v49  ;;  %v6024_v13 = vld [vmem:[#allocation7 + $0xc70] sm:$0xff]  ;;  %v15934_v11 = vpop.f32.mrf.mxu2  ;;  %v6241_v49 = vld [vmem:[#allocation7 + $0x1338] sm:$0xff] }
 0x539   :  { %7524 = vmatpush.msrb.mxu2 %v6262_v15  ;;  %7459 = vmatpush.msra.mxu3 %v5898_v61  ;;  %v5877_v15 = vld [vmem:[#allocation7 + $0x7d8] sm:$0xff] }
 0x53a   :  { %7478 = vmatpush.msrb.mxu0 %v6038_v27  ;;  %7498 = vmatpush.msrb.mxu1 %v6171_v60  ;;  %v6017_v61 = vld [vmem:[#allocation7 + $0xc38] sm:$0xff]  ;;  %v6150_v27 = vld [vmem:[#allocation7 + $0x1060] sm:$0xff] }
 0x53b   :  { %7525 = vmatpush.msrb.mxu2 %v6255_v5  ;;  %7460 = vmatpush.msra.mxu3 %v5891_v25  ;;  %v6234_v60 = vld [vmem:[#allocation7 + $0x1300] sm:$0xff]  ;;  %v15941_v34 = vpop.f32.mrf.mxu0 }
 0x53c   :  { %7479 = vmatpush.msrb.mxu0 %v6031_v14  ;;  %7499 = vmatpush.msrb.mxu1 %v6164_v29  ;;  %v5870_v5 = vld [vmem:[#allocation7 + $0x7a0] sm:$0xff]  ;;  %v6143_v14 = vld [vmem:[#allocation7 + $0x1028] sm:$0xff] }
 0x53d   :  { %7526 = vmatpush.msrb.mxu2 %v6248_v40  ;;  %7423 = vmatmul.f32.gmra.mxu1 %v15682_v39  ;;  %v6010_v25 = vld [vmem:[#allocation7 + $0xc00] sm:$0xff]  ;;  %v6227_v29 = vld [vmem:[#allocation7 + $0x12c8] sm:$0xff]  ;;  %v15943_v59 = vpop.f32.mrf.mxu1 }
 0x53e   :  { %7461 = vmatpush.msra.mxu3 %v5884_v41  ;;  %7480 = vmatpush.msrb.mxu0 %v6024_v13  ;;  %v5863_v40 = vld [vmem:[#allocation7 + $0x768] sm:$0xff]  ;;  %v6136_v41 = vld [vmem:[#allocation7 + $0xff0] sm:$0xff] }
 0x53f   :  { %7500 = vmatpush.msrb.mxu1 %v6157_v9  ;;  %7527 = vmatpush.msrb.mxu2 %v6241_v49  ;;  %v6003_v39 = vld [vmem:[#allocation7 + $0xbc8] sm:$0xff]  ;;  %v6220_v13 = vld [vmem:[#allocation7 + $0x1290] sm:$0xff] }
 0x540   :  { %7462 = vmatpush.msra.mxu3 %v5877_v15  ;;  %7481 = vmatpush.msrb.mxu0 %v6017_v61  ;;  %v5856_v9 = vld [vmem:[#allocation7 + $0x730] sm:$0xff]  ;;  %v6129_v15 = vld [vmem:[#allocation7 + $0xfb8] sm:$0xff] }
 0x541   :  { %7501 = vmatpush.msrb.mxu1 %v6150_v27  ;;  %7528 = vmatpush.msrb.mxu2 %v6234_v60  ;;  %v5996_v49 = vld [vmem:[#allocation7 + $0xb90] sm:$0xff]  ;;  %v6409_v61 = vld [vmem:[#allocation7 + $0x1878] sm:$0xf]  ;;  %v15945_v60 = vpop.f32.mrf.mxu2 }
 0x542   :  { %7463 = vmatpush.msra.mxu3 %v5870_v5  ;;  %7482 = vmatpush.msrb.mxu0 %v6010_v25  ;;  %v5989_v27 = vld [vmem:[#allocation7 + $0xb58] sm:$0xff]  ;;  %v15947_v5 = vpop.f32.mrf.mxu3  ;;  %v6122_v25 = vld [vmem:[#allocation7 + $0xf80] sm:$0xff] }
 0x543   :  { %7502 = vmatpush.msrb.mxu1 %v6143_v14  ;;  %7529 = vmatpush.msrb.mxu2 %v6227_v29  ;;  %v6206_v14 = vld [vmem:[#allocation7 + $0x1220] sm:$0xff]  ;;  %v15951_v24 = vpop.f32.mrf.mxu0 }
 0x544   :  { %7464 = vmatpush.msra.mxu3 %v5863_v40  ;;  %7483 = vmatpush.msrb.mxu0 %v6003_v39  ;;  %v6402_v29 = vld [vmem:[#allocation7 + $0x1840] sm:$0xff]  ;;  %v6115_v39 = vld [vmem:[#allocation7 + $0xf48] sm:$0xff] }
 0x545   :  { %7503 = vmatpush.msrb.mxu1 %v6136_v41  ;;  %7530 = vmatpush.msrb.mxu2 %v6220_v13  ;;  %v5982_v40 = vld [vmem:[#allocation7 + $0xb20] sm:$0xff]  ;;  %v6199_v41 = vld [vmem:[#allocation7 + $0x11e8] sm:$0xff] }
 0x546   :  { %7465 = vmatpush.msra.mxu3 %v5856_v9  ;;  %7484 = vmatpush.msrb.mxu0 %v5996_v49  ;;  %v6395_v13 = vld [vmem:[#allocation7 + $0x1808] sm:$0xff]  ;;  %v6108_v49 = vld [vmem:[#allocation7 + $0xf10] sm:$0xff] }
 0x547   :  { %7504 = vmatpush.msrb.mxu1 %v6129_v15  ;;  %7531 = vmatpush.msrb.mxu2 %v6213_v50  ;;  %v5975_v9 = vld [vmem:[#allocation7 + $0xae8] sm:$0xff]  ;;  %v6192_v15 = vld [vmem:[#allocation7 + $0x11b0] sm:$0xff] }
 0x548   :  { %7466 = vmatmul.f32.vlgmr.msra.gmra.mxu3 %v15702_v35  ;;  %7485 = vmatpush.msrb.mxu0 %v5989_v27  ;;  %v6388_v35 = vld [vmem:[#allocation7 + $0x17d0] sm:$0xff] }
 0x549   :  { %11954 = vmatpush.msk.msrb.mxu3 %vm6416_vm2, %v6409_v61  ;;  %7505 = vmatpush.msrb.mxu1 %v6122_v25  ;;  %v5968_v50 = vld [vmem:[#allocation7 + $0xab0] sm:$0xff]  ;;  %v6101_v61 = vld [vmem:[#allocation7 + $0xed8] sm:$0xff]  ;;  %v15953_v27 = vpop.f32.mrf.mxu2 }
 0x54a   :  { %7532 = vmatpush.msrb.mxu2 %v6206_v14  ;;  %7486 = vmatpush.msrb.mxu0 %v5982_v40  ;;  %v15956_v25 = vpop.f32.mrf.mxu3  ;;  %v6381_v14 = vld [vmem:[#allocation7 + $0x1798] sm:$0xff]  ;;  %v15958_v40 = vpop.f32.mrf.mxu1 }
 0x54b   :  { %7543 = vmatpush.msrb.mxu3 %v6402_v29  ;;  %7506 = vmatpush.msrb.mxu1 %v6115_v39  ;;  %v6094_v29 = vld [vmem:[#allocation7 + $0xea0] sm:$0xff] }
 0x54c   :  { %7533 = vmatpush.msrb.mxu2 %v6199_v41  ;;  %7487 = vmatpush.msrb.mxu0 %v5975_v9  ;;  %v6374_v39 = vld [vmem:[#allocation7 + $0x1760] sm:$0xff]  ;;  %v6087_v41 = vld [vmem:[#allocation7 + $0xe68] sm:$0xff] }
 0x54d   :  { %7544 = vmatpush.msrb.mxu3 %v6395_v13  ;;  %7507 = vmatpush.msrb.mxu1 %v6108_v49  ;;  %v7122_v13 = vpop.f32.mrf.mxu0  ;;  %v6367_v9 = vld [vmem:[#allocation7 + $0x1728] sm:$0xff]  ;;  %v6360_v49 = vld [vmem:[#allocation7 + $0x16f0] sm:$0xff] }
 0x54e   :  { %7534 = vmatpush.msrb.mxu2 %v6192_v15  ;;  %7488 = vmatpush.msrb.mxu0 %v5968_v50  ;;  %v6353_v15 = vld [vmem:[#allocation7 + $0x16b8] sm:$0xff]  ;;  %v6346_v50 = vld [vmem:[#allocation7 + $0x1680] sm:$0xff] }
 0x54f   :  { %7535 = vmatmul.f32.vlgmr.msrb.gmra.mxu2 %v15743_v32  ;;  %7545 = vmatpush.msrb.mxu3 %v6388_v35  ;;  %v6080_v32 = vld [vmem:[#allocation7 + $0xe30] sm:$0xff] }
 0x550   :  { %7508 = vmatpush.msrb.mxu1 %v6101_v61  ;;  %7469 = vmatmul.f32.gmra.mxu3 %v15735_v36  ;;  %v6339_v61 = vld [vmem:[#allocation7 + $0x1648] sm:$0xff] }
 0x551   :  { %7489 = vmatmul.f32.vlgmr.msrb.gmra.mxu0 %v15675_v63  ;;  %7546 = vmatpush.msrb.mxu3 %v6381_v14  ;;  %v15964_v63 = vpop.f32.mrf.mxu2 }
 0x552   :  { %7509 = vmatpush.msrb.mxu1 %v6094_v29  ;;  %v7145_v36 = vpop.f32.mrf.mxu1  ;;  %v7102_v35 = vpop.f32.mrf.mxu3  ;;  %v6332_v29 = vld [vmem:[#allocation7 + $0x1610] sm:$0xff] }
 0x553   :  { %7547 = vmatpush.msrb.mxu3 %v6374_v39  ;;  %v6318_v39 = vld [vmem:[#allocation7 + $0x15a0] sm:$0xff] }
 0x554   :  { %7510 = vmatpush.msrb.mxu1 %v6087_v41 }
 0x555   :  { %7548 = vmatpush.msrb.mxu3 %v6367_v9  ;;  %v7125_v14 = vpop.f32.mrf.mxu0 }
 0x556   :  { %7511 = vmatpush.msrb.mxu1 %v6080_v32  ;;  %v6311_v32 = vld [vmem:[#allocation7 + $0x1568] sm:$0xff]  ;;  %v7126_v10 = vadd.f32 %v7125_v14, %v7102_v35 }
 0x557   :  { %7512 = vmatmul.f32.vlgmr.msrb.gmra.mxu1 %v15715_v33  ;;  %7538 = vmatmul.f32.gmra.mxu2 %v15757_v54  ;;  %v6325_v33 = vld [vmem:[#allocation7 + $0x15d8] sm:$0xff] }
 0x558   :  { %7549 = vmatpush.msrb.mxu3 %v6360_v49  ;;  %v6304_v49 = vld [vmem:[#allocation7 + $0x1530] sm:$0xff] }
 0x559   :  { %7492 = vmatmul.f32.gmra.mxu0 %v15709_v22  ;;  %v7168_v54 = vpop.f32.mrf.mxu2 }
 0x55a   :  { %7550 = vmatpush.msrb.mxu3 %v6353_v15  ;;  %v7148_v9 = vpop.f32.mrf.mxu1 }
 0x55b   :  { %v7149_v15 = vadd.f32 %v7148_v9, %v7126_v10 }
 0x55c   :  { %7551 = vmatpush.msrb.mxu3 %v6346_v50 }
 0x55e   :  { %7552 = vmatpush.msrb.mxu3 %v6339_v61 }
 0x55f   :  { %7515 = vmatmul.f32.gmra.mxu1 %v15741_v3  ;;  %v7191_v41 = vpop.f32.mrf.mxu3 }
 0x560   :  { %7553 = vmatpush.msrb.mxu3 %v6332_v29 }
 0x561   :  { %v7171_v3 = vpop.f32.mrf.mxu2 }
 0x562   :  { %7554 = vmatpush.msrb.mxu3 %v6325_v33  ;;  %v7214_v22 = vpop.f32.mrf.mxu0  ;;  %v7172_v29 = vadd.f32 %v7171_v3, %v7149_v15 }
 0x564   :  { %7555 = vmatpush.msrb.mxu3 %v6318_v39 }
 0x566   :  { %7556 = vmatpush.msrb.mxu3 %v6311_v32  ;;  %v7123_v32 = vadd.f32 %v7122_v13, %v15956_v25  ;;  %v6827_v25 = vadd.f32 %v15905_v45, %v6804_v42 }
 0x568   :  { %7557 = vmatpush.msrb.mxu3 %v6304_v49  ;;  %v7194_v61 = vpop.f32.mrf.mxu3  ;;  %v7146_v3 = vadd.f32 %v7145_v36, %v7123_v32 }
 0x569   :  { %11955 = vmatmul.msk.f32.vlgmr.msrb.gmra.mxu3 %vm1116_vm5, %v15754_v55  ;;  %v7237_v50 = vpop.f32.mrf.mxu1  ;;  %v7195_v23 = vadd.f32 %v7194_v61, %v7172_v29  ;;  %v7260_v10 = vpop.f32.mrf.mxu2 }
 0x56c   :  { %v7217_v26 = vpop.f32.mrf.mxu0 }
 0x56d   :  { %v7218_v33 = vadd.f32 %v7217_v26, %v7195_v23  ;;  %v7169_v26 = vadd.f32 %v7168_v54, %v7146_v3  ;;  %v6850_v54 = vadd.f32 %v15908_v28, %v6827_v25 }
 0x571   :  { %11956 = vmatmul.msk.f32.gmra.mxu3 %vm1116_vm5, %v15765_v1  ;;  %v7263_v55 = vpop.f32.mrf.mxu2 }
 0x572   :  { %v7240_v39 = vpop.f32.mrf.mxu1 }
 0x573   :  { %v15972_v57 = vadd.f32 %v7240_v39, %v7218_v33  ;;  %v7192_v39 = vadd.f32 %v7191_v41, %v7169_v26 }
 0x575   :  { %7607 = vrot.lane.b32.xlu0 %v15972_v57, %s12923_s5  ;;  %v7215_v13 = vadd.f32 %v7214_v22, %v7192_v39 }
 0x583   :  { %v7283_v35 = vpop.f32.mrf.mxu3 }
 0x584   :  { %v7284_v9 = vadd.f32 %v7283_v35, %v7260_v10 }
 0x586   :  { %v7306_v14 = vpop.f32.mrf.mxu0 }
 0x587   :  { %v7307_v61 = vadd.f32 %v7306_v14, %v7284_v9  ;;  %v15980_v14 = vadd.f32 %v7237_v50, %v7215_v13 }
 0x58a   :  { %v7352_v23 = vpop.f32.mrf.mxu2 }
 0x58c   :  { %v7286_v15 = vpop.f32.mrf.mxu3 }
 0x58d   :  { %v7329_v49 = vpop.f32.mrf.mxu1  ;;  %v7287_v33 = vadd.f32 %v7286_v15, %v7263_v55  ;;  %v15992_v15 = vld [vmem:[#allocation8] sm:$0xff] }
 0x58e   :  { %v7330_v29 = vadd.f32 %v7329_v49, %v7307_v61  ;;  %v6873_v49 = vadd.f32 %v15915_v30, %v6850_v54  ;;  %v6640_v30 = vadd.f32 %v15844_v51, %v15842_v37  ;;  %v6965_v51 = vadd.f32 %v15938_v4, %v15932_v31 }
 0x58f   :  { %v6801_v4 = vadd.f32 %v15892_v19, %v15887_v46 }
 0x590   :  { %v7309_v1 = vpop.f32.mrf.mxu0  ;;  %v7353_v44 = vadd.f32 %v7352_v23, %v7330_v29  ;;  %v6896_v42 = vadd.f32 %v15925_v20, %v6873_v49  ;;  %v6663_v20 = vadd.f32 %v15849_v17, %v6640_v30 }
 0x591   :  { %v7310_v10 = vadd.f32 %v7309_v1, %v7287_v33  ;;  %v15998_v33 = vld [vmem:[#allocation8 + $0x48] sm:$0xff] }
 0x592   :  { %v6919_v0 = vadd.f32 %v15927_v43, %v6896_v42  ;;  %v6686_v29 = vadd.f32 %v15851_v7, %v6663_v20  ;;  %v6962_v7 = vadd.f32 %v15922_v8, %v15920_v12  ;;  %v6824_v12 = vadd.f32 %v15894_v53, %v6801_v4  ;;  %v18078_v4 = vld [vmem:[#allocation37_spill] sm:$0xff] }
 0x593   :  { %v7355_v55 = vpop.f32.mrf.mxu2 }
 0x594   :  { %v6709_v37 = vadd.f32 %v15854_v56, %v6686_v29  ;;  %v6985_v54 = vadd.f32 %v15934_v11, %v6962_v7  ;;  %v6847_v19 = vadd.f32 %v15899_v62, %v6824_v12  ;;  %v18075_v7 = vld [vmem:[#allocation42_spill] sm:$0xff]  ;;  %v18081_v12 = vld [vmem:[#allocation51_spill] sm:$0xff] }
 0x596   :  { %v7332_v58 = vpop.f32.mrf.mxu1  ;;  %v7008_v8 = vadd.f32 %v15936_v38, %v6985_v54  ;;  %v6870_v53 = vadd.f32 %v15901_v6, %v6847_v19  ;;  %v18083_v19 = vld [vmem:[#allocation59_spill] sm:$0xff] }
 0x597   :  { %v7333_v35 = vadd.f32 %v7332_v58, %v7310_v10  ;;  %v6732_v10 = vadd.f32 %v15856_v48, %v6709_v37 }
 0x598   :  { %v7031_v11 = vadd.f32 %v15941_v34, %v7008_v8 }
 0x599   :  { %v7356_v32 = vadd.f32 %v7355_v55, %v7333_v35  ;;  %v16010_v56 = vadd.f32 %v15859_v47, %v6732_v10 }
 0x59a   :  { %v7054_v38 = vadd.f32 %v15943_v59, %v7031_v11  ;;  %v16039_v59 = vld [vmem:[#allocation8 + $0x18] sm:$0xff] }
 0x5a7   :  { %v7375_v16 = vpop.f32.mrf.mxu3 }
 0x5a8   :  { %v7376_v18 = vadd.f32 %v7375_v16, %v7353_v44 }
 0x5aa   :  { %v7398_v36 = vpop.f32.mrf.mxu0 }
 0x5ab   :  { %v7399_v9 = vadd.f32 %v7398_v36, %v7376_v18  ;;  %v6988_v36 = vadd.f32 %v15945_v60, %v6965_v51 }
 0x5ad   :  { %v12346_v41 = vpack.i.bf16 %v7399_v9, %v15980_v14  ;;  %v7011_v55 = vadd.f32 %v15947_v5, %v6988_v36  ;;  %v18077_v36 = vld [vmem:[#allocation43_spill] sm:$0xff] }
 0x5ae   :  { %v7444_v45 = vpop.f32.mrf.mxu2 }
 0x5af   :  { %12347 = vrot.lane.b32.xlu0 %v12346_v41, %s12923_s5  ;;  %v7034_v47 = vadd.f32 %v15951_v24, %v7011_v55  ;;  %v6893_v24 = vadd.f32 %v15910_v21, %v6870_v53  ;;  %v18084_v53 = vld [vmem:[#allocation41_spill] sm:$0xff] }
 0x5b0   :  { %v7378_v44 = vpop.f32.mrf.mxu3 }
 0x5b1   :  { %v7379_v16 = vadd.f32 %v7378_v44, %v7356_v32  ;;  %v7421_v18 = vpop.f32.mrf.mxu1  ;;  %v7057_v5 = vadd.f32 %v15958_v40, %v7034_v47  ;;  %v6916_v34 = vadd.f32 %v15912_v52, %v6893_v24  ;;  %v16033_v40 = vld [vmem:[#allocation8 + $0x30] sm:$0xff]  ;;  %v18082_v47 = vld [vmem:[#allocation49_spill] sm:$0xff] }
 0x5b2   :  { %v7445_v50 = vadd.f32 %v7444_v45, %v7421_v18 }
 0x5b4   :  { %v7401_v2 = vpop.f32.mrf.mxu0 }
 0x5b5   :  { %v7402_v58 = vadd.f32 %v7401_v2, %v7379_v16  ;;  %v7080_v2 = vadd.f32 %v15964_v63, %v7057_v5  ;;  %v7578_v63 = vpop.permute.xlu2 %7577 }
 0x5b7   :  { %7609 = vrot.lane.b32.xlu1 %v7402_v58, %s12923_s5  ;;  %7579 = vrot.lane.b32.xlu0 %v6919_v0, %s12923_s5  ;;  %v7447_v3 = vpop.f32.mrf.mxu2  ;;  %v7077_v58 = vadd.f32 %v15953_v27, %v7054_v38 }
 0x5b9   :  { %v12356_v62 = vpack.i.bf16 %v7077_v58, %v6916_v34 }
 0x5ba   :  { %v7424_v28 = vpop.f32.mrf.mxu1 }
 0x5bb   :  { %v7448_v39 = vadd.f32 %v7447_v3, %v7424_v28 }
 0x5bf   :  { %7652 = vrot.lane.b32.xlu0 %v15992_v15, %s12903_s16 }
 0x5c7   :  { %7658 = vrot.lane.b32.xlu0 %v15998_v33, %s12903_s16 }
 0x5cb   :  { %v7467_v22 = vpop.f32.mrf.mxu3 }
 0x5cc   :  { %v7468_v43 = vadd.f32 %v7467_v22, %v7445_v50 }
 0x5ce   :  { %v7490_v61 = vpop.f32.mrf.mxu0 }
 0x5cf   :  { %v7491_v23 = vadd.f32 %v7490_v61, %v7468_v43  ;;  %7821 = vrot.lane.b32.xlu0 %v16033_v40, %s12907_s1 }
 0x5d2   :  { %v7536_v25 = vpop.f32.mrf.mxu2 }
 0x5d3   :  { %v7470_v26 = vpop.f32.mrf.mxu3 }
 0x5d4   :  { %v7513_v1 = vpop.f32.mrf.mxu1  ;;  %v7471_v13 = vadd.f32 %v7470_v26, %v7448_v39 }
 0x5d5   :  { %v7514_v17 = vadd.f32 %v7513_v1, %v7491_v23 }
 0x5d6   :  { %v7493_v35 = vpop.f32.mrf.mxu0 }
 0x5d7   :  { %v7537_v9 = vadd.f32 %v7536_v25, %v7514_v17  ;;  %v7494_v41 = vadd.f32 %v7493_v35, %v7471_v13  ;;  %v18074_v25 = vld [vmem:[#allocation40_spill] sm:$0xff]  ;;  %v18076_v35 = vld [vmem:[#allocation33_spill] sm:$0xff] }
 0x5d8   :  { %v6479_v13 = vadd.f32 %v18075_v7, %v18074_v25 }
 0x5da   :  { %v7539_v46 = vpop.f32.mrf.mxu2 }
 0x5dc   :  { %v7516_v31 = vpop.f32.mrf.mxu1 }
 0x5dd   :  { %v7517_v60 = vadd.f32 %v7516_v31, %v7494_v41  ;;  %v6502_v31 = vadd.f32 %v18078_v4, %v6479_v13  ;;  %v18080_v41 = vld [vmem:[#allocation48_spill] sm:$0xff] }
 0x5df   :  { %v7540_v44 = vadd.f32 %v7539_v46, %v7517_v60 }
 0x5e7   :  { %v7608_v6 = vpop.permute.xlu0 %7607 }
 0x5ec   :  { %v7559_v48 = vpop.f32.mrf.mxu3 }
 0x5ed   :  { %v7560_v32 = vadd.f32 %v7559_v48, %v7537_v9  ;;  %v6482_v9 = vadd.f32 %v18077_v36, %v18076_v35  ;;  %v18079_v48 = vld [vmem:[#allocation50_spill] sm:$0xff] }
 0x5ef   :  { %v12351_v49 = vpack.i.bf16 %v16010_v56, %v7560_v32  ;;  %v6505_v54 = vadd.f32 %v18079_v48, %v6482_v9  ;;  %v6525_v32 = vadd.f32 %v18080_v41, %v6502_v31  ;;  %v16236_v48 = vld [vmem:[#allocation8 + $0x8] sm:$0xff] }
 0x5f1   :  { %12352 = vrot.lane.b32.xlu1 %v12351_v49, %s12923_s5  ;;  %v6528_v8 = vadd.f32 %v18081_v12, %v6505_v54  ;;  %v6548_v46 = vadd.f32 %v18082_v47, %v6525_v32 }
 0x5f3   :  { %v6551_v11 = vadd.f32 %v18083_v19, %v6528_v8  ;;  %v6571_v38 = vadd.f32 %v18084_v53, %v6548_v46  ;;  %v16249_v8 = vld [vmem:[#allocation8 + $0x20] sm:$0xff] }
 0x5f4   :  { %v7562_v16 = vpop.f32.mrf.mxu3 }
 0x5f5   :  { %v7563_v42 = vadd.f32 %v7562_v16, %v7540_v44 }
 0x5f7   :  { %7611 = vrot.lane.b32.xlu2 %v7563_v42, %s12923_s5  ;;  %v18085_v42 = vld [vmem:[#allocation64_spill] sm:$0xff] }
 0x5f9   :  { %7581 = vrot.lane.b32.xlu1 %v7080_v2, %s12923_s5 }
 0x5ff   :  { %12357 = vrot.lane.b32.xlu2 %v12356_v62, %s12923_s5  ;;  %s12953_s5 = smov 72  }
 0x601   :  { %7654 = vrot.lane.b32.xlu1 %v16039_v59, %s12903_s16 }
 0x607   :  { %7656 = vrot.lane.b32.xlu2 %v16033_v40, %s12903_s16  ;;  %s12939_s16 = smov 114  }
 0x609   :  { %7817 = vrot.lane.b32.xlu1 %v15992_v15, %s12907_s1 }
 0x60f   :  { %7819 = vrot.lane.b32.xlu2 %v16039_v59, %s12907_s1 }
 0x611   :  { %7823 = vrot.lane.b32.xlu1 %v15998_v33, %s12907_s1  ;;  %s12940_s1 = smov 113  }
 0x617   :  { %7915 = vrot.lane.b32.xlu2 %v15992_v15, %s12911_s21 }
 0x621   :  { %v12348_v28 = vpop.permute.xlu0 %12347 }
 0x622   :  { %v12350_v22 = vunpack.i.h.bf16 %v12348_v28  ;;  %v12349_v30 = vunpack.i.l.bf16 %v12348_v28 }
 0x624   :  { %v7613_v20 = vsel %vm3326_vm15, %v12349_v30, %v12350_v22 }
 0x625   :  { %v7621_v43 = vmax.f32 %v7077_v58, %v7613_v20 }
 0x629   :  { %v7610_v21 = vpop.permute.xlu1 %7609  ;;  %v7580_v26 = vpop.permute.xlu0 %7579 }
 0x62a   :  { %v7615_v52 = vsel %vm3326_vm15, %v7608_v6, %v7610_v21  ;;  %v7585_v34 = vsel %vm3326_vm15, %v7578_v63, %v7580_v26  ;;  %v18086_v6 = vld [vmem:[#allocation60_spill] sm:$0xff] }
 0x62b   :  { %v7623_v27 = vmax.f32 %v7080_v2, %v7615_v52  ;;  %v6574_v2 = vadd.f32 %v18085_v42, %v6551_v11  ;;  %v18087_v52 = vld [vmem:[#allocation44_spill] sm:$0xff] }
 0x62d   :  { %7633 = vrot.lane.b32.xlu0 %v7623_v27, %s12938_s0  ;;  %v6597_v27 = vadd.f32 %v18087_v52, %v6574_v2 }
 0x631   :  { %v16074_v51 = vpop.permute.xlu0 %7652 }
 0x635   :  { %7917 = vrot.lane.b32.xlu0 %v16039_v59, %s12911_s21 }
 0x63d   :  { %8015 = vrot.lane.b32.xlu0 %v16039_v59, %s12915_s3 }
 0x651   :  { %v7612_v0 = vpop.permute.xlu2 %7611 }
 0x652   :  { %v7616_v18 = vsel %vm3326_vm15, %v7610_v21, %v7612_v0  ;;  %v6594_v21 = vadd.f32 %v18086_v6, %v6571_v38 }
 0x653   :  { %v7624_v45 = vmax.f32 %v15972_v57, %v7616_v18  ;;  %v18088_v18 = vld [vmem:[#allocation58_spill] sm:$0xff] }
 0x655   :  { %7635 = vrot.lane.b32.xlu1 %v7624_v45, %s12938_s0 }
 0x659   :  { %v12358_v1 = vpop.permute.xlu2 %12357 }
 0x65a   :  { %v12360_v5 = vunpack.i.h.bf16 %v12358_v1  ;;  %v12359_v44 = vunpack.i.l.bf16 %v12358_v1 }
 0x65c   :  { %v7584_v24 = vsel %vm3326_vm15, %v12359_v44, %v12360_v5 }
 0x65d   :  { %8013 = vrot.lane.b32.xlu1 %v15992_v15, %s12915_s3  ;;  %v7592_v30 = vmax.f32 %v16010_v56, %v7584_v24 }
 0x661   :  { %v16072_v37 = vpop.permute.xlu2 %7656 }
 0x663   :  { %v12353_v50 = vpop.permute.xlu1 %12352 }
 0x664   :  { %v12354_v3 = vunpack.i.l.bf16 %v12353_v50  ;;  %v12355_v16 = vunpack.i.h.bf16 %v12353_v50  ;;  %v7593_v50 = vmax.f32 %v6597_v27, %v7585_v34 }
 0x665   :  { %7921 = vrot.lane.b32.xlu1 %v15998_v33, %s12911_s21 }
 0x666   :  { %v7614_v61 = vsel %vm3326_vm15, %v12350_v22, %v12354_v3  ;;  %v7583_v62 = vsel %vm3326_vm15, %v12355_v16, %v12359_v44  ;;  %v16275_v44 = vld [vmem:[#allocation8 + $0x38] sm:$0xff] }
 0x667   :  { %v7622_v57 = vmax.f32 %v15980_v14, %v7614_v61  ;;  %v16080_v14 = vpop.permute.xlu0 %7658  ;;  %v7591_v20 = vmax.f32 %v6594_v21, %v7583_v62  ;;  %v16340_v21 = vld [vmem:[#allocation8 + $0x50] sm:$0xff] }
 0x669   :  { %v12361_v29 = vpack.i.bf16 %v7622_v57, %v7621_v43  ;;  %v16078_v17 = vpop.permute.xlu2 %7819 }
 0x66b   :  { %12362 = vrot.lane.b32.xlu2 %v12361_v29, %s12938_s0  ;;  %v7582_v23 = vpop.permute.xlu1 %7581 }
 0x66c   :  { %v7586_v58 = vsel %vm3326_vm15, %v7580_v26, %v7582_v23  ;;  %vm8325_vm15 = vcmask 916480  }
 0x66d   :  { %v7594_v45 = vmax.f32 %v18088_v18, %v7586_v58 }
 0x66f   :  { %v16094_v60 = vpop.permute.xlu0 %7821 }
 0x671   :  { %v16090_v55 = vpop.permute.xlu2 %7915 }
 0x673   :  { %7919 = vrot.lane.b32.xlu2 %v16033_v40, %s12911_s21  ;;  %v16076_v39 = vpop.permute.xlu1 %7654  ;;  %s12949_s21 = smov 83  }
 0x67b   :  { %8017 = vrot.lane.b32.xlu2 %v16033_v40, %s12915_s3  ;;  %v16082_v10 = vpop.permute.xlu1 %7817 }
 0x683   :  { %v16096_v49 = vpop.permute.xlu1 %7823 }
 0x69f   :  { %v7634_v3 = vpop.permute.xlu0 %7633 }
 0x6a7   :  { %v16216_v35 = vpop.permute.xlu0 %7917 }
 0x6af   :  { %v16232_v4 = vpop.permute.xlu0 %8015 }
 0x6c5   :  { %v12363_v0 = vpop.permute.xlu2 %12362 }
 0x6c6   :  { %v12365_v28 = vunpack.i.h.bf16 %v12363_v0  ;;  %v12364_v22 = vunpack.i.l.bf16 %v12363_v0 }
 0x6c7   :  { %v7636_v61 = vpop.permute.xlu1 %7635 }
 0x6c8   :  { %v7645_v43 = vmax.f32 %v7592_v30, %v12365_v28  ;;  %v7638_v63 = vsel %vm7637_vm13, %v12364_v22, %v12365_v28  ;;  %v7639_v57 = vsel %vm7637_vm13, %v7634_v3, %v7636_v61  ;;  %v16110_v29 = vmax.f32 %v7594_v45, %v7636_v61 }
 0x6c9   :  { %v7644_v1 = vmax.f32 %v7591_v20, %v7638_v63  ;;  %v16112_v26 = vmax.f32 %v7593_v50, %v7639_v57  ;;  %vm9232_vm13 = vcmask 695296  }
 0x6ca   :  { %7670 = vrot.lane.b32.xlu1 %v16110_v29, %s12901_s8  ;;  %11972 = vmatpush.msk.msra.mxu3 %vm6416_vm2, %v16110_v29 }
 0x6cb   :  { %11967 = vmatpush.msk.msra.mxu2 %vm6416_vm2, %v16112_v26  ;;  %v16120_v56 = vpack.i.bf16 %v7645_v43, %v7644_v1 }
 0x6cc   :  { %7803 = vmatpush.msra.mxu3 %v7645_v43 }
 0x6cd   :  { %12372 = vrot.lane.b32.xlu0 %v16120_v56, %s12902_s7  ;;  %12367 = vrot.lane.b32.xlu2 %v16120_v56, %s12901_s8  ;;  %v16180_v23 = vpop.permute.xlu2 %7919 }
 0x6ce   :  { %7774 = vmatpush.msra.mxu2 %v7644_v1  ;;  %11973 = vmatmul.msk.f32.vlgmr.msra.gmra.mxu3 %vm7676_vm14, %v15992_v15 }
 0x6cf   :  { %11968 = vmatmul.msk.f32.vlgmr.msra.gmra.mxu2 %vm7676_vm14, %v15992_v15  ;;  %v16212_v13 = vpop.permute.xlu1 %8013 }
 0x6d2   :  { %8027 = vrot.lane.b32.xlu1 %v16110_v29, %s12906_s19 }
 0x6d5   :  { %12377 = vrot.lane.b32.xlu0 %v16120_v56, %s12904_s18  ;;  %12382 = vrot.lane.b32.xlu2 %v16120_v56, %s12906_s19  ;;  %v16200_v25 = vpop.permute.xlu2 %8017 }
 0x6d6   :  { %11974 = vmatmul.msk.f32.gmra.mxu3 %vm7676_vm14, %v16039_v59 }
 0x6d7   :  { %11969 = vmatmul.msk.f32.gmra.mxu2 %vm7676_vm14, %v16039_v59  ;;  %v16226_v9 = vpop.permute.xlu1 %7921 }
 0x6da   :  { %8125 = vrot.lane.b32.xlu1 %v16110_v29, %s12939_s16 }
 0x6dd   :  { %12387 = vrot.lane.b32.xlu2 %v16120_v56, %s12939_s16  ;;  %7668 = vrot.lane.b32.xlu0 %v16112_v26, %s12901_s8  ;;  %s12941_s8 = smov 111  }
 0x6de   :  { %11975 = vmatmul.msk.f32.gmra.mxu3 %vm7676_vm14, %v16033_v40 }
 0x6df   :  { %11970 = vmatmul.msk.f32.gmra.mxu2 %vm7676_vm14, %v16033_v40 }
 0x6e2   :  { %8111 = vrot.lane.b32.xlu1 %v15992_v15, %s12918_s27 }
 0x6e5   :  { %7831 = vrot.lane.b32.xlu2 %v16110_v29, %s12902_s7  ;;  %8019 = vrot.lane.b32.xlu0 %v15998_v33, %s12915_s3  ;;  %s12951_s3 = smov 40  }
 0x6e6   :  { %11976 = vmatmul.msk.f32.gmra.mxu3 %vm7676_vm14, %v15998_v33 }
 0x6e7   :  { %11971 = vmatmul.msk.f32.gmra.mxu2 %vm7676_vm14, %v15998_v33 }
 0x6ea   :  { %12392 = vrot.lane.b32.xlu1 %v16120_v56, %s12940_s1 }
 0x6ed   :  { %7929 = vrot.lane.b32.xlu2 %v16110_v29, %s12904_s18  ;;  %8224 = vrot.lane.b32.xlu0 %v16110_v29, %s12940_s1 }
 0x6f2   :  { %8115 = vrot.lane.b32.xlu1 %v16033_v40, %s12918_s27 }
 0x6f5   :  { %8113 = vrot.lane.b32.xlu2 %v16039_v59, %s12918_s27  ;;  %8210 = vrot.lane.b32.xlu0 %v15992_v15, %s12894_s23 }
 0x6fa   :  { %7829 = vrot.lane.b32.xlu1 %v16112_v26, %s12902_s7  ;;  %s12943_s7 = smov 99  }
 0x6fd   :  { %8212 = vrot.lane.b32.xlu2 %v16039_v59, %s12894_s23  ;;  %8117 = vrot.lane.b32.xlu0 %v15998_v33, %s12918_s27 }
 0x702   :  { %8214 = vrot.lane.b32.xlu1 %v16033_v40, %s12894_s23 }
 0x705   :  { %8216 = vrot.lane.b32.xlu2 %v15998_v33, %s12894_s23  ;;  %8323 = vrot.lane.b32.xlu0 %v16110_v29, %s12936_s12  ;;  %s12942_s23 = smov 100  }
 0x70a   :  { %12397 = vrot.lane.b32.xlu1 %v16120_v56, %s12936_s12 }
 0x70d   :  { %8422 = vrot.lane.b32.xlu2 %v16110_v29, %s12941_s8  ;;  %8309 = vrot.lane.b32.xlu0 %v15992_v15, %s12924_s24 }
 0x712   :  { %7927 = vrot.lane.b32.xlu1 %v16112_v26, %s12904_s18  ;;  %s12945_s18 = smov 88  }
 0x715   :  { %8408 = vrot.lane.b32.xlu2 %v15992_v15, %s12925_s30  ;;  %12402 = vrot.lane.b32.xlu0 %v16120_v56, %s12941_s8 }
 0x71a   :  { %8311 = vrot.lane.b32.xlu1 %v16039_v59, %s12924_s24 }
 0x71d   :  { %8315 = vrot.lane.b32.xlu2 %v15998_v33, %s12924_s24  ;;  %8025 = vrot.lane.b32.xlu0 %v16112_v26, %s12906_s19 }
 0x722   :  { %8410 = vrot.lane.b32.xlu1 %v16039_v59, %s12925_s30 }
 0x725   :  { %8521 = vrot.lane.b32.xlu2 %v16110_v29, %s12905_s15  ;;  %8313 = vrot.lane.b32.xlu0 %v16033_v40, %s12924_s24  ;;  %s12954_s24 = smov 4  }
 0x727   :  { %v12368_v7 = vpop.permute.xlu2 %12367 }
 0x728   :  { %v12370_v41 = vunpack.i.h.bf16 %v12368_v7  ;;  %v12369_v38 = vunpack.i.l.bf16 %v12368_v7 }
 0x72a   :  { %8414 = vrot.lane.b32.xlu1 %v15998_v33, %s12925_s30  ;;  %v7672_v58 = vsel %vm295_vm0, %v12369_v38, %v12370_v41 }
 0x72d   :  { %8507 = vrot.lane.b32.xlu2 %v15992_v15, %s12931_s13  ;;  %8412 = vrot.lane.b32.xlu0 %v16033_v40, %s12925_s30  ;;  %s12955_s30 = smov 71  }
 0x72f   :  { %v16222_v36 = vpop.permute.xlu2 %12382 }
 0x730   :  { %v12385_v19 = vunpack.i.h.bf16 %v16222_v36 }
 0x732   :  { %8637 = vrot.lane.b32.xlu1 %v16110_v29, %s12942_s23 }
 0x735   :  { %12412 = vrot.lane.b32.xlu2 %v16120_v56, %s12942_s23  ;;  %8123 = vrot.lane.b32.xlu0 %v16112_v26, %s12939_s16 }
 0x737   :  { %v16234_v31 = vpop.permute.xlu2 %12387 }
 0x738   :  { %v12390_v53 = vunpack.i.h.bf16 %v16234_v31 }
 0x73a   :  { %8612 = vrot.lane.b32.xlu1 %v16236_v48, %s12881_s22 }
 0x73c   :  { %v7671_v54 = vpop.permute.xlu1 %7670 }
 0x73d   :  { %11962 = vmatpush.msk.msra.mxu1 %vm6416_vm2, %v7671_v54  ;;  %8222 = vrot.lane.b32.xlu2 %v16112_v26, %s12940_s1 }
 0x73e   :  { %12407 = vrot.lane.b32.xlu0 %v16120_v56, %s12905_s15 }
 0x73f   :  { %v16245_v32 = vpop.permute.xlu0 %12372  ;;  %v16247_v12 = vpop.permute.xlu2 %7831  ;;  %7733 = vmatpush.msra.mxu1 %v12370_v41 }
 0x740   :  { %v12375_v47 = vunpack.i.h.bf16 %v16245_v32  ;;  %11963 = vmatmul.msk.f32.vlgmr.msra.gmra.mxu1 %vm7676_vm14, %v16074_v51  ;;  %v12374_v0 = vunpack.i.l.bf16 %v16245_v32 }
 0x741   :  { %11982 = vmatpush.msk.msrb.mxu1 %vm6416_vm2, %v16247_v12 }
 0x742   :  { %8616 = vrot.lane.b32.xlu1 %v16249_v8, %s12881_s22  ;;  %v7833_v22 = vsel %vm680_vm3, %v12374_v0, %v12375_v47 }
 0x743   :  { %7893 = vmatpush.msrb.mxu1 %v12375_v47 }
 0x744   :  { %v16260_v46 = vpop.permute.xlu1 %8027 }
 0x745   :  { %12002 = vmatpush.msk.msra.mxu1 %vm6416_vm2, %v16260_v46  ;;  %8509 = vrot.lane.b32.xlu2 %v16039_v59, %s12931_s13 }
 0x746   :  { %8610 = vrot.lane.b32.xlu0 %v15992_v15, %s12881_s22 }
 0x747   :  { %v16269_v11 = vpop.permute.xlu0 %12377  ;;  %v16271_v5 = vpop.permute.xlu2 %7929  ;;  %8089 = vmatpush.msra.mxu1 %v12385_v19 }
 0x748   :  { %v12380_v16 = vunpack.i.h.bf16 %v16269_v11  ;;  %11964 = vmatmul.msk.f32.gmra.mxu1 %vm7676_vm14, %v16076_v39  ;;  %11992 = vmatpush.msk.msrb.mxu3 %vm6416_vm2, %v16271_v5 }
 0x74a   :  { %7991 = vmatpush.msrb.mxu3 %v12380_v16  ;;  %8620 = vrot.lane.b32.xlu1 %v16275_v44, %s12881_s22 }
 0x74b   :  { %11993 = vmatmul.msk.f32.vlgmr.msrb.gmra.mxu3 %vm7676_vm14, %v16090_v55 }
 0x74c   :  { %v16288_v15 = vpop.permute.xlu1 %8125 }
 0x74d   :  { %12012 = vmatpush.msk.msra.mxu3 %vm6416_vm2, %v16288_v15  ;;  %8511 = vrot.lane.b32.xlu2 %v16033_v40, %s12931_s13 }
 0x74e   :  { %8614 = vrot.lane.b32.xlu0 %v16039_v59, %s12881_s22 }
 0x74f   :  { %v16297_v42 = vpop.permute.xlu2 %8113  ;;  %8188 = vmatpush.msra.mxu3 %v12390_v53  ;;  %v7669_v2 = vpop.permute.xlu0 %7668 }
 0x750   :  { %v7673_v24 = vsel %vm295_vm0, %v7669_v2, %v7671_v54  ;;  %11965 = vmatmul.msk.f32.gmra.mxu1 %vm7676_vm14, %v16072_v37  ;;  %vm8424_vm0 = vcmask 908288  }
 0x751   :  { %11957 = vmatpush.msk.msra.mxu0 %vm6416_vm2, %v7673_v24 }
 0x752   :  { %8736 = vrot.lane.b32.xlu1 %v16110_v29, %s12943_s7 }
 0x753   :  { %7704 = vmatpush.msra.mxu0 %v7672_v58  ;;  %11994 = vmatmul.msk.f32.gmra.mxu3 %vm7676_vm14, %v16216_v35 }
 0x754   :  { %v16310_v59 = vpop.permute.xlu1 %8111  ;;  %11958 = vmatmul.msk.f32.vlgmr.msra.gmra.mxu0 %vm7676_vm14, %v16074_v51 }
 0x755   :  { %8321 = vrot.lane.b32.xlu2 %v16112_v26, %s12936_s12 }
 0x756   :  { %8618 = vrot.lane.b32.xlu0 %v16033_v40, %s12881_s22 }
 0x757   :  { %v16318_v34 = vpop.permute.xlu2 %8212  ;;  %v16320_v62 = vpop.permute.xlu0 %8019 }
 0x758   :  { %11966 = vmatmul.msk.f32.gmra.mxu1 %vm7676_vm14, %v16080_v14 }
 0x75a   :  { %8420 = vrot.lane.b32.xlu1 %v16112_v26, %s12941_s8 }
 0x75b   :  { %11995 = vmatmul.msk.f32.gmra.mxu3 %vm7676_vm14, %v16180_v23 }
 0x75c   :  { %v16328_v51 = vpop.permute.xlu1 %12392  ;;  %11959 = vmatmul.msk.f32.gmra.mxu0 %vm7676_vm14, %v16076_v39 }
 0x75d   :  { %8513 = vrot.lane.b32.xlu2 %v15998_v33, %s12931_s13  ;;  %v12395_v52 = vunpack.i.h.bf16 %v16328_v51  ;;  %s12957_s13 = smov 69  }
 0x75e   :  { %8622 = vrot.lane.b32.xlu0 %v15998_v33, %s12881_s22 }
 0x75f   :  { %v16336_v40 = vpop.permute.xlu2 %8216  ;;  %v16338_v6 = vpop.permute.xlu0 %8224 }
 0x760   :  { %11983 = vmatmul.msk.f32.vlgmr.msrb.gmra.mxu1 %vm7676_vm14, %v16082_v10 }
 0x761   :  { %12022 = vmatpush.msk.msrb.mxu1 %vm6416_vm2, %v16338_v6 }
 0x762   :  { %8624 = vrot.lane.b32.xlu1 %v16340_v21, %s12881_s22  ;;  %s12944_s22 = smov 97  }
 0x763   :  { %8287 = vmatpush.msrb.mxu1 %v12395_v52  ;;  %11996 = vmatmul.msk.f32.gmra.mxu3 %vm7676_vm14, %v16226_v9 }
 0x764   :  { %v16353_v33 = vpop.permute.xlu1 %8115  ;;  %11960 = vmatmul.msk.f32.gmra.mxu0 %vm7676_vm14, %v16072_v37 }
 0x765   :  { %12417 = vrot.lane.b32.xlu2 %v16120_v56, %s12943_s7 }
 0x766   :  { %8724 = vrot.lane.b32.xlu0 %v16249_v8, %s12906_s19 }
 0x767   :  { %v16361_v39 = vpop.permute.xlu2 %8422  ;;  %v16363_v27 = vpop.permute.xlu0 %8210 }
 0x768   :  { %11984 = vmatmul.msk.f32.gmra.mxu1 %vm7676_vm14, %v16078_v17 }
 0x76a   :  { %8835 = vrot.lane.b32.xlu1 %v16110_v29, %s12909_s9 }
 0x76b   :  { %12013 = vmatmul.msk.f32.vlgmr.msra.gmra.mxu3 %vm7676_vm14, %v16310_v59 }
 0x76c   :  { %v7830_v37 = vpop.permute.xlu1 %7829  ;;  %11961 = vmatmul.msk.f32.gmra.mxu0 %vm7676_vm14, %v16080_v14 }
 0x76d   :  { %v7834_v18 = vsel %vm680_vm3, %v7830_v37, %v16247_v12  ;;  %8722 = vrot.lane.b32.xlu2 %v16236_v48, %s12906_s19  ;;  %vm8639_vm3 = vcmask 818176  }
 0x76e   :  { %8823 = vrot.lane.b32.xlu0 %v16249_v8, %s12936_s12  ;;  %11977 = vmatpush.msk.msrb.mxu0 %vm6416_vm2, %v7834_v18 }
 0x76f   :  { %v16381_v45 = vpop.permute.xlu2 %8408  ;;  %v16383_v28 = vpop.permute.xlu0 %8117 }
 0x770   :  { %7864 = vmatpush.msrb.mxu0 %v7833_v22  ;;  %11985 = vmatmul.msk.f32.gmra.mxu1 %vm7676_vm14, %v16094_v60 }
 0x772   :  { %8519 = vrot.lane.b32.xlu1 %v16112_v26, %s12905_s15  ;;  %s12946_s15 = smov 85  }
 0x773   :  { %12014 = vmatmul.msk.f32.gmra.mxu3 %vm7676_vm14, %v16297_v42 }
 0x774   :  { %v16394_v14 = vpop.permute.xlu1 %8214  ;;  %11978 = vmatmul.msk.f32.vlgmr.msrb.gmra.mxu0 %vm7676_vm14, %v16082_v10 }
 0x775   :  { %12422 = vrot.lane.b32.xlu2 %v16120_v56, %s12909_s9 }
 0x776   :  { %8827 = vrot.lane.b32.xlu0 %v16340_v21, %s12936_s12 }
 0x777   :  { %v16402_v30 = vpop.permute.xlu2 %8315  ;;  %v16404_v50 = vpop.permute.xlu0 %8323 }
 0x778   :  { %11986 = vmatmul.msk.f32.gmra.mxu1 %vm7676_vm14, %v16096_v49  ;;  %12032 = vmatpush.msk.msrb.mxu3 %vm6416_vm2, %v16404_v50 }
 0x77a   :  { %8821 = vrot.lane.b32.xlu1 %v16236_v48, %s12936_s12 }
 0x77b   :  { %12015 = vmatmul.msk.f32.gmra.mxu3 %vm7676_vm14, %v16353_v33 }
 0x77c   :  { %v16414_v10 = vpop.permute.xlu1 %12397  ;;  %11979 = vmatmul.msk.f32.gmra.mxu0 %vm7676_vm14, %v16078_v17  ;;  %v12379_v17 = vunpack.i.l.bf16 %v16269_v11 }
 0x77d   :  { %v12400_v20 = vunpack.i.h.bf16 %v16414_v10  ;;  %8726 = vrot.lane.b32.xlu2 %v16275_v44, %s12906_s19 }
 0x77e   :  { %8635 = vrot.lane.b32.xlu0 %v16112_v26, %s12942_s23  ;;  %v7931_v7 = vsel %vm898_vm4, %v12379_v17, %v12380_v16 }
 0x77f   :  { %v16423_v3 = vpop.permute.xlu2 %8521  ;;  %8386 = vmatpush.msrb.mxu3 %v12400_v20  ;;  %v16427_v61 = vpop.permute.xlu0 %8309 }
 0x780   :  { %12003 = vmatmul.msk.f32.vlgmr.msra.gmra.mxu1 %vm7676_vm14, %v16212_v13 }
 0x781   :  { %12052 = vmatpush.msk.msra.mxu3 %vm6416_vm2, %v16423_v3  ;;  %12042 = vmatpush.msk.msra.mxu1 %vm6416_vm2, %v16361_v39 }
 0x782   :  { %8728 = vrot.lane.b32.xlu1 %v16340_v21, %s12906_s19  ;;  %s12947_s19 = smov 76  }
 0x783   :  { %12016 = vmatmul.msk.f32.gmra.mxu3 %vm7676_vm14, %v16383_v28 }
 0x784   :  { %v7928_v43 = vpop.permute.xlu1 %7927  ;;  %11980 = vmatmul.msk.f32.gmra.mxu0 %vm7676_vm14, %v16094_v60 }
 0x785   :  { %v7932_v63 = vsel %vm898_vm4, %v7928_v43, %v16271_v5  ;;  %8825 = vrot.lane.b32.xlu2 %v16275_v44, %s12936_s12  ;;  %vm8226_vm4 = vcmask 924672   ;;  %s12961_s12 = smov [#allocation23]  }
 0x786   :  { %9033 = vrot.lane.b32.xlu0 %v16110_v29, %s12908_s20  ;;  %11987 = vmatpush.msk.msrb.mxu2 %vm6416_vm2, %v7932_v63  ;;  %s11393_s11 = sshll.u32 %s12961_s12, 4  ;;  %s11394_s11 = int_to_ptr.vmem [resolvable:$true] %s11393_s11 }
 0x787   :  { %v16449_v57 = vpop.permute.xlu2 %8507  ;;  %v12403_v1 = vpop.permute.xlu0 %12402 }
 0x788   :  { %v12405_v60 = vunpack.i.h.bf16 %v12403_v1  ;;  %v12404_v54 = vunpack.i.l.bf16 %v12403_v1  ;;  %7962 = vmatpush.msrb.mxu2 %v7931_v7  ;;  %12004 = vmatmul.msk.f32.gmra.mxu1 %vm7676_vm14, %v16232_v4 }
 0x789   :  { %11988 = vmatmul.msk.f32.vlgmr.msrb.gmra.mxu2 %vm7676_vm14, %v16090_v55  ;;  %v12384_v55 = vunpack.i.l.bf16 %v16222_v36 }
 0x78a   :  { %8934 = vrot.lane.b32.xlu1 %v16110_v29, %s12944_s22  ;;  %8485 = vmatpush.msra.mxu1 %v12405_v60  ;;  %v16461_v41 = vsel %vm8424_vm0, %v12404_v54, %v12405_v60 }
 0x78b   :  { %12033 = vmatmul.msk.f32.vlgmr.msrb.gmra.mxu3 %vm7676_vm14, %v16427_v61 }
 0x78c   :  { %v16465_v32 = vpop.permute.xlu1 %8311  ;;  %11981 = vmatmul.msk.f32.gmra.mxu0 %vm7676_vm14, %v16096_v49  ;;  %v8029_v49 = vsel %vm1116_vm5, %v12384_v55, %v12385_v19 }
 0x78d   :  { %12427 = vrot.lane.b32.xlu2 %v16120_v56, %s12944_s22 }
 0x78e   :  { %9019 = vrot.lane.b32.xlu0 %v16236_v48, %s12945_s18 }
 0x78f   :  { %v12413_v12 = vpop.permute.xlu2 %12412  ;;  %v8026_v47 = vpop.permute.xlu0 %8025 }
 0x790   :  { %v12415_v11 = vunpack.i.h.bf16 %v12413_v12  ;;  %v12414_v5 = vunpack.i.l.bf16 %v12413_v12  ;;  %v8030_v16 = vsel %vm1116_vm5, %v8026_v47, %v16260_v46  ;;  %12005 = vmatmul.msk.f32.gmra.mxu1 %vm7676_vm14, %v16200_v25  ;;  %vm8127_vm5 = vcmask 932864  }
 0x791   :  { %11989 = vmatmul.msk.f32.gmra.mxu2 %vm7676_vm14, %v16216_v35  ;;  %11997 = vmatpush.msk.msra.mxu0 %vm6416_vm2, %v8030_v16  ;;  %v12394_v35 = vunpack.i.l.bf16 %v16328_v51  ;;  %v12389_v51 = vunpack.i.l.bf16 %v16234_v31 }
 0x792   :  { %8920 = vrot.lane.b32.xlu1 %v16236_v48, %s12942_s23  ;;  %v16487_v38 = vsel %vm8639_vm3, %v12414_v5, %v12415_v11 }
 0x793   :  { %8060 = vmatpush.msra.mxu0 %v8029_v49  ;;  %12034 = vmatmul.msk.f32.gmra.mxu3 %vm7676_vm14, %v16465_v32  ;;  %v8128_v0 = vsel %vm8127_vm5, %v12389_v51, %v12390_v53 }
 0x794   :  { %v16491_v46 = vpop.permute.xlu1 %8410  ;;  %11998 = vmatmul.msk.f32.vlgmr.msra.gmra.mxu0 %vm7676_vm14, %v16212_v13  ;;  %v8227_v13 = vsel %vm8226_vm4, %v12394_v35, %v12395_v52 }
 0x795   :  { %8922 = vrot.lane.b32.xlu2 %v16249_v8, %s12942_s23 }
 0x796   :  { %8734 = vrot.lane.b32.xlu0 %v16112_v26, %s12943_s7 }
 0x797   :  { %v8223_v36 = vpop.permute.xlu2 %8222  ;;  %v16500_v19 = vpop.permute.xlu0 %8313 }
 0x798   :  { %v8228_v2 = vsel %vm8226_vm4, %v8223_v36, %v16338_v6  ;;  %12006 = vmatmul.msk.f32.gmra.mxu1 %vm7676_vm14, %v16320_v62  ;;  %vm9628_vm4 = vcmask 588800  }
 0x799   :  { %11990 = vmatmul.msk.f32.gmra.mxu2 %vm7676_vm14, %v16180_v23  ;;  %12017 = vmatpush.msk.msrb.mxu0 %vm6416_vm2, %v8228_v2 }
 0x79a   :  { %12432 = vrot.lane.b32.xlu1 %v16120_v56, %s12908_s20 }
 0x79b   :  { %8258 = vmatpush.msrb.mxu0 %v8227_v13  ;;  %12035 = vmatmul.msk.f32.gmra.mxu3 %vm7676_vm14, %v16500_v19 }
 0x79c   :  { %v16514_v24 = vpop.permute.xlu1 %8414  ;;  %11999 = vmatmul.msk.f32.gmra.mxu0 %vm7676_vm14, %v16232_v4 }
 0x79d   :  { %9021 = vrot.lane.b32.xlu2 %v16249_v8, %s12945_s18 }
 0x79e   :  { %8833 = vrot.lane.b32.xlu0 %v16112_v26, %s12909_s9  ;;  %s12948_s9 = smov 84  }
 0x79f   :  { %v16522_v23 = vpop.permute.xlu2 %8509  ;;  %v16524_v58 = vpop.permute.xlu0 %8412 }
 0x7a0   :  { %12023 = vmatmul.msk.f32.vlgmr.msrb.gmra.mxu1 %vm7676_vm14, %v16363_v27 }
 0x7a1   :  { %11991 = vmatmul.msk.f32.gmra.mxu2 %vm7676_vm14, %v16226_v9  ;;  %v16545_v9 = vpop.f32.mrf.mxu3 }
 0x7a2   :  { %8924 = vrot.lane.b32.xlu1 %v16275_v44, %s12942_s23 }
 0x7a3   :  { %12036 = vmatmul.msk.f32.gmra.mxu3 %vm7676_vm14, %v16402_v30 }
 0x7a4   :  { %v16534_v4 = vpop.permute.xlu1 %8637  ;;  %12000 = vmatmul.msk.f32.gmra.mxu0 %vm7676_vm14, %v16200_v25 }
 0x7a5   :  { %9025 = vrot.lane.b32.xlu2 %v16340_v21, %s12945_s18  ;;  %12062 = vmatpush.msk.msrb.mxu1 %vm6416_vm2, %v16534_v4 }
 0x7a6   :  { %8926 = vrot.lane.b32.xlu0 %v16340_v21, %s12942_s23 }
 0x7a7   :  { %v16547_v6 = vpop.permute.xlu2 %8511  ;;  %v8124_v52 = vpop.permute.xlu0 %8123  ;;  %8700 = vmatpush.msrb.mxu1 %v12415_v11 }
 0x7a8   :  { %v8129_v25 = vsel %vm8127_vm5, %v8124_v52, %v16288_v15  ;;  %12024 = vmatmul.msk.f32.gmra.mxu1 %vm7676_vm14, %v16318_v34  ;;  %v12399_v15 = vunpack.i.l.bf16 %v16414_v10  ;;  %vm9529_vm5 = vcmask 670720  }
 0x7a9   :  { %12007 = vmatpush.msk.msra.mxu2 %vm6416_vm2, %v8129_v25 }
 0x7aa   :  { %9023 = vrot.lane.b32.xlu1 %v16275_v44, %s12945_s18  ;;  %v8326_v22 = vsel %vm8325_vm15, %v12399_v15, %v12400_v20 }
 0x7ab   :  { %8159 = vmatpush.msra.mxu2 %v8128_v0 }
 0x7ac   :  { %v16557_v37 = vpop.permute.xlu1 %8612  ;;  %12001 = vmatmul.msk.f32.gmra.mxu0 %vm7676_vm14, %v16320_v62  ;;  %12008 = vmatmul.msk.f32.vlgmr.msra.gmra.mxu2 %vm7676_vm14, %v16310_v59  ;;  %v16573_v62 = vpop.f32.mrf.mxu3 }
 0x7ad   :  { %9230 = vrot.lane.b32.xlu2 %v16110_v29, %s12946_s15 }
 0x7ae   :  { %9131 = vrot.lane.b32.xlu0 %v16110_v29, %s12913_s2 }
 0x7af   :  { %v8322_v31 = vpop.permute.xlu2 %8321 }
 0x7b0   :  { %v8327_v53 = vsel %vm8325_vm15, %v8322_v31, %v16404_v50  ;;  %v16569_v18 = vpop.permute.xlu0 %12407  ;;  %12025 = vmatmul.msk.f32.gmra.mxu1 %vm7676_vm14, %v16394_v14  ;;  %v16753_v31 = vpop.f32.mrf.mxu2  ;;  %vm9744_vm15 = vcmask 580608  }
 0x7b1   :  { %v12410_v59 = vunpack.i.h.bf16 %v16569_v18  ;;  %12027 = vmatpush.msk.msrb.mxu2 %vm6416_vm2, %v8327_v53  ;;  %v12409_v25 = vunpack.i.l.bf16 %v16569_v18 }
 0x7b2   :  { %12437 = vrot.lane.b32.xlu1 %v16120_v56, %s12913_s2 }
 0x7b3   :  { %8584 = vmatpush.msra.mxu3 %v12410_v59  ;;  %8357 = vmatpush.msrb.mxu2 %v8326_v22 }
 0x7b4   :  { %12053 = vmatmul.msk.f32.vlgmr.msra.gmra.mxu3 %vm7676_vm14, %v16449_v57  ;;  %v16585_v50 = vpop.permute.xlu1 %8616  ;;  %12009 = vmatmul.msk.f32.gmra.mxu2 %vm7676_vm14, %v16297_v42  ;;  %v16603_v42 = vpop.f32.mrf.mxu3 }
 0x7b5   :  { %12018 = vmatmul.msk.f32.vlgmr.msrb.gmra.mxu0 %vm7676_vm14, %v16363_v27  ;;  %9216 = vrot.lane.b32.xlu2 %v16236_v48, %s12917_s10  ;;  %18089 = vst [vmem:[#allocation69_spill] sm:$0xff] %v16603_v42 }
 0x7b6   :  { %8932 = vrot.lane.b32.xlu0 %v16112_v26, %s12944_s22 }
 0x7b7   :  { %v16595_v10 = vpop.permute.xlu2 %8513 }
 0x7b8   :  { %v16597_v20 = vpop.permute.xlu0 %8610  ;;  %12026 = vmatmul.msk.f32.gmra.mxu1 %vm7676_vm14, %v16336_v40 }
 0x7ba   :  { %9119 = vrot.lane.b32.xlu1 %v16249_v8, %s12947_s19 }
 0x7bc   :  { %12054 = vmatmul.msk.f32.gmra.mxu3 %vm7676_vm14, %v16522_v23  ;;  %v16607_v27 = vpop.permute.xlu1 %8620  ;;  %12010 = vmatmul.msk.f32.gmra.mxu2 %vm7676_vm14, %v16353_v33  ;;  %v16634_v60 = vpop.f32.mrf.mxu3 }
 0x7bd   :  { %12019 = vmatmul.msk.f32.gmra.mxu0 %vm7676_vm14, %v16318_v34  ;;  %v16613_v17 = vpop.f32.mrf.mxu1  ;;  %9031 = vrot.lane.b32.xlu2 %v16112_v26, %s12908_s20 }
 0x7be   :  { %9117 = vrot.lane.b32.xlu0 %v16236_v48, %s12947_s19 }
 0x7bf   :  { %v12418_v43 = vpop.permute.xlu2 %12417 }
 0x7c0   :  { %v12420_v63 = vunpack.i.h.bf16 %v12418_v43  ;;  %v12419_v1 = vunpack.i.l.bf16 %v12418_v43  ;;  %v16619_v7 = vpop.permute.xlu0 %8614  ;;  %12043 = vmatmul.msk.f32.vlgmr.msra.gmra.mxu1 %vm7676_vm14, %v16381_v45 }
 0x7c2   :  { %9218 = vrot.lane.b32.xlu1 %v16249_v8, %s12917_s10  ;;  %v16626_v34 = vsel %vm8738_vm8, %v12419_v1, %v12420_v63 }
 0x7c4   :  { %12055 = vmatmul.msk.f32.gmra.mxu3 %vm7676_vm14, %v16547_v6  ;;  %v16630_v33 = vpop.permute.xlu1 %8736  ;;  %12011 = vmatmul.msk.f32.gmra.mxu2 %vm7676_vm14, %v16383_v28 }
 0x7c5   :  { %12020 = vmatmul.msk.f32.gmra.mxu0 %vm7676_vm14, %v16394_v14  ;;  %v16638_v54 = vpop.f32.mrf.mxu1  ;;  %9123 = vrot.lane.b32.xlu2 %v16340_v21, %s12947_s19 }
 0x7c6   :  { %12442 = vrot.lane.b32.xlu0 %v16120_v56, %s12946_s15  ;;  %12072 = vmatpush.msk.msrb.mxu3 %vm6416_vm2, %v16630_v33 }
 0x7c7   :  { %v16646_v55 = vpop.permute.xlu2 %8722 }
 0x7c8   :  { %v16648_v12 = vpop.permute.xlu0 %8618  ;;  %8799 = vmatpush.msrb.mxu3 %v12420_v63  ;;  %12044 = vmatmul.msk.f32.gmra.mxu1 %vm7676_vm14, %v16491_v46  ;;  %v16791_v63 = vpop.f32.mrf.mxu2 }
 0x7ca   :  { %9222 = vrot.lane.b32.xlu1 %v16340_v21, %s12917_s10 }
 0x7cc   :  { %12056 = vmatmul.msk.f32.gmra.mxu3 %vm7676_vm14, %v16595_v10  ;;  %v8421_v28 = vpop.permute.xlu1 %8420  ;;  %12028 = vmatmul.msk.f32.vlgmr.msrb.gmra.mxu2 %vm7676_vm14, %v16427_v61 }
 0x7cd   :  { %v8426_v14 = vsel %vm8424_vm0, %v8421_v28, %v16361_v39  ;;  %12021 = vmatmul.msk.f32.gmra.mxu0 %vm7676_vm14, %v16336_v40  ;;  %v16662_v47 = vpop.f32.mrf.mxu1  ;;  %9329 = vrot.lane.b32.xlu2 %v16110_v29, %s12948_s9  ;;  %vm9331_vm0 = vcmask 687104  }
 0x7ce   :  { %18090 = vst [vmem:[#allocation67_spill] sm:$0xff] %v16662_v47  ;;  %9121 = vrot.lane.b32.xlu0 %v16275_v44, %s12947_s19  ;;  %v16668_v11 = vpop.f32.mrf.mxu3  ;;  %12037 = vmatpush.msk.msra.mxu0 %vm6416_vm2, %v8426_v14 }
 0x7cf   :  { %v16671_v61 = vpop.permute.xlu2 %12422 }
 0x7d0   :  { %v16673_v5 = vpop.permute.xlu0 %8622  ;;  %8456 = vmatpush.msra.mxu0 %v16461_v41  ;;  %12045 = vmatmul.msk.f32.gmra.mxu1 %vm7676_vm14, %v16524_v58  ;;  %v17938_v2 = vunpack.i.h.bf16 %v16671_v61  ;;  %v16827_v14 = vpop.f32.mrf.mxu2 }
 0x7d1   :  { %v16678_v40 = vpop.f32.mrf.mxu0 }
 0x7d2   :  { %9428 = vrot.lane.b32.xlu1 %v16110_v29, %s12949_s21 }
 0x7d4   :  { %12073 = vmatmul.msk.f32.vlgmr.msrb.gmra.mxu3 %vm7676_vm14, %v16646_v55  ;;  %v16684_v39 = vpop.permute.xlu1 %8624  ;;  %12029 = vmatmul.msk.f32.gmra.mxu2 %vm7676_vm14, %v16465_v32 }
 0x7d5   :  { %12038 = vmatmul.msk.f32.vlgmr.msra.gmra.mxu0 %vm7676_vm14, %v16381_v45  ;;  %v16690_v41 = vpop.f32.mrf.mxu1  ;;  %9129 = vrot.lane.b32.xlu2 %v16112_v26, %s12913_s2  ;;  %s12950_s2 = smov 52  }
 0x7d6   :  { %9220 = vrot.lane.b32.xlu0 %v16275_v44, %s12917_s10  ;;  %v16696_v16 = vpop.f32.mrf.mxu3  ;;  %s12952_s10 = smov 82  }
 0x7d7   :  { %18091 = vst [vmem:[#allocation74_spill] sm:$0xff] %v16696_v16  ;;  %v16698_v49 = vpop.permute.xlu2 %8726 }
 0x7d8   :  { %v16700_v35 = vpop.permute.xlu0 %8724  ;;  %12046 = vmatmul.msk.f32.gmra.mxu1 %vm7676_vm14, %v16514_v24 }
 0x7d9   :  { %v16704_v32 = vpop.f32.mrf.mxu0 }
 0x7da   :  { %9228 = vrot.lane.b32.xlu1 %v16112_v26, %s12946_s15 }
 0x7dc   :  { %12074 = vmatmul.msk.f32.gmra.mxu3 %vm7676_vm14, %v16700_v35  ;;  %v16710_v45 = vpop.permute.xlu1 %8835  ;;  %12030 = vmatmul.msk.f32.gmra.mxu2 %vm7676_vm14, %v16500_v19 }
 0x7dd   :  { %12039 = vmatmul.msk.f32.gmra.mxu0 %vm7676_vm14, %v16491_v46  ;;  %v16716_v36 = vpop.f32.mrf.mxu1  ;;  %9315 = vrot.lane.b32.xlu2 %v16236_v48, %s12950_s2  ;;  %v8627_v46 = vsel %vm8626_vm9, %v16597_v20, %v16557_v37 }
 0x7de   :  { %12447 = vrot.lane.b32.xlu0 %v16120_v56, %s12948_s9  ;;  %12082 = vmatpush.msk.msra.mxu1 %vm6416_vm2, %v16710_v45  ;;  %v16725_v13 = vpop.f32.mrf.mxu3 }
 0x7df   :  { %18092 = vst [vmem:[#allocation46_spill] sm:$0xff] %v16725_v13  ;;  %v16727_v19 = vpop.permute.xlu2 %8825 }
 0x7e0   :  { %v16732_v51 = vpop.permute.xlu0 %8823  ;;  %8898 = vmatpush.msra.mxu1 %v17938_v2 }
 0x7e1   :  { %12063 = vmatmul.msk.f32.vlgmr.msrb.gmra.mxu1 %vm7676_vm14, %v8627_v46  ;;  %v16737_v52 = vpop.f32.mrf.mxu0 }
 0x7e2   :  { %9414 = vrot.lane.b32.xlu1 %v16236_v48, %s12951_s3 }
 0x7e4   :  { %v8520_v0 = vpop.permute.xlu1 %8519  ;;  %12031 = vmatmul.msk.f32.gmra.mxu2 %vm7676_vm14, %v16402_v30  ;;  %12075 = vmatmul.msk.f32.gmra.mxu3 %vm7676_vm14, %v16698_v49 }
 0x7e5   :  { %v8525_v37 = vsel %vm8523_vm10, %v8520_v0, %v16423_v3  ;;  %12040 = vmatmul.msk.f32.gmra.mxu0 %vm7676_vm14, %v16524_v58  ;;  %v16749_v15 = vpop.f32.mrf.mxu1  ;;  %12452 = vrot.lane.b32.xlu2 %v16120_v56, %s12949_s21  ;;  %v8524_v3 = vsel %vm8523_vm10, %v12409_v25, %v12410_v59  ;;  %v8628_v58 = vsel %vm8626_vm9, %v16619_v7, %v16585_v50  ;;  %vm9843_vm10 = vcmask 572416  }
 0x7e6   :  { %9317 = vrot.lane.b32.xlu0 %v16249_v8, %s12950_s2  ;;  %12047 = vmatpush.msk.msra.mxu2 %vm6416_vm2, %v8525_v37  ;;  %v16765_v53 = vpop.f32.mrf.mxu3  ;;  %v8629_v50 = vsel %vm8626_vm9, %v16648_v12, %v16607_v27 }
 0x7e7   :  { %v16758_v30 = vpop.permute.xlu2 %12427 }
 0x7e8   :  { %v16767_v22 = vpop.permute.xlu0 %8827  ;;  %8555 = vmatpush.msra.mxu2 %v8524_v3  ;;  %v16861_v3 = vpop.f32.mrf.mxu2 }
 0x7e9   :  { %12064 = vmatmul.msk.f32.gmra.mxu1 %vm7676_vm14, %v8628_v58  ;;  %v16770_v20 = vpop.f32.mrf.mxu0 }
 0x7ea   :  { %9321 = vrot.lane.b32.xlu1 %v16340_v21, %s12950_s2 }
 0x7ec   :  { %v16774_v43 = vpop.permute.xlu1 %8821  ;;  %12048 = vmatmul.msk.f32.vlgmr.msra.gmra.mxu2 %vm7676_vm14, %v16449_v57 }
 0x7ed   :  { %12041 = vmatmul.msk.f32.gmra.mxu0 %vm7676_vm14, %v16514_v24  ;;  %v16780_v18 = vpop.f32.mrf.mxu1  ;;  %9319 = vrot.lane.b32.xlu2 %v16275_v44, %s12950_s2 }
 0x7ee   :  { %18093 = vst [vmem:[#allocation72_spill] sm:$0xff] %v16780_v18  ;;  %9416 = vrot.lane.b32.xlu0 %v16249_v8, %s12951_s3  ;;  %v16798_v7 = vpop.f32.mrf.mxu3  ;;  %v18099_v18 = vunpack.i.h.bf16 %v16671_v61 }
 0x7ef   :  { %v16786_v59 = vpop.permute.xlu2 %8922  ;;  %18094 = vst [vmem:[#allocation77_spill] sm:$0xff] %v16798_v7  ;;  %v17007_v7 = vld [vmem:[#allocation8 + $0x10] sm:$0xff] }
 0x7f0   :  { %v8636_v57 = vpop.permute.xlu0 %8635 }
 0x7f1   :  { %v8641_v24 = vsel %vm8639_vm3, %v8636_v57, %v16534_v4  ;;  %12065 = vmatmul.msk.f32.gmra.mxu1 %vm7676_vm14, %v8629_v50  ;;  %v16796_v1 = vpop.f32.mrf.mxu0  ;;  %vm9430_vm3 = vcmask 678912  }
 0x7f2   :  { %12057 = vmatpush.msk.msrb.mxu0 %vm6416_vm2, %v8641_v24  ;;  %9327 = vrot.lane.b32.xlu1 %v16112_v26, %s12948_s9 }
 0x7f4   :  { %8671 = vmatpush.msrb.mxu0 %v16487_v38  ;;  %v16804_v27 = vpop.permute.xlu1 %8728  ;;  %12049 = vmatmul.msk.f32.gmra.mxu2 %vm7676_vm14, %v16522_v23  ;;  %v8630_v38 = vsel %vm8626_vm9, %v16673_v5, %v16684_v39  ;;  %v17937_v39 = vunpack.i.h.bf16 %v16758_v30 }
 0x7f5   :  { %12058 = vmatmul.msk.f32.vlgmr.msrb.gmra.mxu0 %vm7676_vm14, %v8627_v46  ;;  %v16809_v4 = vpop.f32.mrf.mxu1  ;;  %9418 = vrot.lane.b32.xlu2 %v16275_v44, %s12951_s3 }
 0x7f6   :  { %9420 = vrot.lane.b32.xlu0 %v16340_v21, %s12951_s3  ;;  %12076 = vmatmul.msk.f32.gmra.mxu3 %vm7676_vm14, %v16804_v27  ;;  %v16833_v46 = vpop.f32.mrf.mxu3 }
 0x7f7   :  { %v16817_v12 = vpop.permute.xlu2 %9021  ;;  %18095 = vst [vmem:[#allocation52_spill] sm:$0xff] %v16833_v46 }
 0x7f8   :  { %v16822_v23 = vpop.permute.xlu0 %9033 }
 0x7f9   :  { %12066 = vmatmul.msk.f32.gmra.mxu1 %vm7676_vm14, %v8630_v38  ;;  %v16825_v28 = vpop.f32.mrf.mxu0 }
 0x7fa   :  { %12102 = vmatpush.msk.msrb.mxu1 %vm6416_vm2, %v16822_v23  ;;  %9527 = vrot.lane.b32.xlu1 %v16110_v29, %s12952_s10 }
 0x7fc   :  { %v16835_v25 = vpop.permute.xlu1 %8934  ;;  %12050 = vmatmul.msk.f32.gmra.mxu2 %vm7676_vm14, %v16547_v6 }
 0x7fd   :  { %12059 = vmatmul.msk.f32.gmra.mxu0 %vm7676_vm14, %v8628_v58  ;;  %v16840_v5 = vpop.f32.mrf.mxu1  ;;  %12457 = vrot.lane.b32.xlu2 %v16120_v56, %s12952_s10 }
 0x7fe   :  { %9426 = vrot.lane.b32.xlu0 %v16112_v26, %s12949_s21  ;;  %12092 = vmatpush.msk.msra.mxu3 %vm6416_vm2, %v16835_v25  ;;  %v16872_v24 = vpop.f32.mrf.mxu3 }
 0x7ff   :  { %v16849_v0 = vpop.permute.xlu2 %9025  ;;  %18097 = vst [vmem:[#allocation54_spill] sm:$0xff] %v16872_v24 }
 0x800   :  { %v16851_v37 = vpop.permute.xlu0 %9019  ;;  %8997 = vmatpush.msra.mxu3 %v17937_v39 }
 0x801   :  { %12083 = vmatmul.msk.f32.vlgmr.msra.gmra.mxu1 %vm7676_vm14, %v16774_v43  ;;  %v16857_v6 = vpop.f32.mrf.mxu0 }
 0x802   :  { %9513 = vrot.lane.b32.xlu1 %v16236_v48, %s12932_s25 }
 0x804   :  { %v16863_v58 = vpop.permute.xlu1 %8920  ;;  %12051 = vmatmul.msk.f32.gmra.mxu2 %vm7676_vm14, %v16595_v10 }
 0x805   :  { %12060 = vmatmul.msk.f32.gmra.mxu0 %vm7676_vm14, %v8629_v50  ;;  %v16868_v57 = vpop.f32.mrf.mxu1  ;;  %9515 = vrot.lane.b32.xlu2 %v16249_v8, %s12932_s25 }
 0x806   :  { %18096 = vst [vmem:[#allocation53_spill] sm:$0xff] %v16868_v57  ;;  %9626 = vrot.lane.b32.xlu0 %v16110_v29, %s12953_s5  ;;  %12093 = vmatmul.msk.f32.vlgmr.msra.gmra.mxu3 %vm7676_vm14, %v16863_v58 }
 0x807   :  { %v16878_v39 = vpop.permute.xlu2 %9230 }
 0x808   :  { %v8735_v2 = vpop.permute.xlu0 %8734 }
 0x809   :  { %v8740_v10 = vsel %vm8738_vm8, %v8735_v2, %v16630_v33  ;;  %12084 = vmatmul.msk.f32.gmra.mxu1 %vm7676_vm14, %v16732_v51  ;;  %v16884_v50 = vpop.f32.mrf.mxu0  ;;  %v12424_v2 = vunpack.i.l.bf16 %v16671_v61  ;;  %vm9731_vm8 = vcmask 31744  }
 0x80a   :  { %12067 = vmatpush.msk.msrb.mxu2 %vm6416_vm2, %v8740_v10  ;;  %12462 = vrot.lane.b32.xlu1 %v16120_v56, %s12953_s5 }
 0x80b   :  { %v8838_v57 = vsel %vm8837_vm11, %v12424_v2, %v18099_v18 }
 0x80c   :  { %8770 = vmatpush.msrb.mxu2 %v16626_v34  ;;  %v12433_v24 = vpop.permute.xlu1 %12432  ;;  %v16890_v13 = vpop.f32.mrf.mxu2 }
 0x80d   :  { %v12435_v46 = vunpack.i.h.bf16 %v12433_v24  ;;  %12061 = vmatmul.msk.f32.gmra.mxu0 %vm7676_vm14, %v8630_v38  ;;  %12068 = vmatmul.msk.f32.vlgmr.msrb.gmra.mxu2 %vm7676_vm14, %v16646_v55  ;;  %v16895_v33 = vpop.f32.mrf.mxu1  ;;  %v16906_v38 = vpop.f32.mrf.mxu3 }
 0x80e   :  { %18098 = vst [vmem:[#allocation62_spill] sm:$0xff] %v16895_v33  ;;  %9614 = vrot.lane.b32.xlu2 %v16249_v8, %s12891_s17  ;;  %9612 = vrot.lane.b32.xlu0 %v16236_v48, %s12891_s17 }
 0x80f   :  { %12094 = vmatmul.msk.f32.gmra.mxu3 %vm7676_vm14, %v16786_v59  ;;  %v16904_v34 = vpop.permute.xlu2 %9216  ;;  %9095 = vmatpush.msrb.mxu1 %v12435_v46 }
 0x810   :  { %v8834_v55 = vpop.permute.xlu0 %8833 }
 0x811   :  { %12122 = vmatpush.msk.msra.mxu1 %vm6416_vm2, %v16878_v39  ;;  %v8839_v10 = vsel %vm8837_vm11, %v8834_v55, %v16710_v45  ;;  %v16913_v33 = vpop.f32.mrf.mxu0  ;;  %v12434_v55 = vunpack.i.l.bf16 %v12433_v24  ;;  %vm9942_vm11 = vcmask 564224  }
 0x812   :  { %12085 = vmatmul.msk.f32.gmra.mxu1 %vm7676_vm14, %v16727_v19  ;;  %12077 = vmatpush.msk.msra.mxu0 %vm6416_vm2, %v8839_v10 }
 0x813   :  { %9517 = vrot.lane.b32.xlu1 %v16275_v44, %s12932_s25 }
 0x814   :  { %8869 = vmatpush.msra.mxu0 %v8838_v57  ;;  %v16920_v42 = vpop.permute.xlu1 %8924  ;;  %v16922_v47 = vpop.f32.mrf.mxu2  ;;  %v9035_v57 = vsel %vm1337_vm6, %v12434_v55, %v12435_v46 }
 0x815   :  { %12069 = vmatmul.msk.f32.gmra.mxu2 %vm7676_vm14, %v16700_v35  ;;  %12078 = vmatmul.msk.f32.vlgmr.msra.gmra.mxu0 %vm7676_vm14, %v16774_v43  ;;  %v16928_v45 = vpop.f32.mrf.mxu1 }
 0x816   :  { %9715 = vrot.lane.b32.xlu2 %v16236_v48, %s12954_s24  ;;  %9525 = vrot.lane.b32.xlu0 %v16112_v26, %s12952_s10  ;;  %v16945_v48 = vpop.f32.mrf.mxu3 }
 0x817   :  { %12095 = vmatmul.msk.f32.gmra.mxu3 %vm7676_vm14, %v16920_v42  ;;  %v9032_v61 = vpop.permute.xlu2 %9031  ;;  %18100 = vst [vmem:[#allocation34_spill] sm:$0xff] %v16945_v48 }
 0x818   :  { %v9036_v35 = vsel %vm1337_vm6, %v9032_v61, %v16822_v23  ;;  %v16938_v18 = vpop.permute.xlu0 %8926  ;;  %vm8936_vm6 = vcmask 793600  }
 0x819   :  { %v16942_v43 = vpop.f32.mrf.mxu0  ;;  %12097 = vmatpush.msk.msrb.mxu0 %vm6416_vm2, %v9036_v35 }
 0x81a   :  { %12086 = vmatmul.msk.f32.gmra.mxu1 %vm7676_vm14, %v16767_v22 }
 0x81b   :  { %9616 = vrot.lane.b32.xlu1 %v16275_v44, %s12891_s17  ;;  %9066 = vmatpush.msrb.mxu0 %v9035_v57  ;;  %v12429_v57 = vunpack.i.l.bf16 %v16758_v30 }
 0x81c   :  { %v16950_v24 = vpop.permute.xlu1 %9023  ;;  %v16952_v23 = vpop.f32.mrf.mxu2 }
 0x81d   :  { %12070 = vmatmul.msk.f32.gmra.mxu2 %vm7676_vm14, %v16698_v49  ;;  %12079 = vmatmul.msk.f32.gmra.mxu0 %vm7676_vm14, %v16732_v51  ;;  %v16958_v2 = vpop.f32.mrf.mxu1 }
 0x81e   :  { %18101 = vst [vmem:[#allocation63_spill] sm:$0xff] %v16958_v2  ;;  %9624 = vrot.lane.b32.xlu2 %v16112_v26, %s12953_s5  ;;  %9519 = vrot.lane.b32.xlu0 %v16340_v21, %s12932_s25  ;;  %v16975_v51 = vpop.f32.mrf.mxu3  ;;  %s12958_s25 = smov 108  }
 0x81f   :  { %12096 = vmatmul.msk.f32.gmra.mxu3 %vm7676_vm14, %v16938_v18  ;;  %v16966_v46 = vpop.permute.xlu2 %9123  ;;  %18102 = vst [vmem:[#allocation61_spill] sm:$0xff] %v16975_v51 }
 0x820   :  { %v9132_v10 = vpop.permute.xlu0 %9131 }
 0x821   :  { %12112 = vmatpush.msk.msrb.mxu3 %vm6416_vm2, %v9132_v10  ;;  %v16971_v49 = vpop.f32.mrf.mxu0 }
 0x822   :  { %12103 = vmatmul.msk.f32.vlgmr.msrb.gmra.mxu1 %vm7676_vm14, %v16851_v37 }
 0x823   :  { %12467 = vrot.lane.b32.xlu1 %v16120_v56, %s12955_s30 }
 0x824   :  { %v12438_v55 = vpop.permute.xlu1 %12437  ;;  %v16988_v48 = vpop.f32.mrf.mxu2 }
 0x825   :  { %v12440_v61 = vunpack.i.h.bf16 %v12438_v55  ;;  %12071 = vmatmul.msk.f32.gmra.mxu2 %vm7676_vm14, %v16804_v27  ;;  %12080 = vmatmul.msk.f32.gmra.mxu0 %vm7676_vm14, %v16727_v19  ;;  %v16981_v35 = vpop.f32.mrf.mxu1  ;;  %v7777_v27 = vadd.f32 %v16753_v31, %v16678_v40  ;;  %v18104_v40 = vunpack.i.h.bf16 %v16758_v30 }
 0x826   :  { %18103 = vst [vmem:[#allocation71_spill] sm:$0xff] %v16981_v35  ;;  %9719 = vrot.lane.b32.xlu2 %v16249_v8, %s12954_s24  ;;  %9742 = vrot.lane.b32.xlu0 %v16110_v29, %s12955_s30 }
 0x827   :  { %v16990_v51 = vpop.permute.xlu2 %9329  ;;  %9194 = vmatpush.msrb.mxu3 %v12440_v61  ;;  %v7907_v2 = vadd.f32 %v16796_v1, %v7777_v27  ;;  %v8937_v31 = vsel %vm8936_vm6, %v12429_v57, %v18104_v40 }
 0x828   :  { %v8933_v19 = vpop.permute.xlu0 %8932 }
 0x829   :  { %12132 = vmatpush.msk.msra.mxu3 %vm6416_vm2, %v16990_v51  ;;  %v8938_v8 = vsel %vm8936_vm6, %v8933_v19, %v16835_v25  ;;  %v16999_v35 = vpop.f32.mrf.mxu0  ;;  %v8005_v16 = vadd.f32 %v16890_v13, %v7907_v2  ;;  %v17019_v19 = vpop.f32.mrf.mxu3  ;;  %v12439_v13 = vunpack.i.l.bf16 %v12438_v55  ;;  %vm10041_vm6 = vcmask 556032  }
 0x82a   :  { %12104 = vmatmul.msk.f32.gmra.mxu1 %vm7676_vm14, %v16817_v12  ;;  %12087 = vmatpush.msk.msra.mxu2 %vm6416_vm2, %v8938_v8 }
 0x82b   :  { %9618 = vrot.lane.b32.xlu1 %v16340_v21, %s12891_s17  ;;  %v8103_v27 = vadd.f32 %v16913_v33, %v8005_v16  ;;  %v7780_v16 = vadd.f32 %v16791_v63, %v16704_v32  ;;  %s12956_s17 = smov 70  }
 0x82c   :  { %8968 = vmatpush.msra.mxu2 %v8937_v31  ;;  %v17010_v25 = vpop.permute.xlu1 %9119 }
 0x82d   :  { %12081 = vmatmul.msk.f32.gmra.mxu0 %vm7676_vm14, %v16767_v22  ;;  %12088 = vmatmul.msk.f32.vlgmr.msra.gmra.mxu2 %vm7676_vm14, %v16863_v58  ;;  %v17016_v1 = vpop.f32.mrf.mxu1  ;;  %v7909_v33 = vadd.f32 %v16825_v28, %v7780_v16 }
 0x82e   :  { %9723 = vrot.lane.b32.xlu2 %v16275_v44, %s12954_s24  ;;  %9717 = vrot.lane.b32.xlu0 %v17007_v7, %s12954_s24 }
 0x82f   :  { %v9130_v30 = vpop.permute.xlu2 %9129  ;;  %v8161_v2 = vpop.f32.mrf.mxu2  ;;  %v8007_v32 = vadd.f32 %v16922_v47, %v7909_v33 }
 0x830   :  { %v9135_v22 = vsel %vm9133_vm12, %v9130_v30, %v9132_v10  ;;  %v17025_v57 = vpop.permute.xlu0 %9117  ;;  %v17027_v58 = vadd.f32 %v8161_v2, %v8103_v27  ;;  %v9134_v10 = vsel %vm9133_vm12, %v12439_v13, %v12440_v61  ;;  %vm10406_vm12 = vcmask 203776  }
 0x831   :  { %12113 = vmatmul.msk.f32.vlgmr.msrb.gmra.mxu3 %vm7676_vm14, %v17025_v57  ;;  %12107 = vmatpush.msk.msrb.mxu2 %vm6416_vm2, %v9135_v22  ;;  %v8105_v28 = vadd.f32 %v16942_v43, %v8007_v32  ;;  %v17061_v40 = vpop.f32.mrf.mxu3 }
 0x832   :  { %12105 = vmatmul.msk.f32.gmra.mxu1 %vm7676_vm14, %v16950_v24  ;;  %v17035_v44 = vpop.f32.mrf.mxu0 }
 0x833   :  { %12472 = vrot.lane.b32.xlu1 %v16120_v56, %s12956_s17  ;;  %9165 = vmatpush.msrb.mxu2 %v9134_v10  ;;  %v17112_v10 = vld [vmem:[#allocation8 + $0x40] sm:$0xff] }
 0x834   :  { %v17041_v55 = vpop.permute.xlu1 %9218 }
 0x835   :  { %12089 = vmatmul.msk.f32.gmra.mxu2 %vm7676_vm14, %v16786_v59  ;;  %12098 = vmatmul.msk.f32.vlgmr.msrb.gmra.mxu0 %vm7676_vm14, %v16851_v37  ;;  %v17048_v63 = vpop.f32.mrf.mxu1  ;;  %v7783_v59 = vadd.f32 %v16827_v14, %v16737_v52  ;;  %v17077_v52 = vld [vmem:[#allocation8 + $0x28] sm:$0xff] }
 0x836   :  { %9740 = vrot.lane.b32.xlu2 %v16112_v26, %s12955_s30  ;;  %9841 = vrot.lane.b32.xlu0 %v16110_v29, %s12956_s17 }
 0x837   :  { %v17055_v61 = vpop.permute.xlu2 %9315  ;;  %v8164_v47 = vpop.f32.mrf.mxu2  ;;  %v7911_v27 = vadd.f32 %v16857_v6, %v7783_v59  ;;  %v17149_v59 = vld [vmem:[#allocation8 + $0x58] sm:$0xff] }
 0x838   :  { %v17057_v8 = vpop.permute.xlu0 %12442  ;;  %v17064_v31 = vadd.f32 %v8164_v47, %v8105_v28 }
 0x839   :  { %v12445_v37 = vunpack.i.h.bf16 %v17057_v8  ;;  %12114 = vmatmul.msk.f32.gmra.mxu3 %vm7676_vm14, %v17010_v25  ;;  %v8009_v13 = vadd.f32 %v16952_v23, %v7911_v27  ;;  %v17099_v16 = vpop.f32.mrf.mxu3  ;;  %v12444_v27 = vunpack.i.l.bf16 %v17057_v8 }
 0x83a   :  { %12106 = vmatmul.msk.f32.gmra.mxu1 %vm7676_vm14, %v16849_v0  ;;  %v17070_v43 = vpop.f32.mrf.mxu0 }
 0x83b   :  { %9827 = vrot.lane.b32.xlu1 %v17007_v7, %s12938_s0  ;;  %9293 = vmatpush.msra.mxu1 %v12445_v37  ;;  %v8107_v6 = vadd.f32 %v16971_v49, %v8009_v13 }
 0x83c   :  { %v17079_v14 = vpop.permute.xlu1 %9222 }
 0x83d   :  { %12090 = vmatmul.msk.f32.gmra.mxu2 %vm7676_vm14, %v16920_v42  ;;  %12099 = vmatmul.msk.f32.gmra.mxu0 %vm7676_vm14, %v16817_v12  ;;  %v17086_v30 = vpop.f32.mrf.mxu1  ;;  %v7786_v42 = vadd.f32 %v16861_v3, %v16770_v20 }
 0x83e   :  { %9839 = vrot.lane.b32.xlu2 %v16112_v26, %s12956_s17  ;;  %9721 = vrot.lane.b32.xlu0 %v17077_v52, %s12954_s24 }
 0x83f   :  { %v17093_v2 = vpop.permute.xlu2 %12452  ;;  %v8167_v23 = vpop.f32.mrf.mxu2  ;;  %v7913_v49 = vadd.f32 %v16884_v50, %v7786_v42  ;;  %v8301_v42 = vadd.f32 %v17035_v44, %v17027_v58 }
 0x840   :  { %v17095_v22 = vpop.permute.xlu0 %9121  ;;  %v17101_v12 = vadd.f32 %v8167_v23, %v8107_v6  ;;  %v12455_v28 = vunpack.i.h.bf16 %v17093_v2 }
 0x841   :  { %12115 = vmatmul.msk.f32.gmra.mxu3 %vm7676_vm14, %v17095_v22  ;;  %v8011_v3 = vadd.f32 %v16988_v48, %v7913_v49 }
 0x842   :  { %12123 = vmatmul.msk.f32.vlgmr.msra.gmra.mxu1 %vm7676_vm14, %v16904_v34  ;;  %v17107_v33 = vpop.f32.mrf.mxu0 }
 0x843   :  { %9829 = vrot.lane.b32.xlu1 %v17077_v52, %s12938_s0  ;;  %v8109_v50 = vadd.f32 %v16999_v35, %v8011_v3  ;;  %v17147_v35 = vpop.f32.mrf.mxu3 }
 0x844   :  { %v17114_v20 = vpop.permute.xlu1 %9428 }
 0x845   :  { %12091 = vmatmul.msk.f32.gmra.mxu2 %vm7676_vm14, %v16938_v18  ;;  %12100 = vmatmul.msk.f32.gmra.mxu0 %vm7676_vm14, %v16950_v24  ;;  %v17121_v32 = vpop.f32.mrf.mxu1 }
 0x846   :  { %9727 = vrot.lane.b32.xlu2 %v16340_v21, %s12954_s24  ;;  %9725 = vrot.lane.b32.xlu0 %v17112_v10, %s12954_s24 }
 0x847   :  { %12142 = vmatpush.msk.msrb.mxu1 %vm6416_vm2, %v17114_v20  ;;  %v17131_v48 = vpop.permute.xlu2 %9319  ;;  %v8170_v24 = vpop.f32.mrf.mxu2 }
 0x848   :  { %v17133_v18 = vpop.permute.xlu0 %9220  ;;  %v17135_v47 = vadd.f32 %v8170_v24, %v8109_v50 }
 0x849   :  { %9491 = vmatpush.msrb.mxu1 %v12455_v28  ;;  %12116 = vmatmul.msk.f32.gmra.mxu3 %vm7676_vm14, %v16966_v46 }
 0x84a   :  { %12124 = vmatmul.msk.f32.gmra.mxu1 %vm7676_vm14, %v17041_v55  ;;  %v17143_v21 = vpop.f32.mrf.mxu0 }
 0x84b   :  { %9831 = vrot.lane.b32.xlu1 %v17112_v10, %s12938_s0  ;;  %v17181_v44 = vpop.f32.mrf.mxu3 }
 0x84c   :  { %v9229_v13 = vpop.permute.xlu1 %9228  ;;  %18105 = vst [vmem:[#allocation36_spill] sm:$0xff] %v17181_v44 }
 0x84d   :  { %v9234_v6 = vsel %vm9232_vm13, %v9229_v13, %v16878_v39  ;;  %12101 = vmatmul.msk.f32.gmra.mxu0 %vm7676_vm14, %v16849_v0  ;;  %12108 = vmatmul.msk.f32.vlgmr.msrb.gmra.mxu2 %vm7676_vm14, %v17025_v57  ;;  %v17157_v23 = vpop.f32.mrf.mxu1  ;;  %v9233_v57 = vsel %vm9232_vm13, %v12444_v27, %v12445_v37  ;;  %v8303_v37 = vadd.f32 %v17070_v43, %v17064_v31  ;;  %vm10546_vm13 = vcmask 1044480  }
 0x84e   :  { %9833 = vrot.lane.b32.xlu2 %v17149_v59, %s12938_s0  ;;  %9729 = vrot.lane.b32.xlu0 %v17149_v59, %s12954_s24 }
 0x84f   :  { %12117 = vmatpush.msk.msra.mxu0 %vm6416_vm2, %v9234_v6  ;;  %v17166_v39 = vpop.permute.xlu2 %9418  ;;  %v8359_v0 = vpop.f32.mrf.mxu2 }
 0x850   :  { %v12448_v49 = vpop.permute.xlu0 %12447  ;;  %v17170_v50 = vadd.f32 %v8359_v0, %v8301_v42 }
 0x851   :  { %v12450_v3 = vunpack.i.h.bf16 %v12448_v49  ;;  %9264 = vmatpush.msra.mxu0 %v9233_v57 }
 0x852   :  { %12125 = vmatmul.msk.f32.gmra.mxu1 %vm7676_vm14, %v17133_v18  ;;  %v17174_v24 = vpop.f32.mrf.mxu0 }
 0x853   :  { %12477 = vrot.lane.b32.xlu1 %v16120_v56, %s12957_s13  ;;  %9392 = vmatpush.msra.mxu3 %v12450_v3  ;;  %v17221_v43 = vpop.f32.mrf.mxu3 }
 0x854   :  { %12133 = vmatmul.msk.f32.vlgmr.msra.gmra.mxu3 %vm7676_vm14, %v17055_v61  ;;  %v17179_v58 = vpop.permute.xlu1 %9414 }
 0x855   :  { %12109 = vmatmul.msk.f32.gmra.mxu2 %vm7676_vm14, %v17010_v25  ;;  %12118 = vmatmul.msk.f32.vlgmr.msra.gmra.mxu0 %vm7676_vm14, %v16904_v34  ;;  %v17187_v8 = vpop.f32.mrf.mxu1 }
 0x856   :  { %9938 = vrot.lane.b32.xlu2 %v16112_v26, %s12957_s13  ;;  %9940 = vrot.lane.b32.xlu0 %v16110_v29, %s12957_s13 }
 0x857   :  { %v17193_v27 = vpop.permute.xlu2 %12457  ;;  %v8362_v6 = vpop.f32.mrf.mxu2 }
 0x858   :  { %v17195_v13 = vpop.permute.xlu0 %9317  ;;  %v17197_v42 = vadd.f32 %v8362_v6, %v8303_v37  ;;  %v12449_v37 = vunpack.i.l.bf16 %v12448_v49  ;;  %v8307_v6 = vadd.f32 %v17143_v21, %v17135_v47 }
 0x85a   :  { %12126 = vmatmul.msk.f32.gmra.mxu1 %vm7676_vm14, %v17079_v14  ;;  %v17201_v34 = vpop.f32.mrf.mxu0 }
 0x85b   :  { %10037 = vrot.lane.b32.xlu1 %v16112_v26, %s12918_s27  ;;  %v8305_v26 = vadd.f32 %v17107_v33, %v17101_v12 }
 0x85c   :  { %12134 = vmatmul.msk.f32.gmra.mxu3 %vm7676_vm14, %v17195_v13  ;;  %v17207_v25 = vpop.permute.xlu1 %9321 }
 0x85d   :  { %12110 = vmatmul.msk.f32.gmra.mxu2 %vm7676_vm14, %v17095_v22  ;;  %12119 = vmatmul.msk.f32.gmra.mxu0 %vm7676_vm14, %v17041_v55 }
 0x85e   :  { %10039 = vrot.lane.b32.xlu2 %v16110_v29, %s12918_s27  ;;  %9926 = vrot.lane.b32.xlu0 %v17007_v7, %s12958_s25  ;;  %v17217_v31 = vpop.f32.mrf.mxu1 }
 0x85f   :  { %v17223_v0 = vpop.permute.xlu2 %9515  ;;  %v8365_v57 = vpop.f32.mrf.mxu2 }
 0x860   :  { %v17225_v22 = vpop.permute.xlu0 %9416  ;;  %v17227_v55 = vadd.f32 %v8365_v57, %v8305_v26  ;;  %v17255_v57 = vpop.f32.mrf.mxu3 }
 0x862   :  { %12143 = vmatmul.msk.f32.vlgmr.msrb.gmra.mxu1 %vm7676_vm14, %v17179_v58  ;;  %v17231_v29 = vpop.f32.mrf.mxu0 }
 0x863   :  { %9928 = vrot.lane.b32.xlu1 %v17077_v52, %s12958_s25 }
 0x864   :  { %12135 = vmatmul.msk.f32.gmra.mxu3 %vm7676_vm14, %v17131_v48  ;;  %v9328_v12 = vpop.permute.xlu1 %9327 }
 0x865   :  { %v9333_v33 = vsel %vm9331_vm0, %v9328_v12, %v16990_v51  ;;  %12111 = vmatmul.msk.f32.gmra.mxu2 %vm7676_vm14, %v16966_v46  ;;  %12120 = vmatmul.msk.f32.gmra.mxu0 %vm7676_vm14, %v17133_v18  ;;  %v9332_v46 = vsel %vm9331_vm0, %v12449_v37, %v12450_v3  ;;  %v12460_v3 = vunpack.i.h.bf16 %v17193_v27  ;;  %vm10671_vm0 = vcmask 1042432  }
 0x866   :  { %10025 = vrot.lane.b32.xlu2 %v17007_v7, %s12908_s20  ;;  %12482 = vrot.lane.b32.xlu0 %v16120_v56, %s12918_s27  ;;  %v17246_v49 = vpop.f32.mrf.mxu1  ;;  %s12960_s27 = smov 78  }
 0x867   :  { %12127 = vmatpush.msk.msra.mxu2 %vm6416_vm2, %v9333_v33  ;;  %v8368_v18 = vpop.f32.mrf.mxu2 }
 0x868   :  { %v17251_v51 = vpop.permute.xlu2 %9614  ;;  %v17253_v26 = vpop.permute.xlu0 %9420  ;;  %v17257_v7 = vadd.f32 %v8368_v18, %v8307_v6 }
 0x869   :  { %9363 = vmatpush.msra.mxu2 %v9332_v46 }
 0x86a   :  { %12144 = vmatmul.msk.f32.gmra.mxu1 %vm7676_vm14, %v17225_v22  ;;  %v17261_v56 = vpop.f32.mrf.mxu0 }
 0x86b   :  { %10027 = vrot.lane.b32.xlu1 %v17077_v52, %s12908_s20  ;;  %v12454_v52 = vunpack.i.l.bf16 %v17093_v2  ;;  %v8501_v2 = vadd.f32 %v17201_v34, %v17197_v42  ;;  %v10127_v42 = vld [vmem:[#allocation10 + $0x18] sm:$0xff] }
 0x86c   :  { %12136 = vmatmul.msk.f32.gmra.mxu3 %vm7676_vm14, %v17207_v25  ;;  %v17267_v47 = vpop.permute.xlu1 %9527 }
 0x86d   :  { %12121 = vmatmul.msk.f32.gmra.mxu0 %vm7676_vm14, %v17079_v14  ;;  %12128 = vmatmul.msk.f32.vlgmr.msra.gmra.mxu2 %vm7676_vm14, %v17055_v61  ;;  %v8499_v14 = vadd.f32 %v17174_v24, %v17170_v50  ;;  %v17297_v50 = vpop.f32.mrf.mxu3  ;;  %v10124_v24 = vld [vmem:[#allocation10] sm:$0xff] }
 0x86e   :  { %9932 = vrot.lane.b32.xlu2 %v17149_v59, %s12958_s25  ;;  %9930 = vrot.lane.b32.xlu0 %v17112_v10, %s12958_s25  ;;  %v17277_v21 = vpop.f32.mrf.mxu1  ;;  %18107 = vst [vmem:[#allocation70_spill] sm:$0xff] %v17297_v50 }
 0x86f   :  { %18106 = vst [vmem:[#allocation38_spill] sm:$0xff] %v17277_v21  ;;  %12152 = vmatpush.msk.msrb.mxu3 %vm6416_vm2, %v17267_v47  ;;  %v8557_v33 = vpop.f32.mrf.mxu2 }
 0x870   :  { %v17285_v37 = vpop.permute.xlu2 %9715  ;;  %v9427_v61 = vpop.permute.xlu0 %9426  ;;  %v17290_v6 = vadd.f32 %v8557_v33, %v8499_v14 }
 0x871   :  { %v9432_v12 = vsel %vm9430_vm3, %v9427_v61, %v17114_v20  ;;  %9590 = vmatpush.msrb.mxu3 %v12460_v3  ;;  %v9431_v20 = vsel %vm9430_vm3, %v12454_v52, %v12455_v28  ;;  %v10126_v52 = vld [vmem:[#allocation10 + $0x10] sm:$0xff]  ;;  %vm10734_vm3 = vcmask 1041408  }
 0x872   :  { %12145 = vmatmul.msk.f32.gmra.mxu1 %vm7676_vm14, %v17166_v39  ;;  %v17294_v46 = vpop.f32.mrf.mxu0  ;;  %12137 = vmatpush.msk.msrb.mxu0 %vm6416_vm2, %v9432_v12 }
 0x873   :  { %10031 = vrot.lane.b32.xlu1 %v17149_v59, %s12908_s20 }
 0x874   :  { %9462 = vmatpush.msrb.mxu0 %v9431_v20  ;;  %v9514_v18 = vpop.permute.xlu1 %9513 }
 0x875   :  { %12129 = vmatmul.msk.f32.gmra.mxu2 %vm7676_vm14, %v17195_v13  ;;  %12138 = vmatmul.msk.f32.vlgmr.msrb.gmra.mxu0 %vm7676_vm14, %v17179_v58 }
 0x876   :  { %10130 = vperm.xlu2 %12345, %v10124_v24   ;;  %v17307_v14 = vpop.f32.mrf.mxu1  ;;  %12153 = vmatmul.msk.f32.vlgmr.msrb.gmra.mxu3 %vm7676_vm14, %v9514_v18 }
 0x877   :  { %10029 = vrot.lane.b32.xlu0 %v17112_v10, %s12908_s20  ;;  %v8560_v61 = vpop.f32.mrf.mxu2  ;;  %v17323_v10 = vpop.f32.mrf.mxu3  ;;  %s12959_s20 = smov 103  }
 0x878   :  { %v9625_v28 = vpop.permute.xlu2 %9624  ;;  %v9627_v59 = vpop.permute.xlu0 %9626  ;;  %v17316_v58 = vadd.f32 %v8560_v61, %v8501_v2  ;;  %18108 = vst [vmem:[#allocation76_spill] sm:$0xff] %v17323_v10 }
 0x879   :  { %v9630_v13 = vsel %vm9628_vm4, %v9625_v28, %v9627_v59  ;;  %12162 = vmatpush.msk.msra.mxu1 %vm6416_vm2, %v9627_v59  ;;  %v8503_v28 = vadd.f32 %v17231_v29, %v17227_v55  ;;  %v12459_v55 = vunpack.i.l.bf16 %v17193_v27  ;;  %v8505_v29 = vadd.f32 %v17261_v56, %v17257_v7 }
 0x87a   :  { %12146 = vmatmul.msk.f32.gmra.mxu1 %vm7676_vm14, %v17253_v26  ;;  %v17320_v12 = vpop.f32.mrf.mxu0  ;;  %12157 = vmatpush.msk.msra.mxu0 %vm6416_vm2, %v9630_v13 }
 0x87b   :  { %10140 = vperm.xlu1 %12344, %v10126_v52  }
 0x87c   :  { %v12463_v34 = vpop.permute.xlu1 %12462 }
 0x87d   :  { %v12465_v33 = vunpack.i.h.bf16 %v12463_v34  ;;  %v12464_v20 = vunpack.i.l.bf16 %v12463_v34  ;;  %12130 = vmatmul.msk.f32.gmra.mxu2 %vm7676_vm14, %v17131_v48  ;;  %12139 = vmatmul.msk.f32.gmra.mxu0 %vm7676_vm14, %v17225_v22 }
 0x87e   :  { %10145 = vperm.xlu2 %12345, %v10127_v42   ;;  %v17329_v24 = vpop.f32.mrf.mxu1  ;;  %12154 = vmatmul.msk.f32.gmra.mxu3 %vm7676_vm14, %v17223_v0 }
 0x87f   :  { %9689 = vmatpush.msra.mxu1 %v12465_v33  ;;  %v9629_v2 = vsel %vm9628_vm4, %v12464_v20, %v12465_v33  ;;  %v8563_v48 = vpop.f32.mrf.mxu2  ;;  %v17339_v42 = vpop.f32.mrf.mxu3 }
 0x880   :  { %v17336_v59 = vpop.permute.xlu2 %9719  ;;  %v9613_v52 = vpop.permute.xlu0 %9612  ;;  %9660 = vmatpush.msra.mxu0 %v9629_v2  ;;  %v8602_v13 = vadd.f32 %v8563_v48, %v8503_v28  ;;  %v9530_v48 = vsel %vm9529_vm5, %v12459_v55, %v12460_v3 }
 0x882   :  { %12163 = vmatmul.msk.f32.vlgmr.msra.gmra.mxu1 %vm7676_vm14, %v9613_v52  ;;  %v8679_v22 = vpop.f32.mrf.mxu0 }
 0x885   :  { %v9518_v61 = vpop.permute.xlu1 %9517  ;;  %12131 = vmatmul.msk.f32.gmra.mxu2 %vm7676_vm14, %v17207_v25  ;;  %12140 = vmatmul.msk.f32.gmra.mxu0 %vm7676_vm14, %v17166_v39 }
 0x886   :  { %v17345_v34 = vpop.f32.mrf.mxu1  ;;  %12155 = vmatmul.msk.f32.gmra.mxu3 %vm7676_vm14, %v9518_v61 }
 0x887   :  { %18109 = vst [vmem:[#allocation47_spill] sm:$0xff] %v17345_v34  ;;  %v8566_v28 = vpop.f32.mrf.mxu2 }
 0x888   :  { %v17351_v33 = vpop.permute.xlu2 %9723  ;;  %v9526_v20 = vpop.permute.xlu0 %9525  ;;  %v8604_v25 = vadd.f32 %v8566_v28, %v8505_v29  ;;  %v8716_v28 = vadd.f32 %v17320_v12, %v17316_v58  ;;  %v8718_v12 = vadd.f32 %v8679_v22, %v8602_v13 }
 0x889   :  { %v9531_v2 = vsel %vm9529_vm5, %v9526_v20, %v17267_v47  ;;  %v17359_v7 = vpop.f32.mrf.mxu3  ;;  %v8714_v47 = vadd.f32 %v17294_v46, %v17290_v6 }
 0x88a   :  { %12164 = vmatmul.msk.f32.gmra.mxu1 %vm7676_vm14, %v17251_v51  ;;  %v8682_v39 = vpop.f32.mrf.mxu0  ;;  %12147 = vmatpush.msk.msrb.mxu2 %vm6416_vm2, %v9531_v2 }
 0x88c   :  { %9561 = vmatpush.msrb.mxu2 %v9530_v48 }
 0x88d   :  { %v9617_v10 = vpop.permute.xlu1 %9616  ;;  %12141 = vmatmul.msk.f32.gmra.mxu0 %vm7676_vm14, %v17253_v26  ;;  %12148 = vmatmul.msk.f32.vlgmr.msrb.gmra.mxu2 %vm7676_vm14, %v9514_v18 }
 0x88f   :  { %v17364_v56 = vpop.f32.mrf.mxu1 }
 0x890   :  { %18110 = vst [vmem:[#allocation55_spill] sm:$0xff] %v17364_v56  ;;  %v9741_v29 = vpop.permute.xlu2 %9740  ;;  %v9520_v20 = vpop.permute.xlu0 %9519 }
 0x891   :  { %v8772_v2 = vpop.f32.mrf.mxu2  ;;  %12156 = vmatmul.msk.f32.gmra.mxu3 %vm7676_vm14, %v9520_v20 }
 0x892   :  { %v17369_v27 = vadd.f32 %v8772_v2, %v8714_v47  ;;  %12165 = vmatmul.msk.f32.gmra.mxu1 %vm7676_vm14, %v9617_v10  ;;  %v17372_v3 = vpop.f32.mrf.mxu0  ;;  %v17379_v6 = vpop.f32.mrf.mxu3 }
 0x893   :  { %18111 = vst [vmem:[#allocation56_spill] sm:$0xff] %v17379_v6 }
 0x895   :  { %v12468_v55 = vpop.permute.xlu1 %12467  ;;  %12149 = vmatmul.msk.f32.gmra.mxu2 %vm7676_vm14, %v17223_v0  ;;  %12158 = vmatmul.msk.f32.vlgmr.msra.gmra.mxu0 %vm7676_vm14, %v9613_v52 }
 0x896   :  { %v12470_v46 = vunpack.i.h.bf16 %v12468_v55  ;;  %v12469_v18 = vunpack.i.l.bf16 %v12468_v55 }
 0x897   :  { %v17377_v26 = vpop.f32.mrf.mxu1 }
 0x898   :  { %v9840_v48 = vpop.permute.xlu2 %9839  ;;  %v9743_v47 = vpop.permute.xlu0 %9742  ;;  %v9745_v52 = vsel %vm9744_vm15, %v12469_v18, %v12470_v46 }
 0x899   :  { %v9746_v2 = vsel %vm9744_vm15, %v9741_v29, %v9743_v47  ;;  %v8775_v56 = vpop.f32.mrf.mxu2  ;;  %12172 = vmatpush.msk.msra.mxu3 %vm6416_vm2, %v9743_v47 }
 0x89a   :  { %v17384_v21 = vadd.f32 %v8775_v56, %v8716_v28  ;;  %v17386_v0 = vpop.f32.mrf.mxu0  ;;  %12167 = vmatpush.msk.msra.mxu2 %vm6416_vm2, %v9746_v2 }
 0x89b   :  { %9805 = vmatpush.msra.mxu3 %v12470_v46  ;;  %v17397_v46 = vpop.f32.mrf.mxu3 }
 0x89c   :  { %9776 = vmatpush.msra.mxu2 %v9745_v52  ;;  %18113 = vst [vmem:[#allocation35_spill] sm:$0xff] %v17397_v46 }
 0x89d   :  { %v9619_v6 = vpop.permute.xlu1 %9618  ;;  %12150 = vmatmul.msk.f32.gmra.mxu2 %vm7676_vm14, %v9518_v61  ;;  %12159 = vmatmul.msk.f32.gmra.mxu0 %vm7676_vm14, %v17251_v51 }
 0x89e   :  { %12166 = vmatmul.msk.f32.gmra.mxu1 %vm7676_vm14, %v9619_v6 }
 0x89f   :  { %v17392_v58 = vpop.f32.mrf.mxu1 }
 0x8a0   :  { %18112 = vst [vmem:[#allocation65_spill] sm:$0xff] %v17392_v58  ;;  %v9728_v56 = vpop.permute.xlu2 %9727  ;;  %v9718_v29 = vpop.permute.xlu0 %9717 }
 0x8a1   :  { %v9732_v55 = vsel %vm9731_vm8, %v17285_v37, %v9718_v29  ;;  %v8778_v28 = vpop.f32.mrf.mxu2  ;;  %v8720_v37 = vadd.f32 %v8682_v39, %v8604_v25 }
 0x8a2   :  { %v17399_v18 = vadd.f32 %v8778_v28, %v8718_v12  ;;  %v17401_v61 = vpop.f32.mrf.mxu0  ;;  %12173 = vmatmul.msk.f32.vlgmr.msra.gmra.mxu3 %vm7676_vm14, %v9732_v55 }
 0x8a5   :  { %v12473_v51 = vpop.permute.xlu1 %12472  ;;  %12151 = vmatmul.msk.f32.gmra.mxu2 %vm7676_vm14, %v9520_v20  ;;  %12160 = vmatmul.msk.f32.gmra.mxu0 %vm7676_vm14, %v9617_v10  ;;  %v17416_v20 = vpop.f32.mrf.mxu3 }
 0x8a6   :  { %v12475_v22 = vunpack.i.h.bf16 %v12473_v51  ;;  %v12474_v47 = vunpack.i.l.bf16 %v12473_v51 }
 0x8a7   :  { %v17406_v13 = vpop.f32.mrf.mxu1 }
 0x8a8   :  { %18114 = vst [vmem:[#allocation32_spill] sm:$0xff] %v17406_v13  ;;  %v17408_v2 = vpop.permute.xlu2 %9833  ;;  %v9842_v52 = vpop.permute.xlu0 %9841  ;;  %v9844_v10 = vsel %vm9843_vm10, %v12474_v47, %v12475_v22 }
 0x8a9   :  { %v9845_v12 = vsel %vm9843_vm10, %v9840_v48, %v9842_v52  ;;  %v8781_v29 = vpop.f32.mrf.mxu2  ;;  %12182 = vmatpush.msk.msrb.mxu1 %vm6416_vm2, %v9842_v52 }
 0x8aa   :  { %v17411_v28 = vadd.f32 %v8781_v29, %v8720_v37  ;;  %v17413_v46 = vpop.f32.mrf.mxu0  ;;  %12177 = vmatpush.msk.msrb.mxu0 %vm6416_vm2, %v9845_v12 }
 0x8ab   :  { %9904 = vmatpush.msrb.mxu1 %v12475_v22 }
 0x8ac   :  { %9875 = vmatpush.msrb.mxu0 %v9844_v10 }
 0x8ad   :  { %v9828_v51 = vpop.permute.xlu1 %9827  ;;  %12161 = vmatmul.msk.f32.gmra.mxu0 %vm7676_vm14, %v9619_v6  ;;  %12168 = vmatmul.msk.f32.vlgmr.msra.gmra.mxu2 %vm7676_vm14, %v9732_v55 }
 0x8ae   :  { %12183 = vmatmul.msk.f32.vlgmr.msrb.gmra.mxu1 %vm7676_vm14, %v9828_v51 }
 0x8af   :  { %v17420_v25 = vpop.f32.mrf.mxu1 }
 0x8b0   :  { %18115 = vst [vmem:[#allocation66_spill] sm:$0xff] %v17420_v25  ;;  %v9939_v39 = vpop.permute.xlu2 %9938  ;;  %v9722_v48 = vpop.permute.xlu0 %9721 }
 0x8b1   :  { %v9733_v37 = vsel %vm9731_vm8, %v17336_v59, %v9722_v48  ;;  %v17425_v52 = vpop.f32.mrf.mxu2 }
 0x8b2   :  { %v17427_v22 = vpop.f32.mrf.mxu0  ;;  %12174 = vmatmul.msk.f32.gmra.mxu3 %vm7676_vm14, %v9733_v37 }
 0x8b4   :  { %v17430_v47 = vpop.f32.mrf.mxu3 }
 0x8b5   :  { %18116 = vst [vmem:[#allocation75_spill] sm:$0xff] %v17430_v47  ;;  %v9830_v6 = vpop.permute.xlu1 %9829  ;;  %12169 = vmatmul.msk.f32.gmra.mxu2 %vm7676_vm14, %v9733_v37  ;;  %12178 = vmatmul.msk.f32.vlgmr.msrb.gmra.mxu0 %vm7676_vm14, %v9828_v51 }
 0x8b6   :  { %12184 = vmatmul.msk.f32.gmra.mxu1 %vm7676_vm14, %v9830_v6 }
 0x8b7   :  { %v17434_v55 = vpop.f32.mrf.mxu1 }
 0x8b8   :  { %v10040_v12 = vpop.permute.xlu2 %10039  ;;  %v9726_v29 = vpop.permute.xlu0 %9725 }
 0x8b9   :  { %v9734_v59 = vsel %vm9731_vm8, %v17351_v33, %v9726_v29  ;;  %v17439_v10 = vpop.f32.mrf.mxu2  ;;  %12202 = vmatpush.msk.msra.mxu1 %vm6416_vm2, %v10040_v12 }
 0x8ba   :  { %v17442_v48 = vpop.f32.mrf.mxu0  ;;  %12175 = vmatmul.msk.f32.gmra.mxu3 %vm7676_vm14, %v9734_v59 }
 0x8bc   :  { %v17445_v37 = vpop.f32.mrf.mxu3 }
 0x8bd   :  { %18117 = vst [vmem:[#allocation39_spill] sm:$0xff] %v17445_v37  ;;  %v9832_v51 = vpop.permute.xlu1 %9831  ;;  %12170 = vmatmul.msk.f32.gmra.mxu2 %vm7676_vm14, %v9734_v59  ;;  %12179 = vmatmul.msk.f32.gmra.mxu0 %vm7676_vm14, %v9830_v6 }
 0x8be   :  { %12185 = vmatmul.msk.f32.gmra.mxu1 %vm7676_vm14, %v9832_v51 }
 0x8bf   :  { %v17449_v25 = vpop.f32.mrf.mxu1 }
 0x8c0   :  { %18118 = vst [vmem:[#allocation73_spill] sm:$0xff] %v17449_v25  ;;  %v9730_v33 = vpop.permute.xlu0 %9729 }
 0x8c1   :  { %v9735_v29 = vsel %vm9731_vm8, %v9728_v56, %v9730_v33  ;;  %v17453_v13 = vpop.f32.mrf.mxu2 }
 0x8c2   :  { %v17455_v47 = vpop.f32.mrf.mxu0  ;;  %12176 = vmatmul.msk.f32.gmra.mxu3 %vm7676_vm14, %v9735_v29 }
 0x8c4   :  { %v17458_v37 = vpop.f32.mrf.mxu3 }
 0x8c5   :  { %v12478_v34 = vpop.permute.xlu1 %12477  ;;  %18119 = vst [vmem:[#allocation79_spill] sm:$0xff] %v17458_v37  ;;  %12171 = vmatmul.msk.f32.gmra.mxu2 %vm7676_vm14, %v9735_v29  ;;  %12180 = vmatmul.msk.f32.gmra.mxu0 %vm7676_vm14, %v9832_v51  ;;  %v7815_v29 = vadd.f32 %v16634_v60, %v16690_v41 }
 0x8c6   :  { %12186 = vmatmul.msk.f32.gmra.mxu1 %vm7676_vm14, %v17408_v2  ;;  %v12480_v6 = vunpack.i.h.bf16 %v12478_v34  ;;  %v12479_v59 = vunpack.i.l.bf16 %v12478_v34 }
 0x8c7   :  { %v17464_v56 = vpop.f32.mrf.mxu1 }
 0x8c8   :  { %18120 = vst [vmem:[#allocation45_spill] sm:$0xff] %v17464_v56  ;;  %v9941_v33 = vpop.permute.xlu0 %9940  ;;  %v9943_v51 = vsel %vm9942_vm11, %v12479_v59, %v12480_v6 }
 0x8c9   :  { %v9944_v25 = vsel %vm9942_vm11, %v9939_v39, %v9941_v33  ;;  %v17466_v44 = vpop.f32.mrf.mxu2  ;;  %12192 = vmatpush.msk.msrb.mxu3 %vm6416_vm2, %v9941_v33  ;;  %v7914_v39 = vadd.f32 %v16809_v4, %v7815_v29 }
 0x8ca   :  { %v17469_v58 = vpop.f32.mrf.mxu0  ;;  %12187 = vmatpush.msk.msrb.mxu2 %vm6416_vm2, %v9944_v25 }
 0x8cb   :  { %10003 = vmatpush.msrb.mxu3 %v12480_v6  ;;  %v8012_v60 = vadd.f32 %v16765_v53, %v7914_v39 }
 0x8cc   :  { %9974 = vmatpush.msrb.mxu2 %v9943_v51  ;;  %v9205_v33 = vpop.f32.mrf.mxu3 }
 0x8cd   :  { %v10038_v34 = vpop.permute.xlu1 %10037  ;;  %12181 = vmatmul.msk.f32.gmra.mxu0 %vm7676_vm14, %v17408_v2  ;;  %v8110_v4 = vadd.f32 %v16928_v45, %v8012_v60 }
 0x8ce   :  { %v10043_v37 = vsel %vm10041_vm6, %v10038_v34, %v10040_v12  ;;  %v10125_v12 = vld [vmem:[#allocation10 + $0x8] sm:$0xff] }
 0x8cf   :  { %12197 = vmatpush.msk.msra.mxu0 %vm6416_vm2, %v10043_v37  ;;  %v17479_v56 = vpop.f32.mrf.mxu1  ;;  %10135 = vperm.xlu0 %12486, %v10125_v12   ;;  %v8209_v6 = vadd.f32 %v16906_v38, %v8110_v4 }
 0x8d0   :  { %18121 = vst [vmem:[#allocation57_spill] sm:$0xff] %v17479_v56  ;;  %v9927_v25 = vpop.permute.xlu0 %9926 }
 0x8d1   :  { %v17481_v50 = vpop.f32.mrf.mxu2  ;;  %12188 = vmatmul.msk.f32.vlgmr.msrb.gmra.mxu2 %vm7676_vm14, %v9927_v25  ;;  %12193 = vmatmul.msk.f32.vlgmr.msrb.gmra.mxu3 %vm7676_vm14, %v9927_v25  ;;  %v8308_v53 = vadd.f32 %v17048_v63, %v8209_v6  ;;  %v10026_v25 = vpop.permute.xlu2 %10025 }
 0x8d2   :  { %v17486_v41 = vpop.f32.mrf.mxu0 }
 0x8d3   :  { %v8407_v38 = vadd.f32 %v17061_v40, %v8308_v53 }
 0x8d5   :  { %v9929_v59 = vpop.permute.xlu1 %9928  ;;  %v8506_v4 = vadd.f32 %v17187_v8, %v8407_v38 }
 0x8d7   :  { %v9304_v2 = vpop.f32.mrf.mxu1  ;;  %v17489_v37 = vpop.f32.mrf.mxu3 }
 0x8d8   :  { %v12483_v51 = vpop.permute.xlu0 %12482 }
 0x8d9   :  { %v12485_v29 = vunpack.i.h.bf16 %v12483_v51  ;;  %v12484_v34 = vunpack.i.l.bf16 %v12483_v51  ;;  %v9170_v56 = vpop.f32.mrf.mxu2  ;;  %12189 = vmatmul.msk.f32.gmra.mxu2 %vm7676_vm14, %v9929_v59  ;;  %12194 = vmatmul.msk.f32.gmra.mxu3 %vm7676_vm14, %v9929_v59  ;;  %v9933_v53 = vpop.permute.xlu2 %9932 }
 0x8da   :  { %v9269_v39 = vpop.f32.mrf.mxu0 }
 0x8db   :  { %10102 = vmatpush.msra.mxu1 %v12485_v29  ;;  %v10042_v45 = vsel %vm10041_vm6, %v12484_v34, %v12485_v29  ;;  %v8605_v29 = vadd.f32 %v17221_v43, %v8506_v4 }
 0x8dc   :  { %10073 = vmatpush.msra.mxu0 %v10042_v45  ;;  %12203 = vmatmul.msk.f32.vlgmr.msra.gmra.mxu1 %vm7676_vm14, %v10026_v25 }
 0x8dd   :  { %12198 = vmatmul.msk.f32.vlgmr.msra.gmra.mxu0 %vm7676_vm14, %v10026_v25  ;;  %v10028_v51 = vpop.permute.xlu1 %10027  ;;  %v8721_v40 = vadd.f32 %v17307_v14, %v8605_v29 }
 0x8df   :  { %v17499_v60 = vpop.f32.mrf.mxu1  ;;  %v17501_v12 = vpop.f32.mrf.mxu3  ;;  %v8820_v38 = vadd.f32 %v17339_v42, %v8721_v40 }
 0x8e0   :  { %v9931_v59 = vpop.permute.xlu0 %9930 }
 0x8e1   :  { %v9173_v63 = vpop.f32.mrf.mxu2  ;;  %12190 = vmatmul.msk.f32.gmra.mxu2 %vm7676_vm14, %v9931_v59  ;;  %12195 = vmatmul.msk.f32.gmra.mxu3 %vm7676_vm14, %v9931_v59  ;;  %v8919_v4 = vadd.f32 %v17377_v26, %v8820_v38  ;;  %v8914_v59 = vadd.f32 %v17386_v0, %v17384_v21 }
 0x8e2   :  { %v9272_v6 = vpop.f32.mrf.mxu0 }
 0x8e3   :  { %v9018_v14 = vadd.f32 %v17416_v20, %v8919_v4 }
 0x8e4   :  { %12204 = vmatmul.msk.f32.gmra.mxu1 %vm7676_vm14, %v10028_v51 }
 0x8e5   :  { %12199 = vmatmul.msk.f32.gmra.mxu0 %vm7676_vm14, %v10028_v51  ;;  %v9013_v51 = vadd.f32 %v17439_v10, %v8914_v59  ;;  %v10032_v21 = vpop.permute.xlu1 %10031 }
 0x8e7   :  { %v17510_v34 = vpop.f32.mrf.mxu1  ;;  %v17512_v8 = vpop.f32.mrf.mxu3  ;;  %v9111_v42 = vadd.f32 %v17442_v48, %v9013_v51 }
 0x8e8   :  { %18122 = vst [vmem:[#allocation68_spill] sm:$0xff] %v17512_v8 }
 0x8e9   :  { %v9176_v25 = vpop.f32.mrf.mxu2  ;;  %12191 = vmatmul.msk.f32.gmra.mxu2 %vm7676_vm14, %v9933_v53  ;;  %12196 = vmatmul.msk.f32.gmra.mxu3 %vm7676_vm14, %v9933_v53  ;;  %v10030_v45 = vpop.permute.xlu0 %10029  ;;  %v9116_v53 = vadd.f32 %v17434_v55, %v9018_v14  ;;  %v9210_v20 = vadd.f32 %v9170_v56, %v9111_v42 }
 0x8ea   :  { %v9275_v43 = vpop.f32.mrf.mxu0 }
 0x8eb   :  { %v9215_v26 = vadd.f32 %v9205_v33, %v9116_v53  ;;  %v9309_v59 = vadd.f32 %v9269_v39, %v9210_v20 }
 0x8ec   :  { %12205 = vmatmul.msk.f32.gmra.mxu1 %vm7676_vm14, %v10030_v45 }
 0x8ed   :  { %12200 = vmatmul.msk.f32.gmra.mxu0 %vm7676_vm14, %v10030_v45  ;;  %v8916_v45 = vadd.f32 %v17401_v61, %v17399_v18  ;;  %v9314_v38 = vadd.f32 %v9304_v2, %v9215_v26  ;;  %v8918_v18 = vadd.f32 %v17413_v46, %v17411_v28 }
 0x8ef   :  { %v17524_v29 = vpop.f32.mrf.mxu1  ;;  %v9403_v0 = vpop.f32.mrf.mxu3  ;;  %v9015_v55 = vadd.f32 %v17453_v13, %v8916_v45  ;;  %v9017_v2 = vadd.f32 %v17466_v44, %v8918_v18  ;;  %v10179_v18 = vld [vmem:[#allocation11 + $0x78] sm:$0xff] }
 0x8f0   :  { %v9413_v10 = vadd.f32 %v9403_v0, %v9314_v38  ;;  %10193 = vmatpush.msra.mxu2 %v10179_v18  ;;  %v18131_v18 = vld [vmem:[#allocation53_spill] sm:$0xff] }
 0x8f1   :  { %v17527_v8 = vpop.f32.mrf.mxu2  ;;  %v9113_v14 = vadd.f32 %v17455_v47, %v9015_v55  ;;  %v9115_v26 = vadd.f32 %v17469_v58, %v9017_v2  ;;  %v10177_v2 = vld [vmem:[#allocation11 + $0x68] sm:$0xff] }
 0x8f2   :  { %v17530_v40 = vpop.f32.mrf.mxu0 }
 0x8f3   :  { %v9212_v61 = vadd.f32 %v9173_v63, %v9113_v14  ;;  %v9214_v0 = vadd.f32 %v9176_v25, %v9115_v26 }
 0x8f4   :  { %12206 = vmatmul.msk.f32.gmra.mxu1 %vm7676_vm14, %v10032_v21 }
 0x8f5   :  { %12201 = vmatmul.msk.f32.gmra.mxu0 %vm7676_vm14, %v10032_v21  ;;  %v9311_v42 = vadd.f32 %v9272_v6, %v9212_v61  ;;  %v9313_v47 = vadd.f32 %v9275_v43, %v9214_v0  ;;  %v10178_v61 = vld [vmem:[#allocation11 + $0x70] sm:$0xff]  ;;  %vm10395_vm14 = vcmask 1046528  }
 0x8f6   :  { %10194 = vmatpush.msra.mxu2 %v10178_v61  ;;  %v18132_v61 = vld [vmem:[#allocation63_spill] sm:$0xff] }
 0x8f7   :  { %v9502_v4 = vpop.f32.mrf.mxu1 }
 0x8f8   :  { %v17537_v48 = vadd.f32 %v9502_v4, %v9413_v10  ;;  %10195 = vmatpush.msra.mxu2 %v10177_v2 }
 0x8f9   :  { %v9368_v33 = vpop.f32.mrf.mxu2  ;;  %v17548_v10 = vpop.f32.mrf.mxu3 }
 0x8fa   :  { %18123 = vst [vmem:[#allocation78_spill] sm:$0xff] %v17537_v48  ;;  %v9408_v51 = vadd.f32 %v9368_v33, %v9309_v59  ;;  %v9467_v53 = vpop.f32.mrf.mxu0  ;;  %v7806_v33 = vadd.f32 %v16545_v9, %v16613_v17 }
 0x8fc   :  { %v17542_v56 = vadd.f32 %v9467_v53, %v9408_v51  ;;  %v7908_v53 = vadd.f32 %v16716_v36, %v7806_v33  ;;  %v18129_v33 = vld [vmem:[#allocation67_spill] sm:$0xff] }
 0x8ff   :  { %v17552_v28 = vpop.f32.mrf.mxu1 }
 0x901   :  { %v9371_v13 = vpop.f32.mrf.mxu2  ;;  %v17558_v58 = vpop.f32.mrf.mxu3 }
 0x902   :  { %v9410_v39 = vadd.f32 %v9371_v13, %v9311_v42  ;;  %v9470_v21 = vpop.f32.mrf.mxu0  ;;  %v7809_v42 = vadd.f32 %v16573_v62, %v16638_v54  ;;  %v8006_v13 = vadd.f32 %v16668_v11, %v7908_v53  ;;  %v18127_v62 = vld [vmem:[#allocation74_spill] sm:$0xff]  ;;  %v18128_v11 = vld [vmem:[#allocation77_spill] sm:$0xff] }
 0x903   :  { %v18130_v53 = vld [vmem:[#allocation69_spill] sm:$0xff] }
 0x904   :  { %v17546_v45 = vadd.f32 %v9470_v21, %v9410_v39  ;;  %v7910_v9 = vadd.f32 %v16749_v15, %v7809_v42  ;;  %v8104_v17 = vadd.f32 %v16840_v5, %v8006_v13  ;;  %v10176_v21 = vld [vmem:[#allocation11 + $0x60] sm:$0xff]  ;;  %v7812_v15 = vadd.f32 %v18130_v53, %v18129_v33 }
 0x905   :  { %10196 = vmatpush.msra.mxu2 %v10176_v21  ;;  %v10172_v13 = vld [vmem:[#allocation11 + $0x40] sm:$0xff] }
 0x906   :  { %v8008_v54 = vadd.f32 %v18127_v62, %v7910_v9  ;;  %v10171_v9 = vld [vmem:[#allocation11 + $0x38] sm:$0xff] }
 0x907   :  { %v17560_v6 = vpop.f32.mrf.mxu1 }
 0x908   :  { %v8106_v5 = vadd.f32 %v18131_v18, %v8008_v54  ;;  %v10170_v54 = vld [vmem:[#allocation11 + $0x30] sm:$0xff] }
 0x909   :  { %v9374_v38 = vpop.f32.mrf.mxu2  ;;  %v17566_v4 = vpop.f32.mrf.mxu3 }
 0x90a   :  { %v9412_v20 = vadd.f32 %v9374_v38, %v9313_v47  ;;  %v9473_v55 = vpop.f32.mrf.mxu0  ;;  %v10175_v47 = vld [vmem:[#allocation11 + $0x58] sm:$0xff]  ;;  %v10174_v38 = vld [vmem:[#allocation11 + $0x50] sm:$0xff] }
 0x90b   :  { %10197 = vmatpush.msra.mxu2 %v10175_v47  ;;  %v18133_v47 = vld [vmem:[#allocation72_spill] sm:$0xff] }
 0x90c   :  { %v17550_v46 = vadd.f32 %v9473_v55, %v9412_v20  ;;  %v8203_v20 = vadd.f32 %v18128_v11, %v8104_v17  ;;  %v10173_v55 = vld [vmem:[#allocation11 + $0x48] sm:$0xff]  ;;  %v18134_v17 = vld [vmem:[#allocation52_spill] sm:$0xff]  ;;  %v18135_v11 = vld [vmem:[#allocation34_spill] sm:$0xff] }
 0x90d   :  { %10198 = vmatpush.msra.mxu2 %v10174_v38  ;;  %v8205_v38 = vadd.f32 %v18134_v17, %v8106_v5  ;;  %v8912_v5 = vadd.f32 %v17372_v3, %v17369_v27 }
 0x90e   :  { %v8302_v2 = vadd.f32 %v18132_v61, %v8203_v20  ;;  %v18136_v20 = vld [vmem:[#allocation46_spill] sm:$0xff]  ;;  %v18137_v61 = vld [vmem:[#allocation71_spill] sm:$0xff] }
 0x90f   :  { %v17574_v51 = vpop.f32.mrf.mxu1  ;;  %10199 = vmatpush.msra.mxu2 %v10173_v55 }
 0x910   :  { %v8401_v33 = vadd.f32 %v18135_v11, %v8302_v2 }
 0x911   :  { %v17554_v44 = vpop.f32.mrf.mxu2  ;;  %10200 = vmatpush.msra.mxu2 %v10172_v13  ;;  %v10168_v13 = vld [vmem:[#allocation11 + $0x20] sm:$0xff] }
 0x912   :  { %v17556_v63 = vpop.f32.mrf.mxu0  ;;  %v8500_v55 = vadd.f32 %v17086_v30, %v8401_v33  ;;  %v18140_v30 = vld [vmem:[#allocation54_spill] sm:$0xff] }
 0x913   :  { %10201 = vmatpush.msra.mxu2 %v10171_v9  ;;  %v18139_v9 = vld [vmem:[#allocation61_spill] sm:$0xff] }
 0x914   :  { %v17580_v26 = vpop.f32.mrf.mxu3 }
 0x915   :  { %18124 = vst [vmem:[#allocation40_spill] sm:$0xff] %v17580_v26  ;;  %v10169_v26 = vld [vmem:[#allocation11 + $0x28] sm:$0xff]  ;;  %10202 = vmatpush.msra.mxu2 %v10170_v54 }
 0x917   :  { %10203 = vmatpush.msra.mxu2 %v10169_v26  ;;  %v10167_v26 = vld [vmem:[#allocation11 + $0x18] sm:$0xff] }
 0x919   :  { %v17562_v25 = vpop.f32.mrf.mxu2  ;;  %10204 = vmatpush.msra.mxu2 %v10168_v13  ;;  %v10164_v13 = vld [vmem:[#allocation11] sm:$0xff] }
 0x91a   :  { %v17564_v43 = vpop.f32.mrf.mxu0 }
 0x91b   :  { %v17588_v0 = vpop.f32.mrf.mxu1  ;;  %10205 = vmatpush.msra.mxu2 %v10167_v26 }
 0x91c   :  { %18126 = vst [vmem:[#allocation33_spill] sm:$0xff] %v17588_v0  ;;  %v8304_v0 = vadd.f32 %v18137_v61, %v8205_v38  ;;  %v9011_v38 = vadd.f32 %v17425_v52, %v8912_v5 }
 0x91e   :  { %v8403_v17 = vadd.f32 %v18139_v9, %v8304_v0  ;;  %v9109_v0 = vadd.f32 %v17427_v22, %v9011_v38 }
 0x920   :  { %v8502_v33 = vadd.f32 %v17121_v32, %v8403_v17  ;;  %v10165_v32 = vld [vmem:[#allocation11 + $0x8] sm:$0xff] }
 0x921   :  { %v17568_v59 = vpop.f32.mrf.mxu2 }
 0x922   :  { %v17572_v14 = vpop.f32.mrf.mxu0  ;;  %v8601_v52 = vadd.f32 %v17147_v35, %v8502_v33  ;;  %v18145_v33 = vld [vmem:[#allocation75_spill] sm:$0xff] }
 0x925   :  { %v17596_v42 = vpop.f32.mrf.mxu3 }
 0x929   :  { %v17582_v39 = vpop.f32.mrf.mxu2 }
 0x92a   :  { %v17586_v36 = vpop.f32.mrf.mxu0 }
 0x92b   :  { %18125 = vst [vmem:[#allocation42_spill] sm:$0xff] %v17586_v36  ;;  %v7912_v36 = vadd.f32 %v18133_v47, %v7812_v15  ;;  %v17601_v62 = vpop.f32.mrf.mxu1  ;;  %v18138_v15 = vld [vmem:[#allocation62_spill] sm:$0xff] }
 0x92d   :  { %v8010_v18 = vadd.f32 %v18136_v20, %v7912_v36  ;;  %v8599_v36 = vadd.f32 %v17099_v16, %v8500_v55  ;;  %v10180_v16 = vld [vmem:[#allocation11 + $0x80] sm:$0xff] }
 0x92e   :  { %10237 = vmatpush.msra.mxu3 %v10180_v16 }
 0x92f   :  { %v8108_v47 = vadd.f32 %v18138_v15, %v8010_v18  ;;  %v8715_v54 = vadd.f32 %v17217_v31, %v8599_v36  ;;  %v10166_v18 = vld [vmem:[#allocation11 + $0x10] sm:$0xff]  ;;  %v9208_v31 = vadd.f32 %v17481_v50, %v9109_v0  ;;  %v18143_v36 = vld [vmem:[#allocation36_spill] sm:$0xff]  ;;  %v18148_v0 = vld [vmem:[#allocation73_spill] sm:$0xff] }
 0x930   :  { %10206 = vmatpush.msra.mxu2 %v10166_v18  ;;  %v18141_v50 = vld [vmem:[#allocation70_spill] sm:$0xff] }
 0x931   :  { %v17598_v21 = vpop.f32.mrf.mxu2  ;;  %v8207_v11 = vadd.f32 %v18140_v30, %v8108_v47  ;;  %v8814_v61 = vadd.f32 %v17255_v57, %v8715_v54  ;;  %v9307_v5 = vadd.f32 %v17486_v41, %v9208_v31  ;;  %v18144_v30 = vld [vmem:[#allocation47_spill] sm:$0xff]  ;;  %v18147_v41 = vld [vmem:[#allocation56_spill] sm:$0xff] }
 0x932   :  { %v17605_v53 = vpop.f32.mrf.mxu0  ;;  %10207 = vmatpush.msra.mxu2 %v10165_v32 }
 0x933   :  { %v17623_v20 = vpop.f32.mrf.mxu1  ;;  %v8306_v27 = vadd.f32 %v17016_v1, %v8207_v11  ;;  %v8717_v1 = vadd.f32 %v17246_v49, %v8601_v52  ;;  %v8913_v15 = vadd.f32 %v17329_v24, %v8814_v61  ;;  %v9406_v49 = vadd.f32 %v17527_v8, %v9307_v5  ;;  %v18149_v52 = vld [vmem:[#allocation32_spill] sm:$0xff]  ;;  %v18152_v5 = vld [vmem:[#allocation55_spill] sm:$0xff] }
 0x934   :  { %10208 = vmatpush.msra.mxu2 %v10164_v13  ;;  %v18151_v13 = vld [vmem:[#allocation39_spill] sm:$0xff] }
 0x935   :  { %v17611_v48 = vpop.f32.mrf.mxu3  ;;  %v8405_v55 = vadd.f32 %v17019_v19, %v8306_v27  ;;  %v9012_v57 = vadd.f32 %v17359_v7, %v8913_v15  ;;  %v8816_v9 = vadd.f32 %v18141_v50, %v8717_v1  ;;  %v18142_v19 = vld [vmem:[#allocation65_spill] sm:$0xff]  ;;  %v18146_v7 = vld [vmem:[#allocation38_spill] sm:$0xff]  ;;  %v9505_v18 = vadd.f32 %v17530_v40, %v9406_v49  ;;  %v18150_v1 = vld [vmem:[#allocation76_spill] sm:$0xff] }
 0x936   :  { %v18154_v49 = vld [vmem:[#allocation35_spill] sm:$0xff] }
 0x937   :  { %v8504_v35 = vadd.f32 %v17157_v23, %v8405_v55  ;;  %v9110_v17 = vadd.f32 %v18142_v19, %v9012_v57  ;;  %v8915_v11 = vadd.f32 %v18144_v30, %v8816_v9  ;;  %v9604_v55 = vadd.f32 %v17554_v44, %v9505_v18  ;;  %v18153_v9 = vld [vmem:[#allocation45_spill] sm:$0xff] }
 0x939   :  { %v17615_v2 = vpop.f32.mrf.mxu2  ;;  %v8603_v38 = vadd.f32 %v18143_v36, %v8504_v35  ;;  %v9209_v54 = vadd.f32 %v18145_v33, %v9110_v17  ;;  %v9014_v26 = vadd.f32 %v18147_v41, %v8915_v11  ;;  %v18155_v11 = vld [vmem:[#allocation66_spill] sm:$0xff]  ;;  %v18156_v41 = vld [vmem:[#allocation79_spill] sm:$0xff] }
 0x93a   :  { %v17626_v3 = vpop.f32.mrf.mxu0 }
 0x93b   :  { %v17645_v24 = vpop.f32.mrf.mxu1  ;;  %v8719_v27 = vadd.f32 %v18146_v7, %v8603_v38  ;;  %v9308_v16 = vadd.f32 %v18148_v0, %v9209_v54  ;;  %v9112_v8 = vadd.f32 %v18149_v52, %v9014_v26 }
 0x93d   :  { %v17635_v47 = vpop.f32.mrf.mxu3  ;;  %v9407_v61 = vadd.f32 %v17489_v37, %v9308_v16  ;;  %v8818_v15 = vadd.f32 %v18150_v1, %v8719_v27  ;;  %v9211_v35 = vadd.f32 %v18151_v13, %v9112_v8  ;;  %v9703_v37 = vadd.f32 %v17556_v63, %v9604_v55 }
 0x93e   :  { %v9606_v27 = vadd.f32 %v17562_v25, %v17542_v56 }
 0x93f   :  { %v9506_v57 = vadd.f32 %v17499_v60, %v9407_v61  ;;  %v8917_v50 = vadd.f32 %v18152_v5, %v8818_v15  ;;  %v9310_v40 = vadd.f32 %v18153_v9, %v9211_v35  ;;  %v9819_v60 = vadd.f32 %v17598_v21, %v9703_v37  ;;  %v18157_v21 = vld [vmem:[#allocation57_spill] sm:$0xff]  ;;  %v18158_v61 = vld [vmem:[#allocation68_spill] sm:$0xff] }
 0x941   :  { %v17637_v22 = vpop.f32.mrf.mxu2  ;;  %v9605_v19 = vadd.f32 %v17548_v10, %v9506_v57  ;;  %v9016_v36 = vadd.f32 %v18154_v49, %v8917_v50  ;;  %v9409_v44 = vadd.f32 %v17501_v12, %v9310_v40  ;;  %v9918_v0 = vadd.f32 %v17605_v53, %v9819_v60 }
 0x942   :  { %v17650_v23 = vpop.f32.mrf.mxu0 }
 0x943   :  { %v17670_v17 = vpop.f32.mrf.mxu1  ;;  %v9704_v38 = vadd.f32 %v17552_v28, %v9605_v19  ;;  %v9114_v33 = vadd.f32 %v18155_v11, %v9016_v36  ;;  %v9508_v54 = vadd.f32 %v17510_v34, %v9409_v44 }
 0x945   :  { %v17658_v32 = vpop.f32.mrf.mxu3  ;;  %v9820_v10 = vadd.f32 %v17596_v42, %v9704_v38  ;;  %v9213_v26 = vadd.f32 %v18156_v41, %v9114_v33  ;;  %v9607_v12 = vadd.f32 %v17558_v58, %v9508_v54  ;;  %v9705_v42 = vadd.f32 %v17564_v43, %v9606_v27  ;;  %v10131_v58 = vpop.permute.xlu2 %10130  ;;  %v18159_v33 = vld [vmem:[#allocation78_spill] sm:$0xff]  ;;  %v18161_v27 = vld [vmem:[#allocation33_spill] sm:$0xff] }
 0x946   :  { %v9608_v43 = vadd.f32 %v17568_v59, %v17546_v45  ;;  %v10136_v45 = vpop.permute.xlu0 %10135 }
 0x947   :  { %v9919_v28 = vadd.f32 %v17601_v62, %v9820_v10  ;;  %v9312_v16 = vadd.f32 %v18157_v21, %v9213_v26  ;;  %v9706_v18 = vadd.f32 %v17560_v6, %v9607_v12  ;;  %v9821_v62 = vadd.f32 %v17615_v2, %v9705_v42  ;;  %v18162_v26 = vld [vmem:[#allocation42_spill] sm:$0xff] }
 0x949   :  { %v17660_v31 = vpop.f32.mrf.mxu2  ;;  %v9411_v55 = vadd.f32 %v18158_v61, %v9312_v16  ;;  %v9822_v56 = vadd.f32 %v17611_v48, %v9706_v18  ;;  %v9920_v9 = vadd.f32 %v17626_v3, %v9821_v62  ;;  %v10141_v16 = vpop.permute.xlu1 %10140 }
 0x94a   :  { %v17675_v30 = vpop.f32.mrf.mxu0 }
 0x94b   :  { %v9510_v53 = vadd.f32 %v17524_v29, %v9411_v55  ;;  %v9921_v48 = vadd.f32 %v17623_v20, %v9822_v56  ;;  %v9707_v29 = vadd.f32 %v17572_v14, %v9608_v43  ;;  %v18160_v14 = vld [vmem:[#allocation40_spill] sm:$0xff] }
 0x94c   :  { %v9611_v54 = vadd.f32 %v18160_v14, %v18159_v33  ;;  %v17719_v14 = vld [vmem:[#allocation14 + $0x30] sm:$0xff] }
 0x94d   :  { %v9609_v5 = vadd.f32 %v17566_v4, %v9510_v53  ;;  %v9823_v20 = vadd.f32 %v17637_v22, %v9707_v29 }
 0x94e   :  { %v9710_v41 = vadd.f32 %v18161_v27, %v9611_v54  ;;  %v10296_v54 = vld [vmem:[#allocation14 + $0x28] sm:$0xff] }
 0x94f   :  { %v9708_v2 = vadd.f32 %v17574_v51, %v9609_v5  ;;  %v9610_v51 = vadd.f32 %v17582_v39, %v17550_v46 }
 0x950   :  { %v9826_v46 = vadd.f32 %v17658_v32, %v9710_v41 }
 0x951   :  { %v9824_v59 = vadd.f32 %v17635_v47, %v9708_v2  ;;  %v9922_v47 = vadd.f32 %v17650_v23, %v9823_v20  ;;  %v9709_v12 = vadd.f32 %v18162_v26, %v9610_v51  ;;  %v10299_v26 = vld [vmem:[#allocation14 + $0x40] sm:$0xff] }
 0x952   :  { %v9925_v61 = vadd.f32 %v17670_v17, %v9826_v46 }
 0x954   :  { %v9976_v7 = vpop.f32.mrf.mxu2  ;;  %v10005_v63 = vpop.f32.mrf.mxu3 }
 0x955   :  { %v10018_v34 = vadd.f32 %v10005_v63, %v9919_v28  ;;  %v10017_v52 = vadd.f32 %v9976_v7, %v9918_v0  ;;  %v9923_v7 = vadd.f32 %v17645_v24, %v9824_v59  ;;  %v9825_v24 = vadd.f32 %v17660_v31, %v9709_v12  ;;  %v10146_v31 = vpop.permute.xlu2 %10145 }
 0x957   :  { %v9924_v55 = vadd.f32 %v17675_v30, %v9825_v24 }
 0x959   :  { %v10104_v8 = vpop.f32.mrf.mxu1 }
 0x95a   :  { %v10117_v25 = vadd.f32 %v10104_v8, %v10018_v34  ;;  %v10075_v1 = vpop.f32.mrf.mxu0 }
 0x95b   :  { %v10116_v15 = vadd.f32 %v10075_v1, %v10017_v52 }
 0x95c   :  { %v10149_v13 = vadd.f32 %v10131_v58, %v10117_v25  ;;  %v9979_v35 = vpop.f32.mrf.mxu2  ;;  %v10008_v6 = vpop.f32.mrf.mxu3 }
 0x95d   :  { %v10148_v57 = vadd.f32 %v10131_v58, %v10116_v15  ;;  %v10020_v19 = vadd.f32 %v10008_v6, %v9921_v48  ;;  %v10019_v37 = vadd.f32 %v9979_v35, %v9920_v9 }
 0x95e   :  { %v10157_v50 = vmax.f32 %v10149_v13, 0.0 }
 0x95f   :  { %v10156_v40 = vmax.f32 %v10148_v57, 0.0 }
 0x960   :  { %12207 = vmatmul.msk.f32.vlgmr.msra.gmra.mxu3 %vm8626_vm9, %v10157_v50 }
 0x961   :  { %v10107_v49 = vpop.f32.mrf.mxu1  ;;  %10209 = vmatmul.f32.vlgmr.msra.gmra.mxu2 %v10156_v40 }
 0x962   :  { %v10119_v4 = vadd.f32 %v10107_v49, %v10020_v19  ;;  %v10078_v36 = vpop.f32.mrf.mxu0 }
 0x963   :  { %v10118_v44 = vadd.f32 %v10078_v36, %v10019_v37 }
 0x964   :  { %v10151_v3 = vadd.f32 %v10136_v45, %v10119_v4  ;;  %v9982_v38 = vpop.f32.mrf.mxu2  ;;  %v10011_v60 = vpop.f32.mrf.mxu3 }
 0x965   :  { %v10150_v11 = vadd.f32 %v10136_v45, %v10118_v44  ;;  %v10022_v22 = vadd.f32 %v10011_v60, %v9923_v7  ;;  %v10021_v28 = vadd.f32 %v9982_v38, %v9922_v47  ;;  %v10294_v7 = vld [vmem:[#allocation14 + $0x18] sm:$0xff]  ;;  %v10401_v47 = vrot.slane %v17719_v14, 1 }
 0x966   :  { %v10159_v10 = vmax.f32 %v10151_v3, 0.0  ;;  %v10396_v41 = vrot.slane %v10294_v7, 1 }
 0x967   :  { %v10158_v63 = vmax.f32 %v10150_v11, 0.0 }
 0x968   :  { %12208 = vmatmul.msk.f32.gmra.mxu3 %vm8626_vm9, %v10159_v10  ;;  %v10295_v10 = vld [vmem:[#allocation14 + $0x20] sm:$0xff] }
 0x969   :  { %v10110_v0 = vpop.f32.mrf.mxu1  ;;  %10212 = vmatmul.f32.gmra.mxu2 %v10158_v63  ;;  %v10399_v63 = vrot.slane %v10296_v54, 1  ;;  %v10397_v27 = vrot.slane %v10295_v10, 1  ;;  %v10304_v54 = vld [vmem:[#allocation14 + $0x68] sm:$0xff] }
 0x96a   :  { %v10121_v39 = vadd.f32 %v10110_v0, %v10022_v22  ;;  %v10081_v21 = vpop.f32.mrf.mxu0  ;;  %v17722_v22 = vld [vmem:[#allocation14 + $0x48] sm:$0xff]  ;;  %v10298_v0 = vld [vmem:[#allocation14 + $0x38] sm:$0xff] }
 0x96b   :  { %v10120_v18 = vadd.f32 %v10081_v21, %v10021_v28  ;;  %v10402_v12 = vsel %vm10395_vm14, %v10399_v63, %v10401_v47  ;;  %v10400_v28 = vsel %vm10395_vm14, %v10397_v27, %v10399_v63  ;;  %v10489_v46 = vrot.slane %v17722_v22, 2 }
 0x96c   :  { %v10153_v23 = vadd.f32 %v10141_v16, %v10121_v39  ;;  %v10014_v42 = vpop.f32.mrf.mxu3  ;;  %v9985_v8 = vpop.f32.mrf.mxu2  ;;  %v10487_v39 = vrot.slane %v10299_v26, 2  ;;  %v10398_v24 = vsel %vm10395_vm14, %v10396_v41, %v10397_v27  ;;  %v10312_v26 = vld [vmem:[#allocation14 + $0xa8] sm:$0xff] }
 0x96d   :  { %v10152_v34 = vadd.f32 %v10141_v16, %v10120_v18  ;;  %v10024_v25 = vadd.f32 %v10014_v42, %v9925_v61  ;;  %v10023_v32 = vadd.f32 %v9985_v8, %v9924_v55 }
 0x96e   :  { %v10161_v52 = vmax.f32 %v10153_v23, 0.0  ;;  %v10490_v8 = vsel %vm307_vm1, %v10487_v39, %v10489_v46 }
 0x96f   :  { %v10160_v56 = vmax.f32 %v10152_v34, 0.0  ;;  %v10485_v34 = vrot.slane %v10298_v0, 2 }
 0x970   :  { %12209 = vmatmul.msk.f32.gmra.mxu3 %vm8626_vm9, %v10161_v52 }
 0x971   :  { %v10113_v1 = vpop.f32.mrf.mxu1  ;;  %10215 = vmatmul.f32.gmra.mxu2 %v10160_v56  ;;  %v10341_v56 = vld [vmem:[#allocation13] sm:$0xff] }
 0x972   :  { %v10123_v58 = vadd.f32 %v10113_v1, %v10024_v25  ;;  %v10084_v62 = vpop.f32.mrf.mxu0  ;;  %v10488_v25 = vsel %vm307_vm1, %v10485_v34, %v10487_v39  ;;  %v10368_v1 = vrot.slane %v10341_v56, 2 }
 0x973   :  { %v10122_v15 = vadd.f32 %v10084_v62, %v10023_v32  ;;  %v10293_v62 = vld [vmem:[#allocation14 + $0x10] sm:$0xff] }
 0x974   :  { %v10155_v53 = vadd.f32 %v10146_v31, %v10123_v58 }
 0x975   :  { %v10154_v13 = vadd.f32 %v10146_v31, %v10122_v15  ;;  %v10292_v31 = vld [vmem:[#allocation14 + $0x8] sm:$0xff]  ;;  %v10458_v15 = vrot.slane %v10341_v56, 4 }
 0x976   :  { %v10163_v35 = vmax.f32 %v10155_v53, 0.0  ;;  %v10291_v53 = vld [vmem:[#allocation14] sm:$0xff] }
 0x977   :  { %v10162_v6 = vmax.f32 %v10154_v13, 0.0  ;;  %v10484_v13 = vrot.slane %v17719_v14, 2  ;;  %v10305_v14 = vld [vmem:[#allocation14 + $0x70] sm:$0xff] }
 0x978   :  { %12210 = vmatmul.msk.f32.gmra.mxu3 %vm8626_vm9, %v10163_v35  ;;  %vm10410_vm9 = vcmask 1040384  }
 0x979   :  { %10218 = vmatmul.f32.gmra.mxu2 %v10162_v6  ;;  %v10486_v35 = vsel %vm307_vm1, %v10484_v13, %v10485_v34 }
 0x97a   :  { %12213 = vmatpush.msk.msrb.mxu2 %vm10410_vm9, %v10401_v47  ;;  %v10610_v47 = vrot.slane %v10304_v54, 4 }
 0x97c   :  { %10426 = vmatpush.msrb.mxu2 %v10402_v12  ;;  %v10308_v12 = vld [vmem:[#allocation14 + $0x88] sm:$0xff] }
 0x97d   :  { %v10675_v39 = vrot.slane %v10308_v12, 5  ;;  %v10316_v12 = vld [vmem:[#allocation14 + $0xc8] sm:$0xff] }
 0x97e   :  { %10427 = vmatpush.msrb.mxu2 %v10400_v28 }
 0x980   :  { %10428 = vmatpush.msrb.mxu2 %v10398_v24  ;;  %v10310_v24 = vld [vmem:[#allocation14 + $0x98] sm:$0xff] }
 0x981   :  { %v10736_v34 = vrot.slane %v10310_v24, 6 }
 0x982   :  { %12218 = vmatpush.msk.msra.mxu2 %vm10410_vm9, %v10489_v46  ;;  %v10740_v46 = vrot.slane %v10312_v26, 6 }
 0x984   :  { %10512 = vmatpush.msra.mxu2 %v10490_v8 }
 0x986   :  { %10513 = vmatpush.msra.mxu2 %v10488_v25 }
 0x988   :  { %10514 = vmatpush.msra.mxu2 %v10486_v35 }
 0x9e3   :  { %v10239_v17 = vpop.f32.mrf.mxu3 }
 0x9e4   :  { %v10210_v30 = vpop.f32.mrf.mxu2 }
 0x9e5   :  { %v10240_v5 = vadd.f32 %v10239_v17, %v10210_v30  ;;  %v10520_v30 = vrot.slane %v10341_v56, 6 }
 0x9eb   :  { %v10242_v43 = vpop.f32.mrf.mxu3 }
 0x9ec   :  { %v10213_v57 = vpop.f32.mrf.mxu2 }
 0x9ed   :  { %v10243_v50 = vadd.f32 %v10242_v43, %v10213_v57  ;;  %v10342_v57 = vld [vmem:[#allocation13 + $0x8] sm:$0xff] }
 0x9ef   :  { %v12492_v48 = vpack.i.bf16 %v10240_v5, %v10243_v50 }
 0x9f1   :  { %12493 = vrot.lane.b32.xlu2 %v12492_v48, %s12959_s20  ;;  %v10771_v48 = vrot.slane %v10342_v57, 6 }
 0x9f3   :  { %v10245_v9 = vpop.f32.mrf.mxu3 }
 0x9f4   :  { %v10216_v40 = vpop.f32.mrf.mxu2 }
 0x9f5   :  { %v10246_v29 = vadd.f32 %v10245_v9, %v10216_v40  ;;  %v10343_v9 = vld [vmem:[#allocation13 + $0x10] sm:$0xff] }
 0x9f6   :  { %v10883_v40 = vrot.slane %v10343_v9, 2 }
 0x9fb   :  { %v10248_v2 = vpop.f32.mrf.mxu3 }
 0x9fc   :  { %v10219_v19 = vpop.f32.mrf.mxu2 }
 0x9fd   :  { %v10249_v37 = vadd.f32 %v10248_v2, %v10219_v19  ;;  %v10945_v2 = vrot.slane %v10343_v9, 4  ;;  %v11007_v19 = vrot.slane %v10343_v9, 6 }
 0x9ff   :  { %v12487_v49 = vpack.i.bf16 %v10246_v29, %v10249_v37 }
 0xa01   :  { %12488 = vrot.lane.b32.xlu1 %v12487_v49, %s12959_s20 }
 0xa4b   :  { %v12494_v45 = vpop.permute.xlu2 %12493 }
 0xa4c   :  { %v12496_v59 = vunpack.i.h.bf16 %v12494_v45  ;;  %v12495_v4 = vunpack.i.l.bf16 %v12494_v45 }
 0xa4e   :  { %v10267_v36 = vmax.f32 %v10240_v5, %v12496_v59  ;;  %v10268_v20 = vmax.f32 %v10243_v50, %v12495_v4  ;;  %v10645_v5 = vrot.slane %v10342_v57, 2  ;;  %v10708_v50 = vrot.slane %v10342_v57, 4  ;;  %v10303_v59 = vld [vmem:[#allocation14 + $0x60] sm:$0xff]  ;;  %v10302_v4 = vld [vmem:[#allocation14 + $0x58] sm:$0xff] }
 0xa4f   :  { %v10609_v41 = vrot.slane %v10303_v59, 4 }
 0xa50   :  { %v12502_v44 = vpack.i.bf16 %v10267_v36, %v10268_v20 }
 0xa51   :  { %v10611_v28 = vsel %vm6416_vm2, %v10609_v41, %v10610_v47  ;;  %v10323_v41 = vld [vmem:[#allocation14 + $0x100] sm:$0xff] }
 0xa52   :  { %12503 = vrot.lane.b32.xlu1 %v12502_v44, %s12960_s27 }
 0xa73   :  { %v12489_v3 = vpop.permute.xlu1 %12488 }
 0xa74   :  { %v12491_v38 = vunpack.i.h.bf16 %v12489_v3  ;;  %v12490_v60 = vunpack.i.l.bf16 %v12489_v3  ;;  %v10301_v3 = vld [vmem:[#allocation14 + $0x50] sm:$0xff] }
 0xa76   :  { %v10269_v51 = vmax.f32 %v10246_v29, %v12491_v38  ;;  %v10270_v11 = vmax.f32 %v10249_v37, %v12490_v60  ;;  %v10344_v29 = vld [vmem:[#allocation13 + $0x18] sm:$0xff]  ;;  %v10548_v38 = vrot.slane %v10301_v3, 3  ;;  %v10547_v60 = vrot.slane %v17722_v22, 3  ;;  %v10309_v22 = vld [vmem:[#allocation14 + $0x90] sm:$0xff] }
 0xa77   :  { %v11131_v37 = vrot.slane %v10344_v29, 2  ;;  %v11193_v49 = vrot.slane %v10344_v29, 4  ;;  %v11255_v45 = vrot.slane %v10344_v29, 6  ;;  %v10677_v0 = vrot.slane %v10309_v22, 5  ;;  %v10326_v3 = vld [vmem:[#allocation14 + $0x118] sm:$0xff] }
 0xa78   :  { %v12497_v33 = vpack.i.bf16 %v10269_v51, %v10270_v11  ;;  %v10735_v25 = vrot.slane %v10309_v22, 6  ;;  %v17866_v22 = vld [vmem:[#allocation14 + $0x158] sm:$0xff] }
 0xa79   :  { %v11162_v24 = vrot.slane %v17866_v22, 5 }
 0xa7a   :  { %12498 = vrot.lane.b32.xlu0 %v12497_v33, %s12960_s27  ;;  %v10306_v33 = vld [vmem:[#allocation14 + $0x78] sm:$0xff] }
 0xa7b   :  { %v10614_v10 = vrot.slane %v10306_v33, 4 }
 0xa7d   :  { %12224 = vmatpush.msk.msrb.mxu3 %vm10410_vm9, %v10614_v10 }
 0xac4   :  { %v12504_v21 = vpop.permute.xlu1 %12503 }
 0xac5   :  { %v12505_v42 = vunpack.i.l.bf16 %v12504_v21  ;;  %v12506_v61 = vunpack.i.h.bf16 %v12504_v21  ;;  %v10311_v21 = vld [vmem:[#allocation14 + $0xa0] sm:$0xff] }
 0xac7   :  { %v17738_v32 = vmax.f32 %v10268_v20, %v12505_v42  ;;  %v17742_v58 = vmax.f32 %v10267_v36, %v12506_v61  ;;  %v10552_v36 = vrot.slane %v10303_v59, 3  ;;  %v10550_v20 = vrot.slane %v10302_v4, 3 }
 0xac8   :  { %v10672_v42 = vrot.slane %v10306_v33, 5  ;;  %v10318_v33 = vld [vmem:[#allocation14 + $0xd8] sm:$0xff] }
 0xac9   :  { %v10553_v44 = vsel %vm10546_vm13, %v10550_v20, %v10552_v36 }
 0xaec   :  { %v12499_v16 = vpop.permute.xlu0 %12498 }
 0xaed   :  { %v12501_v18 = vunpack.i.h.bf16 %v12499_v16  ;;  %v12500_v23 = vunpack.i.l.bf16 %v12499_v16  ;;  %v10307_v16 = vld [vmem:[#allocation14 + $0x80] sm:$0xff] }
 0xaef   :  { %v17729_v52 = vmax.f32 %v10270_v11, %v12500_v23  ;;  %v17733_v55 = vmax.f32 %v10269_v51, %v12501_v18  ;;  %v10551_v51 = vsel %vm10546_vm13, %v10548_v38, %v10550_v20  ;;  %v10549_v11 = vsel %vm10546_vm13, %v10547_v60, %v10548_v38  ;;  %v10327_v20 = vld [vmem:[#allocation14 + $0x120] sm:$0xff] }
 0xaf0   :  { %v10738_v18 = vrot.slane %v10311_v21, 6  ;;  %v10673_v23 = vrot.slane %v10307_v16, 5  ;;  %v10972_v21 = vrot.slane %v10323_v41, 2 }
 0xaf1   :  { %10360 = vmatpush.msrb.mxu0 %v17729_v52  ;;  %10383 = vmatpush.msrb.mxu1 %v17729_v52 }
 0xaf2   :  { %v10741_v8 = vsel %vm10734_vm3, %v10738_v18, %v10740_v46  ;;  %v10676_v61 = vsel %vm10671_vm0, %v10673_v23, %v10675_v39 }
 0xaf3   :  { %10361 = vmatpush.msrb.mxu0 %v17733_v55  ;;  %10384 = vmatpush.msrb.mxu1 %v17733_v55 }
 0xaf5   :  { %10362 = vmatpush.msrb.mxu0 %v17738_v32  ;;  %10385 = vmatpush.msrb.mxu1 %v17738_v32 }
 0xaf7   :  { %10363 = vmatpush.msrb.mxu0 %v17742_v58  ;;  %10386 = vmatpush.msrb.mxu1 %v17742_v58 }
 0xaf8   :  { %12211 = vmatmul.msk.f32.vlgmr.msrb.gmra.mxu0 %vm3547_vm7, %v10341_v56  ;;  %12212 = vmatmul.msk.f32.vlgmr.msrb.gmra.mxu1 %vm3547_vm7, %v10368_v1  ;;  %v10674_v56 = vsel %vm10671_vm0, %v10672_v42, %v10673_v23  ;;  %v10737_v1 = vsel %vm10734_vm3, %v10735_v25, %v10736_v34 }
 0xaf9   :  { %12215 = vmatpush.msk.msra.mxu0 %vm10410_vm9, %v10294_v7  ;;  %10473 = vmatpush.msra.mxu1 %v17729_v52  ;;  %v10612_v7 = vrot.slane %v10305_v14, 4  ;;  %v11034_v14 = vrot.slane %v10326_v3, 3 }
 0xafb   :  { %10451 = vmatpush.msra.mxu0 %v10293_v62  ;;  %10474 = vmatpush.msra.mxu1 %v17733_v55  ;;  %v10615_v63 = vsel %vm6416_vm2, %v10612_v7, %v10614_v10  ;;  %v10613_v27 = vsel %vm6416_vm2, %v10610_v47, %v10612_v7  ;;  %v10314_v62 = vld [vmem:[#allocation14 + $0xb8] sm:$0xff]  ;;  %v10325_v10 = vld [vmem:[#allocation14 + $0x110] sm:$0xff]  ;;  %v10324_v7 = vld [vmem:[#allocation14 + $0x108] sm:$0xff] }
 0xafc   :  { %10637 = vmatpush.msrb.mxu3 %v10615_v63  ;;  %v10317_v47 = vld [vmem:[#allocation14 + $0xd0] sm:$0xff] }
 0xafd   :  { %10452 = vmatpush.msra.mxu0 %v10292_v31  ;;  %10475 = vmatpush.msra.mxu1 %v17738_v32  ;;  %v10313_v31 = vld [vmem:[#allocation14 + $0xb0] sm:$0xff] }
 0xafe   :  { %10638 = vmatpush.msrb.mxu3 %v10613_v27  ;;  %v11033_v27 = vrot.slane %v10325_v10, 3 }
 0xaff   :  { %10453 = vmatpush.msra.mxu0 %v10291_v53  ;;  %10476 = vmatpush.msra.mxu1 %v17742_v58  ;;  %v10800_v53 = vrot.slane %v10314_v62, 7  ;;  %v10339_v62 = vld [vmem:[#allocation14 + $0x180] sm:$0xff] }
 0xb00   :  { %12217 = vmatmul.msk.f32.vlgmr.msra.gmra.mxu1 %vm3547_vm7, %v10458_v15  ;;  %10639 = vmatpush.msrb.mxu3 %v10611_v28  ;;  %v10976_v28 = vrot.slane %v10325_v10, 2  ;;  %v11035_v16 = vsel %vm10546_vm13, %v11033_v27, %v11034_v14 }
 0xb01   :  { %10535 = vmatpush.msrb.mxu0 %v17729_v52  ;;  %12221 = vmatpush.msk.msrb.mxu1 %vm10410_vm9, %v10552_v36  ;;  %v17856_v36 = vld [vmem:[#allocation14 + $0x128] sm:$0xff] }
 0xb02   :  { %12230 = vmatpush.msk.msra.mxu3 %vm10410_vm9, %v10740_v46  ;;  %v11038_v60 = vrot.slane %v17856_v36, 3 }
 0xb03   :  { %10536 = vmatpush.msrb.mxu0 %v17733_v55  ;;  %10575 = vmatpush.msrb.mxu1 %v10553_v44 }
 0xb04   :  { %10763 = vmatpush.msra.mxu3 %v10741_v8 }
 0xb05   :  { %10537 = vmatpush.msrb.mxu0 %v17738_v32  ;;  %10576 = vmatpush.msrb.mxu1 %v10551_v51  ;;  %v11036_v51 = vrot.slane %v10327_v20, 3 }
 0xb07   :  { %10538 = vmatpush.msrb.mxu0 %v17742_v58  ;;  %10577 = vmatpush.msrb.mxu1 %v10549_v11  ;;  %v11039_v63 = vsel %vm10546_vm13, %v11036_v51, %v11038_v60  ;;  %v11037_v46 = vsel %vm10546_vm13, %v11034_v14, %v11036_v51  ;;  %v11219_v51 = vrot.slane %v17866_v22, 6 }
 0xb09   :  { %12227 = vmatpush.msk.msra.mxu1 %vm10410_vm9, %v10677_v0 }
 0xb75   :  { %v10365_v6 = vpop.f32.mrf.mxu0  ;;  %v10388_v17 = vpop.f32.mrf.mxu1 }
 0xb76   :  { %12214 = vmatmul.msk.f32.vlgmr.msrb.gmra.mxu2 %vm10406_vm12, %v10388_v17  ;;  %12216 = vmatmul.msk.f32.vlgmr.msra.gmra.mxu0 %vm10406_vm12, %v10365_v6  ;;  %v10798_v6 = vrot.slane %v10313_v31, 7 }
 0xb77   :  { %10598 = vmatpush.msrb.mxu2 %v17729_v52  ;;  %10660 = vmatpush.msra.mxu0 %v17729_v52 }
 0xb79   :  { %10599 = vmatpush.msrb.mxu2 %v17733_v55  ;;  %10661 = vmatpush.msra.mxu0 %v17733_v55 }
 0xb7b   :  { %10600 = vmatpush.msrb.mxu2 %v17738_v32  ;;  %10662 = vmatpush.msra.mxu0 %v17738_v32 }
 0xb7d   :  { %10601 = vmatpush.msrb.mxu2 %v17742_v58  ;;  %10663 = vmatpush.msra.mxu0 %v17742_v58  ;;  %v10478_v43 = vpop.f32.mrf.mxu1 }
 0xb7e   :  { %12219 = vmatmul.msk.f32.vlgmr.msra.gmra.mxu2 %vm10406_vm12, %v10478_v43  ;;  %12220 = vmatmul.msk.f32.vlgmr.msrb.gmra.mxu0 %vm3547_vm7, %v10520_v30  ;;  %v10797_v43 = vrot.slane %v10312_v26, 7  ;;  %v10333_v26 = vld [vmem:[#allocation14 + $0x150] sm:$0xff] }
 0xb7f   :  { %10723 = vmatpush.msra.mxu2 %v17729_v52  ;;  %10786 = vmatpush.msrb.mxu0 %v17729_v52 }
 0xb81   :  { %10724 = vmatpush.msra.mxu2 %v17733_v55  ;;  %10787 = vmatpush.msrb.mxu0 %v17733_v55 }
 0xb83   :  { %10725 = vmatpush.msra.mxu2 %v17738_v32  ;;  %10788 = vmatpush.msrb.mxu0 %v17738_v32 }
 0xb85   :  { %10726 = vmatpush.msra.mxu2 %v17742_v58  ;;  %10789 = vmatpush.msrb.mxu0 %v17742_v58 }
 0xb86   :  { %12223 = vmatmul.msk.f32.vlgmr.msrb.gmra.mxu2 %vm3547_vm7, %v10342_v57  ;;  %12226 = vmatmul.msk.f32.vlgmr.msra.gmra.mxu0 %vm3547_vm7, %v10645_v5  ;;  %v17846_v57 = vld [vmem:[#allocation14 + $0xf8] sm:$0xff]  ;;  %v10321_v5 = vld [vmem:[#allocation14 + $0xf0] sm:$0xff] }
 0xb87   :  { %10848 = vmatpush.msrb.mxu2 %v17729_v52  ;;  %10898 = vmatpush.msra.mxu0 %v17729_v52  ;;  %v10971_v42 = vrot.slane %v17846_v57, 2 }
 0xb89   :  { %10849 = vmatpush.msrb.mxu2 %v17733_v55  ;;  %10899 = vmatpush.msra.mxu0 %v17733_v55  ;;  %v10973_v31 = vsel %vm307_vm1, %v10971_v42, %v10972_v21 }
 0xb8b   :  { %10850 = vmatpush.msrb.mxu2 %v17738_v32  ;;  %10900 = vmatpush.msra.mxu0 %v17738_v32 }
 0xb8d   :  { %10851 = vmatpush.msrb.mxu2 %v17742_v58  ;;  %10901 = vmatpush.msra.mxu0 %v17742_v58 }
 0xb8e   :  { %12229 = vmatmul.msk.f32.vlgmr.msra.gmra.mxu2 %vm3547_vm7, %v10708_v50  ;;  %12232 = vmatmul.msk.f32.vlgmr.msrb.gmra.mxu0 %vm3547_vm7, %v10771_v48  ;;  %v10801_v50 = vsel %vm10410_vm9, %v10798_v6, %v10800_v53  ;;  %v10320_v48 = vld [vmem:[#allocation14 + $0xe8] sm:$0xff] }
 0xb8f   :  { %10960 = vmatpush.msra.mxu2 %v17729_v52  ;;  %11022 = vmatpush.msrb.mxu0 %v17729_v52 }
 0xb91   :  { %10961 = vmatpush.msra.mxu2 %v17733_v55  ;;  %11023 = vmatpush.msrb.mxu0 %v17733_v55 }
 0xb93   :  { %10962 = vmatpush.msra.mxu2 %v17738_v32  ;;  %11024 = vmatpush.msrb.mxu0 %v17738_v32 }
 0xb95   :  { %10963 = vmatpush.msra.mxu2 %v17742_v58  ;;  %11025 = vmatpush.msrb.mxu0 %v17742_v58 }
 0xb96   :  { %12235 = vmatmul.msk.f32.vlgmr.msrb.gmra.mxu2 %vm3547_vm7, %v10343_v9  ;;  %12238 = vmatmul.msk.f32.vlgmr.msra.gmra.mxu0 %vm3547_vm7, %v10883_v40  ;;  %v10799_v9 = vsel %vm10410_vm9, %v10797_v43, %v10798_v6  ;;  %v10914_v40 = vrot.slane %v17846_v57, 1  ;;  %v11284_v43 = vrot.slane %v10339_v62, 7 }
 0xb97   :  { %11084 = vmatpush.msrb.mxu2 %v17729_v52  ;;  %11146 = vmatpush.msra.mxu0 %v17729_v52 }
 0xb99   :  { %11085 = vmatpush.msrb.mxu2 %v17733_v55  ;;  %11147 = vmatpush.msra.mxu0 %v17733_v55 }
 0xb9b   :  { %11086 = vmatpush.msrb.mxu2 %v17738_v32  ;;  %11148 = vmatpush.msra.mxu0 %v17738_v32 }
 0xb9d   :  { %11087 = vmatpush.msrb.mxu2 %v17742_v58  ;;  %11149 = vmatpush.msra.mxu0 %v17742_v58 }
 0xb9e   :  { %12241 = vmatmul.msk.f32.vlgmr.msra.gmra.mxu2 %vm3547_vm7, %v10945_v2  ;;  %12244 = vmatmul.msk.f32.vlgmr.msrb.gmra.mxu0 %vm3547_vm7, %v11007_v19  ;;  %v10912_v2 = vrot.slane %v10321_v5, 1 }
 0xb9f   :  { %11208 = vmatpush.msra.mxu2 %v17729_v52  ;;  %11270 = vmatpush.msrb.mxu0 %v17729_v52  ;;  %v10678_v52 = vsel %vm10671_vm0, %v10675_v39, %v10677_v0  ;;  %v10974_v0 = vrot.slane %v10324_v7, 2  ;;  %v10332_v39 = vld [vmem:[#allocation14 + $0x148] sm:$0xff] }
 0xba0   :  { %10700 = vmatpush.msra.mxu1 %v10678_v52  ;;  %v10915_v59 = vsel %vm10395_vm14, %v10912_v2, %v10914_v40  ;;  %v11158_v52 = vrot.slane %v10332_v39, 5  ;;  %v11325_v39 = vld [vmem:[#allocation17 + $0x10] sm:$0xff] }
 0xba1   :  { %11209 = vmatpush.msra.mxu2 %v17733_v55  ;;  %11271 = vmatpush.msrb.mxu0 %v17733_v55  ;;  %v10739_v55 = vsel %vm10734_vm3, %v10736_v34, %v10738_v18  ;;  %v11160_v18 = vrot.slane %v10333_v26, 5  ;;  %v10977_v34 = vsel %vm307_vm1, %v10974_v0, %v10976_v28 }
 0xba2   :  { %10701 = vmatpush.msra.mxu1 %v10676_v61  ;;  %10764 = vmatpush.msra.mxu3 %v10739_v55  ;;  %v10331_v61 = vld [vmem:[#allocation14 + $0x140] sm:$0xff]  ;;  %v10330_v55 = vld [vmem:[#allocation14 + $0x138] sm:$0xff] }
 0xba3   :  { %11210 = vmatpush.msra.mxu2 %v17738_v32  ;;  %11272 = vmatpush.msrb.mxu0 %v17738_v32  ;;  %v11163_v25 = vsel %vm10671_vm0, %v11160_v18, %v11162_v24 }
 0xba4   :  { %10702 = vmatpush.msra.mxu1 %v10674_v56  ;;  %10765 = vmatpush.msra.mxu3 %v10737_v1  ;;  %v10975_v56 = vsel %vm307_vm1, %v10972_v21, %v10974_v0  ;;  %v10329_v1 = vld [vmem:[#allocation14 + $0x130] sm:$0xff]  ;;  %vm11386_vm1 = vcmask 9216  }
 0xba5   :  { %11211 = vmatpush.msra.mxu2 %v17742_v58  ;;  %11273 = vmatpush.msrb.mxu0 %v17742_v58  ;;  %v10315_v58 = vld [vmem:[#allocation14 + $0xc0] sm:$0xff]  ;;  %v11096_v6 = vrot.slane %v10329_v1, 4  ;;  %v11326_v0 = vld [vmem:[#allocation17 + $0x18] sm:$0xff] }
 0xba6   :  { %12247 = vmatmul.msk.f32.vlgmr.msrb.gmra.mxu2 %vm3547_vm7, %v10344_v29  ;;  %12250 = vmatmul.msk.f32.vlgmr.msra.gmra.mxu0 %vm3547_vm7, %v11131_v37  ;;  %v10802_v15 = vrot.slane %v10315_v58, 7  ;;  %v10910_v37 = vrot.slane %v10320_v48, 1  ;;  %v10340_v58 = vld [vmem:[#allocation14 + $0x188] sm:$0xff] }
 0xba7   :  { %11346 = vmatpush.msrb.mxu2 %v11326_v0 }
 0xba8   :  { %v10803_v30 = vsel %vm10410_vm9, %v10800_v53, %v10802_v15  ;;  %v10913_v44 = vsel %vm10395_vm14, %v10910_v37, %v10912_v2  ;;  %v11098_v53 = vrot.slane %v10330_v55, 4  ;;  %v10336_v2 = vld [vmem:[#allocation14 + $0x168] sm:$0xff] }
 0xba9   :  { %11347 = vmatpush.msrb.mxu2 %v11325_v39 }
 0xbae   :  { %12253 = vmatmul.msk.f32.vlgmr.msra.gmra.mxu2 %vm3547_vm7, %v11193_v49  ;;  %12256 = vmatmul.msk.f32.vlgmr.msrb.gmra.mxu0 %vm3547_vm7, %v11255_v45  ;;  %v10319_v45 = vld [vmem:[#allocation14 + $0xe0] sm:$0xff] }
 0xbaf   :  { %v10909_v4 = vrot.slane %v10319_v45, 1 }
 0xbb1   :  { %v10911_v38 = vsel %vm10395_vm14, %v10909_v4, %v10910_v37 }
 0xbf3   :  { %v10455_v32 = vpop.f32.mrf.mxu0 }
 0xbf9   :  { %v10430_v13 = vpop.f32.mrf.mxu2 }
 0xbfa   :  { %v10456_v35 = vadd.f32 %v10455_v32, %v10430_v13  ;;  %v11157_v32 = vrot.slane %v10331_v61, 5  ;;  %v11161_v13 = vsel %vm10671_vm0, %v11158_v52, %v11160_v18  ;;  %v11358_v18 = vld [vmem:[#allocation20 + $0x18] sm:$0xff] }
 0xbfb   :  { %v10540_v17 = vpop.f32.mrf.mxu0 }
 0xbfc   :  { %12222 = vmatmul.msk.f32.vlgmr.msrb.gmra.mxu1 %vm10406_vm12, %v10540_v17  ;;  %v11159_v17 = vsel %vm10671_vm0, %v11157_v32, %v11158_v52 }
 0xbfd   :  { %12233 = vmatpush.msk.msrb.mxu1 %vm10410_vm9, %v10802_v15  ;;  %v11100_v15 = vrot.slane %v10331_v61, 4 }
 0xbff   :  { %10825 = vmatpush.msrb.mxu1 %v10803_v30  ;;  %v11286_v30 = vrot.slane %v10340_v58, 7  ;;  %v11101_v5 = vsel %vm6416_vm2, %v11098_v53, %v11100_v15 }
 0xc01   :  { %v10516_v19 = vpop.f32.mrf.mxu2  ;;  %10826 = vmatpush.msrb.mxu1 %v10801_v50  ;;  %v11095_v50 = vrot.slane %v17856_v36, 4  ;;  %v11287_v37 = vsel %vm10410_vm9, %v11284_v43, %v11286_v30  ;;  %v11222_v36 = vrot.slane %v10336_v2, 6 }
 0xc02   :  { %v17851_v29 = vadd.f32 %v10516_v19, %v10456_v35  ;;  %v10338_v35 = vld [vmem:[#allocation14 + $0x178] sm:$0xff]  ;;  %v11099_v19 = vsel %vm6416_vm2, %v11096_v6, %v11098_v53 }
 0xc03   :  { %v10665_v49 = vpop.f32.mrf.mxu0  ;;  %10827 = vmatpush.msrb.mxu1 %v10799_v9  ;;  %v11282_v48 = vrot.slane %v10338_v35, 7 }
 0xc04   :  { %12228 = vmatmul.msk.f32.vlgmr.msra.gmra.mxu1 %vm10406_vm12, %v10665_v49 }
 0xc05   :  { %12239 = vmatpush.msk.msra.mxu1 %vm10410_vm9, %v10914_v40  ;;  %v10337_v40 = vld [vmem:[#allocation14 + $0x170] sm:$0xff]  ;;  %v11285_v20 = vsel %vm10410_vm9, %v11282_v48, %v11284_v43 }
 0xc06   :  { %v11281_v49 = vrot.slane %v10337_v40, 7  ;;  %v11224_v4 = vrot.slane %v10337_v40, 6  ;;  %v12508_v43 = vld [vmem:[#allocation19] ss:$0 sm:$0xff] }
 0xc07   :  { %10937 = vmatpush.msra.mxu1 %v10915_v59  ;;  %v11097_v59 = vsel %vm6416_vm2, %v11095_v50, %v11096_v6  ;;  %v11357_v6 = vld [vmem:[#allocation20 + $0x10] sm:$0xff] }
 0xc08   :  { %v11283_v3 = vsel %vm10410_vm9, %v11281_v49, %v11282_v48  ;;  %v12509_v48 = vld [vmem:[#allocation22] ss:$0 sm:$0xff] }
 0xc09   :  { %v10603_v11 = vpop.f32.mrf.mxu2  ;;  %10938 = vmatpush.msra.mxu1 %v10913_v44 }
 0xc0a   :  { %12225 = vmatmul.msk.f32.vlgmr.msrb.gmra.mxu3 %vm10406_vm12, %v10603_v11 }
 0xc0b   :  { %12236 = vmatpush.msk.msrb.mxu3 %vm10410_vm9, %v10319_v45  ;;  %v10791_v54 = vpop.f32.mrf.mxu0  ;;  %10939 = vmatpush.msra.mxu1 %v10911_v38  ;;  %v10335_v45 = vld [vmem:[#allocation14 + $0x160] sm:$0xff] }
 0xc0c   :  { %12234 = vmatmul.msk.f32.vlgmr.msrb.gmra.mxu1 %vm10406_vm12, %v10791_v54  ;;  %v11220_v44 = vrot.slane %v10335_v45, 6 }
 0xc0d   :  { %10875 = vmatpush.msrb.mxu3 %v10318_v33  ;;  %12245 = vmatpush.msk.msrb.mxu1 %vm10410_vm9, %v11038_v60  ;;  %v11225_v60 = vsel %vm10734_vm3, %v11222_v36, %v11224_v4 }
 0xc0e   :  { %v11223_v33 = vsel %vm10734_vm3, %v11220_v44, %v11222_v36  ;;  %v11221_v14 = vsel %vm10734_vm3, %v11219_v51, %v11220_v44 }
 0xc0f   :  { %10876 = vmatpush.msrb.mxu3 %v10317_v47  ;;  %11061 = vmatpush.msrb.mxu1 %v11039_v63 }
 0xc11   :  { %v10728_v23 = vpop.f32.mrf.mxu2  ;;  %10877 = vmatpush.msrb.mxu3 %v10316_v12  ;;  %11062 = vmatpush.msrb.mxu1 %v11037_v46 }
 0xc12   :  { %12231 = vmatmul.msk.f32.vlgmr.msra.gmra.mxu3 %vm10406_vm12, %v10728_v23  ;;  %v11323_v23 = vld [vmem:[#allocation17] sm:$0xff] }
 0xc13   :  { %12242 = vmatpush.msk.msra.mxu3 %vm10410_vm9, %v10976_v28  ;;  %v10903_v8 = vpop.f32.mrf.mxu0  ;;  %11063 = vmatpush.msrb.mxu1 %v11035_v16  ;;  %v11324_v16 = vld [vmem:[#allocation17 + $0x8] sm:$0xff] }
 0xc14   :  { %12240 = vmatmul.msk.f32.vlgmr.msra.gmra.mxu1 %vm10406_vm12, %v10903_v8  ;;  %11348 = vmatpush.msrb.mxu2 %v11324_v16 }
 0xc15   :  { %10999 = vmatpush.msra.mxu3 %v10977_v34  ;;  %12251 = vmatpush.msk.msra.mxu1 %vm10410_vm9, %v11162_v24 }
 0xc16   :  { %11349 = vmatpush.msrb.mxu2 %v11323_v23 }
 0xc17   :  { %11000 = vmatpush.msra.mxu3 %v10975_v56  ;;  %11185 = vmatpush.msra.mxu1 %v11163_v25 }
 0xc19   :  { %v10853_v57 = vpop.f32.mrf.mxu2  ;;  %11001 = vmatpush.msra.mxu3 %v10973_v31  ;;  %11186 = vmatpush.msra.mxu1 %v11161_v13 }
 0xc1a   :  { %12237 = vmatmul.msk.f32.vlgmr.msrb.gmra.mxu3 %vm10406_vm12, %v10853_v57 }
 0xc1b   :  { %12248 = vmatpush.msk.msrb.mxu3 %vm10410_vm9, %v11100_v15  ;;  %v11027_v9 = vpop.f32.mrf.mxu0  ;;  %11187 = vmatpush.msra.mxu1 %v11159_v17  ;;  %v12507_v15 = vld [vmem:[#allocation16] ss:$0 sm:$0xff]  ;;  %v11356_v17 = vld [vmem:[#allocation20 + $0x8] sm:$0xff] }
 0xc1c   :  { %12246 = vmatmul.msk.f32.vlgmr.msrb.gmra.mxu1 %vm10406_vm12, %v11027_v9 }
 0xc1d   :  { %11123 = vmatpush.msrb.mxu3 %v11101_v5  ;;  %12257 = vmatpush.msk.msrb.mxu1 %vm10410_vm9, %v11286_v30  ;;  %v11355_v30 = vld [vmem:[#allocation20] sm:$0xff] }
 0xc1f   :  { %11124 = vmatpush.msrb.mxu3 %v11099_v19  ;;  %11309 = vmatpush.msrb.mxu1 %v11287_v37 }
 0xc21   :  { %v10965_v38 = vpop.f32.mrf.mxu2  ;;  %11125 = vmatpush.msrb.mxu3 %v11097_v59  ;;  %11310 = vmatpush.msrb.mxu1 %v11285_v20 }
 0xc22   :  { %12243 = vmatmul.msk.f32.vlgmr.msra.gmra.mxu3 %vm10406_vm12, %v10965_v38 }
 0xc23   :  { %12254 = vmatpush.msk.msra.mxu3 %vm10410_vm9, %v11224_v4  ;;  %v11151_v11 = vpop.f32.mrf.mxu0  ;;  %11311 = vmatpush.msrb.mxu1 %v11283_v3 }
 0xc24   :  { %12252 = vmatmul.msk.f32.vlgmr.msra.gmra.mxu1 %vm10406_vm12, %v11151_v11 }
 0xc25   :  { %11247 = vmatpush.msra.mxu3 %v11225_v60 }
 0xc27   :  { %11248 = vmatpush.msra.mxu3 %v11223_v33 }
 0xc29   :  { %v11089_v54 = vpop.f32.mrf.mxu2  ;;  %11249 = vmatpush.msra.mxu3 %v11221_v14 }
 0xc2a   :  { %12249 = vmatmul.msk.f32.vlgmr.msrb.gmra.mxu3 %vm10406_vm12, %v11089_v54 }
 0xc2b   :  { %v11275_v10 = vpop.f32.mrf.mxu0  ;;  %11378 = vmatpush.msrb.mxu3 %v11358_v18 }
 0xc2c   :  { %12258 = vmatmul.msk.f32.vlgmr.msrb.gmra.mxu1 %vm10406_vm12, %v11275_v10 }
 0xc2d   :  { %11379 = vmatpush.msrb.mxu3 %v11357_v6 }
 0xc2f   :  { %11380 = vmatpush.msrb.mxu3 %v11356_v17 }
 0xc31   :  { %v11213_v7 = vpop.f32.mrf.mxu2  ;;  %11381 = vmatpush.msrb.mxu3 %v11355_v30 }
 0xc32   :  { %12255 = vmatmul.msk.f32.vlgmr.msra.gmra.mxu3 %vm10406_vm12, %v11213_v7 }
 0xc79   :  { %v10579_v47 = vpop.f32.mrf.mxu1 }
 0xc7a   :  { %v10582_v26 = vadd.f32 %v10579_v47, %v17851_v29 }
 0xc81   :  { %v10704_v63 = vpop.f32.mrf.mxu1 }
 0xc89   :  { %v10829_v41 = vpop.f32.mrf.mxu1 }
 0xc8d   :  { %v10641_v27 = vpop.f32.mrf.mxu3 }
 0xc8e   :  { %v10644_v28 = vadd.f32 %v10641_v27, %v10582_v26 }
 0xc90   :  { %v10707_v46 = vadd.f32 %v10704_v63, %v10644_v28 }
 0xc91   :  { %v10941_v12 = vpop.f32.mrf.mxu1 }
 0xc95   :  { %v10767_v22 = vpop.f32.mrf.mxu3 }
 0xc96   :  { %v10770_v24 = vadd.f32 %v10767_v22, %v10707_v46 }
 0xc98   :  { %v10832_v42 = vadd.f32 %v10829_v41, %v10770_v24 }
 0xc99   :  { %v11065_v34 = vpop.f32.mrf.mxu1 }
 0xc9d   :  { %v10879_v21 = vpop.f32.mrf.mxu3 }
 0xc9e   :  { %v10882_v52 = vadd.f32 %v10879_v21, %v10832_v42 }
 0xca0   :  { %v10944_v29 = vadd.f32 %v10941_v12, %v10882_v52 }
 0xca1   :  { %v11189_v55 = vpop.f32.mrf.mxu1 }
 0xca5   :  { %v11003_v8 = vpop.f32.mrf.mxu3 }
 0xca6   :  { %v11006_v61 = vadd.f32 %v11003_v8, %v10944_v29 }
 0xca8   :  { %v11068_v25 = vadd.f32 %v11065_v34, %v11006_v61 }
 0xca9   :  { %v11313_v62 = vpop.f32.mrf.mxu1 }
 0xcad   :  { %v11127_v56 = vpop.f32.mrf.mxu3 }
 0xcae   :  { %v11130_v32 = vadd.f32 %v11127_v56, %v11068_v25 }
 0xcb0   :  { %v11192_v1 = vadd.f32 %v11189_v55, %v11130_v32 }
 0xcb5   :  { %v11251_v58 = vpop.f32.mrf.mxu3 }
 0xcb6   :  { %v11254_v31 = vadd.f32 %v11251_v58, %v11192_v1 }
 0xcb8   :  { %v11316_v53 = vadd.f32 %v11313_v62, %v11254_v31 }
 0xcba   :  { %v11321_v13 = vadd.f32 %v12507_v15, %v11316_v53 }
 0xcbc   :  { %v11322_v35 = vmax.f32 %v11321_v13, 0.0 }
 0xcbe   :  { %12259 = vmatmul.msk.f32.vlgmr.msrb.gmra.mxu2 %vm3547_vm7, %v11322_v35 }
 0xd41   :  { %v11351_v57 = vpop.f32.mrf.mxu2 }
 0xd42   :  { %v11352_v5 = vadd.f32 %v12508_v43, %v11351_v57 }
 0xd44   :  { %v11354_v50 = vmax.f32 %v11352_v5, 0.0 }
 0xd46   :  { %12260 = vmatmul.msk.f32.vlgmr.msrb.gmra.mxu3 %vm3547_vm7, %v11354_v50 }
 0xdc9   :  { %v11383_v9 = vpop.f32.mrf.mxu3 }
 0xdca   :  { %v11384_v40 = vadd.f32 %v12509_v48, %v11383_v9 }
 0xdcc   :  { %11387 = vst.msk [vmem:[#allocation23] sm:$0x3] %vm11386_vm1, %v11384_v40 }
 0xdcd   :  { %11398 = dma.vmem_to_hbm [thread:$0]  %s11394_s11, 32, %s11396_s29, [#allocation4]  }
 0xdce   :  { %12877 = dma.done.wait [#allocation4], 32  }
 0xdcf   :  { %12878 = vsyncadd [#allocation4], 4294967264 }
 0xdd0   :  { %11403 = vsyncpa [#allocation3], 1 }
 0xdd1   :  { %11404 = vsyncpa [#allocation6], 1 }
 0xdd2   :  { %11405 = vsyncpa [#allocation9], 1 }
 0xdd3   :  { %11406 = vsyncpa [#allocation12], 1 }
 0xdd4   :  { %11407 = vsyncpa [#allocation15], 1 }
 0xdd5   :  { %11408 = vsyncpa [#allocation18], 1 }
 0xdd6   :  { %11409 = vsyncpa [#allocation21], 1 }
 0xdd7   :  { %11410 = vsyncpa [#allocation4], 1 }

</bundles_post_ra>
